<compile_context>
chip_gen: v5e
topology: v5e:2x2
jax: 0.10.0
libtpu: 0.0.40
codegen_flags: <defaults>
</compile_context>

<pallas_src>
import functools

import jax
import jax.numpy as jnp
from jax.experimental import pallas as pl
from jax.experimental.pallas import tpu as pltpu


def _largest_tile(dim, cap):
    """Largest divisor of `dim` that is <= cap (keeps grid math exact)."""
    cap = min(cap, dim)
    for t in range(cap, 0, -1):
        if dim % t == 0:
            return t
    return dim


def _linear_kernel(x_ref, w_ref, b_ref, o_ref, *, apply_relu):
    """One (n, k) grid step of y = x @ W + b (+ optional ReLU).

    The f32 output block is resident across the k axis and used directly as
    the accumulator (no scratch).
    """
    k = pl.program_id(1)
    partial = jnp.dot(x_ref[...], w_ref[...], preferred_element_type=jnp.float32)

    @pl.when(k == 0)
    def _():
        o_ref[...] = partial

    @pl.when(k > 0)
    def _():
        o_ref[...] += partial

    @pl.when(k == pl.num_programs(1) - 1)
    def _():
        r = o_ref[...] + b_ref[...]
        if apply_relu:
            r = jnp.maximum(r, 0.0)
        o_ref[...] = r


def pallas_linear(x, w_t, b, *, apply_relu, tn=512, tk=4096):
    """x: (M, K); w_t: (K, N) pre-transposed bf16; b: (N,) f32. Returns f32 (M, N)."""
    M, K = x.shape
    Kw, N = w_t.shape
    assert K == Kw, (K, Kw)

    tn = _largest_tile(N, tn)
    tk = _largest_tile(K, tk)

    x = x.astype(jnp.bfloat16)          # tiny (M, K) cast; MXU runs bf16 x bf16
    b2 = b.reshape(1, N).astype(jnp.float32)

    kernel = functools.partial(_linear_kernel, apply_relu=apply_relu)
    return pl.pallas_call(
        kernel,
        out_shape=jax.ShapeDtypeStruct((M, N), jnp.float32),
        grid_spec=pltpu.PrefetchScalarGridSpec(
            num_scalar_prefetch=0,
            grid=(N // tn, K // tk),            # reduction (k) axis last
            in_specs=[
                pl.BlockSpec((M, tk), lambda j, k: (0, k)),
                pl.BlockSpec((tk, tn), lambda j, k: (k, j)),
                pl.BlockSpec((1, tn), lambda j, k: (0, j)),
            ],
            out_specs=pl.BlockSpec((M, tn), lambda j, k: (0, j)),
        ),
        compiler_params=pltpu.CompilerParams(
            dimension_semantics=("parallel", "arbitrary")
        ),
        # NOTE(batch): at M=2 this is a weight-streaming GEMV; if M grows,
        # add an M grid axis (tm=128/256) instead of one (M, tn) block.
    )(x, w_t, b2)


def init_params(key, image_size, num_classes, dtype=jnp.float32):
    """Deterministic synthetic parameters matching VGG_Classifier.__init__.

    Weights are stored in PyTorch nn.Linear layout (out_features, in_features).
    """
    in_features = 25088 if image_size == 224 else 512
    dims = [(in_features, 4096), (4096, 4096), (4096, num_classes)]
    params = []
    for i, (fan_in, fan_out) in enumerate(dims):
        kw, kb = jax.random.split(jax.random.fold_in(key, i))
        bound = 1.0 / (fan_in ** 0.5)
        w = jax.random.uniform(kw, (fan_out, fan_in), dtype, -bound, bound)
        b = jax.random.uniform(kb, (fan_out,), dtype, -bound, bound)
        params.append((w, b))
    return params


def prepare_params(params):
    """One-time (outside the jit'd hot path) weight prep.

    - transpose to (in_features, out_features) so kernels compute x @ W + b
    - cast weights to bf16 (halves HBM streaming; f32 accumulation in-kernel)
    - zero-pad the final layer's output dim up to a multiple of 128 lanes
    """
    prepped = []
    last = len(params) - 1
    for i, (w, b) in enumerate(params):
        w_t = jnp.asarray(w).T.astype(jnp.bfloat16)       # (in, out)
        b = jnp.asarray(b, jnp.float32)
        if i == last:
            n = w_t.shape[1]
            n_pad = ((n + 127) // 128) * 128
            if n_pad != n:
                w_t = jnp.pad(w_t, ((0, 0), (0, n_pad - n)))
                b = jnp.pad(b, (0, n_pad - n))
        prepped.append((w_t, b))
    return jax.tree_util.tree_map(jax.device_put, prepped)


def vgg_classifier_forward(x, prepped, *, num_classes):
    """Forward pass: fc1 -> ReLU -> fc2 -> ReLU -> fc3 (all in Pallas)."""
    (w1, b1), (w2, b2), (w3, b3) = prepped
    h = pallas_linear(x, w1, b1, apply_relu=True)
    h = pallas_linear(h, w2, b2, apply_relu=True)
    out = pallas_linear(h, w3, b3, apply_relu=False)
    return out[:, :num_classes]


def reference_forward(x, prepped, num_classes):
    """Pure-JAX reference using the same prepared (bf16, padded) weights."""
    (w1, b1), (w2, b2), (w3, b3) = prepped
    h = jnp.dot(x.astype(jnp.bfloat16), w1, preferred_element_type=jnp.float32) + b1
    h = jnp.maximum(h, 0.0)
    h = jnp.dot(h.astype(jnp.bfloat16), w2, preferred_element_type=jnp.float32) + b2
    h = jnp.maximum(h, 0.0)
    out = jnp.dot(h.astype(jnp.bfloat16), w3, preferred_element_type=jnp.float32) + b3
    return out[:, :num_classes]


if __name__ == "__main__":
    key = jax.random.PRNGKey(0)
    image_size = 32          # != 224  -> in_features = 512
    num_classes = 10
    batch = 2

    kx, kp = jax.random.split(key)
    x = jax.random.normal(kx, (batch, 512), dtype=jnp.float32)

    params = init_params(kp, image_size, num_classes)   # PyTorch-layout f32
    prepped = prepare_params(params)                     # one-time prep, outside jit

    fwd = jax.jit(functools.partial(vgg_classifier_forward, num_classes=num_classes))
    out = jax.block_until_ready(fwd(x, prepped))
    assert out.shape == (batch, num_classes)

    ref = reference_forward(x, prepped, num_classes)
    assert jnp.allclose(out, ref, rtol=1e-2, atol=1e-2)

    print("KERNEL_OK")
</pallas_src>

<mosaic_0001>
module attributes {stable_mosaic.version = 11 : i64} {
  func.func @_linear_kernel(%arg0: i32, %arg1: i32, %arg2: memref<2x4096xbf16, #tpu.memory_space<vmem>>, %arg3: memref<4096x512xbf16, #tpu.memory_space<vmem>>, %arg4: memref<1x512xf32, #tpu.memory_space<vmem>>, %arg5: memref<2x512xf32, #tpu.memory_space<vmem>>) attributes {dimension_semantics = [#tpu.dimension_semantics<parallel>, #tpu.dimension_semantics<arbitrary>], iteration_bounds = array<i64: 8, 1>, scalar_prefetch = 0 : i64, scratch_operands = 0 : i64, tpu.core_type = #tpu.core_type<tc>, window_params = [{transform_indices = @transform_0, window_bounds = array<i64: 2, 4096>}, {transform_indices = @transform_1, window_bounds = array<i64: 4096, 512>}, {transform_indices = @transform_2, window_bounds = array<i64: 1, 512>}, {transform_indices = @transform_3, window_bounds = array<i64: 2, 512>}]} {
    %c0 = arith.constant 0 : index
    %c0_0 = arith.constant 0 : index
    %0 = vector.load %arg2[%c0, %c0_0] : memref<2x4096xbf16, #tpu.memory_space<vmem>>, vector<2x4096xbf16>
    %c0_1 = arith.constant 0 : index
    %c0_2 = arith.constant 0 : index
    %1 = vector.load %arg3[%c0_1, %c0_2] : memref<4096x512xbf16, #tpu.memory_space<vmem>>, vector<4096x512xbf16>
    %cst = arith.constant dense<0.000000e+00> : vector<2x512xf32>
    %2 = tpu.matmul %0, %1, %cst {dimension_numbers = #tpu.dot_dimension_numbers<[1], [0], [0], [1], [0, 0, 1, 1], [], []>} : vector<2x4096xbf16>, vector<4096x512xbf16>, vector<2x512xf32> -> vector<2x512xf32>
    %c0_i32 = arith.constant 0 : i32
    %3 = arith.cmpi eq, %arg1, %c0_i32 : i32
    %4 = arith.extui %3 : i1 to i32
    %c0_i32_3 = arith.constant 0 : i32
    %5 = arith.cmpi ne, %4, %c0_i32_3 : i32
    scf.if %5 {
      %c0_8 = arith.constant 0 : index
      %c0_9 = arith.constant 0 : index
      %12 = vector.load %arg5[%c0_8, %c0_9] : memref<2x512xf32, #tpu.memory_space<vmem>>, vector<2x512xf32>
      tpu.vector_store %arg5[%c0_8, %c0_9], %2 {strides = array<i32>} : memref<2x512xf32, #tpu.memory_space<vmem>>, vector<2x512xf32>,
    } else {
    }
    %c0_i32_4 = arith.constant 0 : i32
    %6 = arith.cmpi sgt, %arg1, %c0_i32_4 : i32
    %7 = arith.extui %6 : i1 to i32
    %c0_i32_5 = arith.constant 0 : i32
    %8 = arith.cmpi ne, %7, %c0_i32_5 : i32
    scf.if %8 {
      %c0_8 = arith.constant 0 : index
      %c0_9 = arith.constant 0 : index
      %12 = vector.load %arg5[%c0_8, %c0_9] : memref<2x512xf32, #tpu.memory_space<vmem>>, vector<2x512xf32>
      %13 = arith.addf %12, %2 : vector<2x512xf32>
      %c0_10 = arith.constant 0 : index
      %c0_11 = arith.constant 0 : index
      %14 = vector.load %arg5[%c0_10, %c0_11] : memref<2x512xf32, #tpu.memory_space<vmem>>, vector<2x512xf32>
      tpu.vector_store %arg5[%c0_10, %c0_11], %13 {strides = array<i32>} : memref<2x512xf32, #tpu.memory_space<vmem>>, vector<2x512xf32>,
    } else {
    }
    %c0_i32_6 = arith.constant 0 : i32
    %9 = arith.cmpi eq, %arg1, %c0_i32_6 : i32
    %10 = arith.extui %9 : i1 to i32
    %c0_i32_7 = arith.constant 0 : i32
    %11 = arith.cmpi ne, %10, %c0_i32_7 : i32
    scf.if %11 {
      %c0_8 = arith.constant 0 : index
      %c0_9 = arith.constant 0 : index
      %12 = vector.load %arg5[%c0_8, %c0_9] : memref<2x512xf32, #tpu.memory_space<vmem>>, vector<2x512xf32>
      %c0_10 = arith.constant 0 : index
      %c0_11 = arith.constant 0 : index
      %13 = vector.load %arg4[%c0_10, %c0_11] : memref<1x512xf32, #tpu.memory_space<vmem>>, vector<1x512xf32>
      %14 = vector.broadcast %13 : vector<1x512xf32> to vector<2x512xf32>
      %15 = arith.addf %12, %14 : vector<2x512xf32>
      %cst_12 = arith.constant 0.000000e+00 : f32
      %16 = vector.broadcast %cst_12 : f32 to vector<2x512xf32>
      %17 = arith.maximumf %15, %16 : vector<2x512xf32>
      %c0_13 = arith.constant 0 : index
      %c0_14 = arith.constant 0 : index
      %18 = vector.load %arg5[%c0_13, %c0_14] : memref<2x512xf32, #tpu.memory_space<vmem>>, vector<2x512xf32>
      tpu.vector_store %arg5[%c0_13, %c0_14], %17 {strides = array<i32>} : memref<2x512xf32, #tpu.memory_space<vmem>>, vector<2x512xf32>,
    } else {
    }
    return
  }
  func.func @transform_0(%arg0: i32, %arg1: i32) -> (i32, i32) {
    %c0_i32 = arith.constant 0 : i32
    %c0_i32_0 = arith.constant 0 : i32
    return %c0_i32, %arg1 : i32, i32
  }
  func.func @transform_1(%arg0: i32, %arg1: i32) -> (i32, i32) {
    %c0_i32 = arith.constant 0 : i32
    return %arg1, %arg0 : i32, i32
  }
  func.func @transform_2(%arg0: i32, %arg1: i32) -> (i32, i32) {
    %c0_i32 = arith.constant 0 : i32
    %c0_i32_0 = arith.constant 0 : i32
    return %c0_i32, %arg0 : i32, i32
  }
  func.func @transform_3(%arg0: i32, %arg1: i32) -> (i32, i32) {
    %c0_i32 = arith.constant 0 : i32
    %c0_i32_0 = arith.constant 0 : i32
    return %c0_i32, %arg0 : i32, i32
  }
}

module attributes {stable_mosaic.version = 11 : i64} {
  func.func @_linear_kernel(%arg0: i32, %arg1: i32, %arg2: memref<2x512xbf16, #tpu.memory_space<vmem>>, %arg3: memref<512x512xbf16, #tpu.memory_space<vmem>>, %arg4: memref<1x512xf32, #tpu.memory_space<vmem>>, %arg5: memref<2x512xf32, #tpu.memory_space<vmem>>) attributes {dimension_semantics = [#tpu.dimension_semantics<parallel>, #tpu.dimension_semantics<arbitrary>], iteration_bounds = array<i64: 8, 1>, scalar_prefetch = 0 : i64, scratch_operands = 0 : i64, tpu.core_type = #tpu.core_type<tc>, window_params = [{transform_indices = @transform_0, window_bounds = array<i64: 2, 512>}, {transform_indices = @transform_1, window_bounds = array<i64: 512, 512>}, {transform_indices = @transform_2, window_bounds = array<i64: 1, 512>}, {transform_indices = @transform_3, window_bounds = array<i64: 2, 512>}]} {
    %c0 = arith.constant 0 : index
    %c0_0 = arith.constant 0 : index
    %0 = vector.load %arg2[%c0, %c0_0] : memref<2x512xbf16, #tpu.memory_space<vmem>>, vector<2x512xbf16>
    %c0_1 = arith.constant 0 : index
    %c0_2 = arith.constant 0 : index
    %1 = vector.load %arg3[%c0_1, %c0_2] : memref<512x512xbf16, #tpu.memory_space<vmem>>, vector<512x512xbf16>
    %cst = arith.constant dense<0.000000e+00> : vector<2x512xf32>
    %2 = tpu.matmul %0, %1, %cst {dimension_numbers = #tpu.dot_dimension_numbers<[1], [0], [0], [1], [0, 0, 1, 1], [], []>} : vector<2x512xbf16>, vector<512x512xbf16>, vector<2x512xf32> -> vector<2x512xf32>
    %c0_i32 = arith.constant 0 : i32
    %3 = arith.cmpi eq, %arg1, %c0_i32 : i32
    %4 = arith.extui %3 : i1 to i32
    %c0_i32_3 = arith.constant 0 : i32
    %5 = arith.cmpi ne, %4, %c0_i32_3 : i32
    scf.if %5 {
      %c0_8 = arith.constant 0 : index
      %c0_9 = arith.constant 0 : index
      %12 = vector.load %arg5[%c0_8, %c0_9] : memref<2x512xf32, #tpu.memory_space<vmem>>, vector<2x512xf32>
      tpu.vector_store %arg5[%c0_8, %c0_9], %2 {strides = array<i32>} : memref<2x512xf32, #tpu.memory_space<vmem>>, vector<2x512xf32>,
    } else {
    }
    %c0_i32_4 = arith.constant 0 : i32
    %6 = arith.cmpi sgt, %arg1, %c0_i32_4 : i32
    %7 = arith.extui %6 : i1 to i32
    %c0_i32_5 = arith.constant 0 : i32
    %8 = arith.cmpi ne, %7, %c0_i32_5 : i32
    scf.if %8 {
      %c0_8 = arith.constant 0 : index
      %c0_9 = arith.constant 0 : index
      %12 = vector.load %arg5[%c0_8, %c0_9] : memref<2x512xf32, #tpu.memory_space<vmem>>, vector<2x512xf32>
      %13 = arith.addf %12, %2 : vector<2x512xf32>
      %c0_10 = arith.constant 0 : index
      %c0_11 = arith.constant 0 : index
      %14 = vector.load %arg5[%c0_10, %c0_11] : memref<2x512xf32, #tpu.memory_space<vmem>>, vector<2x512xf32>
      tpu.vector_store %arg5[%c0_10, %c0_11], %13 {strides = array<i32>} : memref<2x512xf32, #tpu.memory_space<vmem>>, vector<2x512xf32>,
    } else {
    }
    %c0_i32_6 = arith.constant 0 : i32
    %9 = arith.cmpi eq, %arg1, %c0_i32_6 : i32
    %10 = arith.extui %9 : i1 to i32
    %c0_i32_7 = arith.constant 0 : i32
    %11 = arith.cmpi ne, %10, %c0_i32_7 : i32
    scf.if %11 {
      %c0_8 = arith.constant 0 : index
      %c0_9 = arith.constant 0 : index
      %12 = vector.load %arg5[%c0_8, %c0_9] : memref<2x512xf32, #tpu.memory_space<vmem>>, vector<2x512xf32>
      %c0_10 = arith.constant 0 : index
      %c0_11 = arith.constant 0 : index
      %13 = vector.load %arg4[%c0_10, %c0_11] : memref<1x512xf32, #tpu.memory_space<vmem>>, vector<1x512xf32>
      %14 = vector.broadcast %13 : vector<1x512xf32> to vector<2x512xf32>
      %15 = arith.addf %12, %14 : vector<2x512xf32>
      %cst_12 = arith.constant 0.000000e+00 : f32
      %16 = vector.broadcast %cst_12 : f32 to vector<2x512xf32>
      %17 = arith.maximumf %15, %16 : vector<2x512xf32>
      %c0_13 = arith.constant 0 : index
      %c0_14 = arith.constant 0 : index
      %18 = vector.load %arg5[%c0_13, %c0_14] : memref<2x512xf32, #tpu.memory_space<vmem>>, vector<2x512xf32>
      tpu.vector_store %arg5[%c0_13, %c0_14], %17 {strides = array<i32>} : memref<2x512xf32, #tpu.memory_space<vmem>>, vector<2x512xf32>,
    } else {
    }
    return
  }
  func.func @transform_0(%arg0: i32, %arg1: i32) -> (i32, i32) {
    %c0_i32 = arith.constant 0 : i32
    %c0_i32_0 = arith.constant 0 : i32
    return %c0_i32, %arg1 : i32, i32
  }
  func.func @transform_1(%arg0: i32, %arg1: i32) -> (i32, i32) {
    %c0_i32 = arith.constant 0 : i32
    return %arg1, %arg0 : i32, i32
  }
  func.func @transform_2(%arg0: i32, %arg1: i32) -> (i32, i32) {
    %c0_i32 = arith.constant 0 : i32
    %c0_i32_0 = arith.constant 0 : i32
    return %c0_i32, %arg0 : i32, i32
  }
  func.func @transform_3(%arg0: i32, %arg1: i32) -> (i32, i32) {
    %c0_i32 = arith.constant 0 : i32
    %c0_i32_0 = arith.constant 0 : i32
    return %c0_i32, %arg0 : i32, i32
  }
}

module attributes {stable_mosaic.version = 11 : i64} {
  func.func @_linear_kernel(%arg0: i32, %arg1: i32, %arg2: memref<2x4096xbf16, #tpu.memory_space<vmem>>, %arg3: memref<4096x128xbf16, #tpu.memory_space<vmem>>, %arg4: memref<1x128xf32, #tpu.memory_space<vmem>>, %arg5: memref<2x128xf32, #tpu.memory_space<vmem>>) attributes {dimension_semantics = [#tpu.dimension_semantics<parallel>, #tpu.dimension_semantics<arbitrary>], iteration_bounds = array<i64: 1, 1>, scalar_prefetch = 0 : i64, scratch_operands = 0 : i64, tpu.core_type = #tpu.core_type<tc>, window_params = [{transform_indices = @transform_0, window_bounds = array<i64: 2, 4096>}, {transform_indices = @transform_1, window_bounds = array<i64: 4096, 128>}, {transform_indices = @transform_2, window_bounds = array<i64: 1, 128>}, {transform_indices = @transform_3, window_bounds = array<i64: 2, 128>}]} {
    %c0 = arith.constant 0 : index
    %c0_0 = arith.constant 0 : index
    %0 = vector.load %arg2[%c0, %c0_0] : memref<2x4096xbf16, #tpu.memory_space<vmem>>, vector<2x4096xbf16>
    %c0_1 = arith.constant 0 : index
    %c0_2 = arith.constant 0 : index
    %1 = vector.load %arg3[%c0_1, %c0_2] : memref<4096x128xbf16, #tpu.memory_space<vmem>>, vector<4096x128xbf16>
    %cst = arith.constant dense<0.000000e+00> : vector<2x128xf32>
    %2 = tpu.matmul %0, %1, %cst {dimension_numbers = #tpu.dot_dimension_numbers<[1], [0], [0], [1], [0, 0, 1, 1], [], []>} : vector<2x4096xbf16>, vector<4096x128xbf16>, vector<2x128xf32> -> vector<2x128xf32>
    %c0_i32 = arith.constant 0 : i32
    %3 = arith.cmpi eq, %arg1, %c0_i32 : i32
    %4 = arith.extui %3 : i1 to i32
    %c0_i32_3 = arith.constant 0 : i32
    %5 = arith.cmpi ne, %4, %c0_i32_3 : i32
    scf.if %5 {
      %c0_8 = arith.constant 0 : index
      %c0_9 = arith.constant 0 : index
      %12 = vector.load %arg5[%c0_8, %c0_9] : memref<2x128xf32, #tpu.memory_space<vmem>>, vector<2x128xf32>
      tpu.vector_store %arg5[%c0_8, %c0_9], %2 {strides = array<i32>} : memref<2x128xf32, #tpu.memory_space<vmem>>, vector<2x128xf32>,
    } else {
    }
    %c0_i32_4 = arith.constant 0 : i32
    %6 = arith.cmpi sgt, %arg1, %c0_i32_4 : i32
    %7 = arith.extui %6 : i1 to i32
    %c0_i32_5 = arith.constant 0 : i32
    %8 = arith.cmpi ne, %7, %c0_i32_5 : i32
    scf.if %8 {
      %c0_8 = arith.constant 0 : index
      %c0_9 = arith.constant 0 : index
      %12 = vector.load %arg5[%c0_8, %c0_9] : memref<2x128xf32, #tpu.memory_space<vmem>>, vector<2x128xf32>
      %13 = arith.addf %12, %2 : vector<2x128xf32>
      %c0_10 = arith.constant 0 : index
      %c0_11 = arith.constant 0 : index
      %14 = vector.load %arg5[%c0_10, %c0_11] : memref<2x128xf32, #tpu.memory_space<vmem>>, vector<2x128xf32>
      tpu.vector_store %arg5[%c0_10, %c0_11], %13 {strides = array<i32>} : memref<2x128xf32, #tpu.memory_space<vmem>>, vector<2x128xf32>,
    } else {
    }
    %c0_i32_6 = arith.constant 0 : i32
    %9 = arith.cmpi eq, %arg1, %c0_i32_6 : i32
    %10 = arith.extui %9 : i1 to i32
    %c0_i32_7 = arith.constant 0 : i32
    %11 = arith.cmpi ne, %10, %c0_i32_7 : i32
    scf.if %11 {
      %c0_8 = arith.constant 0 : index
      %c0_9 = arith.constant 0 : index
      %12 = vector.load %arg5[%c0_8, %c0_9] : memref<2x128xf32, #tpu.memory_space<vmem>>, vector<2x128xf32>
      %c0_10 = arith.constant 0 : index
      %c0_11 = arith.constant 0 : index
      %13 = vector.load %arg4[%c0_10, %c0_11] : memref<1x128xf32, #tpu.memory_space<vmem>>, vector<1x128xf32>
      %14 = vector.broadcast %13 : vector<1x128xf32> to vector<2x128xf32>
      %15 = arith.addf %12, %14 : vector<2x128xf32>
      %c0_12 = arith.constant 0 : index
      %c0_13 = arith.constant 0 : index
      %16 = vector.load %arg5[%c0_12, %c0_13] : memref<2x128xf32, #tpu.memory_space<vmem>>, vector<2x128xf32>
      tpu.vector_store %arg5[%c0_12, %c0_13], %15 {strides = array<i32>} : memref<2x128xf32, #tpu.memory_space<vmem>>, vector<2x128xf32>,
    } else {
    }
    return
  }
  func.func @transform_0(%arg0: i32, %arg1: i32) -> (i32, i32) {
    %c0_i32 = arith.constant 0 : i32
    %c0_i32_0 = arith.constant 0 : i32
    return %c0_i32, %arg1 : i32, i32
  }
  func.func @transform_1(%arg0: i32, %arg1: i32) -> (i32, i32) {
    %c0_i32 = arith.constant 0 : i32
    return %arg1, %arg0 : i32, i32
  }
  func.func @transform_2(%arg0: i32, %arg1: i32) -> (i32, i32) {
    %c0_i32 = arith.constant 0 : i32
    %c0_i32_0 = arith.constant 0 : i32
    return %c0_i32, %arg0 : i32, i32
  }
  func.func @transform_3(%arg0: i32, %arg1: i32) -> (i32, i32) {
    %c0_i32 = arith.constant 0 : i32
    %c0_i32_0 = arith.constant 0 : i32
    return %c0_i32, %arg0 : i32, i32
  }
}

</mosaic_0001>

<bundles_post_ra>
// kernel: vgg_classifier_forward.3
= control target key start
LH: loop header
LB: loop body
LE: loop exit
PB: predicated region body
PF: predicated region fallthrough
CT: control target
= control target key end

     0   :  { %8 = vsyncpa [#allocation3], 0  ;;  %s2695_s0 = inlined_call_operand.vmem [shape: bf16[2,512], index: 0, kind: input, shape index: {}]   ;;  %s2696_s1 = inlined_call_operand.hbm [shape: bf16[512,4096], index: 1, kind: input, shape index: {}]   ;;  %s2697_s2 = inlined_call_operand.hbm [shape: f32[1,4096], index: 2, kind: input, shape index: {}]   ;;  %s2698_s3 = inlined_call_operand.vmem [shape: f32[2,4096], index: 3, kind: output, shape index: {}]  }
   0x1   :  { %10 = vsyncpa [#allocation3 + $0x1], 0 }
   0x2   :  { %11 = vsyncpa [#allocation5], 0 }
   0x3   :  { %13 = vsyncpa [#allocation5 + $0x1], 0  ;;  %s2296_s12 = smov 0   ;;  %s2298_s13 = smov 0  }
   0x4   :  { %s2300_s14 = smov 0   ;;  %s2302_s15 = smov 0  }
   0x5   :  { %s2304_s16 = smov 0   ;;  %s2306_s17 = smov 0  }
   0x6 LB: > { %s1436_s18 = sadd.s32 4294967295, %s2271_s17   ;;  %s31_s19 = sadd.s32 1, %s2267_s16  ;;  %s2271_s17 = sphi %s2306_s17, %s19_s17   ;;  %s2267_s16 = sphi %s2304_s16, %s2706_s16   ;;  %s2263_s15 = sphi %s2302_s15, %s2705_s15   ;;  %s2259_s14 = sphi %s2300_s14, %s2704_s14   ;;  %s2255_s13 = sphi %s2298_s13, %s2703_s13   ;;  %s2251_s12 = sphi %s2296_s12, %s2702_s12  }
   0x7   : > { %p33_p0 = scmp.ge.s32.totalorder %s31_s19, 8  ;;  %s66_s20 = sadd.s32 1, %s2259_s14 }
   0x8   : > { %p73_p1 = scmp.ne.s32.totalorder %s2259_s14, %s2255_s13  ;;  %p74_p2 = scmp.eq.s32.totalorder %s2271_s17, 0 }
   0x9   : > { %s2708_s19 = smov (%p33_p0, %s31_s19), 0  ;;  %p79_p4 = scmp.ne.s32.totalorder %s2255_s13, %s2251_s12 }
   0xa   : > { %p2332_p3 = por %p74_p2, %p73_p1  ;;  %s62_s22 = ssub.s32 %s2267_s16, %s2708_s19 }
   0xb   : > { %p80_p5 = scmp.eq.s32.totalorder %s1436_s18, 0  ;;  %p64_p6 = scmp.eq.s32.totalorder %s62_s22, 0 }
   0xc   : > { %p2105_p8 = scmp.lt.s32.totalorder %s2271_s17, 8  ;;  %s2348_s25 = sand.u32 1, %s2259_s14  }
   0xd   : > { %p2339_p7 = por %p80_p5, %p79_p4  ;;  %s1965_s26 = sshll.u32 %s2267_s16, 4 }
   0xe   : > { %s2345_s24 = scalar_select %p64_p6, %s2259_s14, %s66_s20  }
   0xf   : > { %s1441_s27 = sshll.u32 %s2348_s25, 10  ;;  %s175_s30 = scalar_lea.hbm %s2696_s1, %s1965_s26 }
  0x10   : > { %s176_s4 = sshll.u32 %s175_s30, 4  ;;  %s167_s5 = scalar_lea.vmem [#allocation2], %s1441_s27  ;;  %s177_s4 = int_to_ptr.hbm [resolvable:$true] %s176_s4 }
  0x11   : > { %s178_s6 = sshll.u32 %s167_s5, 4  ;;  %p2357_p9 = pnand %p2105_p8, %p2332_p3  ;;  %s179_s6 = int_to_ptr.vmem [resolvable:$true] %s178_s6 }
  0x12   : > { %p1446_p10 = scmp.ge.s32.totalorder %s2271_s17, 1  ;;  %s164_s8 = scalar_lea.sflag [#allocation3], %s2348_s25 }
  0x13   : > { %s2273_s9 = smov 2048   ;;  %s2274_s10 = smov 256  }
  0x14   : > { %s2275_s11 = smov 16   ;;  %p205_p11 = scmp.lt.s32.totalorder %s2271_s17, 9 }
  0x15   : > { %2101 = dma.hbm_to_vmem [thread:$0]  (!%p2357_p9), %s177_s4, 16384, %s179_s6, %s164_s8, %s2273_s9, %s2274_s10, %s2275_s11  }
  0x16   : > { %s1444_s12 = sshll.u32 %s2348_s25, 2  ;;  %s1445_s18 = sshll.u32 %s2267_s16, 2 }
  0x17   : > { %p206_p12 = pnand %p1446_p10, %p205_p11  ;;  %s196_s22 = scalar_lea.hbm %s2697_s2, %s1445_s18 }
  0x18   : > { %s192_s26 = scalar_lea.vmem [#allocation4], %s1444_s12  ;;  %s198_s28 = sshll.u32 %s196_s22, 4  ;;  %s199_s28 = int_to_ptr.hbm [resolvable:$true] %s198_s28 }
  0x19   : > { %s200_s27 = sshll.u32 %s192_s26, 4  ;;  %s189_s29 = scalar_lea.sflag [#allocation5], %s2348_s25  ;;  %s201_s27 = int_to_ptr.vmem [resolvable:$true] %s200_s27 }
  0x1a   : > { %2104 = dma.hbm_to_vmem [thread:$0]  (!%p2357_p9), %s199_s28, 64, %s201_s27, %s189_s29  }
  0x1b   : > { %209 = sbr.rel (%p206_p12) target bundleno = 313 (0x139), region = 32  ;;  %s211_s30 = sand.u32 (!%p206_p12), 1, %s2255_s13  }
  0x1c   : > { %s1447_s4 = sshll.u32 (!%p206_p12), %s211_s30, 10  ;;  %s212_s5 = scalar_lea.sflag (!%p206_p12), [#allocation3], %s211_s30 }
  0x1d   : > { %s2375_s6 = scalar_lea.vmem (!%p206_p12), [#allocation2], %s1447_s4 }
  0x20   : > { %2242 = dma.done.wait (%p2339_p7), %s212_s5, 16384  }
  0x21   : > { %2244 = vsyncadd (%p2339_p7), %s212_s5, 4294950912  ;;  %s1448_s8 = sshll.u32 %s211_s30, 2  ;;  %s222_s9 = scalar_lea.sflag [#allocation5], %s211_s30 }
  0x22   : > { %s2381_s10 = scalar_lea.vmem [#allocation4], %s1448_s8 }
  0x23   : > { %2246 = dma.done.wait (%p2339_p7), %s222_s9, 64  }
  0x24   : > { %2248 = vsyncadd (%p2339_p7), %s222_s9, 4294967232  ;;  %v1565_v0 = vld [vmem:[%s2375_s6 + $0xe0] sm:$0xf]  ;;  %v1996_v1 = vld [vmem:[%s2375_s6 + $0xec] sm:$0xf0]  ;;  %s1449_s7 = sshll.u32 %s2263_s15, 2 }
  0x25   : > { %v1693_v2 = vld [vmem:[%s2375_s6 + $0x1e0] sm:$0xf]  ;;  %v1566_v3 = vor.u32 %v1996_v1, %v1565_v0  ;;  %v2028_v4 = vld [vmem:[%s2375_s6 + $0x1ec] sm:$0xf0]  ;;  %p267_p13 = scmp.lt.s32.totalorder %s1449_s7, 31  ;;  %vm1272_vm0 = vcmask 1045508  }
  0x26   : > { %v1821_v5 = vld [vmem:[%s2375_s6 + $0x2e0] sm:$0xf]  ;;  %v2060_v6 = vld [vmem:[%s2375_s6 + $0x2ec] sm:$0xf0]  ;;  %v1694_v7 = vor.u32 %v2028_v4, %v1693_v2  ;;  %vm1270_vm1 = vcmask 1041408   ;;  %vm1274_vm2 = vcmask 1043456  }
  0x27   : > { %v1822_v8 = vor.u32 %v2060_v6, %v1821_v5  ;;  %v1949_v9 = vld [vmem:[%s2375_s6 + $0x3e0] sm:$0xf]  ;;  %v2092_v10 = vld [vmem:[%s2375_s6 + $0x3ec] sm:$0xf0]  ;;  %1051 = vmatpush.bf16.msra.mxu0 %v1566_v3  ;;  %s2710_s7 = smov (!%p267_p13, %s1449_s7), 31 }
  0x28   : > { %v1549_v11 = vld [vmem:[%s2375_s6 + $0xc0] sm:$0xf]  ;;  %v1950_v12 = vor.u32 %v2092_v10, %v1949_v9  ;;  %v1992_v13 = vld [vmem:[%s2375_s6 + $0xcc] sm:$0xf0]  ;;  %1064 = vmatpush.bf16.msra.mxu1 %v1694_v7  ;;  %s1450_s15 = sshll.u32 %s2710_s7, 1 }
  0x29   : > { %v1677_v14 = vld [vmem:[%s2375_s6 + $0x1c0] sm:$0xf]  ;;  %v2024_v15 = vld [vmem:[%s2375_s6 + $0x1cc] sm:$0xf0]  ;;  %1077 = vmatpush.bf16.msra.mxu2 %v1822_v8  ;;  %v1550_v16 = vor.u32 %v1992_v13, %v1549_v11  ;;  %s270_s18 = scalar_lea.vmem %s2698_s3, %s1450_s15 }
  0x2a   : > { %v1678_v17 = vor.u32 %v2024_v15, %v1677_v14  ;;  %v1805_v18 = vld [vmem:[%s2375_s6 + $0x2c0] sm:$0xf]  ;;  %v2056_v19 = vld [vmem:[%s2375_s6 + $0x2cc] sm:$0xf0]  ;;  %1090 = vmatpush.bf16.msra.mxu3 %v1950_v12 }
  0x2b   : > { %v1933_v20 = vld [vmem:[%s2375_s6 + $0x3c0] sm:$0xf]  ;;  %v1806_v21 = vor.u32 %v2056_v19, %v1805_v18  ;;  %v2088_v22 = vld [vmem:[%s2375_s6 + $0x3cc] sm:$0xf0]  ;;  %1052 = vmatpush.bf16.msra.mxu0 %v1550_v16 }
  0x2c   : > { %v1533_v23 = vld [vmem:[%s2375_s6 + $0xa0] sm:$0xf]  ;;  %v1988_v24 = vld [vmem:[%s2375_s6 + $0xac] sm:$0xf0]  ;;  %v1934_v25 = vor.u32 %v2088_v22, %v1933_v20  ;;  %1065 = vmatpush.bf16.msra.mxu1 %v1678_v17 }
  0x2d   : > { %v1661_v26 = vld [vmem:[%s2375_s6 + $0x1a0] sm:$0xf]  ;;  %v2020_v27 = vld [vmem:[%s2375_s6 + $0x1ac] sm:$0xf0]  ;;  %v1534_v29 = vor.u32 %v1988_v24, %v1533_v23  ;;  %1078 = vmatpush.bf16.msra.mxu2 %v1806_v21 }
  0x2e   : > { %v1789_v28 = vld [vmem:[%s2375_s6 + $0x2a0] sm:$0xf]  ;;  %v2052_v30 = vld [vmem:[%s2375_s6 + $0x2ac] sm:$0xf0]  ;;  %v1662_v33 = vor.u32 %v2020_v27, %v1661_v26  ;;  %1091 = vmatpush.bf16.msra.mxu3 %v1934_v25 }
  0x2f   : > { %v1917_v31 = vld [vmem:[%s2375_s6 + $0x3a0] sm:$0xf]  ;;  %v2084_v32 = vld [vmem:[%s2375_s6 + $0x3ac] sm:$0xf0]  ;;  %v1790_v34 = vor.u32 %v2052_v30, %v1789_v28  ;;  %1053 = vmatpush.bf16.msra.mxu0 %v1534_v29  ;;  %v1994_v28 = vld [vmem:[%s2375_s6 + $0xe4] sm:$0xf] }
  0x30   : > { %v1517_v35 = vld [vmem:[%s2375_s6 + $0x80] sm:$0xf]  ;;  %v1984_v36 = vld [vmem:[%s2375_s6 + $0x8c] sm:$0xf0]  ;;  %v1918_v38 = vor.u32 %v2084_v32, %v1917_v31  ;;  %1066 = vmatpush.bf16.msra.mxu1 %v1662_v33  ;;  %v1567_v29 = vld [vmem:[%s2375_s6 + $0xf0] sm:$0xf0] }
  0x31   : > { %v1645_v37 = vld [vmem:[%s2375_s6 + $0x180] sm:$0xf]  ;;  %v2016_v39 = vld [vmem:[%s2375_s6 + $0x18c] sm:$0xf0]  ;;  %v1518_v44 = vor.u32 %v1984_v36, %v1517_v35  ;;  %1079 = vmatpush.bf16.msra.mxu2 %v1790_v34  ;;  %v2026_v30 = vld [vmem:[%s2375_s6 + $0x1e4] sm:$0xf] }
  0x32   : > { %v1773_v40 = vld [vmem:[%s2375_s6 + $0x280] sm:$0xf]  ;;  %v2048_v41 = vld [vmem:[%s2375_s6 + $0x28c] sm:$0xf0]  ;;  %v1646_v45 = vor.u32 %v2016_v39, %v1645_v37  ;;  %1092 = vmatpush.bf16.msra.mxu3 %v1918_v38  ;;  %v1695_v32 = vld [vmem:[%s2375_s6 + $0x1f0] sm:$0xf0] }
  0x33   : > { %v1901_v42 = vld [vmem:[%s2375_s6 + $0x380] sm:$0xf]  ;;  %v2080_v43 = vld [vmem:[%s2375_s6 + $0x38c] sm:$0xf0]  ;;  %v1774_v46 = vor.u32 %v2048_v41, %v1773_v40  ;;  %1054 = vmatpush.bf16.msra.mxu0 %v1518_v44  ;;  %v2058_v33 = vld [vmem:[%s2375_s6 + $0x2e4] sm:$0xf]  ;;  %v1570_v40 = vor.u32 %v1994_v28, %v1567_v29  ;;  %v1698_v41 = vor.u32 %v2026_v30, %v1695_v32 }
  0x34   : > { %v1501_v47 = vld [vmem:[%s2375_s6 + $0x60] sm:$0xf]  ;;  %v1980_v48 = vld [vmem:[%s2375_s6 + $0x6c] sm:$0xf0]  ;;  %v1902_v50 = vor.u32 %v2080_v43, %v1901_v42  ;;  %1067 = vmatpush.bf16.msra.mxu1 %v1646_v45  ;;  %v1823_v34 = vld [vmem:[%s2375_s6 + $0x2f0] sm:$0xf0] }
  0x35   : > { %v1629_v49 = vld [vmem:[%s2375_s6 + $0x160] sm:$0xf]  ;;  %v2012_v51 = vld [vmem:[%s2375_s6 + $0x16c] sm:$0xf0]  ;;  %v1502_v56 = vor.u32 %v1980_v48, %v1501_v47  ;;  %1080 = vmatpush.bf16.msra.mxu2 %v1774_v46  ;;  %v2090_v37 = vld [vmem:[%s2375_s6 + $0x3e4] sm:$0xf]  ;;  %v1826_v42 = vor.u32 %v2058_v33, %v1823_v34 }
  0x36   : > { %v1757_v52 = vld [vmem:[%s2375_s6 + $0x260] sm:$0xf]  ;;  %v2044_v53 = vld [vmem:[%s2375_s6 + $0x26c] sm:$0xf0]  ;;  %v1630_v57 = vor.u32 %v2012_v51, %v1629_v49  ;;  %1093 = vmatpush.bf16.msra.mxu3 %v1902_v50  ;;  %v1951_v38 = vld [vmem:[%s2375_s6 + $0x3f0] sm:$0xf0] }
  0x37   : > { %v1885_v54 = vld [vmem:[%s2375_s6 + $0x360] sm:$0xf]  ;;  %v2076_v55 = vld [vmem:[%s2375_s6 + $0x36c] sm:$0xf0]  ;;  %v1758_v58 = vor.u32 %v2044_v53, %v1757_v52  ;;  %1055 = vmatpush.bf16.msra.mxu0 %v1502_v56  ;;  %v1990_v43 = vld [vmem:[%s2375_s6 + $0xc4] sm:$0xf]  ;;  %v1954_v46 = vor.u32 %v2090_v37, %v1951_v38 }
  0x38   : > { %v1485_v59 = vld [vmem:[%s2375_s6 + $0x40] sm:$0xf]  ;;  %v1976_v60 = vld [vmem:[%s2375_s6 + $0x4c] sm:$0xf0]  ;;  %v1886_v62 = vor.u32 %v2076_v55, %v1885_v54  ;;  %1068 = vmatpush.bf16.msra.mxu1 %v1630_v57  ;;  %v1551_v44 = vld [vmem:[%s2375_s6 + $0xd0] sm:$0xf0] }
  0x39   : > { %v1613_v61 = vld [vmem:[%s2375_s6 + $0x140] sm:$0xf]  ;;  %v2008_v63 = vld [vmem:[%s2375_s6 + $0x14c] sm:$0xf0]  ;;  %v1486_v4 = vor.u32 %v1976_v60, %v1485_v59  ;;  %1081 = vmatpush.bf16.msra.mxu2 %v1758_v58  ;;  %v2022_v45 = vld [vmem:[%s2375_s6 + $0x1c4] sm:$0xf]  ;;  %v1554_v53 = vor.u32 %v1990_v43, %v1551_v44 }
  0x3a   : > { %v1741_v0 = vld [vmem:[%s2375_s6 + $0x240] sm:$0xf]  ;;  %v2040_v1 = vld [vmem:[%s2375_s6 + $0x24c] sm:$0xf0]  ;;  %v1614_v5 = vor.u32 %v2008_v63, %v1613_v61  ;;  %1094 = vmatpush.bf16.msra.mxu3 %v1886_v62  ;;  %v1679_v47 = vld [vmem:[%s2375_s6 + $0x1d0] sm:$0xf0] }
  0x3b   : > { %v1869_v2 = vld [vmem:[%s2375_s6 + $0x340] sm:$0xf]  ;;  %v2072_v3 = vld [vmem:[%s2375_s6 + $0x34c] sm:$0xf0]  ;;  %v1742_v6 = vor.u32 %v2040_v1, %v1741_v0  ;;  %1056 = vmatpush.bf16.msra.mxu0 %v1486_v4  ;;  %v2054_v48 = vld [vmem:[%s2375_s6 + $0x2c4] sm:$0xf]  ;;  %v1682_v54 = vor.u32 %v2022_v45, %v1679_v47 }
  0x3c   : > { %v1469_v7 = vld [vmem:[%s2375_s6 + $0x20] sm:$0xf]  ;;  %v1972_v8 = vld [vmem:[%s2375_s6 + $0x2c] sm:$0xf0]  ;;  %v1870_v10 = vor.u32 %v2072_v3, %v1869_v2  ;;  %1069 = vmatpush.bf16.msra.mxu1 %v1614_v5  ;;  %v1807_v49 = vld [vmem:[%s2375_s6 + $0x2d0] sm:$0xf0] }
  0x3d   : > { %v1597_v9 = vld [vmem:[%s2375_s6 + $0x120] sm:$0xf]  ;;  %v2004_v11 = vld [vmem:[%s2375_s6 + $0x12c] sm:$0xf0]  ;;  %v1470_v16 = vor.u32 %v1972_v8, %v1469_v7  ;;  %1082 = vmatpush.bf16.msra.mxu2 %v1742_v6  ;;  %v2086_v50 = vld [vmem:[%s2375_s6 + $0x3c4] sm:$0xf]  ;;  %v1810_v55 = vor.u32 %v2054_v48, %v1807_v49 }
  0x3e   : > { %v1725_v12 = vld [vmem:[%s2375_s6 + $0x220] sm:$0xf]  ;;  %v2036_v13 = vld [vmem:[%s2375_s6 + $0x22c] sm:$0xf0]  ;;  %v1598_v19 = vor.u32 %v2004_v11, %v1597_v9  ;;  %1095 = vmatpush.bf16.msra.mxu3 %v1870_v10  ;;  %v1935_v51 = vld [vmem:[%s2375_s6 + $0x3d0] sm:$0xf0] }
  0x3f   : > { %v1853_v14 = vld [vmem:[%s2375_s6 + $0x320] sm:$0xf]  ;;  %v2068_v15 = vld [vmem:[%s2375_s6 + $0x32c] sm:$0xf0]  ;;  %v1726_v20 = vor.u32 %v2036_v13, %v1725_v12  ;;  %1057 = vmatpush.bf16.msra.mxu0 %v1470_v16  ;;  %v272_v52 = vld [vmem:[%s2695_s0] sm:$0xf]  ;;  %v1938_v59 = vor.u32 %v2086_v50, %v1935_v51 }
  0x40   : > { %v1453_v17 = vld [vmem:[%s2375_s6] sm:$0xf]  ;;  %v1968_v18 = vld [vmem:[%s2375_s6 + $0xc] sm:$0xf0]  ;;  %v1854_v24 = vor.u32 %v2068_v15, %v1853_v14  ;;  %1070 = vmatpush.bf16.msra.mxu1 %v1598_v19  ;;  %402 = vst [vmem:[#allocation1] ss:$9 sm:$0xff] %v272_v52 }
  0x41   : > { %v1581_v21 = vld [vmem:[%s2375_s6 + $0x100] sm:$0xf]  ;;  %v2000_v22 = vld [vmem:[%s2375_s6 + $0x10c] sm:$0xf0]  ;;  %v1454_v31 = vor.u32 %v1968_v18, %v1453_v17  ;;  %1083 = vmatpush.bf16.msra.mxu2 %v1726_v20  ;;  %v1986_v56 = vld [vmem:[%s2375_s6 + $0xa4] sm:$0xf] }
  0x42   : > { %v1709_v23 = vld [vmem:[%s2375_s6 + $0x200] sm:$0xf]  ;;  %v2032_v25 = vld [vmem:[%s2375_s6 + $0x20c] sm:$0xf0]  ;;  %v1582_v35 = vor.u32 %v2000_v22, %v1581_v21  ;;  %1096 = vmatpush.bf16.msra.mxu3 %v1854_v24  ;;  %v1535_v57 = vld [vmem:[%s2375_s6 + $0xb0] sm:$0xf0] }
  0x43   : > { %v1837_v26 = vld [vmem:[%s2375_s6 + $0x300] sm:$0xf]  ;;  %v2064_v27 = vld [vmem:[%s2375_s6 + $0x30c] sm:$0xf0]  ;;  %v1710_v36 = vor.u32 %v2032_v25, %v1709_v23  ;;  %1058 = vmatpush.bf16.msra.mxu0 %v1454_v31  ;;  %v2018_v58 = vld [vmem:[%s2375_s6 + $0x1a4] sm:$0xf]  ;;  %v1538_v1 = vor.u32 %v1986_v56, %v1535_v57 }
  0x44   : > { %v1838_v39 = vor.u32 %v2064_v27, %v1837_v26  ;;  %1071 = vmatpush.bf16.msra.mxu1 %v1582_v35  ;;  %v1663_v60 = vld [vmem:[%s2375_s6 + $0x1b0] sm:$0xf0]  ;;  %v2050_v61 = vld [vmem:[%s2375_s6 + $0x2a4] sm:$0xf] }
  0x45   : > { %1084 = vmatpush.bf16.msra.mxu2 %v1710_v36  ;;  %v1791_v62 = vld [vmem:[%s2375_s6 + $0x2b0] sm:$0xf0]  ;;  %v2082_v63 = vld [vmem:[%s2375_s6 + $0x3a4] sm:$0xf]  ;;  %v1666_v3 = vor.u32 %v2018_v58, %v1663_v60 }
  0x46   : > { %1097 = vmatpush.bf16.msra.mxu3 %v1838_v39  ;;  %v1919_v0 = vld [vmem:[%s2375_s6 + $0x3b0] sm:$0xf0]  ;;  %v1982_v2 = vld [vmem:[%s2375_s6 + $0x84] sm:$0xf]  ;;  %v1794_v4 = vor.u32 %v2050_v61, %v1791_v62 }
  0x47   : > { %1103 = vmatpush.bf16.msrb.mxu0 %v1570_v40  ;;  %v1519_v5 = vld [vmem:[%s2375_s6 + $0x90] sm:$0xf0]  ;;  %v2014_v6 = vld [vmem:[%s2375_s6 + $0x184] sm:$0xf]  ;;  %v1922_v8 = vor.u32 %v2082_v63, %v1919_v0  ;;  %v2486_v13 = vld [vmem:[#allocation1 + $0x12] sm:$0xff] }
  0x48   : > { %1116 = vmatpush.bf16.msrb.mxu1 %v1698_v41  ;;  %v1647_v7 = vld [vmem:[%s2375_s6 + $0x190] sm:$0xf0]  ;;  %v2046_v9 = vld [vmem:[%s2375_s6 + $0x284] sm:$0xf]  ;;  %v2488_v14 = vld [vmem:[#allocation1] sm:$0xff]  ;;  %v1522_v15 = vor.u32 %v1982_v2, %v1519_v5  ;;  %1085 = vmatmul.bf16.vlgmr.msra.gmra.mxu2 %v2486_v13 }
  0x49   : > { %1129 = vmatpush.bf16.msrb.mxu2 %v1826_v42  ;;  %v1775_v10 = vld [vmem:[%s2375_s6 + $0x290] sm:$0xf0]  ;;  %v2078_v11 = vld [vmem:[%s2375_s6 + $0x384] sm:$0xf]  ;;  %v1650_v18 = vor.u32 %v2014_v6, %v1647_v7  ;;  %1059 = vmatmul.bf16.vlgmr.msra.gmra.mxu0 %v2488_v14  ;;  %v1997_v2 = vld [vmem:[%s2375_s6 + $0xf4] sm:$0xf0] }
  0x4a   : > { %1142 = vmatpush.bf16.msrb.mxu3 %v1954_v46  ;;  %v1903_v12 = vld [vmem:[%s2375_s6 + $0x390] sm:$0xf0]  ;;  %v2493_v17 = vld [vmem:[#allocation1 + $0x9] sm:$0xff]  ;;  %v1778_v19 = vor.u32 %v2046_v9, %v1775_v10  ;;  %v2029_v5 = vld [vmem:[%s2375_s6 + $0x1f4] sm:$0xf0] }
  0x4b   : > { %1104 = vmatpush.bf16.msrb.mxu0 %v1554_v53  ;;  %v2491_v16 = vld [vmem:[#allocation1 + $0x1b] sm:$0xff]  ;;  %v1978_v20 = vld [vmem:[%s2375_s6 + $0x64] sm:$0xf]  ;;  %v1906_v23 = vor.u32 %v2078_v11, %v1903_v12  ;;  %1072 = vmatmul.bf16.vlgmr.msra.gmra.mxu1 %v2493_v17  ;;  %v1829_v6 = vld [vmem:[%s2375_s6 + $0x2e8] sm:$0xf] }
  0x4c   : > { %1117 = vmatpush.bf16.msrb.mxu1 %v1682_v54  ;;  %v1503_v21 = vld [vmem:[%s2375_s6 + $0x70] sm:$0xf0]  ;;  %v2010_v22 = vld [vmem:[%s2375_s6 + $0x164] sm:$0xf]  ;;  %1098 = vmatmul.bf16.vlgmr.msra.gmra.mxu3 %v2491_v16  ;;  %v2061_v7 = vld [vmem:[%s2375_s6 + $0x2f4] sm:$0xf0] }
  0x4d   : > { %1130 = vmatpush.bf16.msrb.mxu2 %v1810_v55  ;;  %v1631_v24 = vld [vmem:[%s2375_s6 + $0x170] sm:$0xf0]  ;;  %v2042_v25 = vld [vmem:[%s2375_s6 + $0x264] sm:$0xf]  ;;  %v1506_v29 = vor.u32 %v1978_v20, %v1503_v21  ;;  %v1957_v10 = vld [vmem:[%s2375_s6 + $0x3e8] sm:$0xf] }
  0x4e   : > { %1143 = vmatpush.bf16.msrb.mxu3 %v1938_v59  ;;  %v1759_v26 = vld [vmem:[%s2375_s6 + $0x270] sm:$0xf0]  ;;  %v2074_v27 = vld [vmem:[%s2375_s6 + $0x364] sm:$0xf]  ;;  %v1634_v30 = vor.u32 %v2010_v22, %v1631_v24  ;;  %v2093_v11 = vld [vmem:[%s2375_s6 + $0x3f4] sm:$0xf0] }
  0x4f   : > { %1105 = vmatpush.bf16.msrb.mxu0 %v1538_v1  ;;  %v1887_v28 = vld [vmem:[%s2375_s6 + $0x370] sm:$0xf0]  ;;  %v1762_v31 = vor.u32 %v2042_v25, %v1759_v26  ;;  %v1974_v32 = vld [vmem:[%s2375_s6 + $0x44] sm:$0xf]  ;;  %v1573_v1 = vld [vmem:[%s2375_s6 + $0xe8] sm:$0xf] }
  0x50   : > { %1118 = vmatpush.bf16.msrb.mxu1 %v1666_v3  ;;  %v1487_v33 = vld [vmem:[%s2375_s6 + $0x50] sm:$0xf0]  ;;  %v2006_v34 = vld [vmem:[%s2375_s6 + $0x144] sm:$0xf]  ;;  %v1890_v35 = vor.u32 %v2074_v27, %v1887_v28  ;;  %v1701_v3 = vld [vmem:[%s2375_s6 + $0x1e8] sm:$0xf] }
  0x51   : > { %1131 = vmatpush.bf16.msrb.mxu2 %v1794_v4  ;;  %v1615_v36 = vld [vmem:[%s2375_s6 + $0x150] sm:$0xf0]  ;;  %v2038_v37 = vld [vmem:[%s2375_s6 + $0x244] sm:$0xf]  ;;  %v1490_v41 = vor.u32 %v1974_v32, %v1487_v33  ;;  %v1557_v20 = vld [vmem:[%s2375_s6 + $0xc8] sm:$0xf] }
  0x52   : > { %1144 = vmatpush.bf16.msrb.mxu3 %v1922_v8  ;;  %v1743_v38 = vld [vmem:[%s2375_s6 + $0x250] sm:$0xf0]  ;;  %v2070_v39 = vld [vmem:[%s2375_s6 + $0x344] sm:$0xf]  ;;  %v1618_v42 = vor.u32 %v2006_v34, %v1615_v36  ;;  %v1993_v21 = vld [vmem:[%s2375_s6 + $0xd4] sm:$0xf0] }
  0x53   : > { %1106 = vmatpush.bf16.msrb.mxu0 %v1522_v15  ;;  %v1871_v40 = vld [vmem:[%s2375_s6 + $0x350] sm:$0xf0]  ;;  %v1746_v43 = vor.u32 %v2038_v37, %v1743_v38  ;;  %v1970_v44 = vld [vmem:[%s2375_s6 + $0x24] sm:$0xf]  ;;  %v1574_v15 = vor.u32 %v1997_v2, %v1573_v1  ;;  %v1685_v22 = vld [vmem:[%s2375_s6 + $0x1c8] sm:$0xf] }
  0x54   : > { %1119 = vmatpush.bf16.msrb.mxu1 %v1650_v18  ;;  %v1471_v45 = vld [vmem:[%s2375_s6 + $0x30] sm:$0xf0]  ;;  %v2002_v46 = vld [vmem:[%s2375_s6 + $0x124] sm:$0xf]  ;;  %v1874_v47 = vor.u32 %v2070_v39, %v1871_v40  ;;  %v1702_v18 = vor.u32 %v2029_v5, %v1701_v3  ;;  %v2025_v24 = vld [vmem:[%s2375_s6 + $0x1d4] sm:$0xf0] }
  0x55   : > { %1132 = vmatpush.bf16.msrb.mxu2 %v1778_v19  ;;  %v1599_v48 = vld [vmem:[%s2375_s6 + $0x130] sm:$0xf0]  ;;  %v2034_v49 = vld [vmem:[%s2375_s6 + $0x224] sm:$0xf]  ;;  %v1474_v53 = vor.u32 %v1970_v44, %v1471_v45  ;;  %v1830_v19 = vor.u32 %v2061_v7, %v1829_v6  ;;  %v1813_v25 = vld [vmem:[%s2375_s6 + $0x2c8] sm:$0xf] }
  0x56   : > { %1145 = vmatpush.bf16.msrb.mxu3 %v1906_v23  ;;  %v1727_v50 = vld [vmem:[%s2375_s6 + $0x230] sm:$0xf0]  ;;  %v2066_v51 = vld [vmem:[%s2375_s6 + $0x324] sm:$0xf]  ;;  %v1602_v56 = vor.u32 %v2002_v46, %v1599_v48  ;;  %v1958_v23 = vor.u32 %v2093_v11, %v1957_v10  ;;  %v2057_v26 = vld [vmem:[%s2375_s6 + $0x2d4] sm:$0xf0] }
  0x57   : > { %1107 = vmatpush.bf16.msrb.mxu0 %v1506_v29  ;;  %v1855_v52 = vld [vmem:[%s2375_s6 + $0x330] sm:$0xf0]  ;;  %v1966_v54 = vld [vmem:[%s2375_s6 + $0x4] sm:$0xf]  ;;  %v1730_v57 = vor.u32 %v2034_v49, %v1727_v50  ;;  %v1941_v27 = vld [vmem:[%s2375_s6 + $0x3c8] sm:$0xf]  ;;  %v1558_v29 = vor.u32 %v1993_v21, %v1557_v20 }
  0x58   : > { %1120 = vmatpush.bf16.msrb.mxu1 %v1634_v30  ;;  %v1455_v55 = vld [vmem:[%s2375_s6 + $0x10] sm:$0xf0]  ;;  %v1998_v58 = vld [vmem:[%s2375_s6 + $0x104] sm:$0xf]  ;;  %v1858_v61 = vor.u32 %v2066_v51, %v1855_v52  ;;  %v2089_v28 = vld [vmem:[%s2375_s6 + $0x3d4] sm:$0xf0]  ;;  %v1686_v30 = vor.u32 %v2025_v24, %v1685_v22 }
  0x59   : > { %1133 = vmatpush.bf16.msrb.mxu2 %v1762_v31  ;;  %v1583_v59 = vld [vmem:[%s2375_s6 + $0x110] sm:$0xf0]  ;;  %v2030_v60 = vld [vmem:[%s2375_s6 + $0x204] sm:$0xf]  ;;  %v1458_v4 = vor.u32 %v1966_v54, %v1455_v55  ;;  %v1814_v31 = vor.u32 %v2057_v26, %v1813_v25  ;;  %v1541_v32 = vld [vmem:[%s2375_s6 + $0xa8] sm:$0xf] }
  0x5a   : > { %1146 = vmatpush.bf16.msrb.mxu3 %v1890_v35  ;;  %v1711_v62 = vld [vmem:[%s2375_s6 + $0x210] sm:$0xf0]  ;;  %v2062_v63 = vld [vmem:[%s2375_s6 + $0x304] sm:$0xf]  ;;  %v1586_v8 = vor.u32 %v1998_v58, %v1583_v59  ;;  %v1989_v33 = vld [vmem:[%s2375_s6 + $0xb4] sm:$0xf0]  ;;  %v1942_v35 = vor.u32 %v2089_v28, %v1941_v27 }
  0x5b   : > { %1108 = vmatpush.bf16.msrb.mxu0 %v1490_v41  ;;  %v1839_v0 = vld [vmem:[%s2375_s6 + $0x310] sm:$0xf0]  ;;  %v1714_v9 = vor.u32 %v2030_v60, %v1711_v62  ;;  %v1669_v34 = vld [vmem:[%s2375_s6 + $0x1a8] sm:$0xf]  ;;  %v2021_v36 = vld [vmem:[%s2375_s6 + $0x1b4] sm:$0xf0]  ;;  %v1542_v41 = vor.u32 %v1989_v33, %v1541_v32 }
  0x5c   : > { %1121 = vmatpush.bf16.msrb.mxu1 %v1618_v42  ;;  %v1842_v12 = vor.u32 %v2062_v63, %v1839_v0  ;;  %v1797_v37 = vld [vmem:[%s2375_s6 + $0x2a8] sm:$0xf]  ;;  %v2053_v38 = vld [vmem:[%s2375_s6 + $0x2b4] sm:$0xf0]  ;;  %v1670_v42 = vor.u32 %v2021_v36, %v1669_v34 }
  0x5d   : > { %1134 = vmatpush.bf16.msrb.mxu2 %v1746_v43  ;;  %v1925_v39 = vld [vmem:[%s2375_s6 + $0x3a8] sm:$0xf]  ;;  %v2085_v40 = vld [vmem:[%s2375_s6 + $0x3b4] sm:$0xf0]  ;;  %v1798_v43 = vor.u32 %v2053_v38, %v1797_v37 }
  0x5e   : > { %1147 = vmatpush.bf16.msrb.mxu3 %v1874_v47  ;;  %v1525_v44 = vld [vmem:[%s2375_s6 + $0x88] sm:$0xf]  ;;  %v1985_v45 = vld [vmem:[%s2375_s6 + $0x94] sm:$0xf0]  ;;  %v1926_v47 = vor.u32 %v2085_v40, %v1925_v39 }
  0x5f   : > { %1109 = vmatpush.bf16.msrb.mxu0 %v1474_v53  ;;  %v1653_v46 = vld [vmem:[%s2375_s6 + $0x188] sm:$0xf]  ;;  %v2017_v48 = vld [vmem:[%s2375_s6 + $0x194] sm:$0xf0]  ;;  %v1526_v53 = vor.u32 %v1985_v45, %v1525_v44  ;;  %v1703_v45 = vld [vmem:[%s2375_s6 + $0x1f8] sm:$0xf0] }
  0x60   : > { %1122 = vmatpush.bf16.msrb.mxu1 %v1602_v56  ;;  %v1781_v49 = vld [vmem:[%s2375_s6 + $0x288] sm:$0xf]  ;;  %v2049_v50 = vld [vmem:[%s2375_s6 + $0x294] sm:$0xf0]  ;;  %v1654_v54 = vor.u32 %v2017_v48, %v1653_v46  ;;  %v2059_v46 = vld [vmem:[%s2375_s6 + $0x2ec] sm:$0xf] }
  0x61   : > { %1135 = vmatpush.bf16.msrb.mxu2 %v1730_v57  ;;  %v1909_v51 = vld [vmem:[%s2375_s6 + $0x388] sm:$0xf]  ;;  %v2081_v52 = vld [vmem:[%s2375_s6 + $0x394] sm:$0xf0]  ;;  %v1782_v55 = vor.u32 %v2049_v50, %v1781_v49  ;;  %v2091_v50 = vld [vmem:[%s2375_s6 + $0x3ec] sm:$0xf] }
  0x62   : > { %1148 = vmatpush.bf16.msrb.mxu3 %v1858_v61  ;;  %v1509_v56 = vld [vmem:[%s2375_s6 + $0x68] sm:$0xf]  ;;  %v1981_v57 = vld [vmem:[%s2375_s6 + $0x74] sm:$0xf0]  ;;  %v1910_v59 = vor.u32 %v2081_v52, %v1909_v51  ;;  %v1959_v51 = vld [vmem:[%s2375_s6 + $0x3f8] sm:$0xf0] }
  0x63   : > { %1110 = vmatpush.bf16.msrb.mxu0 %v1458_v4  ;;  %v1637_v58 = vld [vmem:[%s2375_s6 + $0x168] sm:$0xf]  ;;  %v2013_v60 = vld [vmem:[%s2375_s6 + $0x174] sm:$0xf0]  ;;  %v1510_v1 = vor.u32 %v1981_v57, %v1509_v56  ;;  %v1991_v56 = vld [vmem:[%s2375_s6 + $0xcc] sm:$0xf] }
  0x64   : > { %1123 = vmatpush.bf16.msrb.mxu1 %v1586_v8  ;;  %v1765_v61 = vld [vmem:[%s2375_s6 + $0x268] sm:$0xf]  ;;  %v2045_v62 = vld [vmem:[%s2375_s6 + $0x274] sm:$0xf0]  ;;  %v1638_v2 = vor.u32 %v2013_v60, %v1637_v58  ;;  %v1559_v57 = vld [vmem:[%s2375_s6 + $0xd8] sm:$0xf0] }
  0x65   : > { %1136 = vmatpush.bf16.msrb.mxu2 %v1714_v9  ;;  %v1893_v63 = vld [vmem:[%s2375_s6 + $0x368] sm:$0xf]  ;;  %v2077_v0 = vld [vmem:[%s2375_s6 + $0x374] sm:$0xf0]  ;;  %v1766_v3 = vor.u32 %v2045_v62, %v1765_v61  ;;  %v2023_v58 = vld [vmem:[%s2375_s6 + $0x1cc] sm:$0xf] }
  0x66   : > { %1149 = vmatpush.bf16.msrb.mxu3 %v1842_v12  ;;  %1111 = vmatmul.bf16.vlgmr.msrb.gmra.mxu0 %v2488_v14  ;;  %v1493_v4 = vld [vmem:[%s2375_s6 + $0x48] sm:$0xf]  ;;  %v1977_v5 = vld [vmem:[%s2375_s6 + $0x54] sm:$0xf0]  ;;  %v1894_v7 = vor.u32 %v2077_v0, %v1893_v63  ;;  %v1687_v60 = vld [vmem:[%s2375_s6 + $0x1d8] sm:$0xf0] }
  0x67   : > { %1155 = vmatpush.bf16.msra.mxu0 %v1574_v15  ;;  %1124 = vmatmul.bf16.vlgmr.msrb.gmra.mxu1 %v2493_v17  ;;  %v1621_v6 = vld [vmem:[%s2375_s6 + $0x148] sm:$0xf]  ;;  %v2009_v8 = vld [vmem:[%s2375_s6 + $0x154] sm:$0xf0]  ;;  %v1494_v15 = vor.u32 %v1977_v5, %v1493_v4  ;;  %v2055_v61 = vld [vmem:[%s2375_s6 + $0x2cc] sm:$0xf] }
  0x68   : > { %1168 = vmatpush.bf16.msra.mxu1 %v1702_v18  ;;  %1137 = vmatmul.bf16.vlgmr.msrb.gmra.mxu2 %v2486_v13  ;;  %v1749_v9 = vld [vmem:[%s2375_s6 + $0x248] sm:$0xf]  ;;  %v2041_v10 = vld [vmem:[%s2375_s6 + $0x254] sm:$0xf0]  ;;  %v1622_v18 = vor.u32 %v2009_v8, %v1621_v6  ;;  %v1815_v62 = vld [vmem:[%s2375_s6 + $0x2d8] sm:$0xf0] }
  0x69   : > { %1181 = vmatpush.bf16.msra.mxu2 %v1830_v19  ;;  %1150 = vmatmul.bf16.vlgmr.msrb.gmra.mxu3 %v2491_v16  ;;  %v1877_v11 = vld [vmem:[%s2375_s6 + $0x348] sm:$0xf]  ;;  %v2073_v12 = vld [vmem:[%s2375_s6 + $0x354] sm:$0xf0]  ;;  %v1750_v19 = vor.u32 %v2041_v10, %v1749_v9  ;;  %v2087_v63 = vld [vmem:[%s2375_s6 + $0x3cc] sm:$0xf] }
  0x6a   : > { %1194 = vmatpush.bf16.msra.mxu3 %v1958_v23  ;;  %v1477_v20 = vld [vmem:[%s2375_s6 + $0x28] sm:$0xf]  ;;  %v1973_v21 = vld [vmem:[%s2375_s6 + $0x34] sm:$0xf0]  ;;  %v1878_v23 = vor.u32 %v2073_v12, %v1877_v11  ;;  %v1943_v0 = vld [vmem:[%s2375_s6 + $0x3d8] sm:$0xf0] }
  0x6b   : > { %1156 = vmatpush.bf16.msra.mxu0 %v1558_v29  ;;  %v1605_v22 = vld [vmem:[%s2375_s6 + $0x128] sm:$0xf]  ;;  %v2005_v24 = vld [vmem:[%s2375_s6 + $0x134] sm:$0xf0]  ;;  %v1478_v29 = vor.u32 %v1973_v21, %v1477_v20  ;;  %v1987_v4 = vld [vmem:[%s2375_s6 + $0xac] sm:$0xf] }
  0x6c   : > { %1169 = vmatpush.bf16.msra.mxu1 %v1686_v30  ;;  %v1733_v25 = vld [vmem:[%s2375_s6 + $0x228] sm:$0xf]  ;;  %v2037_v26 = vld [vmem:[%s2375_s6 + $0x234] sm:$0xf0]  ;;  %v1606_v32 = vor.u32 %v2005_v24, %v1605_v22  ;;  %v1543_v5 = vld [vmem:[%s2375_s6 + $0xb8] sm:$0xf0] }
  0x6d   : > { %1182 = vmatpush.bf16.msra.mxu2 %v1814_v31  ;;  %v1861_v27 = vld [vmem:[%s2375_s6 + $0x328] sm:$0xf]  ;;  %v2069_v28 = vld [vmem:[%s2375_s6 + $0x334] sm:$0xf0]  ;;  %v1734_v33 = vor.u32 %v2037_v26, %v1733_v25  ;;  %v2019_v6 = vld [vmem:[%s2375_s6 + $0x1ac] sm:$0xf] }
  0x6e   : > { %1195 = vmatpush.bf16.msra.mxu3 %v1942_v35  ;;  %v1461_v30 = vld [vmem:[%s2375_s6 + $0x8] sm:$0xf]  ;;  %v1969_v31 = vld [vmem:[%s2375_s6 + $0x14] sm:$0xf0]  ;;  %v1862_v37 = vor.u32 %v2069_v28, %v1861_v27  ;;  %v1671_v8 = vld [vmem:[%s2375_s6 + $0x1b8] sm:$0xf0] }
  0x6f   : > { %1157 = vmatpush.bf16.msra.mxu0 %v1542_v41  ;;  %v1589_v34 = vld [vmem:[%s2375_s6 + $0x108] sm:$0xf]  ;;  %v2001_v35 = vld [vmem:[%s2375_s6 + $0x114] sm:$0xf0]  ;;  %v1995_v41 = vld [vmem:[%s2375_s6 + $0xec] sm:$0xf]  ;;  %v1462_v44 = vor.u32 %v1969_v31, %v1461_v30 }
  0x70   : > { %1170 = vmatpush.bf16.msra.mxu1 %v1670_v42  ;;  %v1717_v36 = vld [vmem:[%s2375_s6 + $0x208] sm:$0xf]  ;;  %v2033_v38 = vld [vmem:[%s2375_s6 + $0x214] sm:$0xf0]  ;;  %v1575_v42 = vld [vmem:[%s2375_s6 + $0xf8] sm:$0xf0]  ;;  %v1590_v48 = vor.u32 %v2001_v35, %v1589_v34 }
  0x71   : > { %1183 = vmatpush.bf16.msra.mxu2 %v1798_v43  ;;  %v1845_v39 = vld [vmem:[%s2375_s6 + $0x308] sm:$0xf]  ;;  %v2065_v40 = vld [vmem:[%s2375_s6 + $0x314] sm:$0xf0]  ;;  %v2027_v43 = vld [vmem:[%s2375_s6 + $0x1ec] sm:$0xf]  ;;  %v1718_v49 = vor.u32 %v2033_v38, %v1717_v36 }
  0x72   : > { %1196 = vmatpush.bf16.msra.mxu3 %v1926_v47  ;;  %v1831_v47 = vld [vmem:[%s2375_s6 + $0x2f8] sm:$0xf0]  ;;  %v1846_v52 = vor.u32 %v2065_v40, %v1845_v39  ;;  %v2051_v9 = vld [vmem:[%s2375_s6 + $0x2ac] sm:$0xf] }
  0x73   : > { %1158 = vmatpush.bf16.msra.mxu0 %v1526_v53  ;;  %v1578_v53 = vor.u32 %v1995_v41, %v1575_v42  ;;  %v1799_v10 = vld [vmem:[%s2375_s6 + $0x2b8] sm:$0xf0]  ;;  %v2083_v11 = vld [vmem:[%s2375_s6 + $0x3ac] sm:$0xf] }
  0x74   : > { %1171 = vmatpush.bf16.msra.mxu1 %v1654_v54  ;;  %v1706_v54 = vor.u32 %v2027_v43, %v1703_v45  ;;  %v1927_v12 = vld [vmem:[%s2375_s6 + $0x3b8] sm:$0xf0]  ;;  %v1983_v20 = vld [vmem:[%s2375_s6 + $0x8c] sm:$0xf] }
  0x75   : > { %1184 = vmatpush.bf16.msra.mxu2 %v1782_v55  ;;  %v1834_v55 = vor.u32 %v2059_v46, %v1831_v47  ;;  %v1527_v21 = vld [vmem:[%s2375_s6 + $0x98] sm:$0xf0]  ;;  %v2015_v22 = vld [vmem:[%s2375_s6 + $0x18c] sm:$0xf] }
  0x76   : > { %1197 = vmatpush.bf16.msra.mxu3 %v1910_v59  ;;  %v1962_v59 = vor.u32 %v2091_v50, %v1959_v51  ;;  %v1655_v24 = vld [vmem:[%s2375_s6 + $0x198] sm:$0xf0]  ;;  %v2047_v25 = vld [vmem:[%s2375_s6 + $0x28c] sm:$0xf] }
  0x77   : > { %1159 = vmatpush.bf16.msra.mxu0 %v1510_v1  ;;  %v1562_v1 = vor.u32 %v1991_v56, %v1559_v57  ;;  %v1783_v26 = vld [vmem:[%s2375_s6 + $0x298] sm:$0xf0]  ;;  %v2079_v27 = vld [vmem:[%s2375_s6 + $0x38c] sm:$0xf]  ;;  %v1658_v30 = vor.u32 %v2015_v22, %v1655_v24 }
  0x78   : > { %1172 = vmatpush.bf16.msra.mxu1 %v1638_v2  ;;  %v1690_v2 = vor.u32 %v2023_v58, %v1687_v60  ;;  %v1911_v28 = vld [vmem:[%s2375_s6 + $0x398] sm:$0xf0]  ;;  %v1786_v31 = vor.u32 %v2047_v25, %v1783_v26  ;;  %v2011_v34 = vld [vmem:[%s2375_s6 + $0x16c] sm:$0xf] }
  0x79   : > { %1185 = vmatpush.bf16.msra.mxu2 %v1766_v3  ;;  %v1818_v3 = vor.u32 %v2055_v61, %v1815_v62  ;;  %v1914_v35 = vor.u32 %v2079_v27, %v1911_v28  ;;  %v1639_v36 = vld [vmem:[%s2375_s6 + $0x178] sm:$0xf0]  ;;  %v2075_v39 = vld [vmem:[%s2375_s6 + $0x36c] sm:$0xf] }
  0x7a   : > { %1198 = vmatpush.bf16.msra.mxu3 %v1894_v7  ;;  %v1946_v7 = vor.u32 %v2087_v63, %v1943_v0  ;;  %v1767_v38 = vld [vmem:[%s2375_s6 + $0x278] sm:$0xf0]  ;;  %v1642_v42 = vor.u32 %v2011_v34, %v1639_v36  ;;  %v2007_v46 = vld [vmem:[%s2375_s6 + $0x14c] sm:$0xf] }
  0x7b   : > { %1160 = vmatpush.bf16.msra.mxu0 %v1494_v15  ;;  %v1546_v15 = vor.u32 %v1987_v4, %v1543_v5  ;;  %v1895_v40 = vld [vmem:[%s2375_s6 + $0x378] sm:$0xf0]  ;;  %v2071_v51 = vld [vmem:[%s2375_s6 + $0x34c] sm:$0xf] }
  0x7c   : > { %1173 = vmatpush.bf16.msra.mxu1 %v1622_v18  ;;  %v1674_v18 = vor.u32 %v2019_v6, %v1671_v8  ;;  %v1495_v45 = vld [vmem:[%s2375_s6 + $0x58] sm:$0xf0]  ;;  %v1898_v47 = vor.u32 %v2075_v39, %v1895_v40  ;;  %v1971_v56 = vld [vmem:[%s2375_s6 + $0x2c] sm:$0xf] }
  0x7d   : > { %1186 = vmatpush.bf16.msra.mxu2 %v1750_v19  ;;  %v1802_v19 = vor.u32 %v2051_v9, %v1799_v10  ;;  %v1751_v50 = vld [vmem:[%s2375_s6 + $0x258] sm:$0xf0]  ;;  %v2003_v58 = vld [vmem:[%s2375_s6 + $0x12c] sm:$0xf] }
  0x7e   : > { %1199 = vmatpush.bf16.msra.mxu3 %v1878_v23  ;;  %v1930_v23 = vor.u32 %v2083_v11, %v1927_v12  ;;  %v1479_v57 = vld [vmem:[%s2375_s6 + $0x38] sm:$0xf0]  ;;  %v2035_v61 = vld [vmem:[%s2375_s6 + $0x22c] sm:$0xf] }
  0x7f   : > { %1161 = vmatpush.bf16.msra.mxu0 %v1478_v29  ;;  %v1530_v29 = vor.u32 %v1983_v20, %v1527_v21  ;;  %v1607_v60 = vld [vmem:[%s2375_s6 + $0x138] sm:$0xf0]  ;;  %v2067_v63 = vld [vmem:[%s2375_s6 + $0x32c] sm:$0xf] }
  0x80   : > { %1174 = vmatpush.bf16.msra.mxu1 %v1606_v32  ;;  %v1979_v32 = vld [vmem:[%s2375_s6 + $0x6c] sm:$0xf]  ;;  %v1735_v62 = vld [vmem:[%s2375_s6 + $0x238] sm:$0xf0] }
  0x81   : > { %1187 = vmatpush.bf16.msra.mxu2 %v1734_v33  ;;  %v1511_v33 = vld [vmem:[%s2375_s6 + $0x78] sm:$0xf0]  ;;  %v1967_v4 = vld [vmem:[%s2375_s6 + $0xc] sm:$0xf] }
  0x82   : > { %1200 = vmatpush.bf16.msra.mxu3 %v1862_v37  ;;  %v2043_v37 = vld [vmem:[%s2375_s6 + $0x26c] sm:$0xf]  ;;  %v1514_v41 = vor.u32 %v1979_v32, %v1511_v33  ;;  %v1863_v0 = vld [vmem:[%s2375_s6 + $0x338] sm:$0xf0] }
  0x83   : > { %1162 = vmatpush.bf16.msra.mxu0 %v1462_v44  ;;  %v1770_v43 = vor.u32 %v2043_v37, %v1767_v38  ;;  %v1975_v44 = vld [vmem:[%s2375_s6 + $0x4c] sm:$0xf]  ;;  %v1463_v5 = vld [vmem:[%s2375_s6 + $0x18] sm:$0xf0] }
  0x84   : > { %1175 = vmatpush.bf16.msra.mxu1 %v1590_v48  ;;  %v1623_v48 = vld [vmem:[%s2375_s6 + $0x158] sm:$0xf0]  ;;  %v1999_v6 = vld [vmem:[%s2375_s6 + $0x10c] sm:$0xf] }
  0x85   : > { %1188 = vmatpush.bf16.msra.mxu2 %v1718_v49  ;;  %v2039_v49 = vld [vmem:[%s2375_s6 + $0x24c] sm:$0xf]  ;;  %v1591_v8 = vld [vmem:[%s2375_s6 + $0x118] sm:$0xf0] }
  0x86   : > { %1201 = vmatpush.bf16.msra.mxu3 %v1846_v52  ;;  %1163 = vmatmul.bf16.vlgmr.msra.gmra.mxu0 %v2488_v14  ;;  %v1879_v52 = vld [vmem:[%s2375_s6 + $0x358] sm:$0xf0]  ;;  %v2031_v9 = vld [vmem:[%s2375_s6 + $0x20c] sm:$0xf] }
  0x87   : > { %1207 = vmatpush.bf16.msrb.mxu0 %v1578_v53  ;;  %1176 = vmatmul.bf16.vlgmr.msra.gmra.mxu1 %v2493_v17  ;;  %v1498_v53 = vor.u32 %v1975_v44, %v1495_v45  ;;  %v1719_v10 = vld [vmem:[%s2375_s6 + $0x218] sm:$0xf0]  ;;  %v2063_v11 = vld [vmem:[%s2375_s6 + $0x30c] sm:$0xf]  ;;  %v1303_v45 = vld [vmem:[%s2381_s10] sm:$0xf] }
  0x88   : > { %1220 = vmatpush.bf16.msrb.mxu1 %v1706_v54  ;;  %1189 = vmatmul.bf16.vlgmr.msra.gmra.mxu2 %v2486_v13  ;;  %v1626_v54 = vor.u32 %v2007_v46, %v1623_v48  ;;  %v1847_v12 = vld [vmem:[%s2375_s6 + $0x318] sm:$0xf0]  ;;  %v1306_v48 = vperm.slane %v1303_v45, 1 }
  0x89   : > { %1233 = vmatpush.bf16.msrb.mxu2 %v1834_v55  ;;  %1202 = vmatmul.bf16.vlgmr.msra.gmra.mxu3 %v2491_v16  ;;  %v1754_v55 = vor.u32 %v2039_v49, %v1751_v50  ;;  %v1850_v20 = vor.u32 %v2063_v11, %v1847_v12 }
  0x8a   : > { %1246 = vmatpush.bf16.msrb.mxu3 %v1962_v59  ;;  %v1882_v59 = vor.u32 %v2071_v51, %v1879_v52  ;;  %v1307_v51 = vperm.slane %v1303_v45, 2  ;;  %v1308_v52 = vperm.slane %v1303_v45, 3 }
  0x8b   : > { %1208 = vmatpush.bf16.msrb.mxu0 %v1562_v1  ;;  %v1482_v1 = vor.u32 %v1971_v56, %v1479_v57  ;;  %v1309_v56 = vrot.slane %v1306_v48, 6 }
  0x8c   : > { %1221 = vmatpush.bf16.msrb.mxu1 %v1690_v2  ;;  %v1610_v2 = vor.u32 %v2003_v58, %v1607_v60  ;;  %v1310_v58 = vrot.slane %v1307_v51, 4 }
  0x8d   : > { %1234 = vmatpush.bf16.msrb.mxu2 %v1818_v3  ;;  %v1738_v3 = vor.u32 %v2035_v61, %v1735_v62 }
  0x8e   : > { %1247 = vmatpush.bf16.msrb.mxu3 %v1946_v7  ;;  %v1866_v7 = vor.u32 %v2067_v63, %v1863_v0 }
  0x8f   : > { %1209 = vmatpush.bf16.msrb.mxu0 %v1546_v15  ;;  %v1466_v15 = vor.u32 %v1967_v4, %v1463_v5 }
  0x90   : > { %1222 = vmatpush.bf16.msrb.mxu1 %v1674_v18  ;;  %v1594_v18 = vor.u32 %v1999_v6, %v1591_v8 }
  0x91   : > { %1235 = vmatpush.bf16.msrb.mxu2 %v1802_v19  ;;  %v1722_v19 = vor.u32 %v2031_v9, %v1719_v10 }
  0x92   : > { %1248 = vmatpush.bf16.msrb.mxu3 %v1930_v23 }
  0x93   : > { %1210 = vmatpush.bf16.msrb.mxu0 %v1530_v29 }
  0x94   : > { %1223 = vmatpush.bf16.msrb.mxu1 %v1658_v30 }
  0x95   : > { %1236 = vmatpush.bf16.msrb.mxu2 %v1786_v31 }
  0x96   : > { %1249 = vmatpush.bf16.msrb.mxu3 %v1914_v35 }
  0x97   : > { %1211 = vmatpush.bf16.msrb.mxu0 %v1514_v41 }
  0x98   : > { %1224 = vmatpush.bf16.msrb.mxu1 %v1642_v42 }
  0x99   : > { %1237 = vmatpush.bf16.msrb.mxu2 %v1770_v43 }
  0x9a   : > { %1250 = vmatpush.bf16.msrb.mxu3 %v1898_v47 }
  0x9b   : > { %1212 = vmatpush.bf16.msrb.mxu0 %v1498_v53 }
  0x9c   : > { %1225 = vmatpush.bf16.msrb.mxu1 %v1626_v54 }
  0x9d   : > { %1238 = vmatpush.bf16.msrb.mxu2 %v1754_v55  ;;  %v1305_v55 = vperm.slane %v1303_v45, 0 }
  0x9e   : > { %1251 = vmatpush.bf16.msrb.mxu3 %v1882_v59  ;;  %v1311_v59 = vrot.slane %v1308_v52, 2 }
  0x9f   : > { %1213 = vmatpush.bf16.msrb.mxu0 %v1482_v1  ;;  %v1313_v1 = vsel %vm1270_vm1, %v1305_v55, %v1309_v56 }
  0xa0   : > { %1226 = vmatpush.bf16.msrb.mxu1 %v1610_v2  ;;  %v1315_v5 = vsel %vm1272_vm0, %v1310_v58, %v1311_v59 }
  0xa1   : > { %1239 = vmatpush.bf16.msrb.mxu2 %v1738_v3  ;;  %v1317_v8 = vsel %vm1274_vm2, %v1313_v1, %v1315_v5 }
  0xa2   : > { %1252 = vmatpush.bf16.msrb.mxu3 %v1866_v7 }
  0xa3   : > { %1214 = vmatpush.bf16.msrb.mxu0 %v1466_v15 }
  0xa4   : > { %1227 = vmatpush.bf16.msrb.mxu1 %v1594_v18 }
  0xa5   : > { %1240 = vmatpush.bf16.msrb.mxu2 %v1722_v19 }
  0xa6   : > { %1253 = vmatpush.bf16.msrb.mxu3 %v1850_v20  ;;  %1215 = vmatmul.bf16.vlgmr.msrb.gmra.mxu0 %v2488_v14 }
  0xa7   : > { %1228 = vmatmul.bf16.vlgmr.msrb.gmra.mxu1 %v2493_v17 }
  0xa8   : > { %1241 = vmatmul.bf16.vlgmr.msrb.gmra.mxu2 %v2486_v13 }
  0xa9   : > { %1254 = vmatmul.bf16.vlgmr.msrb.gmra.mxu3 %v2491_v16 }
  0xc6   : > { %v1060_v21 = vpop.f32.mrf.mxu0 }
  0xc8   : > { %v1073_v22 = vpop.f32.mrf.mxu1 }
  0xc9   : > { %v1074_v23 = vadd.f32 %v1073_v22, %v1060_v21 }
  0xcb   : > { %v1086_v24 = vpop.f32.mrf.mxu2 }
  0xcc   : > { %v1087_v25 = vadd.f32 %v1086_v24, %v1074_v23 }
  0xce   : > { %v1062_v28 = vpop.f32.mrf.mxu0 }
  0xcf   : > { %v1099_v26 = vpop.f32.mrf.mxu3 }
  0xd0   : > { %v1100_v27 = vadd.f32 %v1099_v26, %v1087_v25  ;;  %v1075_v29 = vpop.f32.mrf.mxu1 }
  0xd3   : > { %v1088_v30 = vpop.f32.mrf.mxu2 }
  0xd7   : > { %v1101_v31 = vpop.f32.mrf.mxu3 }
  0xe3   : > { %v1112_v32 = vpop.f32.mrf.mxu0 }
  0xe4   : > { %v1125_v33 = vpop.f32.mrf.mxu1 }
  0xe5   : > { %v1126_v44 = vadd.f32 %v1125_v33, %v1112_v32 }
  0xeb   : > { %v1138_v14 = vpop.f32.mrf.mxu2  ;;  %v1114_v34 = vpop.f32.mrf.mxu0 }
  0xec   : > { %v1151_v17 = vpop.f32.mrf.mxu3  ;;  %v1127_v13 = vpop.f32.mrf.mxu1  ;;  %v1139_v50 = vadd.f32 %v1138_v14, %v1126_v44 }
  0xee   : > { %v1152_v57 = vadd.f32 %v1151_v17, %v1139_v50 }
  0xf0   : > { %v1267_v3 = vrot.slane %v1152_v57, 6 }
  0xf2   : > { %v1271_v9 = vsel %vm1270_vm1, %v1100_v27, %v1267_v3 }
  0xf3   : > { %v1140_v35 = vpop.f32.mrf.mxu2 }
  0xf4   : > { %v1153_v16 = vpop.f32.mrf.mxu3 }
 0x103   : > { %v1164_v36 = vpop.f32.mrf.mxu0 }
 0x104   : > { %v1177_v37 = vpop.f32.mrf.mxu1 }
 0x105   : > { %v1178_v46 = vadd.f32 %v1177_v37, %v1164_v36 }
 0x10b   : > { %v1190_v38 = vpop.f32.mrf.mxu2  ;;  %v1166_v40 = vpop.f32.mrf.mxu0 }
 0x10c   : > { %v1203_v39 = vpop.f32.mrf.mxu3  ;;  %v1179_v41 = vpop.f32.mrf.mxu1  ;;  %v1191_v53 = vadd.f32 %v1190_v38, %v1178_v46 }
 0x10e   : > { %v1204_v61 = vadd.f32 %v1203_v39, %v1191_v53 }
 0x110   : > { %v1268_v6 = vrot.slane %v1204_v61, 4 }
 0x113   : > { %v1192_v42 = vpop.f32.mrf.mxu2 }
 0x114   : > { %v1205_v43 = vpop.f32.mrf.mxu3 }
 0x123   : > { %v1216_v47 = vpop.f32.mrf.mxu0 }
 0x124   : > { %v1229_v49 = vpop.f32.mrf.mxu1 }
 0x125   : > { %v1230_v54 = vadd.f32 %v1229_v49, %v1216_v47 }
 0x12b   : > { %v1242_v60 = vpop.f32.mrf.mxu2  ;;  %v1218_v0 = vpop.f32.mrf.mxu0 }
 0x12c   : > { %v1243_v62 = vadd.f32 %v1242_v60, %v1230_v54  ;;  %v1255_v63 = vpop.f32.mrf.mxu3  ;;  %v1231_v2 = vpop.f32.mrf.mxu1 }
 0x12e   : > { %v1256_v4 = vadd.f32 %v1255_v63, %v1243_v62 }
 0x130   : > { %v1269_v7 = vrot.slane %v1256_v4, 2 }
 0x132   : > { %v1273_v10 = vsel %vm1272_vm0, %v1268_v6, %v1269_v7 }
 0x133   : > { %v1275_v11 = vsel %vm1274_vm2, %v1271_v9, %v1273_v10  ;;  %v1244_v12 = vpop.f32.mrf.mxu2 }
 0x134   : > { %v1319_v15 = vadd.f32 %v1317_v8, %v1275_v11  ;;  %v1257_v18 = vpop.f32.mrf.mxu3 }
 0x136   : > { %v1320_v19 = vmax.f32 %v1319_v15, 0.0 }
 0x138   : > { %1321 = vst [vmem:[%s270_s18] sm:$0xff] %v1320_v19 }
 0x139 PF: > { %s19_s17 = sadd.s32 1, %s2271_s17   ;;  %s2702_s12 = smov %s2255_s13 }
 0x13a   : > { %p16_p0 = scmp.ge.s32.totalorder %s19_s17, 10   ;;  %s2703_s13 = smov %s2259_s14 }
 0x13b   : > { %s2704_s14 = smov %s2345_s24  ;;  %s2705_s15 = smov %s2267_s16 }
 0x13c   : > { %s2706_s16 = smov %s2708_s19  ;;  %18 = sbr.rel (!%p16_p0) target bundleno = 6 (0x6), region = 100 }
 0x141   :  { %1344 = vsyncpa [#allocation3], 1 }
 0x142   :  { %1346 = vsyncpa [#allocation3 + $0x1], 1 }
 0x143   :  { %1347 = vsyncpa [#allocation5], 1 }
 0x144   :  { %1349 = vsyncpa [#allocation5 + $0x1], 1 }

// kernel: vgg_classifier_forward.5
= control target key start
LH: loop header
LB: loop body
LE: loop exit
PB: predicated region body
PF: predicated region fallthrough
CT: control target
= control target key end

     0   :  { %8 = vsyncpa [#allocation3], 0  ;;  %s4038_s0 = inlined_call_operand.vmem [shape: bf16[2,4096], index: 0, kind: input, shape index: {}]   ;;  %s4039_s1 = inlined_call_operand.hbm [shape: bf16[4096,128], index: 1, kind: input, shape index: {}]   ;;  %s4040_s2 = inlined_call_operand.hbm [shape: f32[1,128], index: 2, kind: input, shape index: {}]   ;;  %s4041_s3 = inlined_call_operand.hbm [shape: f32[2,128], index: 3, kind: output, shape index: {}]  }
   0x1   :  { %9 = vsyncpa [#allocation6], 0 }
   0x2   :  { %10 = vsyncpa [#allocation4], 0  ;;  %s17_s14 = sshll.u32 %s4039_s1, 4  ;;  %s3989_s15 = smov [#allocation2]   ;;  %s18_s14 = int_to_ptr.hbm [resolvable:$true] %s17_s14 }
   0x3   :  { %s19_s16 = sshll.u32 %s3989_s15, 4  ;;  %s31_s19 = sshll.u32 %s4040_s2, 4  ;;  %s20_s16 = int_to_ptr.vmem [resolvable:$true] %s19_s16  ;;  %s32_s19 = int_to_ptr.hbm [resolvable:$true] %s31_s19 }
   0x4   :  { %s3990_s20 = smov 64   ;;  %s3991_s21 = smov 4  }
   0x5   :  { %25 = dma.hbm_to_vmem [thread:$0]  %s18_s14, 32768, %s20_s16, [#allocation3], %s3990_s20, %s3990_s20, %s3991_s21  }
   0x6   :  { %s3992_s22 = smov [#allocation5]  }
   0x7   :  { %s33_s23 = sshll.u32 %s3992_s22, 4  ;;  %s34_s23 = int_to_ptr.vmem [resolvable:$true] %s33_s23 }
   0x8   :  { %36 = dma.hbm_to_vmem [thread:$0]  %s32_s19, 16, %s34_s23, [#allocation6]  }
   0x9   :  { %3983 = dma.done.wait [#allocation3], 32768  }
   0xa   :  { %3984 = vsyncadd [#allocation3], 4294934528 }
   0xb   :  { %3985 = dma.done.wait [#allocation6], 16  }
   0xc   :  { %3986 = vsyncadd [#allocation6], 4294967280  ;;  %v3656_v0 = vld [vmem:[#allocation2 + $0x38] sm:$0xff]  ;;  %v3655_v4 = vld [vmem:[#allocation2 + $0x30] sm:$0xff]  ;;  %s2614_s6 = sshll.u32 %s4041_s3, 4  ;;  %s2615_s6 = int_to_ptr.hbm [resolvable:$true] %s2614_s6 }
   0xd   :  { %v3664_v1 = vld [vmem:[#allocation2 + $0x78] sm:$0xff]  ;;  %2169 = vmatpush.bf16.msra.mxu0 %v3656_v0  ;;  %v3663_v5 = vld [vmem:[#allocation2 + $0x70] sm:$0xff]  ;;  %v3654_v8 = vld [vmem:[#allocation2 + $0x28] sm:$0xff] }
   0xe   :  { %v3672_v2 = vld [vmem:[#allocation2 + $0xb8] sm:$0xff]  ;;  %2182 = vmatpush.bf16.msra.mxu1 %v3664_v1  ;;  %v3671_v6 = vld [vmem:[#allocation2 + $0xb0] sm:$0xff]  ;;  %v3662_v9 = vld [vmem:[#allocation2 + $0x68] sm:$0xff] }
   0xf   :  { %v3680_v3 = vld [vmem:[#allocation2 + $0xf8] sm:$0xff]  ;;  %2195 = vmatpush.bf16.msra.mxu2 %v3672_v2  ;;  %v3679_v7 = vld [vmem:[#allocation2 + $0xf0] sm:$0xff]  ;;  %v3670_v10 = vld [vmem:[#allocation2 + $0xa8] sm:$0xff] }
  0x10   :  { %2208 = vmatpush.bf16.msra.mxu3 %v3680_v3  ;;  %v3678_v11 = vld [vmem:[#allocation2 + $0xe8] sm:$0xff]  ;;  %v3653_v12 = vld [vmem:[#allocation2 + $0x20] sm:$0xff]  ;;  %v3652_v16 = vld [vmem:[#allocation2 + $0x18] sm:$0xff] }
  0x11   :  { %2170 = vmatpush.bf16.msra.mxu0 %v3655_v4  ;;  %v3661_v13 = vld [vmem:[#allocation2 + $0x60] sm:$0xff]  ;;  %v3660_v17 = vld [vmem:[#allocation2 + $0x58] sm:$0xff]  ;;  %v3651_v21 = vld [vmem:[#allocation2 + $0x10] sm:$0xff] }
  0x12   :  { %2183 = vmatpush.bf16.msra.mxu1 %v3663_v5  ;;  %v3669_v14 = vld [vmem:[#allocation2 + $0xa0] sm:$0xff]  ;;  %v3668_v18 = vld [vmem:[#allocation2 + $0x98] sm:$0xff]  ;;  %v3659_v22 = vld [vmem:[#allocation2 + $0x50] sm:$0xff] }
  0x13   :  { %2196 = vmatpush.bf16.msra.mxu2 %v3671_v6  ;;  %v3677_v15 = vld [vmem:[#allocation2 + $0xe0] sm:$0xff]  ;;  %v3676_v19 = vld [vmem:[#allocation2 + $0xd8] sm:$0xff]  ;;  %v3667_v23 = vld [vmem:[#allocation2 + $0x90] sm:$0xff] }
  0x14   :  { %2209 = vmatpush.bf16.msra.mxu3 %v3679_v7  ;;  %v45_v20 = vld [vmem:[%s4038_s0] sm:$0xff]  ;;  %v3675_v24 = vld [vmem:[#allocation2 + $0xd0] sm:$0xff]  ;;  %v3650_v25 = vld [vmem:[#allocation2 + $0x8] sm:$0xff] }
  0x15   :  { %2171 = vmatpush.bf16.msra.mxu0 %v3654_v8  ;;  %562 = vst [vmem:[#allocation1] ss:$9 sm:$0xff] %v45_v20  ;;  %v3658_v26 = vld [vmem:[#allocation2 + $0x48] sm:$0xff]  ;;  %v3649_v29 = vld [vmem:[#allocation2] sm:$0xff]  ;;  %v3688_v33 = vld [vmem:[#allocation2 + $0x138] sm:$0xff] }
  0x16   :  { %2184 = vmatpush.bf16.msra.mxu1 %v3662_v9  ;;  %v3666_v27 = vld [vmem:[#allocation2 + $0x88] sm:$0xff]  ;;  %v3657_v30 = vld [vmem:[#allocation2 + $0x40] sm:$0xff]  ;;  %v3696_v34 = vld [vmem:[#allocation2 + $0x178] sm:$0xff] }
  0x17   :  { %2197 = vmatpush.bf16.msra.mxu2 %v3670_v10  ;;  %v3674_v28 = vld [vmem:[#allocation2 + $0xc8] sm:$0xff]  ;;  %v3665_v31 = vld [vmem:[#allocation2 + $0x80] sm:$0xff]  ;;  %v3704_v35 = vld [vmem:[#allocation2 + $0x1b8] sm:$0xff] }
  0x18   :  { %2210 = vmatpush.bf16.msra.mxu3 %v3678_v11  ;;  %v3673_v32 = vld [vmem:[#allocation2 + $0xc0] sm:$0xff]  ;;  %v3712_v36 = vld [vmem:[#allocation2 + $0x1f8] sm:$0xff]  ;;  %v3687_v37 = vld [vmem:[#allocation2 + $0x130] sm:$0xff] }
  0x19   :  { %2172 = vmatpush.bf16.msra.mxu0 %v3653_v12  ;;  %v3695_v40 = vld [vmem:[#allocation2 + $0x170] sm:$0xff]  ;;  %v3686_v45 = vld [vmem:[#allocation2 + $0x128] sm:$0xff]  ;;  %v46_v52 = vld [vmem:[%s4038_s0 + $0x8] sm:$0xff] }
  0x1a   :  { %2185 = vmatpush.bf16.msra.mxu1 %v3661_v13  ;;  %v3703_v43 = vld [vmem:[#allocation2 + $0x1b0] sm:$0xff]  ;;  %v3694_v46 = vld [vmem:[#allocation2 + $0x168] sm:$0xff]  ;;  %v3685_v54 = vld [vmem:[#allocation2 + $0x120] sm:$0xff] }
  0x1b   :  { %2198 = vmatpush.bf16.msra.mxu2 %v3669_v14  ;;  %v3711_v44 = vld [vmem:[#allocation2 + $0x1f0] sm:$0xff]  ;;  %v3702_v47 = vld [vmem:[#allocation2 + $0x1a8] sm:$0xff]  ;;  %v3693_v55 = vld [vmem:[#allocation2 + $0x160] sm:$0xff] }
  0x1c   :  { %2211 = vmatpush.bf16.msra.mxu3 %v3677_v15  ;;  %v565_v38 = vld [vmem:[#allocation1 + $0x12] sm:$0xff]  ;;  %v563_v39 = vld [vmem:[#allocation1] sm:$0xff]  ;;  %v564_v42 = vld [vmem:[#allocation1 + $0x9] sm:$0xff] }
  0x1d   :  { %2173 = vmatpush.bf16.msra.mxu0 %v3652_v16  ;;  %v566_v41 = vld [vmem:[#allocation1 + $0x1b] sm:$0xff]  ;;  %v3710_v48 = vld [vmem:[#allocation2 + $0x1e8] sm:$0xff]  ;;  %v567_v50 = vld [vmem:[#allocation1 + $0x24] sm:$0xff] }
  0x1e   :  { %2186 = vmatpush.bf16.msra.mxu1 %v3660_v17  ;;  %v569_v49 = vld [vmem:[#allocation1 + $0x36] sm:$0xff]  ;;  %v570_v51 = vld [vmem:[#allocation1 + $0x3f] sm:$0xff]  ;;  %v568_v53 = vld [vmem:[#allocation1 + $0x2d] sm:$0xff] }
  0x1f   :  { %2199 = vmatpush.bf16.msra.mxu2 %v3668_v18  ;;  %572 = vst [vmem:[#allocation1] ss:$9 sm:$0xff] %v46_v52  ;;  %v3701_v56 = vld [vmem:[#allocation2 + $0x1a0] sm:$0xff]  ;;  %v3684_v58 = vld [vmem:[#allocation2 + $0x118] sm:$0xff]  ;;  %v3683_v62 = vld [vmem:[#allocation2 + $0x110] sm:$0xff] }
  0x20   :  { %2212 = vmatpush.bf16.msra.mxu3 %v3676_v19  ;;  %v3709_v57 = vld [vmem:[#allocation2 + $0x1e0] sm:$0xff]  ;;  %v3692_v59 = vld [vmem:[#allocation2 + $0x158] sm:$0xff]  ;;  %v3691_v63 = vld [vmem:[#allocation2 + $0x150] sm:$0xff] }
  0x21   :  { %2174 = vmatpush.bf16.msra.mxu0 %v3651_v21  ;;  %v3700_v60 = vld [vmem:[#allocation2 + $0x198] sm:$0xff]  ;;  %v3699_v0 = vld [vmem:[#allocation2 + $0x190] sm:$0xff]  ;;  %v3682_v2 = vld [vmem:[#allocation2 + $0x108] sm:$0xff] }
  0x22   :  { %2187 = vmatpush.bf16.msra.mxu1 %v3659_v22  ;;  %v3708_v61 = vld [vmem:[#allocation2 + $0x1d8] sm:$0xff]  ;;  %v3707_v1 = vld [vmem:[#allocation2 + $0x1d0] sm:$0xff]  ;;  %v3690_v3 = vld [vmem:[#allocation2 + $0x148] sm:$0xff] }
  0x23   :  { %2200 = vmatpush.bf16.msra.mxu2 %v3667_v23  ;;  %v3698_v4 = vld [vmem:[#allocation2 + $0x188] sm:$0xff]  ;;  %v3681_v6 = vld [vmem:[#allocation2 + $0x100] sm:$0xff]  ;;  %v3720_v10 = vld [vmem:[#allocation2 + $0x238] sm:$0xff] }
  0x24   :  { %2213 = vmatpush.bf16.msra.mxu3 %v3675_v24  ;;  %v3706_v5 = vld [vmem:[#allocation2 + $0x1c8] sm:$0xff]  ;;  %v3689_v7 = vld [vmem:[#allocation2 + $0x140] sm:$0xff]  ;;  %v3728_v11 = vld [vmem:[#allocation2 + $0x278] sm:$0xff] }
  0x25   :  { %2175 = vmatpush.bf16.msra.mxu0 %v3650_v25  ;;  %v3697_v8 = vld [vmem:[#allocation2 + $0x180] sm:$0xff]  ;;  %v3736_v12 = vld [vmem:[#allocation2 + $0x2b8] sm:$0xff]  ;;  %v3719_v14 = vld [vmem:[#allocation2 + $0x230] sm:$0xff] }
  0x26   :  { %2188 = vmatpush.bf16.msra.mxu1 %v3658_v26  ;;  %v3705_v9 = vld [vmem:[#allocation2 + $0x1c0] sm:$0xff]  ;;  %v3744_v13 = vld [vmem:[#allocation2 + $0x2f8] sm:$0xff]  ;;  %v3727_v15 = vld [vmem:[#allocation2 + $0x270] sm:$0xff] }
  0x27   :  { %2201 = vmatpush.bf16.msra.mxu2 %v3666_v27  ;;  %v3735_v16 = vld [vmem:[#allocation2 + $0x2b0] sm:$0xff]  ;;  %v3718_v18 = vld [vmem:[#allocation2 + $0x228] sm:$0xff]  ;;  %v3717_v22 = vld [vmem:[#allocation2 + $0x220] sm:$0xff] }
  0x28   :  { %2214 = vmatpush.bf16.msra.mxu3 %v3674_v28  ;;  %v3743_v17 = vld [vmem:[#allocation2 + $0x2f0] sm:$0xff]  ;;  %v3726_v19 = vld [vmem:[#allocation2 + $0x268] sm:$0xff]  ;;  %v3725_v23 = vld [vmem:[#allocation2 + $0x260] sm:$0xff] }
  0x29   :  { %2176 = vmatpush.bf16.msra.mxu0 %v3649_v29  ;;  %v3734_v20 = vld [vmem:[#allocation2 + $0x2a8] sm:$0xff]  ;;  %v3733_v24 = vld [vmem:[#allocation2 + $0x2a0] sm:$0xff]  ;;  %v3716_v26 = vld [vmem:[#allocation2 + $0x218] sm:$0xff] }
  0x2a   :  { %2189 = vmatpush.bf16.msra.mxu1 %v3657_v30  ;;  %v3742_v21 = vld [vmem:[#allocation2 + $0x2e8] sm:$0xff]  ;;  %v3741_v25 = vld [vmem:[#allocation2 + $0x2e0] sm:$0xff]  ;;  %v3724_v27 = vld [vmem:[#allocation2 + $0x258] sm:$0xff] }
  0x2b   :  { %2202 = vmatpush.bf16.msra.mxu2 %v3665_v31  ;;  %v3732_v28 = vld [vmem:[#allocation2 + $0x298] sm:$0xff]  ;;  %v3715_v30 = vld [vmem:[#allocation2 + $0x210] sm:$0xff] }
  0x2c   :  { %2215 = vmatpush.bf16.msra.mxu3 %v3673_v32  ;;  %2177 = vmatmul.bf16.vlgmr.msra.gmra.mxu0 %v563_v39  ;;  %v3740_v29 = vld [vmem:[#allocation2 + $0x2d8] sm:$0xff]  ;;  %v3723_v31 = vld [vmem:[#allocation2 + $0x250] sm:$0xff]  ;;  %v3721_v39 = vld [vmem:[#allocation2 + $0x240] sm:$0xff] }
  0x2d   :  { %2221 = vmatpush.bf16.msrb.mxu0 %v3688_v33  ;;  %2190 = vmatmul.bf16.vlgmr.msra.gmra.mxu1 %v564_v42  ;;  %v3731_v32 = vld [vmem:[#allocation2 + $0x290] sm:$0xff]  ;;  %v3752_v42 = vld [vmem:[#allocation2 + $0x338] sm:$0xff] }
  0x2e   :  { %2234 = vmatpush.bf16.msrb.mxu1 %v3696_v34  ;;  %2203 = vmatmul.bf16.vlgmr.msra.gmra.mxu2 %v565_v38  ;;  %v3739_v33 = vld [vmem:[#allocation2 + $0x2d0] sm:$0xff]  ;;  %v3714_v34 = vld [vmem:[#allocation2 + $0x208] sm:$0xff]  ;;  %v3713_v38 = vld [vmem:[#allocation2 + $0x200] sm:$0xff] }
  0x2f   :  { %2247 = vmatpush.bf16.msrb.mxu2 %v3704_v35  ;;  %2216 = vmatmul.bf16.vlgmr.msra.gmra.mxu3 %v566_v41  ;;  %v3722_v35 = vld [vmem:[#allocation2 + $0x248] sm:$0xff]  ;;  %v3737_v41 = vld [vmem:[#allocation2 + $0x2c0] sm:$0xff]  ;;  %v3767_v52 = vld [vmem:[#allocation2 + $0x3b0] sm:$0xff] }
  0x30   :  { %2260 = vmatpush.bf16.msrb.mxu3 %v3712_v36  ;;  %v3730_v36 = vld [vmem:[#allocation2 + $0x288] sm:$0xff] }
  0x31   :  { %2222 = vmatpush.bf16.msrb.mxu0 %v3687_v37  ;;  %v3738_v37 = vld [vmem:[#allocation2 + $0x2c8] sm:$0xff] }
  0x32   :  { %2235 = vmatpush.bf16.msrb.mxu1 %v3695_v40  ;;  %v3729_v40 = vld [vmem:[#allocation2 + $0x280] sm:$0xff] }
  0x33   :  { %2248 = vmatpush.bf16.msrb.mxu2 %v3703_v43  ;;  %v3760_v43 = vld [vmem:[#allocation2 + $0x378] sm:$0xff] }
  0x34   :  { %2261 = vmatpush.bf16.msrb.mxu3 %v3711_v44  ;;  %v3768_v44 = vld [vmem:[#allocation2 + $0x3b8] sm:$0xff] }
  0x35   :  { %2223 = vmatpush.bf16.msrb.mxu0 %v3686_v45  ;;  %v3776_v45 = vld [vmem:[#allocation2 + $0x3f8] sm:$0xff] }
  0x36   :  { %2236 = vmatpush.bf16.msrb.mxu1 %v3694_v46  ;;  %v573_v46 = vld [vmem:[#allocation1] sm:$0xff] }
  0x37   :  { %2249 = vmatpush.bf16.msrb.mxu2 %v3702_v47  ;;  %v575_v47 = vld [vmem:[#allocation1 + $0x12] sm:$0xff] }
  0x38   :  { %2262 = vmatpush.bf16.msrb.mxu3 %v3710_v48  ;;  %v574_v48 = vld [vmem:[#allocation1 + $0x9] sm:$0xff] }
  0x39   :  { %2224 = vmatpush.bf16.msrb.mxu0 %v3685_v54  ;;  %v3750_v54 = vld [vmem:[#allocation2 + $0x328] sm:$0xff] }
  0x3a   :  { %2237 = vmatpush.bf16.msrb.mxu1 %v3693_v55  ;;  %v3758_v55 = vld [vmem:[#allocation2 + $0x368] sm:$0xff] }
  0x3b   :  { %2250 = vmatpush.bf16.msrb.mxu2 %v3701_v56  ;;  %v3766_v56 = vld [vmem:[#allocation2 + $0x3a8] sm:$0xff] }
  0x3c   :  { %2263 = vmatpush.bf16.msrb.mxu3 %v3709_v57  ;;  %v3774_v57 = vld [vmem:[#allocation2 + $0x3e8] sm:$0xff] }
  0x3d   :  { %2225 = vmatpush.bf16.msrb.mxu0 %v3684_v58  ;;  %v3749_v58 = vld [vmem:[#allocation2 + $0x320] sm:$0xff] }
  0x3e   :  { %2238 = vmatpush.bf16.msrb.mxu1 %v3692_v59  ;;  %v3757_v59 = vld [vmem:[#allocation2 + $0x360] sm:$0xff] }
  0x3f   :  { %2251 = vmatpush.bf16.msrb.mxu2 %v3700_v60  ;;  %v3765_v60 = vld [vmem:[#allocation2 + $0x3a0] sm:$0xff] }
  0x40   :  { %2264 = vmatpush.bf16.msrb.mxu3 %v3708_v61  ;;  %v3773_v61 = vld [vmem:[#allocation2 + $0x3e0] sm:$0xff] }
  0x41   :  { %2226 = vmatpush.bf16.msrb.mxu0 %v3683_v62  ;;  %v3748_v62 = vld [vmem:[#allocation2 + $0x318] sm:$0xff] }
  0x42   :  { %2239 = vmatpush.bf16.msrb.mxu1 %v3691_v63  ;;  %v3756_v63 = vld [vmem:[#allocation2 + $0x358] sm:$0xff] }
  0x43   :  { %2252 = vmatpush.bf16.msrb.mxu2 %v3699_v0  ;;  %v3764_v0 = vld [vmem:[#allocation2 + $0x398] sm:$0xff] }
  0x44   :  { %2265 = vmatpush.bf16.msrb.mxu3 %v3707_v1  ;;  %v3772_v1 = vld [vmem:[#allocation2 + $0x3d8] sm:$0xff] }
  0x45   :  { %2227 = vmatpush.bf16.msrb.mxu0 %v3682_v2  ;;  %v3747_v2 = vld [vmem:[#allocation2 + $0x310] sm:$0xff] }
  0x46   :  { %2240 = vmatpush.bf16.msrb.mxu1 %v3690_v3  ;;  %v3755_v3 = vld [vmem:[#allocation2 + $0x350] sm:$0xff] }
  0x47   :  { %2253 = vmatpush.bf16.msrb.mxu2 %v3698_v4  ;;  %v3763_v4 = vld [vmem:[#allocation2 + $0x390] sm:$0xff] }
  0x48   :  { %2266 = vmatpush.bf16.msrb.mxu3 %v3706_v5  ;;  %v3771_v5 = vld [vmem:[#allocation2 + $0x3d0] sm:$0xff] }
  0x49   :  { %2228 = vmatpush.bf16.msrb.mxu0 %v3681_v6  ;;  %v3746_v6 = vld [vmem:[#allocation2 + $0x308] sm:$0xff] }
  0x4a   :  { %2241 = vmatpush.bf16.msrb.mxu1 %v3689_v7  ;;  %v3754_v7 = vld [vmem:[#allocation2 + $0x348] sm:$0xff] }
  0x4b   :  { %2254 = vmatpush.bf16.msrb.mxu2 %v3697_v8  ;;  %v3762_v8 = vld [vmem:[#allocation2 + $0x388] sm:$0xff] }
  0x4c   :  { %2267 = vmatpush.bf16.msrb.mxu3 %v3705_v9  ;;  %2229 = vmatmul.bf16.vlgmr.msrb.gmra.mxu0 %v567_v50  ;;  %v3751_v50 = vld [vmem:[#allocation2 + $0x330] sm:$0xff]  ;;  %v3770_v9 = vld [vmem:[#allocation2 + $0x3c8] sm:$0xff] }
  0x4d   :  { %2273 = vmatpush.bf16.msra.mxu0 %v3720_v10  ;;  %2242 = vmatmul.bf16.vlgmr.msrb.gmra.mxu1 %v568_v53  ;;  %v3775_v53 = vld [vmem:[#allocation2 + $0x3f0] sm:$0xff]  ;;  %v577_v10 = vld [vmem:[#allocation1 + $0x24] sm:$0xff] }
  0x4e   :  { %2286 = vmatpush.bf16.msra.mxu1 %v3728_v11  ;;  %2255 = vmatmul.bf16.vlgmr.msrb.gmra.mxu2 %v569_v49  ;;  %v576_v49 = vld [vmem:[#allocation1 + $0x1b] sm:$0xff] }
  0x4f   :  { %2299 = vmatpush.bf16.msra.mxu2 %v3736_v12  ;;  %2268 = vmatmul.bf16.vlgmr.msrb.gmra.mxu3 %v570_v51  ;;  %v3759_v51 = vld [vmem:[#allocation2 + $0x370] sm:$0xff]  ;;  %v578_v12 = vld [vmem:[#allocation1 + $0x2d] sm:$0xff] }
  0x50   :  { %2312 = vmatpush.bf16.msra.mxu3 %v3744_v13  ;;  %v579_v11 = vld [vmem:[#allocation1 + $0x36] sm:$0xff]  ;;  %v580_v13 = vld [vmem:[#allocation1 + $0x3f] sm:$0xff] }
  0x51   :  { %2274 = vmatpush.bf16.msra.mxu0 %v3719_v14  ;;  %v47_v14 = vld [vmem:[%s4038_s0 + $0x10] sm:$0xff] }
  0x52   :  { %2287 = vmatpush.bf16.msra.mxu1 %v3727_v15  ;;  %582 = vst [vmem:[#allocation1] ss:$9 sm:$0xff] %v47_v14  ;;  %v3745_v15 = vld [vmem:[#allocation2 + $0x300] sm:$0xff] }
  0x53   :  { %2300 = vmatpush.bf16.msra.mxu2 %v3735_v16  ;;  %v3753_v16 = vld [vmem:[#allocation2 + $0x340] sm:$0xff] }
  0x54   :  { %2313 = vmatpush.bf16.msra.mxu3 %v3743_v17  ;;  %v3761_v17 = vld [vmem:[#allocation2 + $0x380] sm:$0xff] }
  0x55   :  { %2275 = vmatpush.bf16.msra.mxu0 %v3718_v18  ;;  %v3769_v18 = vld [vmem:[#allocation2 + $0x3c0] sm:$0xff] }
  0x56   :  { %2288 = vmatpush.bf16.msra.mxu1 %v3726_v19  ;;  %v3784_v19 = vld [vmem:[#allocation2 + $0x438] sm:$0xff] }
  0x57   :  { %2301 = vmatpush.bf16.msra.mxu2 %v3734_v20  ;;  %v3792_v20 = vld [vmem:[#allocation2 + $0x478] sm:$0xff] }
  0x58   :  { %2314 = vmatpush.bf16.msra.mxu3 %v3742_v21  ;;  %v3800_v21 = vld [vmem:[#allocation2 + $0x4b8] sm:$0xff] }
  0x59   :  { %2276 = vmatpush.bf16.msra.mxu0 %v3717_v22  ;;  %v3808_v22 = vld [vmem:[#allocation2 + $0x4f8] sm:$0xff] }
  0x5a   :  { %2289 = vmatpush.bf16.msra.mxu1 %v3725_v23  ;;  %v3783_v23 = vld [vmem:[#allocation2 + $0x430] sm:$0xff] }
  0x5b   :  { %2302 = vmatpush.bf16.msra.mxu2 %v3733_v24  ;;  %v3791_v24 = vld [vmem:[#allocation2 + $0x470] sm:$0xff] }
  0x5c   :  { %2315 = vmatpush.bf16.msra.mxu3 %v3741_v25  ;;  %v3799_v25 = vld [vmem:[#allocation2 + $0x4b0] sm:$0xff] }
  0x5d   :  { %2277 = vmatpush.bf16.msra.mxu0 %v3716_v26  ;;  %v3807_v26 = vld [vmem:[#allocation2 + $0x4f0] sm:$0xff] }
  0x5e   :  { %2290 = vmatpush.bf16.msra.mxu1 %v3724_v27  ;;  %v3782_v27 = vld [vmem:[#allocation2 + $0x428] sm:$0xff] }
  0x5f   :  { %2303 = vmatpush.bf16.msra.mxu2 %v3732_v28  ;;  %v3790_v28 = vld [vmem:[#allocation2 + $0x468] sm:$0xff] }
  0x60   :  { %2316 = vmatpush.bf16.msra.mxu3 %v3740_v29  ;;  %v3798_v29 = vld [vmem:[#allocation2 + $0x4a8] sm:$0xff] }
  0x61   :  { %2278 = vmatpush.bf16.msra.mxu0 %v3715_v30  ;;  %v3806_v30 = vld [vmem:[#allocation2 + $0x4e8] sm:$0xff] }
  0x62   :  { %2291 = vmatpush.bf16.msra.mxu1 %v3723_v31  ;;  %v3781_v31 = vld [vmem:[#allocation2 + $0x420] sm:$0xff] }
  0x63   :  { %2304 = vmatpush.bf16.msra.mxu2 %v3731_v32  ;;  %v3789_v32 = vld [vmem:[#allocation2 + $0x460] sm:$0xff] }
  0x64   :  { %2317 = vmatpush.bf16.msra.mxu3 %v3739_v33  ;;  %v3797_v33 = vld [vmem:[#allocation2 + $0x4a0] sm:$0xff] }
  0x65   :  { %2279 = vmatpush.bf16.msra.mxu0 %v3714_v34  ;;  %v3805_v34 = vld [vmem:[#allocation2 + $0x4e0] sm:$0xff] }
  0x66   :  { %2292 = vmatpush.bf16.msra.mxu1 %v3722_v35  ;;  %v3780_v35 = vld [vmem:[#allocation2 + $0x418] sm:$0xff] }
  0x67   :  { %2305 = vmatpush.bf16.msra.mxu2 %v3730_v36  ;;  %v3788_v36 = vld [vmem:[#allocation2 + $0x458] sm:$0xff] }
  0x68   :  { %2318 = vmatpush.bf16.msra.mxu3 %v3738_v37  ;;  %v3796_v37 = vld [vmem:[#allocation2 + $0x498] sm:$0xff] }
  0x69   :  { %2280 = vmatpush.bf16.msra.mxu0 %v3713_v38  ;;  %v3804_v38 = vld [vmem:[#allocation2 + $0x4d8] sm:$0xff] }
  0x6a   :  { %2293 = vmatpush.bf16.msra.mxu1 %v3721_v39  ;;  %v3779_v39 = vld [vmem:[#allocation2 + $0x410] sm:$0xff] }
  0x6b   :  { %2306 = vmatpush.bf16.msra.mxu2 %v3729_v40  ;;  %v3787_v40 = vld [vmem:[#allocation2 + $0x450] sm:$0xff] }
  0x6c   :  { %2319 = vmatpush.bf16.msra.mxu3 %v3737_v41  ;;  %2281 = vmatmul.bf16.vlgmr.msra.gmra.mxu0 %v573_v46  ;;  %v3795_v41 = vld [vmem:[#allocation2 + $0x490] sm:$0xff]  ;;  %v3802_v46 = vld [vmem:[#allocation2 + $0x4c8] sm:$0xff] }
  0x6d   :  { %2325 = vmatpush.bf16.msrb.mxu0 %v3752_v42  ;;  %2294 = vmatmul.bf16.vlgmr.msra.gmra.mxu1 %v574_v48  ;;  %v3803_v42 = vld [vmem:[#allocation2 + $0x4d0] sm:$0xff]  ;;  %v3785_v48 = vld [vmem:[#allocation2 + $0x440] sm:$0xff] }
  0x6e   :  { %2338 = vmatpush.bf16.msrb.mxu1 %v3760_v43  ;;  %2307 = vmatmul.bf16.vlgmr.msra.gmra.mxu2 %v575_v47  ;;  %v3778_v43 = vld [vmem:[#allocation2 + $0x408] sm:$0xff]  ;;  %v3777_v47 = vld [vmem:[#allocation2 + $0x400] sm:$0xff] }
  0x6f   :  { %2351 = vmatpush.bf16.msrb.mxu2 %v3768_v44  ;;  %2320 = vmatmul.bf16.vlgmr.msra.gmra.mxu3 %v576_v49  ;;  %v3786_v44 = vld [vmem:[#allocation2 + $0x448] sm:$0xff]  ;;  %v3793_v49 = vld [vmem:[#allocation2 + $0x480] sm:$0xff] }
  0x70   :  { %2364 = vmatpush.bf16.msrb.mxu3 %v3776_v45  ;;  %v3794_v45 = vld [vmem:[#allocation2 + $0x488] sm:$0xff] }
  0x71   :  { %2326 = vmatpush.bf16.msrb.mxu0 %v3751_v50  ;;  %v3801_v50 = vld [vmem:[#allocation2 + $0x4c0] sm:$0xff] }
  0x72   :  { %2339 = vmatpush.bf16.msrb.mxu1 %v3759_v51  ;;  %v3816_v51 = vld [vmem:[#allocation2 + $0x538] sm:$0xff] }
  0x73   :  { %2352 = vmatpush.bf16.msrb.mxu2 %v3767_v52  ;;  %v3824_v52 = vld [vmem:[#allocation2 + $0x578] sm:$0xff] }
  0x74   :  { %2365 = vmatpush.bf16.msrb.mxu3 %v3775_v53  ;;  %v3832_v53 = vld [vmem:[#allocation2 + $0x5b8] sm:$0xff] }
  0x75   :  { %2327 = vmatpush.bf16.msrb.mxu0 %v3750_v54  ;;  %v3840_v54 = vld [vmem:[#allocation2 + $0x5f8] sm:$0xff] }
  0x76   :  { %2340 = vmatpush.bf16.msrb.mxu1 %v3758_v55  ;;  %v583_v55 = vld [vmem:[#allocation1] sm:$0xff] }
  0x77   :  { %2353 = vmatpush.bf16.msrb.mxu2 %v3766_v56  ;;  %v585_v56 = vld [vmem:[#allocation1 + $0x12] sm:$0xff] }
  0x78   :  { %2366 = vmatpush.bf16.msrb.mxu3 %v3774_v57  ;;  %v584_v57 = vld [vmem:[#allocation1 + $0x9] sm:$0xff] }
  0x79   :  { %2328 = vmatpush.bf16.msrb.mxu0 %v3749_v58  ;;  %v586_v58 = vld [vmem:[#allocation1 + $0x1b] sm:$0xff] }
  0x7a   :  { %2341 = vmatpush.bf16.msrb.mxu1 %v3757_v59  ;;  %v3815_v59 = vld [vmem:[#allocation2 + $0x530] sm:$0xff] }
  0x7b   :  { %2354 = vmatpush.bf16.msrb.mxu2 %v3765_v60  ;;  %v3823_v60 = vld [vmem:[#allocation2 + $0x570] sm:$0xff] }
  0x7c   :  { %2367 = vmatpush.bf16.msrb.mxu3 %v3773_v61  ;;  %v3831_v61 = vld [vmem:[#allocation2 + $0x5b0] sm:$0xff] }
  0x7d   :  { %2329 = vmatpush.bf16.msrb.mxu0 %v3748_v62  ;;  %v3839_v62 = vld [vmem:[#allocation2 + $0x5f0] sm:$0xff] }
  0x7e   :  { %2342 = vmatpush.bf16.msrb.mxu1 %v3756_v63  ;;  %v3814_v63 = vld [vmem:[#allocation2 + $0x528] sm:$0xff] }
  0x7f   :  { %2355 = vmatpush.bf16.msrb.mxu2 %v3764_v0  ;;  %v3822_v0 = vld [vmem:[#allocation2 + $0x568] sm:$0xff] }
  0x80   :  { %2368 = vmatpush.bf16.msrb.mxu3 %v3772_v1  ;;  %v3830_v1 = vld [vmem:[#allocation2 + $0x5a8] sm:$0xff] }
  0x81   :  { %2330 = vmatpush.bf16.msrb.mxu0 %v3747_v2  ;;  %v3838_v2 = vld [vmem:[#allocation2 + $0x5e8] sm:$0xff] }
  0x82   :  { %2343 = vmatpush.bf16.msrb.mxu1 %v3755_v3 }
  0x83   :  { %2356 = vmatpush.bf16.msrb.mxu2 %v3763_v4  ;;  %v3813_v4 = vld [vmem:[#allocation2 + $0x520] sm:$0xff] }
  0x84   :  { %2369 = vmatpush.bf16.msrb.mxu3 %v3771_v5  ;;  %v3821_v5 = vld [vmem:[#allocation2 + $0x560] sm:$0xff] }
  0x85   :  { %2331 = vmatpush.bf16.msrb.mxu0 %v3746_v6 }
  0x86   :  { %2344 = vmatpush.bf16.msrb.mxu1 %v3754_v7  ;;  %v3829_v7 = vld [vmem:[#allocation2 + $0x5a0] sm:$0xff] }
  0x87   :  { %2357 = vmatpush.bf16.msrb.mxu2 %v3762_v8  ;;  %v3837_v8 = vld [vmem:[#allocation2 + $0x5e0] sm:$0xff] }
  0x88   :  { %2370 = vmatpush.bf16.msrb.mxu3 %v3770_v9 }
  0x89   :  { %2332 = vmatpush.bf16.msrb.mxu0 %v3745_v15 }
  0x8a   :  { %2345 = vmatpush.bf16.msrb.mxu1 %v3753_v16 }
  0x8b   :  { %2358 = vmatpush.bf16.msrb.mxu2 %v3761_v17 }
  0x8c   :  { %2371 = vmatpush.bf16.msrb.mxu3 %v3769_v18  ;;  %2333 = vmatmul.bf16.vlgmr.msrb.gmra.mxu0 %v577_v10  ;;  %v3812_v10 = vld [vmem:[#allocation2 + $0x518] sm:$0xff]  ;;  %v3811_v18 = vld [vmem:[#allocation2 + $0x510] sm:$0xff] }
  0x8d   :  { %2377 = vmatpush.bf16.msra.mxu0 %v3784_v19  ;;  %2346 = vmatmul.bf16.vlgmr.msrb.gmra.mxu1 %v578_v12  ;;  %v3828_v12 = vld [vmem:[#allocation2 + $0x598] sm:$0xff]  ;;  %v3819_v19 = vld [vmem:[#allocation2 + $0x550] sm:$0xff] }
  0x8e   :  { %2390 = vmatpush.bf16.msra.mxu1 %v3792_v20  ;;  %2359 = vmatmul.bf16.vlgmr.msrb.gmra.mxu2 %v579_v11  ;;  %v3820_v11 = vld [vmem:[#allocation2 + $0x558] sm:$0xff] }
  0x8f   :  { %2403 = vmatpush.bf16.msra.mxu2 %v3800_v21  ;;  %2372 = vmatmul.bf16.vlgmr.msrb.gmra.mxu3 %v580_v13  ;;  %v3836_v13 = vld [vmem:[#allocation2 + $0x5d8] sm:$0xff] }
  0x90   :  { %2416 = vmatpush.bf16.msra.mxu3 %v3808_v22  ;;  %v3827_v22 = vld [vmem:[#allocation2 + $0x590] sm:$0xff] }
  0x91   :  { %2378 = vmatpush.bf16.msra.mxu0 %v3783_v23  ;;  %v3835_v23 = vld [vmem:[#allocation2 + $0x5d0] sm:$0xff] }
  0x92   :  { %2391 = vmatpush.bf16.msra.mxu1 %v3791_v24  ;;  %v3810_v24 = vld [vmem:[#allocation2 + $0x508] sm:$0xff] }
  0x93   :  { %2404 = vmatpush.bf16.msra.mxu2 %v3799_v25  ;;  %v3818_v25 = vld [vmem:[#allocation2 + $0x548] sm:$0xff] }
  0x94   :  { %2417 = vmatpush.bf16.msra.mxu3 %v3807_v26  ;;  %v3826_v26 = vld [vmem:[#allocation2 + $0x588] sm:$0xff] }
  0x95   :  { %2379 = vmatpush.bf16.msra.mxu0 %v3782_v27  ;;  %v3834_v27 = vld [vmem:[#allocation2 + $0x5c8] sm:$0xff] }
  0x96   :  { %2392 = vmatpush.bf16.msra.mxu1 %v3790_v28  ;;  %v587_v28 = vld [vmem:[#allocation1 + $0x24] sm:$0xff] }
  0x97   :  { %2405 = vmatpush.bf16.msra.mxu2 %v3798_v29  ;;  %v589_v29 = vld [vmem:[#allocation1 + $0x36] sm:$0xff] }
  0x98   :  { %2418 = vmatpush.bf16.msra.mxu3 %v3806_v30 }
  0x99   :  { %2380 = vmatpush.bf16.msra.mxu0 %v3781_v31  ;;  %v588_v31 = vld [vmem:[#allocation1 + $0x2d] sm:$0xff] }
  0x9a   :  { %2393 = vmatpush.bf16.msra.mxu1 %v3789_v32  ;;  %v590_v32 = vld [vmem:[#allocation1 + $0x3f] sm:$0xff] }
  0x9b   :  { %2406 = vmatpush.bf16.msra.mxu2 %v3797_v33 }
  0x9c   :  { %2419 = vmatpush.bf16.msra.mxu3 %v3805_v34  ;;  %v48_v34 = vld [vmem:[%s4038_s0 + $0x18] sm:$0xff]  ;;  %s3993_s0 = smov [#allocation7]  }
  0x9d   :  { %2381 = vmatpush.bf16.msra.mxu0 %v3780_v35  ;;  %592 = vst [vmem:[#allocation1] ss:$9 sm:$0xff] %v48_v34  ;;  %v3809_v35 = vld [vmem:[#allocation2 + $0x500] sm:$0xff]  ;;  %v3902_v34 = vld [vmem:[#allocation2 + $0x7e8] sm:$0xff]  ;;  %s2612_s30 = sshll.u32 %s3993_s0, 4  ;;  %s2613_s30 = int_to_ptr.vmem [resolvable:$true] %s2612_s30 }
  0x9e   :  { %2394 = vmatpush.bf16.msra.mxu1 %v3788_v36  ;;  %v3817_v36 = vld [vmem:[#allocation2 + $0x540] sm:$0xff] }
  0x9f   :  { %2407 = vmatpush.bf16.msra.mxu2 %v3796_v37  ;;  %v3825_v37 = vld [vmem:[#allocation2 + $0x580] sm:$0xff] }
  0xa0   :  { %2420 = vmatpush.bf16.msra.mxu3 %v3804_v38  ;;  %v3833_v38 = vld [vmem:[#allocation2 + $0x5c0] sm:$0xff] }
  0xa1   :  { %2382 = vmatpush.bf16.msra.mxu0 %v3779_v39  ;;  %v3848_v39 = vld [vmem:[#allocation2 + $0x638] sm:$0xff] }
  0xa2   :  { %2395 = vmatpush.bf16.msra.mxu1 %v3787_v40  ;;  %v3856_v40 = vld [vmem:[#allocation2 + $0x678] sm:$0xff] }
  0xa3   :  { %2408 = vmatpush.bf16.msra.mxu2 %v3795_v41  ;;  %v3864_v41 = vld [vmem:[#allocation2 + $0x6b8] sm:$0xff] }
  0xa4   :  { %2421 = vmatpush.bf16.msra.mxu3 %v3803_v42  ;;  %v3872_v42 = vld [vmem:[#allocation2 + $0x6f8] sm:$0xff] }
  0xa5   :  { %2383 = vmatpush.bf16.msra.mxu0 %v3778_v43  ;;  %v3847_v43 = vld [vmem:[#allocation2 + $0x630] sm:$0xff] }
  0xa6   :  { %2396 = vmatpush.bf16.msra.mxu1 %v3786_v44  ;;  %v3855_v44 = vld [vmem:[#allocation2 + $0x670] sm:$0xff] }
  0xa7   :  { %2409 = vmatpush.bf16.msra.mxu2 %v3794_v45  ;;  %v3863_v45 = vld [vmem:[#allocation2 + $0x6b0] sm:$0xff] }
  0xa8   :  { %2422 = vmatpush.bf16.msra.mxu3 %v3802_v46  ;;  %v3871_v46 = vld [vmem:[#allocation2 + $0x6f0] sm:$0xff] }
  0xa9   :  { %2384 = vmatpush.bf16.msra.mxu0 %v3777_v47  ;;  %v2178_v3 = vpop.f32.mrf.mxu0  ;;  %v3846_v47 = vld [vmem:[#allocation2 + $0x628] sm:$0xff] }
  0xaa   :  { %2397 = vmatpush.bf16.msra.mxu1 %v3785_v48  ;;  %v2191_v6 = vpop.f32.mrf.mxu1  ;;  %v3854_v48 = vld [vmem:[#allocation2 + $0x668] sm:$0xff] }
  0xab   :  { %2410 = vmatpush.bf16.msra.mxu2 %v3793_v49  ;;  %v2192_v9 = vadd.f32 %v2191_v6, %v2178_v3  ;;  %v3862_v49 = vld [vmem:[#allocation2 + $0x6a8] sm:$0xff]  ;;  %v3843_v3 = vld [vmem:[#allocation2 + $0x610] sm:$0xff] }
  0xac   :  { %2423 = vmatpush.bf16.msra.mxu3 %v3801_v50  ;;  %2385 = vmatmul.bf16.vlgmr.msra.gmra.mxu0 %v583_v55  ;;  %v3870_v50 = vld [vmem:[#allocation2 + $0x6e8] sm:$0xff] }
  0xad   :  { %2429 = vmatpush.bf16.msrb.mxu0 %v3816_v51  ;;  %2398 = vmatmul.bf16.vlgmr.msra.gmra.mxu1 %v584_v57  ;;  %v3869_v57 = vld [vmem:[#allocation2 + $0x6e0] sm:$0xff] }
  0xae   :  { %2442 = vmatpush.bf16.msrb.mxu1 %v3824_v52  ;;  %2411 = vmatmul.bf16.vlgmr.msra.gmra.mxu2 %v585_v56  ;;  %v3845_v52 = vld [vmem:[#allocation2 + $0x620] sm:$0xff] }
  0xaf   :  { %2455 = vmatpush.bf16.msrb.mxu2 %v3832_v53  ;;  %2424 = vmatmul.bf16.vlgmr.msra.gmra.mxu3 %v586_v58  ;;  %v3853_v53 = vld [vmem:[#allocation2 + $0x660] sm:$0xff] }
  0xb0   :  { %2468 = vmatpush.bf16.msrb.mxu3 %v3840_v54  ;;  %v3861_v56 = vld [vmem:[#allocation2 + $0x6a0] sm:$0xff] }
  0xb1   :  { %2430 = vmatpush.bf16.msrb.mxu0 %v3815_v59  ;;  %v2204_v14 = vpop.f32.mrf.mxu2  ;;  %v2180_v17 = vpop.f32.mrf.mxu0  ;;  %v3844_v59 = vld [vmem:[#allocation2 + $0x618] sm:$0xff] }
  0xb2   :  { %2443 = vmatpush.bf16.msrb.mxu1 %v3823_v60  ;;  %v2205_v15 = vadd.f32 %v2204_v14, %v2192_v9  ;;  %v2217_v16 = vpop.f32.mrf.mxu3  ;;  %v2193_v21 = vpop.f32.mrf.mxu1  ;;  %v3852_v60 = vld [vmem:[#allocation2 + $0x658] sm:$0xff]  ;;  %v3842_v9 = vld [vmem:[#allocation2 + $0x608] sm:$0xff]  ;;  %v3857_v17 = vld [vmem:[#allocation2 + $0x680] sm:$0xff] }
  0xb3   :  { %2456 = vmatpush.bf16.msrb.mxu2 %v3831_v61  ;;  %v3860_v61 = vld [vmem:[#allocation2 + $0x698] sm:$0xff] }
  0xb4   :  { %2469 = vmatpush.bf16.msrb.mxu3 %v3839_v62  ;;  %v4029_v20 = vadd.f32 %v2217_v16, %v2205_v15  ;;  %v3868_v62 = vld [vmem:[#allocation2 + $0x6d8] sm:$0xff]  ;;  %v3841_v15 = vld [vmem:[#allocation2 + $0x600] sm:$0xff] }
  0xb5   :  { %2431 = vmatpush.bf16.msrb.mxu0 %v3814_v63  ;;  %v3849_v16 = vld [vmem:[#allocation2 + $0x640] sm:$0xff]  ;;  %v3896_v21 = vld [vmem:[#allocation2 + $0x7b8] sm:$0xff] }
  0xb6   :  { %2444 = vmatpush.bf16.msrb.mxu1 %v3822_v0 }
  0xb7   :  { %2457 = vmatpush.bf16.msrb.mxu2 %v3830_v1 }
  0xb8   :  { %2470 = vmatpush.bf16.msrb.mxu3 %v3838_v2 }
  0xb9   :  { %2432 = vmatpush.bf16.msrb.mxu0 %v3813_v4  ;;  %v2206_v30 = vpop.f32.mrf.mxu2  ;;  %v3851_v4 = vld [vmem:[#allocation2 + $0x650] sm:$0xff] }
  0xba   :  { %2445 = vmatpush.bf16.msrb.mxu1 %v3821_v5  ;;  %v2219_v33 = vpop.f32.mrf.mxu3  ;;  %v3903_v30 = vld [vmem:[#allocation2 + $0x7f0] sm:$0xff] }
  0xbb   :  { %2458 = vmatpush.bf16.msrb.mxu2 %v3829_v7  ;;  %v3859_v7 = vld [vmem:[#allocation2 + $0x690] sm:$0xff]  ;;  %v3894_v33 = vld [vmem:[#allocation2 + $0x7a8] sm:$0xff] }
  0xbc   :  { %2471 = vmatpush.bf16.msrb.mxu3 %v3837_v8  ;;  %v3867_v8 = vld [vmem:[#allocation2 + $0x6d0] sm:$0xff] }
  0xbd   :  { %2433 = vmatpush.bf16.msrb.mxu0 %v3812_v10  ;;  %v3850_v10 = vld [vmem:[#allocation2 + $0x648] sm:$0xff] }
  0xbe   :  { %2446 = vmatpush.bf16.msrb.mxu1 %v3820_v11  ;;  %v3858_v11 = vld [vmem:[#allocation2 + $0x688] sm:$0xff] }
  0xbf   :  { %2459 = vmatpush.bf16.msrb.mxu2 %v3828_v12  ;;  %v3866_v12 = vld [vmem:[#allocation2 + $0x6c8] sm:$0xff] }
  0xc0   :  { %2472 = vmatpush.bf16.msrb.mxu3 %v3836_v13 }
  0xc1   :  { %2434 = vmatpush.bf16.msrb.mxu0 %v3811_v18  ;;  %v3865_v18 = vld [vmem:[#allocation2 + $0x6c0] sm:$0xff] }
  0xc2   :  { %2447 = vmatpush.bf16.msrb.mxu1 %v3819_v19  ;;  %v3880_v19 = vld [vmem:[#allocation2 + $0x738] sm:$0xff] }
  0xc3   :  { %2460 = vmatpush.bf16.msrb.mxu2 %v3827_v22  ;;  %v3904_v22 = vld [vmem:[#allocation2 + $0x7f8] sm:$0xff] }
  0xc4   :  { %2473 = vmatpush.bf16.msrb.mxu3 %v3835_v23  ;;  %v593_v23 = vld [vmem:[#allocation1] sm:$0xff] }
  0xc5   :  { %2435 = vmatpush.bf16.msrb.mxu0 %v3810_v24  ;;  %v595_v24 = vld [vmem:[#allocation1 + $0x12] sm:$0xff] }
  0xc6   :  { %2448 = vmatpush.bf16.msrb.mxu1 %v3818_v25  ;;  %v594_v25 = vld [vmem:[#allocation1 + $0x9] sm:$0xff] }
  0xc7   :  { %2461 = vmatpush.bf16.msrb.mxu2 %v3826_v26  ;;  %v596_v26 = vld [vmem:[#allocation1 + $0x1b] sm:$0xff] }
  0xc8   :  { %2474 = vmatpush.bf16.msrb.mxu3 %v3834_v27  ;;  %v3879_v27 = vld [vmem:[#allocation2 + $0x730] sm:$0xff] }
  0xc9   :  { %2436 = vmatpush.bf16.msrb.mxu0 %v3809_v35  ;;  %v2230_v51 = vpop.f32.mrf.mxu0 }
  0xca   :  { %2449 = vmatpush.bf16.msrb.mxu1 %v3817_v36  ;;  %v2231_v54 = vadd.f32 %v2230_v51, %v4029_v20  ;;  %v2243_v55 = vpop.f32.mrf.mxu1  ;;  %v3888_v20 = vld [vmem:[#allocation2 + $0x778] sm:$0xff] }
  0xcb   :  { %2462 = vmatpush.bf16.msrb.mxu2 %v3825_v37  ;;  %v3877_v37 = vld [vmem:[#allocation2 + $0x720] sm:$0xff] }
  0xcc   :  { %2475 = vmatpush.bf16.msrb.mxu3 %v3833_v38  ;;  %2437 = vmatmul.bf16.vlgmr.msrb.gmra.mxu0 %v587_v28  ;;  %v2244_v58 = vadd.f32 %v2243_v55, %v2231_v54  ;;  %v3887_v28 = vld [vmem:[#allocation2 + $0x770] sm:$0xff]  ;;  %v3885_v38 = vld [vmem:[#allocation2 + $0x760] sm:$0xff] }
  0xcd   :  { %2481 = vmatpush.bf16.msra.mxu0 %v3848_v39  ;;  %2450 = vmatmul.bf16.vlgmr.msrb.gmra.mxu1 %v588_v31  ;;  %v3878_v31 = vld [vmem:[#allocation2 + $0x728] sm:$0xff]  ;;  %v3891_v55 = vld [vmem:[#allocation2 + $0x790] sm:$0xff] }
  0xce   :  { %2494 = vmatpush.bf16.msra.mxu1 %v3856_v40  ;;  %2463 = vmatmul.bf16.vlgmr.msrb.gmra.mxu2 %v589_v29  ;;  %v3895_v29 = vld [vmem:[#allocation2 + $0x7b0] sm:$0xff]  ;;  %v3893_v40 = vld [vmem:[#allocation2 + $0x7a0] sm:$0xff] }
  0xcf   :  { %2507 = vmatpush.bf16.msra.mxu2 %v3864_v41  ;;  %2476 = vmatmul.bf16.vlgmr.msrb.gmra.mxu3 %v590_v32  ;;  %v3886_v32 = vld [vmem:[#allocation2 + $0x768] sm:$0xff]  ;;  %v3901_v41 = vld [vmem:[#allocation2 + $0x7e0] sm:$0xff] }
  0xd0   :  { %2520 = vmatpush.bf16.msra.mxu3 %v3872_v42 }
  0xd1   :  { %2482 = vmatpush.bf16.msra.mxu0 %v3847_v43  ;;  %v2256_v63 = vpop.f32.mrf.mxu2  ;;  %v2232_v2 = vpop.f32.mrf.mxu0  ;;  %v3876_v43 = vld [vmem:[#allocation2 + $0x718] sm:$0xff] }
  0xd2   :  { %2495 = vmatpush.bf16.msra.mxu1 %v3855_v44  ;;  %v2257_v0 = vadd.f32 %v2256_v63, %v2244_v58  ;;  %v2269_v1 = vpop.f32.mrf.mxu3  ;;  %v2245_v6 = vpop.f32.mrf.mxu1  ;;  %v3884_v44 = vld [vmem:[#allocation2 + $0x758] sm:$0xff]  ;;  %v3882_v58 = vld [vmem:[#allocation2 + $0x748] sm:$0xff]  ;;  %v3873_v63 = vld [vmem:[#allocation2 + $0x700] sm:$0xff] }
  0xd3   :  { %2508 = vmatpush.bf16.msra.mxu2 %v3863_v45  ;;  %v3892_v45 = vld [vmem:[#allocation2 + $0x798] sm:$0xff]  ;;  %v3897_v2 = vld [vmem:[#allocation2 + $0x7c0] sm:$0xff] }
  0xd4   :  { %2521 = vmatpush.bf16.msra.mxu3 %v3871_v46  ;;  %v2270_v5 = vadd.f32 %v2269_v1, %v2257_v0  ;;  %v3900_v46 = vld [vmem:[#allocation2 + $0x7d8] sm:$0xff]  ;;  %v3881_v0 = vld [vmem:[#allocation2 + $0x740] sm:$0xff] }
  0xd5   :  { %2483 = vmatpush.bf16.msra.mxu0 %v3846_v47  ;;  %v3889_v1 = vld [vmem:[#allocation2 + $0x780] sm:$0xff]  ;;  %v600_v6 = vld [vmem:[#allocation1 + $0x3f] sm:$0xff] }
  0xd6   :  { %2496 = vmatpush.bf16.msra.mxu1 %v3854_v48 }
  0xd7   :  { %2509 = vmatpush.bf16.msra.mxu2 %v3862_v49 }
  0xd8   :  { %2522 = vmatpush.bf16.msra.mxu3 %v3870_v50 }
  0xd9   :  { %2484 = vmatpush.bf16.msra.mxu0 %v3845_v52  ;;  %v2258_v13 = vpop.f32.mrf.mxu2  ;;  %v3875_v52 = vld [vmem:[#allocation2 + $0x710] sm:$0xff] }
  0xda   :  { %2497 = vmatpush.bf16.msra.mxu1 %v3853_v53  ;;  %v2271_v14 = vpop.f32.mrf.mxu3  ;;  %v3883_v53 = vld [vmem:[#allocation2 + $0x750] sm:$0xff] }
  0xdb   :  { %2510 = vmatpush.bf16.msra.mxu2 %v3861_v56  ;;  %v3899_v56 = vld [vmem:[#allocation2 + $0x7d0] sm:$0xff] }
  0xdc   :  { %2523 = vmatpush.bf16.msra.mxu3 %v3869_v57  ;;  %v3874_v57 = vld [vmem:[#allocation2 + $0x708] sm:$0xff] }
  0xdd   :  { %2485 = vmatpush.bf16.msra.mxu0 %v3844_v59  ;;  %v3890_v59 = vld [vmem:[#allocation2 + $0x788] sm:$0xff] }
  0xde   :  { %2498 = vmatpush.bf16.msra.mxu1 %v3852_v60  ;;  %v3898_v60 = vld [vmem:[#allocation2 + $0x7c8] sm:$0xff] }
  0xdf   :  { %2511 = vmatpush.bf16.msra.mxu2 %v3860_v61 }
  0xe0   :  { %2524 = vmatpush.bf16.msra.mxu3 %v3868_v62 }
  0xe1   :  { %2486 = vmatpush.bf16.msra.mxu0 %v3843_v3  ;;  %v597_v3 = vld [vmem:[#allocation1 + $0x24] sm:$0xff] }
  0xe2   :  { %2499 = vmatpush.bf16.msra.mxu1 %v3851_v4  ;;  %v598_v4 = vld [vmem:[#allocation1 + $0x2d] sm:$0xff] }
  0xe3   :  { %2512 = vmatpush.bf16.msra.mxu2 %v3859_v7 }
  0xe4   :  { %2525 = vmatpush.bf16.msra.mxu3 %v3867_v8 }
  0xe5   :  { %2487 = vmatpush.bf16.msra.mxu0 %v3842_v9 }
  0xe6   :  { %2500 = vmatpush.bf16.msra.mxu1 %v3850_v10 }
  0xe7   :  { %2513 = vmatpush.bf16.msra.mxu2 %v3858_v11 }
  0xe8   :  { %2526 = vmatpush.bf16.msra.mxu3 %v3866_v12 }
  0xe9   :  { %2488 = vmatpush.bf16.msra.mxu0 %v3841_v15  ;;  %v2282_v35 = vpop.f32.mrf.mxu0 }
  0xea   :  { %2501 = vmatpush.bf16.msra.mxu1 %v3849_v16  ;;  %v2283_v36 = vadd.f32 %v2282_v35, %v2270_v5  ;;  %v2295_v39 = vpop.f32.mrf.mxu1  ;;  %v599_v5 = vld [vmem:[#allocation1 + $0x36] sm:$0xff] }
  0xeb   :  { %2514 = vmatpush.bf16.msra.mxu2 %v3857_v17 }
  0xec   :  { %2527 = vmatpush.bf16.msra.mxu3 %v3865_v18  ;;  %2489 = vmatmul.bf16.vlgmr.msra.gmra.mxu0 %v593_v23  ;;  %v2296_v42 = vadd.f32 %v2295_v39, %v2283_v36 }
  0xed   :  { %2533 = vmatpush.bf16.msrb.mxu0 %v3880_v19  ;;  %2502 = vmatmul.bf16.vlgmr.msra.gmra.mxu1 %v594_v25 }
  0xee   :  { %2546 = vmatpush.bf16.msrb.mxu1 %v3888_v20  ;;  %2515 = vmatmul.bf16.vlgmr.msra.gmra.mxu2 %v595_v24 }
  0xef   :  { %2559 = vmatpush.bf16.msrb.mxu2 %v3896_v21  ;;  %2528 = vmatmul.bf16.vlgmr.msra.gmra.mxu3 %v596_v26 }
  0xf0   :  { %2572 = vmatpush.bf16.msrb.mxu3 %v3904_v22 }
  0xf1   :  { %2534 = vmatpush.bf16.msrb.mxu0 %v3879_v27  ;;  %v2308_v47 = vpop.f32.mrf.mxu2  ;;  %v2284_v50 = vpop.f32.mrf.mxu0 }
  0xf2   :  { %2547 = vmatpush.bf16.msrb.mxu1 %v3887_v28  ;;  %v2309_v48 = vadd.f32 %v2308_v47, %v2296_v42  ;;  %v2321_v49 = vpop.f32.mrf.mxu3  ;;  %v2297_v54 = vpop.f32.mrf.mxu1 }
  0xf3   :  { %2560 = vmatpush.bf16.msrb.mxu2 %v3895_v29 }
  0xf4   :  { %2573 = vmatpush.bf16.msrb.mxu3 %v3903_v30  ;;  %v2322_v51 = vadd.f32 %v2321_v49, %v2309_v48 }
  0xf5   :  { %2535 = vmatpush.bf16.msrb.mxu0 %v3878_v31 }
  0xf6   :  { %2548 = vmatpush.bf16.msrb.mxu1 %v3886_v32 }
  0xf7   :  { %2561 = vmatpush.bf16.msrb.mxu2 %v3894_v33 }
  0xf8   :  { %2574 = vmatpush.bf16.msrb.mxu3 %v3902_v34 }
  0xf9   :  { %2536 = vmatpush.bf16.msrb.mxu0 %v3877_v37  ;;  %v2310_v61 = vpop.f32.mrf.mxu2 }
  0xfa   :  { %2549 = vmatpush.bf16.msrb.mxu1 %v3885_v38  ;;  %v2323_v62 = vpop.f32.mrf.mxu3 }
  0xfb   :  { %2562 = vmatpush.bf16.msrb.mxu2 %v3893_v40 }
  0xfc   :  { %2575 = vmatpush.bf16.msrb.mxu3 %v3901_v41 }
  0xfd   :  { %2537 = vmatpush.bf16.msrb.mxu0 %v3876_v43 }
  0xfe   :  { %2550 = vmatpush.bf16.msrb.mxu1 %v3884_v44 }
  0xff   :  { %2563 = vmatpush.bf16.msrb.mxu2 %v3892_v45 }
 0x100   :  { %2576 = vmatpush.bf16.msrb.mxu3 %v3900_v46 }
 0x101   :  { %2538 = vmatpush.bf16.msrb.mxu0 %v3875_v52 }
 0x102   :  { %2551 = vmatpush.bf16.msrb.mxu1 %v3883_v53 }
 0x103   :  { %2564 = vmatpush.bf16.msrb.mxu2 %v3891_v55 }
 0x104   :  { %2577 = vmatpush.bf16.msrb.mxu3 %v3899_v56 }
 0x105   :  { %2539 = vmatpush.bf16.msrb.mxu0 %v3874_v57 }
 0x106   :  { %2552 = vmatpush.bf16.msrb.mxu1 %v3882_v58 }
 0x107   :  { %2565 = vmatpush.bf16.msrb.mxu2 %v3890_v59 }
 0x108   :  { %2578 = vmatpush.bf16.msrb.mxu3 %v3898_v60 }
 0x109   :  { %2540 = vmatpush.bf16.msrb.mxu0 %v3873_v63  ;;  %v2334_v7 = vpop.f32.mrf.mxu0 }
 0x10a   :  { %2553 = vmatpush.bf16.msrb.mxu1 %v3881_v0  ;;  %v2335_v8 = vadd.f32 %v2334_v7, %v2322_v51  ;;  %v2347_v9 = vpop.f32.mrf.mxu1 }
 0x10b   :  { %2566 = vmatpush.bf16.msrb.mxu2 %v3889_v1 }
 0x10c   :  { %2579 = vmatpush.bf16.msrb.mxu3 %v3897_v2  ;;  %2541 = vmatmul.bf16.vlgmr.msrb.gmra.mxu0 %v597_v3  ;;  %v2348_v10 = vadd.f32 %v2347_v9, %v2335_v8  ;;  %v3910_v3 = vld [vmem:[#allocation5] ss:$0 sm:$0xff] }
 0x10d   :  { %2554 = vmatmul.bf16.vlgmr.msrb.gmra.mxu1 %v598_v4 }
 0x10e   :  { %2567 = vmatmul.bf16.vlgmr.msrb.gmra.mxu2 %v599_v5 }
 0x10f   :  { %2580 = vmatmul.bf16.vlgmr.msrb.gmra.mxu3 %v600_v6 }
 0x111   :  { %v2360_v11 = vpop.f32.mrf.mxu2  ;;  %v2336_v14 = vpop.f32.mrf.mxu0 }
 0x112   :  { %v2361_v12 = vadd.f32 %v2360_v11, %v2348_v10  ;;  %v2373_v13 = vpop.f32.mrf.mxu3  ;;  %v2349_v16 = vpop.f32.mrf.mxu1 }
 0x114   :  { %v2374_v15 = vadd.f32 %v2373_v13, %v2361_v12 }
 0x119   :  { %v2362_v17 = vpop.f32.mrf.mxu2 }
 0x11a   :  { %v2375_v18 = vpop.f32.mrf.mxu3 }
 0x129   :  { %v2386_v19 = vpop.f32.mrf.mxu0 }
 0x12a   :  { %v2387_v20 = vadd.f32 %v2386_v19, %v2374_v15  ;;  %v2399_v21 = vpop.f32.mrf.mxu1 }
 0x12c   :  { %v2400_v22 = vadd.f32 %v2399_v21, %v2387_v20 }
 0x131   :  { %v2412_v23 = vpop.f32.mrf.mxu2  ;;  %v2388_v26 = vpop.f32.mrf.mxu0 }
 0x132   :  { %v2413_v24 = vadd.f32 %v2412_v23, %v2400_v22  ;;  %v2425_v25 = vpop.f32.mrf.mxu3  ;;  %v2401_v28 = vpop.f32.mrf.mxu1 }
 0x134   :  { %v2426_v27 = vadd.f32 %v2425_v25, %v2413_v24 }
 0x139   :  { %v2414_v29 = vpop.f32.mrf.mxu2 }
 0x13a   :  { %v2427_v30 = vpop.f32.mrf.mxu3 }
 0x149   :  { %v2438_v31 = vpop.f32.mrf.mxu0 }
 0x14a   :  { %v2451_v32 = vpop.f32.mrf.mxu1  ;;  %v2439_v42 = vadd.f32 %v2438_v31, %v2426_v27 }
 0x14c   :  { %v2452_v46 = vadd.f32 %v2451_v32, %v2439_v42 }
 0x151   :  { %v2464_v33 = vpop.f32.mrf.mxu2  ;;  %v2440_v35 = vpop.f32.mrf.mxu0 }
 0x152   :  { %v2477_v34 = vpop.f32.mrf.mxu3  ;;  %v2453_v36 = vpop.f32.mrf.mxu1  ;;  %v2465_v47 = vadd.f32 %v2464_v33, %v2452_v46 }
 0x154   :  { %v2478_v50 = vadd.f32 %v2477_v34, %v2465_v47 }
 0x159   :  { %v2466_v37 = vpop.f32.mrf.mxu2 }
 0x15a   :  { %v2479_v38 = vpop.f32.mrf.mxu3 }
 0x169   :  { %v2490_v39 = vpop.f32.mrf.mxu0 }
 0x16a   :  { %v2503_v40 = vpop.f32.mrf.mxu1  ;;  %v2491_v51 = vadd.f32 %v2490_v39, %v2478_v50 }
 0x16c   :  { %v2504_v52 = vadd.f32 %v2503_v40, %v2491_v51 }
 0x171   :  { %v2516_v41 = vpop.f32.mrf.mxu2  ;;  %v2492_v44 = vpop.f32.mrf.mxu0 }
 0x172   :  { %v2529_v43 = vpop.f32.mrf.mxu3  ;;  %v2505_v45 = vpop.f32.mrf.mxu1  ;;  %v2517_v53 = vadd.f32 %v2516_v41, %v2504_v52 }
 0x174   :  { %v2530_v54 = vadd.f32 %v2529_v43, %v2517_v53 }
 0x179   :  { %v2518_v48 = vpop.f32.mrf.mxu2 }
 0x17a   :  { %v2531_v49 = vpop.f32.mrf.mxu3 }
 0x189   :  { %v2542_v55 = vpop.f32.mrf.mxu0 }
 0x18a   :  { %v2555_v56 = vpop.f32.mrf.mxu1  ;;  %v2543_v57 = vadd.f32 %v2542_v55, %v2530_v54 }
 0x18c   :  { %v2556_v58 = vadd.f32 %v2555_v56, %v2543_v57 }
 0x191   :  { %v2568_v59 = vpop.f32.mrf.mxu2  ;;  %v2544_v62 = vpop.f32.mrf.mxu0 }
 0x192   :  { %v2581_v60 = vpop.f32.mrf.mxu3  ;;  %v2569_v61 = vadd.f32 %v2568_v59, %v2556_v58  ;;  %v2557_v63 = vpop.f32.mrf.mxu1 }
 0x194   :  { %v2582_v0 = vadd.f32 %v2581_v60, %v2569_v61 }
 0x196   :  { %2589 = vst [vmem:[#allocation7] sm:$0x3] %v2582_v0 }
 0x199   :  { %v2570_v1 = vpop.f32.mrf.mxu2 }
 0x19a   :  { %v2583_v2 = vpop.f32.mrf.mxu3 }
 0x19d   :  { %v2600_v4 = vld [vmem:[#allocation7] sm:$0x3] }
 0x19e   :  { %v2605_v5 = vadd.f32 %v3910_v3, %v2600_v4 }
 0x1a0   :  { %2606 = vst [vmem:[#allocation7] sm:$0x3] %v2605_v5 }
 0x1a1   :  { %2617 = dma.vmem_to_hbm [thread:$0]  %s2613_s30, 32, %s2615_s6, [#allocation4]  }
 0x1a2   :  { %3987 = dma.done.wait [#allocation4], 32  }
 0x1a3   :  { %3988 = vsyncadd [#allocation4], 4294967264 }
 0x1a4   :  { %2622 = vsyncpa [#allocation3], 1 }
 0x1a5   :  { %2623 = vsyncpa [#allocation6], 1 }
 0x1a6   :  { %2624 = vsyncpa [#allocation4], 1 }

// kernel: vgg_classifier_forward.4
= control target key start
LH: loop header
LB: loop body
LE: loop exit
PB: predicated region body
PF: predicated region fallthrough
CT: control target
= control target key end

     0   :  { %8 = vsyncpa [#allocation3], 0  ;;  %s16095_s0 = inlined_call_operand.vmem [shape: bf16[2,4096], index: 0, kind: input, shape index: {}]   ;;  %s16096_s1 = inlined_call_operand.hbm [shape: bf16[4096,4096], index: 1, kind: input, shape index: {}]   ;;  %s16097_s2 = inlined_call_operand.hbm [shape: f32[1,4096], index: 2, kind: input, shape index: {}]   ;;  %s16098_s3 = inlined_call_operand.vmem [shape: f32[2,4096], index: 3, kind: output, shape index: {}]  }
   0x1   :  { %10 = vsyncpa [#allocation3 + $0x1], 0 }
   0x2   :  { %11 = vsyncpa [#allocation5], 0 }
   0x3   :  { %13 = vsyncpa [#allocation5 + $0x1], 0  ;;  %s13697_s12 = smov 0   ;;  %s13699_s13 = smov 0  }
   0x4   :  { %s13701_s14 = smov 0   ;;  %s13703_s15 = smov 0  }
   0x5   :  { %s13705_s16 = smov 0   ;;  %s13707_s17 = smov 0  }
   0x6 LB: > { %s8333_s18 = sadd.s32 4294967295, %s13672_s17   ;;  %s31_s19 = sadd.s32 1, %s13668_s16  ;;  %s13672_s17 = sphi %s13707_s17, %s19_s17   ;;  %s13668_s16 = sphi %s13705_s16, %s16106_s16   ;;  %s13664_s15 = sphi %s13703_s15, %s16105_s15   ;;  %s13660_s14 = sphi %s13701_s14, %s16104_s14   ;;  %s13656_s13 = sphi %s13699_s13, %s16103_s13   ;;  %s13652_s12 = sphi %s13697_s12, %s16102_s12  }
   0x7   : > { %p33_p0 = scmp.ge.s32.totalorder %s31_s19, 8  ;;  %s66_s20 = sadd.s32 1, %s13660_s14 }
   0x8   : > { %p73_p1 = scmp.ne.s32.totalorder %s13660_s14, %s13656_s13  ;;  %p74_p2 = scmp.eq.s32.totalorder %s13672_s17, 0 }
   0x9   : > { %s16108_s19 = smov (%p33_p0, %s31_s19), 0  ;;  %p79_p4 = scmp.ne.s32.totalorder %s13656_s13, %s13652_s12 }
   0xa   : > { %p13733_p3 = por %p74_p2, %p73_p1  ;;  %s62_s22 = ssub.s32 %s13668_s16, %s16108_s19 }
   0xb   : > { %p80_p5 = scmp.eq.s32.totalorder %s8333_s18, 0  ;;  %p64_p6 = scmp.eq.s32.totalorder %s62_s22, 0 }
   0xc   : > { %p13482_p8 = scmp.lt.s32.totalorder %s13672_s17, 8  ;;  %s13749_s25 = sand.u32 1, %s13660_s14  }
   0xd   : > { %p13740_p7 = por %p80_p5, %p79_p4  ;;  %s12446_s26 = sshll.u32 %s13668_s16, 4 }
   0xe   : > { %s13746_s24 = scalar_select %p64_p6, %s13660_s14, %s66_s20  }
   0xf   : > { %s8338_s27 = sshll.u32 %s13749_s25, 13  ;;  %s175_s30 = scalar_lea.hbm %s16096_s1, %s12446_s26 }
  0x10   : > { %s176_s4 = sshll.u32 %s175_s30, 4  ;;  %s167_s5 = scalar_lea.vmem [#allocation2], %s8338_s27  ;;  %s177_s4 = int_to_ptr.hbm [resolvable:$true] %s176_s4 }
  0x11   : > { %s178_s6 = sshll.u32 %s167_s5, 4  ;;  %p13758_p9 = pnand %p13482_p8, %p13733_p3  ;;  %s179_s6 = int_to_ptr.vmem [resolvable:$true] %s178_s6 }
  0x12   : > { %p8343_p10 = scmp.ge.s32.totalorder %s13672_s17, 1  ;;  %s164_s8 = scalar_lea.sflag [#allocation3], %s13749_s25 }
  0x13   : > { %s13674_s9 = smov 2048   ;;  %s13675_s10 = smov 256  }
  0x14   : > { %s13676_s11 = smov 16   ;;  %p205_p11 = scmp.lt.s32.totalorder %s13672_s17, 9 }
  0x15   : > { %13478 = dma.hbm_to_vmem [thread:$0]  (!%p13758_p9), %s177_s4, 131072, %s179_s6, %s164_s8, %s13674_s9, %s13675_s10, %s13676_s11  }
  0x16   : > { %s8341_s12 = sshll.u32 %s13749_s25, 2  ;;  %s8342_s18 = sshll.u32 %s13668_s16, 2 }
  0x17   : > { %p206_p12 = pnand %p8343_p10, %p205_p11  ;;  %s196_s22 = scalar_lea.hbm %s16097_s2, %s8342_s18 }
  0x18   : > { %s192_s26 = scalar_lea.vmem [#allocation4], %s8341_s12  ;;  %s198_s28 = sshll.u32 %s196_s22, 4  ;;  %s199_s28 = int_to_ptr.hbm [resolvable:$true] %s198_s28 }
  0x19   : > { %s200_s27 = sshll.u32 %s192_s26, 4  ;;  %s189_s29 = scalar_lea.sflag [#allocation5], %s13749_s25  ;;  %s201_s27 = int_to_ptr.vmem [resolvable:$true] %s200_s27 }
  0x1a   : > { %13481 = dma.hbm_to_vmem [thread:$0]  (!%p13758_p9), %s199_s28, 64, %s201_s27, %s189_s29  }
  0x1b   : > { %209 = sbr.rel (%p206_p12) target bundleno = 1217 (0x4c1), region = 32  ;;  %s211_s30 = sand.u32 (!%p206_p12), 1, %s13656_s13  }
  0x1c   : > { %s8344_s4 = sshll.u32 (!%p206_p12), %s211_s30, 13  ;;  %s212_s5 = scalar_lea.sflag (!%p206_p12), [#allocation3], %s211_s30 }
  0x1d   : > { %s13776_s6 = scalar_lea.vmem (!%p206_p12), [#allocation2], %s8344_s4 }
  0x20   : > { %13643 = dma.done.wait (%p13740_p7), %s212_s5, 131072  }
  0x21   : > { %13645 = vsyncadd (%p13740_p7), %s212_s5, 4294836224  ;;  %s8345_s8 = sshll.u32 %s211_s30, 2  ;;  %s222_s9 = scalar_lea.sflag [#allocation5], %s211_s30 }
  0x22   : > { %s13782_s10 = scalar_lea.vmem [#allocation4], %s8345_s8 }
  0x23   : > { %13647 = dma.done.wait (%p13740_p7), %s222_s9, 64  }
  0x24   : > { %13649 = vsyncadd (%p13740_p7), %s222_s9, 4294967232  ;;  %v8462_v0 = vld [vmem:[%s13776_s6 + $0xe0] sm:$0xf]  ;;  %v12477_v1 = vld [vmem:[%s13776_s6 + $0xec] sm:$0xf0]  ;;  %vm8167_vm0 = vcmask 1041408  }
  0x25   : > { %v8590_v2 = vld [vmem:[%s13776_s6 + $0x1e0] sm:$0xf]  ;;  %v8463_v3 = vor.u32 %v12477_v1, %v8462_v0  ;;  %v12509_v4 = vld [vmem:[%s13776_s6 + $0x1ec] sm:$0xf0]  ;;  %s8346_s22 = sshll.u32 %s13664_s15, 2  ;;  %vm8169_vm1 = vcmask 1045508  }
  0x26   : > { %v8718_v5 = vld [vmem:[%s13776_s6 + $0x2e0] sm:$0xf]  ;;  %v12541_v6 = vld [vmem:[%s13776_s6 + $0x2ec] sm:$0xf0]  ;;  %v8591_v7 = vor.u32 %v12509_v4, %v8590_v2  ;;  %p267_p13 = scmp.lt.s32.totalorder %s8346_s22, 31  ;;  %vm8171_vm2 = vcmask 1043456  }
  0x27   : > { %v8719_v8 = vor.u32 %v12541_v6, %v8718_v5  ;;  %v8846_v9 = vld [vmem:[%s13776_s6 + $0x3e0] sm:$0xf]  ;;  %v12573_v10 = vld [vmem:[%s13776_s6 + $0x3ec] sm:$0xf0]  ;;  %6492 = vmatpush.bf16.msra.mxu0 %v8463_v3 }
  0x28   : > { %v8446_v11 = vld [vmem:[%s13776_s6 + $0xc0] sm:$0xf]  ;;  %v8847_v12 = vor.u32 %v12573_v10, %v8846_v9  ;;  %v12473_v13 = vld [vmem:[%s13776_s6 + $0xcc] sm:$0xf0]  ;;  %6505 = vmatpush.bf16.msra.mxu1 %v8591_v7  ;;  %s16110_s22 = smov (!%p267_p13, %s8346_s22), 31 }
  0x29   : > { %v8574_v14 = vld [vmem:[%s13776_s6 + $0x1c0] sm:$0xf]  ;;  %v12505_v15 = vld [vmem:[%s13776_s6 + $0x1cc] sm:$0xf0]  ;;  %6518 = vmatpush.bf16.msra.mxu2 %v8719_v8  ;;  %v8447_v16 = vor.u32 %v12473_v13, %v8446_v11  ;;  %s8347_s15 = sshll.u32 %s16110_s22, 1 }
  0x2a   : > { %v8575_v17 = vor.u32 %v12505_v15, %v8574_v14  ;;  %v8702_v18 = vld [vmem:[%s13776_s6 + $0x2c0] sm:$0xf]  ;;  %v12537_v19 = vld [vmem:[%s13776_s6 + $0x2cc] sm:$0xf0]  ;;  %6531 = vmatpush.bf16.msra.mxu3 %v8847_v12  ;;  %s270_s28 = scalar_lea.vmem %s16098_s3, %s8347_s15 }
  0x2b   : > { %v8830_v20 = vld [vmem:[%s13776_s6 + $0x3c0] sm:$0xf]  ;;  %v8703_v21 = vor.u32 %v12537_v19, %v8702_v18  ;;  %v12569_v22 = vld [vmem:[%s13776_s6 + $0x3cc] sm:$0xf0]  ;;  %6493 = vmatpush.bf16.msra.mxu0 %v8447_v16 }
  0x2c   : > { %v8430_v23 = vld [vmem:[%s13776_s6 + $0xa0] sm:$0xf]  ;;  %v12469_v24 = vld [vmem:[%s13776_s6 + $0xac] sm:$0xf0]  ;;  %v8831_v25 = vor.u32 %v12569_v22, %v8830_v20  ;;  %6506 = vmatpush.bf16.msra.mxu1 %v8575_v17 }
  0x2d   : > { %v8558_v26 = vld [vmem:[%s13776_s6 + $0x1a0] sm:$0xf]  ;;  %v12501_v27 = vld [vmem:[%s13776_s6 + $0x1ac] sm:$0xf0]  ;;  %v8431_v29 = vor.u32 %v12469_v24, %v8430_v23  ;;  %6519 = vmatpush.bf16.msra.mxu2 %v8703_v21 }
  0x2e   : > { %v8686_v28 = vld [vmem:[%s13776_s6 + $0x2a0] sm:$0xf]  ;;  %v12533_v30 = vld [vmem:[%s13776_s6 + $0x2ac] sm:$0xf0]  ;;  %v8559_v33 = vor.u32 %v12501_v27, %v8558_v26  ;;  %6532 = vmatpush.bf16.msra.mxu3 %v8831_v25 }
  0x2f   : > { %v8814_v31 = vld [vmem:[%s13776_s6 + $0x3a0] sm:$0xf]  ;;  %v12565_v32 = vld [vmem:[%s13776_s6 + $0x3ac] sm:$0xf0]  ;;  %v8687_v34 = vor.u32 %v12533_v30, %v8686_v28  ;;  %6494 = vmatpush.bf16.msra.mxu0 %v8431_v29 }
  0x30   : > { %v8414_v35 = vld [vmem:[%s13776_s6 + $0x80] sm:$0xf]  ;;  %v12465_v36 = vld [vmem:[%s13776_s6 + $0x8c] sm:$0xf0]  ;;  %v8815_v38 = vor.u32 %v12565_v32, %v8814_v31  ;;  %6507 = vmatpush.bf16.msra.mxu1 %v8559_v33 }
  0x31   : > { %v8542_v37 = vld [vmem:[%s13776_s6 + $0x180] sm:$0xf]  ;;  %v12497_v39 = vld [vmem:[%s13776_s6 + $0x18c] sm:$0xf0]  ;;  %v8415_v44 = vor.u32 %v12465_v36, %v8414_v35  ;;  %6520 = vmatpush.bf16.msra.mxu2 %v8687_v34 }
  0x32   : > { %v8670_v40 = vld [vmem:[%s13776_s6 + $0x280] sm:$0xf]  ;;  %v12529_v41 = vld [vmem:[%s13776_s6 + $0x28c] sm:$0xf0]  ;;  %v8543_v45 = vor.u32 %v12497_v39, %v8542_v37  ;;  %6533 = vmatpush.bf16.msra.mxu3 %v8815_v38 }
  0x33   : > { %v8798_v42 = vld [vmem:[%s13776_s6 + $0x380] sm:$0xf]  ;;  %v12561_v43 = vld [vmem:[%s13776_s6 + $0x38c] sm:$0xf0]  ;;  %v8671_v46 = vor.u32 %v12529_v41, %v8670_v40  ;;  %6495 = vmatpush.bf16.msra.mxu0 %v8415_v44 }
  0x34   : > { %v8398_v47 = vld [vmem:[%s13776_s6 + $0x60] sm:$0xf]  ;;  %v12461_v48 = vld [vmem:[%s13776_s6 + $0x6c] sm:$0xf0]  ;;  %v8799_v50 = vor.u32 %v12561_v43, %v8798_v42  ;;  %6508 = vmatpush.bf16.msra.mxu1 %v8543_v45 }
  0x35   : > { %v8526_v49 = vld [vmem:[%s13776_s6 + $0x160] sm:$0xf]  ;;  %v12493_v51 = vld [vmem:[%s13776_s6 + $0x16c] sm:$0xf0]  ;;  %v8399_v56 = vor.u32 %v12461_v48, %v8398_v47  ;;  %6521 = vmatpush.bf16.msra.mxu2 %v8671_v46 }
  0x36   : > { %v8654_v52 = vld [vmem:[%s13776_s6 + $0x260] sm:$0xf]  ;;  %v12525_v53 = vld [vmem:[%s13776_s6 + $0x26c] sm:$0xf0]  ;;  %v8527_v57 = vor.u32 %v12493_v51, %v8526_v49  ;;  %6534 = vmatpush.bf16.msra.mxu3 %v8799_v50 }
  0x37   : > { %v8782_v54 = vld [vmem:[%s13776_s6 + $0x360] sm:$0xf]  ;;  %v12557_v55 = vld [vmem:[%s13776_s6 + $0x36c] sm:$0xf0]  ;;  %v8655_v58 = vor.u32 %v12525_v53, %v8654_v52  ;;  %6496 = vmatpush.bf16.msra.mxu0 %v8399_v56 }
  0x38   : > { %v8382_v59 = vld [vmem:[%s13776_s6 + $0x40] sm:$0xf]  ;;  %v12457_v60 = vld [vmem:[%s13776_s6 + $0x4c] sm:$0xf0]  ;;  %v8783_v62 = vor.u32 %v12557_v55, %v8782_v54  ;;  %6509 = vmatpush.bf16.msra.mxu1 %v8527_v57 }
  0x39   : > { %v8510_v61 = vld [vmem:[%s13776_s6 + $0x140] sm:$0xf]  ;;  %v12489_v63 = vld [vmem:[%s13776_s6 + $0x14c] sm:$0xf0]  ;;  %v8383_v4 = vor.u32 %v12457_v60, %v8382_v59  ;;  %6522 = vmatpush.bf16.msra.mxu2 %v8655_v58  ;;  %v272_v59 = vld [vmem:[%s16095_s0] sm:$0xff] }
  0x3a   : > { %v8638_v0 = vld [vmem:[%s13776_s6 + $0x240] sm:$0xf]  ;;  %v12521_v1 = vld [vmem:[%s13776_s6 + $0x24c] sm:$0xf0]  ;;  %v8511_v5 = vor.u32 %v12489_v63, %v8510_v61  ;;  %6535 = vmatpush.bf16.msra.mxu3 %v8783_v62  ;;  %1301 = vst [vmem:[#allocation1] ss:$9 sm:$0xff] %v272_v59 }
  0x3b   : > { %v8766_v2 = vld [vmem:[%s13776_s6 + $0x340] sm:$0xf]  ;;  %v12553_v3 = vld [vmem:[%s13776_s6 + $0x34c] sm:$0xf0]  ;;  %v8639_v6 = vor.u32 %v12521_v1, %v8638_v0  ;;  %6497 = vmatpush.bf16.msra.mxu0 %v8383_v4 }
  0x3c   : > { %v8366_v7 = vld [vmem:[%s13776_s6 + $0x20] sm:$0xf]  ;;  %v12453_v8 = vld [vmem:[%s13776_s6 + $0x2c] sm:$0xf0]  ;;  %v8767_v10 = vor.u32 %v12553_v3, %v8766_v2  ;;  %6510 = vmatpush.bf16.msra.mxu1 %v8511_v5 }
  0x3d   : > { %v8494_v9 = vld [vmem:[%s13776_s6 + $0x120] sm:$0xf]  ;;  %v12485_v11 = vld [vmem:[%s13776_s6 + $0x12c] sm:$0xf0]  ;;  %v8367_v16 = vor.u32 %v12453_v8, %v8366_v7  ;;  %6523 = vmatpush.bf16.msra.mxu2 %v8639_v6 }
  0x3e   : > { %v8622_v12 = vld [vmem:[%s13776_s6 + $0x220] sm:$0xf]  ;;  %v12517_v13 = vld [vmem:[%s13776_s6 + $0x22c] sm:$0xf0]  ;;  %v8495_v19 = vor.u32 %v12485_v11, %v8494_v9  ;;  %6536 = vmatpush.bf16.msra.mxu3 %v8767_v10 }
  0x3f   : > { %v8750_v14 = vld [vmem:[%s13776_s6 + $0x320] sm:$0xf]  ;;  %v12549_v15 = vld [vmem:[%s13776_s6 + $0x32c] sm:$0xf0]  ;;  %v8623_v20 = vor.u32 %v12517_v13, %v8622_v12  ;;  %6498 = vmatpush.bf16.msra.mxu0 %v8367_v16 }
  0x40   : > { %v8350_v17 = vld [vmem:[%s13776_s6] sm:$0xf]  ;;  %v12449_v18 = vld [vmem:[%s13776_s6 + $0xc] sm:$0xf0]  ;;  %v8751_v24 = vor.u32 %v12549_v15, %v8750_v14  ;;  %6511 = vmatpush.bf16.msra.mxu1 %v8495_v19 }
  0x41   : > { %v8478_v21 = vld [vmem:[%s13776_s6 + $0x100] sm:$0xf]  ;;  %v12481_v22 = vld [vmem:[%s13776_s6 + $0x10c] sm:$0xf0]  ;;  %v8351_v31 = vor.u32 %v12449_v18, %v8350_v17  ;;  %6524 = vmatpush.bf16.msra.mxu2 %v8623_v20 }
  0x42   : > { %v8606_v23 = vld [vmem:[%s13776_s6 + $0x200] sm:$0xf]  ;;  %v12513_v25 = vld [vmem:[%s13776_s6 + $0x20c] sm:$0xf0]  ;;  %v8479_v35 = vor.u32 %v12481_v22, %v8478_v21  ;;  %6537 = vmatpush.bf16.msra.mxu3 %v8751_v24  ;;  %v13893_v21 = vld [vmem:[#allocation1] sm:$0xff] }
  0x43   : > { %v8734_v26 = vld [vmem:[%s13776_s6 + $0x300] sm:$0xf]  ;;  %v12545_v27 = vld [vmem:[%s13776_s6 + $0x30c] sm:$0xf0]  ;;  %v8607_v36 = vor.u32 %v12513_v25, %v8606_v23  ;;  %6499 = vmatpush.bf16.msra.mxu0 %v8351_v31 }
  0x44   : > { %v8974_v28 = vld [vmem:[%s13776_s6 + $0x4e0] sm:$0xf]  ;;  %v12605_v29 = vld [vmem:[%s13776_s6 + $0x4ec] sm:$0xf0]  ;;  %v8735_v39 = vor.u32 %v12545_v27, %v8734_v26  ;;  %6512 = vmatpush.bf16.msra.mxu1 %v8479_v35 }
  0x45   : > { %v9102_v30 = vld [vmem:[%s13776_s6 + $0x5e0] sm:$0xf]  ;;  %v12637_v32 = vld [vmem:[%s13776_s6 + $0x5ec] sm:$0xf0]  ;;  %v8975_v40 = vor.u32 %v12605_v29, %v8974_v28  ;;  %6525 = vmatpush.bf16.msra.mxu2 %v8607_v36 }
  0x46   : > { %v9230_v33 = vld [vmem:[%s13776_s6 + $0x6e0] sm:$0xf]  ;;  %v12669_v34 = vld [vmem:[%s13776_s6 + $0x6ec] sm:$0xf0]  ;;  %v9103_v41 = vor.u32 %v12637_v32, %v9102_v30  ;;  %6538 = vmatpush.bf16.msra.mxu3 %v8735_v39  ;;  %6500 = vmatmul.bf16.vlgmr.msra.gmra.mxu0 %v13893_v21 }
  0x47   : > { %v9358_v37 = vld [vmem:[%s13776_s6 + $0x7e0] sm:$0xf]  ;;  %v12701_v38 = vld [vmem:[%s13776_s6 + $0x7ec] sm:$0xf0]  ;;  %v9231_v42 = vor.u32 %v12669_v34, %v9230_v33  ;;  %6544 = vmatpush.bf16.msrb.mxu0 %v8975_v40 }
  0x48   : > { %v8958_v43 = vld [vmem:[%s13776_s6 + $0x4c0] sm:$0xf]  ;;  %v12601_v44 = vld [vmem:[%s13776_s6 + $0x4cc] sm:$0xf0]  ;;  %v9359_v46 = vor.u32 %v12701_v38, %v9358_v37  ;;  %6557 = vmatpush.bf16.msrb.mxu1 %v9103_v41 }
  0x49   : > { %v9086_v45 = vld [vmem:[%s13776_s6 + $0x5c0] sm:$0xf]  ;;  %v12633_v47 = vld [vmem:[%s13776_s6 + $0x5cc] sm:$0xf0]  ;;  %v8959_v52 = vor.u32 %v12601_v44, %v8958_v43  ;;  %6570 = vmatpush.bf16.msrb.mxu2 %v9231_v42 }
  0x4a   : > { %v9214_v48 = vld [vmem:[%s13776_s6 + $0x6c0] sm:$0xf]  ;;  %v12665_v49 = vld [vmem:[%s13776_s6 + $0x6cc] sm:$0xf0]  ;;  %v9087_v55 = vor.u32 %v12633_v47, %v9086_v45  ;;  %6583 = vmatpush.bf16.msrb.mxu3 %v9359_v46 }
  0x4b   : > { %v9342_v50 = vld [vmem:[%s13776_s6 + $0x7c0] sm:$0xf]  ;;  %v12697_v51 = vld [vmem:[%s13776_s6 + $0x7cc] sm:$0xf0]  ;;  %v9215_v56 = vor.u32 %v12665_v49, %v9214_v48  ;;  %6545 = vmatpush.bf16.msrb.mxu0 %v8959_v52 }
  0x4c   : > { %v8942_v53 = vld [vmem:[%s13776_s6 + $0x4a0] sm:$0xf]  ;;  %v12597_v54 = vld [vmem:[%s13776_s6 + $0x4ac] sm:$0xf0]  ;;  %v9343_v60 = vor.u32 %v12697_v51, %v9342_v50  ;;  %6558 = vmatpush.bf16.msrb.mxu1 %v9087_v55 }
  0x4d   : > { %v9070_v57 = vld [vmem:[%s13776_s6 + $0x5a0] sm:$0xf]  ;;  %v12629_v58 = vld [vmem:[%s13776_s6 + $0x5ac] sm:$0xf0]  ;;  %v8943_v1 = vor.u32 %v12597_v54, %v8942_v53  ;;  %6571 = vmatpush.bf16.msrb.mxu2 %v9215_v56 }
  0x4e   : > { %v9198_v61 = vld [vmem:[%s13776_s6 + $0x6a0] sm:$0xf]  ;;  %v12661_v62 = vld [vmem:[%s13776_s6 + $0x6ac] sm:$0xf0]  ;;  %v9071_v2 = vor.u32 %v12629_v58, %v9070_v57  ;;  %6584 = vmatpush.bf16.msrb.mxu3 %v9343_v60 }
  0x4f   : > { %v9326_v63 = vld [vmem:[%s13776_s6 + $0x7a0] sm:$0xf]  ;;  %v12693_v0 = vld [vmem:[%s13776_s6 + $0x7ac] sm:$0xf0]  ;;  %v9199_v3 = vor.u32 %v12661_v62, %v9198_v61  ;;  %6546 = vmatpush.bf16.msrb.mxu0 %v8943_v1 }
  0x50   : > { %v8926_v4 = vld [vmem:[%s13776_s6 + $0x480] sm:$0xf]  ;;  %v12593_v5 = vld [vmem:[%s13776_s6 + $0x48c] sm:$0xf0]  ;;  %v9327_v7 = vor.u32 %v12693_v0, %v9326_v63  ;;  %6559 = vmatpush.bf16.msrb.mxu1 %v9071_v2 }
  0x51   : > { %v9054_v6 = vld [vmem:[%s13776_s6 + $0x580] sm:$0xf]  ;;  %v12625_v8 = vld [vmem:[%s13776_s6 + $0x58c] sm:$0xf0]  ;;  %v8927_v14 = vor.u32 %v12593_v5, %v8926_v4  ;;  %6572 = vmatpush.bf16.msrb.mxu2 %v9199_v3 }
  0x52   : > { %v9182_v9 = vld [vmem:[%s13776_s6 + $0x680] sm:$0xf]  ;;  %v12657_v10 = vld [vmem:[%s13776_s6 + $0x68c] sm:$0xf0]  ;;  %v9055_v18 = vor.u32 %v12625_v8, %v9054_v6  ;;  %6585 = vmatpush.bf16.msrb.mxu3 %v9327_v7 }
  0x53   : > { %v9310_v11 = vld [vmem:[%s13776_s6 + $0x780] sm:$0xf]  ;;  %v12689_v12 = vld [vmem:[%s13776_s6 + $0x78c] sm:$0xf0]  ;;  %v9183_v19 = vor.u32 %v12657_v10, %v9182_v9  ;;  %6547 = vmatpush.bf16.msrb.mxu0 %v8927_v14 }
  0x54   : > { %v8910_v13 = vld [vmem:[%s13776_s6 + $0x460] sm:$0xf]  ;;  %v12589_v15 = vld [vmem:[%s13776_s6 + $0x46c] sm:$0xf0]  ;;  %v9311_v23 = vor.u32 %v12689_v12, %v9310_v11  ;;  %6560 = vmatpush.bf16.msrb.mxu1 %v9055_v18 }
  0x55   : > { %v9038_v16 = vld [vmem:[%s13776_s6 + $0x560] sm:$0xf]  ;;  %v12621_v17 = vld [vmem:[%s13776_s6 + $0x56c] sm:$0xf0]  ;;  %v8911_v29 = vor.u32 %v12589_v15, %v8910_v13  ;;  %6573 = vmatpush.bf16.msrb.mxu2 %v9183_v19 }
  0x56   : > { %v13891_v20 = vld [vmem:[#allocation1 + $0x12] sm:$0xff]  ;;  %v13895_v22 = vld [vmem:[#allocation1 + $0x1b] sm:$0xff]  ;;  %v9166_v24 = vld [vmem:[%s13776_s6 + $0x660] sm:$0xf]  ;;  %v9039_v30 = vor.u32 %v12621_v17, %v9038_v16  ;;  %6586 = vmatpush.bf16.msrb.mxu3 %v9311_v23 }
  0x57   : > { %v12653_v25 = vld [vmem:[%s13776_s6 + $0x66c] sm:$0xf0]  ;;  %6526 = vmatmul.bf16.vlgmr.msra.gmra.mxu2 %v13891_v20  ;;  %v13900_v26 = vld [vmem:[#allocation1 + $0x9] sm:$0xff]  ;;  %6539 = vmatmul.bf16.vlgmr.msra.gmra.mxu3 %v13895_v22 }
  0x58   : > { %v9294_v27 = vld [vmem:[%s13776_s6 + $0x760] sm:$0xf]  ;;  %v12685_v28 = vld [vmem:[%s13776_s6 + $0x76c] sm:$0xf0]  ;;  %6513 = vmatmul.bf16.vlgmr.msra.gmra.mxu1 %v13900_v26  ;;  %v9167_v31 = vor.u32 %v12653_v25, %v9166_v24  ;;  %6548 = vmatpush.bf16.msrb.mxu0 %v8911_v29 }
  0x59   : > { %v8894_v32 = vld [vmem:[%s13776_s6 + $0x440] sm:$0xf]  ;;  %v12585_v33 = vld [vmem:[%s13776_s6 + $0x44c] sm:$0xf0]  ;;  %v9295_v35 = vor.u32 %v12685_v28, %v9294_v27  ;;  %6561 = vmatpush.bf16.msrb.mxu1 %v9039_v30 }
  0x5a   : > { %v9022_v34 = vld [vmem:[%s13776_s6 + $0x540] sm:$0xf]  ;;  %v12617_v36 = vld [vmem:[%s13776_s6 + $0x54c] sm:$0xf0]  ;;  %v8895_v41 = vor.u32 %v12585_v33, %v8894_v32  ;;  %6574 = vmatpush.bf16.msrb.mxu2 %v9167_v31  ;;  %v13951_v32 = vld [vmem:[#allocation1 + $0x3f] sm:$0xff] }
  0x5b   : > { %v9150_v37 = vld [vmem:[%s13776_s6 + $0x640] sm:$0xf]  ;;  %v12649_v38 = vld [vmem:[%s13776_s6 + $0x64c] sm:$0xf0]  ;;  %v9023_v42 = vor.u32 %v12617_v36, %v9022_v34  ;;  %6587 = vmatpush.bf16.msrb.mxu3 %v9295_v35 }
  0x5c   : > { %v9278_v39 = vld [vmem:[%s13776_s6 + $0x740] sm:$0xf]  ;;  %v12681_v40 = vld [vmem:[%s13776_s6 + $0x74c] sm:$0xf0]  ;;  %v9151_v43 = vor.u32 %v12649_v38, %v9150_v37  ;;  %6549 = vmatpush.bf16.msrb.mxu0 %v8895_v41  ;;  %v13956_v38 = vld [vmem:[#allocation1 + $0x2d] sm:$0xff] }
  0x5d   : > { %v8878_v44 = vld [vmem:[%s13776_s6 + $0x420] sm:$0xf]  ;;  %v12581_v45 = vld [vmem:[%s13776_s6 + $0x42c] sm:$0xf0]  ;;  %v9279_v47 = vor.u32 %v12681_v40, %v9278_v39  ;;  %6562 = vmatpush.bf16.msrb.mxu1 %v9023_v42 }
  0x5e   : > { %v9006_v46 = vld [vmem:[%s13776_s6 + $0x520] sm:$0xf]  ;;  %v12613_v48 = vld [vmem:[%s13776_s6 + $0x52c] sm:$0xf0]  ;;  %v8879_v53 = vor.u32 %v12581_v45, %v8878_v44  ;;  %6575 = vmatpush.bf16.msrb.mxu2 %v9151_v43 }
  0x5f   : > { %v9134_v49 = vld [vmem:[%s13776_s6 + $0x620] sm:$0xf]  ;;  %v12645_v50 = vld [vmem:[%s13776_s6 + $0x62c] sm:$0xf0]  ;;  %v9007_v56 = vor.u32 %v12613_v48, %v9006_v46  ;;  %6588 = vmatpush.bf16.msrb.mxu3 %v9279_v47 }
  0x60   : > { %v9262_v51 = vld [vmem:[%s13776_s6 + $0x720] sm:$0xf]  ;;  %v12677_v52 = vld [vmem:[%s13776_s6 + $0x72c] sm:$0xf0]  ;;  %v9135_v57 = vor.u32 %v12645_v50, %v9134_v49  ;;  %6550 = vmatpush.bf16.msrb.mxu0 %v8879_v53 }
  0x61   : > { %v8862_v54 = vld [vmem:[%s13776_s6 + $0x400] sm:$0xf]  ;;  %v12577_v55 = vld [vmem:[%s13776_s6 + $0x40c] sm:$0xf0]  ;;  %v9263_v61 = vor.u32 %v12677_v52, %v9262_v51  ;;  %6563 = vmatpush.bf16.msrb.mxu1 %v9007_v56 }
  0x62   : > { %v8990_v58 = vld [vmem:[%s13776_s6 + $0x500] sm:$0xf]  ;;  %v12609_v59 = vld [vmem:[%s13776_s6 + $0x50c] sm:$0xf0]  ;;  %v8863_v4 = vor.u32 %v12577_v55, %v8862_v54  ;;  %6576 = vmatpush.bf16.msrb.mxu2 %v9135_v57 }
  0x63   : > { %v9118_v60 = vld [vmem:[%s13776_s6 + $0x600] sm:$0xf]  ;;  %v12641_v62 = vld [vmem:[%s13776_s6 + $0x60c] sm:$0xf0]  ;;  %v8991_v8 = vor.u32 %v12609_v59, %v8990_v58  ;;  %6589 = vmatpush.bf16.msrb.mxu3 %v9263_v61 }
  0x64   : > { %v9246_v63 = vld [vmem:[%s13776_s6 + $0x700] sm:$0xf]  ;;  %v12673_v0 = vld [vmem:[%s13776_s6 + $0x70c] sm:$0xf0]  ;;  %v9119_v9 = vor.u32 %v12641_v62, %v9118_v60  ;;  %6551 = vmatpush.bf16.msrb.mxu0 %v8863_v4 }
  0x65   : > { %v9486_v1 = vld [vmem:[%s13776_s6 + $0x8e0] sm:$0xf]  ;;  %v12733_v2 = vld [vmem:[%s13776_s6 + $0x8ec] sm:$0xf0]  ;;  %v9247_v12 = vor.u32 %v12673_v0, %v9246_v63  ;;  %6564 = vmatpush.bf16.msrb.mxu1 %v8991_v8 }
  0x66   : > { %v9614_v3 = vld [vmem:[%s13776_s6 + $0x9e0] sm:$0xf]  ;;  %v12765_v5 = vld [vmem:[%s13776_s6 + $0x9ec] sm:$0xf0]  ;;  %v9487_v13 = vor.u32 %v12733_v2, %v9486_v1  ;;  %6577 = vmatpush.bf16.msrb.mxu2 %v9119_v9 }
  0x67   : > { %v9742_v6 = vld [vmem:[%s13776_s6 + $0xae0] sm:$0xf]  ;;  %v12797_v7 = vld [vmem:[%s13776_s6 + $0xaec] sm:$0xf0]  ;;  %v9615_v14 = vor.u32 %v12765_v5, %v9614_v3  ;;  %6590 = vmatpush.bf16.msrb.mxu3 %v9247_v12 }
  0x68   : > { %v9870_v10 = vld [vmem:[%s13776_s6 + $0xbe0] sm:$0xf]  ;;  %v12829_v11 = vld [vmem:[%s13776_s6 + $0xbec] sm:$0xf0]  ;;  %v9743_v15 = vor.u32 %v12797_v7, %v9742_v6  ;;  %6596 = vmatpush.bf16.msra.mxu0 %v9487_v13  ;;  %6565 = vmatmul.bf16.vlgmr.msrb.gmra.mxu1 %v13956_v38 }
  0x69   : > { %v9470_v16 = vld [vmem:[%s13776_s6 + $0x8c0] sm:$0xf]  ;;  %v12729_v17 = vld [vmem:[%s13776_s6 + $0x8cc] sm:$0xf0]  ;;  %v9871_v19 = vor.u32 %v12829_v11, %v9870_v10  ;;  %6609 = vmatpush.bf16.msra.mxu1 %v9615_v14 }
  0x6a   : > { %v9598_v18 = vld [vmem:[%s13776_s6 + $0x9c0] sm:$0xf]  ;;  %v12761_v23 = vld [vmem:[%s13776_s6 + $0x9cc] sm:$0xf0]  ;;  %v9471_v30 = vor.u32 %v12729_v17, %v9470_v16  ;;  %6622 = vmatpush.bf16.msra.mxu2 %v9743_v15  ;;  %6591 = vmatmul.bf16.vlgmr.msrb.gmra.mxu3 %v13951_v32 }
  0x6b   : > { %v9726_v24 = vld [vmem:[%s13776_s6 + $0xac0] sm:$0xf]  ;;  %v12793_v25 = vld [vmem:[%s13776_s6 + $0xacc] sm:$0xf0]  ;;  %v9599_v34 = vor.u32 %v12761_v23, %v9598_v18  ;;  %6635 = vmatpush.bf16.msra.mxu3 %v9871_v19 }
  0x6c   : > { %v9854_v27 = vld [vmem:[%s13776_s6 + $0xbc0] sm:$0xf]  ;;  %v12825_v28 = vld [vmem:[%s13776_s6 + $0xbcc] sm:$0xf0]  ;;  %v9727_v35 = vor.u32 %v12793_v25, %v9726_v24  ;;  %6597 = vmatpush.bf16.msra.mxu0 %v9471_v30 }
  0x6d   : > { %v13947_v29 = vld [vmem:[#allocation1 + $0x36] sm:$0xff]  ;;  %v13949_v31 = vld [vmem:[#allocation1 + $0x24] sm:$0xff]  ;;  %v9855_v39 = vor.u32 %v12825_v28, %v9854_v27  ;;  %6610 = vmatpush.bf16.msra.mxu1 %v9599_v34 }
  0x6e   : > { %v9454_v33 = vld [vmem:[%s13776_s6 + $0x8a0] sm:$0xf]  ;;  %v12725_v36 = vld [vmem:[%s13776_s6 + $0x8ac] sm:$0xf0]  ;;  %6578 = vmatmul.bf16.vlgmr.msrb.gmra.mxu2 %v13947_v29  ;;  %6552 = vmatmul.bf16.vlgmr.msrb.gmra.mxu0 %v13949_v31 }
  0x6f   : > { %v9582_v37 = vld [vmem:[%s13776_s6 + $0x9a0] sm:$0xf]  ;;  %v12757_v40 = vld [vmem:[%s13776_s6 + $0x9ac] sm:$0xf0]  ;;  %v9455_v45 = vor.u32 %v12725_v36, %v9454_v33  ;;  %6623 = vmatpush.bf16.msra.mxu2 %v9727_v35  ;;  %6636 = vmatpush.bf16.msra.mxu3 %v9855_v39 }
  0x70   : > { %v9710_v41 = vld [vmem:[%s13776_s6 + $0xaa0] sm:$0xf]  ;;  %v12789_v42 = vld [vmem:[%s13776_s6 + $0xaac] sm:$0xf0]  ;;  %v9583_v46 = vor.u32 %v12757_v40, %v9582_v37 }
  0x71   : > { %v9838_v43 = vld [vmem:[%s13776_s6 + $0xba0] sm:$0xf]  ;;  %v12821_v44 = vld [vmem:[%s13776_s6 + $0xbac] sm:$0xf0]  ;;  %v9711_v47 = vor.u32 %v12789_v42, %v9710_v41  ;;  %6598 = vmatpush.bf16.msra.mxu0 %v9455_v45 }
  0x72   : > { %v9438_v48 = vld [vmem:[%s13776_s6 + $0x880] sm:$0xf]  ;;  %v12721_v49 = vld [vmem:[%s13776_s6 + $0x88c] sm:$0xf0]  ;;  %v9839_v51 = vor.u32 %v12821_v44, %v9838_v43  ;;  %6611 = vmatpush.bf16.msra.mxu1 %v9583_v46 }
  0x73   : > { %v9566_v50 = vld [vmem:[%s13776_s6 + $0x980] sm:$0xf]  ;;  %v12753_v52 = vld [vmem:[%s13776_s6 + $0x98c] sm:$0xf0]  ;;  %v9439_v58 = vor.u32 %v12721_v49, %v9438_v48  ;;  %6624 = vmatpush.bf16.msra.mxu2 %v9711_v47 }
  0x74   : > { %v9694_v53 = vld [vmem:[%s13776_s6 + $0xa80] sm:$0xf]  ;;  %v12785_v54 = vld [vmem:[%s13776_s6 + $0xa8c] sm:$0xf0]  ;;  %v9567_v59 = vor.u32 %v12753_v52, %v9566_v50  ;;  %6637 = vmatpush.bf16.msra.mxu3 %v9839_v51 }
  0x75   : > { %v9822_v55 = vld [vmem:[%s13776_s6 + $0xb80] sm:$0xf]  ;;  %v12817_v56 = vld [vmem:[%s13776_s6 + $0xb8c] sm:$0xf0]  ;;  %v9695_v60 = vor.u32 %v12785_v54, %v9694_v53  ;;  %6599 = vmatpush.bf16.msra.mxu0 %v9439_v58 }
  0x76   : > { %v273_v57 = vld [vmem:[%s16095_s0 + $0x8] sm:$0xff]  ;;  %v12717_v62 = vld [vmem:[%s13776_s6 + $0x86c] sm:$0xf0]  ;;  %v9823_v0 = vor.u32 %v12817_v56, %v9822_v55  ;;  %6612 = vmatpush.bf16.msra.mxu1 %v9567_v59 }
  0x77   : > { %1311 = vst [vmem:[#allocation1] ss:$9 sm:$0xff] %v273_v57  ;;  %v9422_v61 = vld [vmem:[%s13776_s6 + $0x860] sm:$0xf]  ;;  %v12749_v1 = vld [vmem:[%s13776_s6 + $0x96c] sm:$0xf0]  ;;  %6625 = vmatpush.bf16.msra.mxu2 %v9695_v60 }
  0x78   : > { %v9550_v63 = vld [vmem:[%s13776_s6 + $0x960] sm:$0xf]  ;;  %v12781_v3 = vld [vmem:[%s13776_s6 + $0xa6c] sm:$0xf0]  ;;  %v9423_v6 = vor.u32 %v12717_v62, %v9422_v61  ;;  %6638 = vmatpush.bf16.msra.mxu3 %v9823_v0 }
  0x79   : > { %v9678_v2 = vld [vmem:[%s13776_s6 + $0xa60] sm:$0xf]  ;;  %v12813_v5 = vld [vmem:[%s13776_s6 + $0xb6c] sm:$0xf0]  ;;  %v9551_v7 = vor.u32 %v12749_v1, %v9550_v63 }
  0x7a   : > { %v9806_v4 = vld [vmem:[%s13776_s6 + $0xb60] sm:$0xf]  ;;  %v9679_v8 = vor.u32 %v12781_v3, %v9678_v2  ;;  %v12713_v10 = vld [vmem:[%s13776_s6 + $0x84c] sm:$0xf0]  ;;  %6600 = vmatpush.bf16.msra.mxu0 %v9423_v6 }
  0x7b   : > { %v9406_v9 = vld [vmem:[%s13776_s6 + $0x840] sm:$0xf]  ;;  %v9807_v12 = vor.u32 %v12813_v5, %v9806_v4  ;;  %v12745_v13 = vld [vmem:[%s13776_s6 + $0x94c] sm:$0xf0]  ;;  %6613 = vmatpush.bf16.msra.mxu1 %v9551_v7 }
  0x7c   : > { %v9534_v11 = vld [vmem:[%s13776_s6 + $0x940] sm:$0xf]  ;;  %v12777_v15 = vld [vmem:[%s13776_s6 + $0xa4c] sm:$0xf0]  ;;  %v9407_v18 = vor.u32 %v12713_v10, %v9406_v9  ;;  %6626 = vmatpush.bf16.msra.mxu2 %v9679_v8 }
  0x7d   : > { %v9662_v14 = vld [vmem:[%s13776_s6 + $0xa40] sm:$0xf]  ;;  %v12809_v17 = vld [vmem:[%s13776_s6 + $0xb4c] sm:$0xf0]  ;;  %v9535_v19 = vor.u32 %v12745_v13, %v9534_v11  ;;  %6639 = vmatpush.bf16.msra.mxu3 %v9807_v12 }
  0x7e   : > { %v9790_v16 = vld [vmem:[%s13776_s6 + $0xb40] sm:$0xf]  ;;  %v9663_v23 = vor.u32 %v12777_v15, %v9662_v14  ;;  %v12709_v25 = vld [vmem:[%s13776_s6 + $0x82c] sm:$0xf0]  ;;  %6601 = vmatpush.bf16.msra.mxu0 %v9407_v18  ;;  %v14024_v8 = vld [vmem:[#allocation1] sm:$0xff] }
  0x7f   : > { %v9390_v24 = vld [vmem:[%s13776_s6 + $0x820] sm:$0xf]  ;;  %v9791_v28 = vor.u32 %v12809_v17, %v9790_v16  ;;  %v12741_v30 = vld [vmem:[%s13776_s6 + $0x92c] sm:$0xf0]  ;;  %6614 = vmatpush.bf16.msra.mxu1 %v9535_v19 }
  0x80   : > { %v9518_v27 = vld [vmem:[%s13776_s6 + $0x920] sm:$0xf]  ;;  %v12773_v34 = vld [vmem:[%s13776_s6 + $0xa2c] sm:$0xf0]  ;;  %v9391_v37 = vor.u32 %v12709_v25, %v9390_v24  ;;  %6627 = vmatpush.bf16.msra.mxu2 %v9663_v23 }
  0x81   : > { %v9646_v33 = vld [vmem:[%s13776_s6 + $0xa20] sm:$0xf]  ;;  %v12805_v36 = vld [vmem:[%s13776_s6 + $0xb2c] sm:$0xf0]  ;;  %v9519_v41 = vor.u32 %v12741_v30, %v9518_v27  ;;  %6640 = vmatpush.bf16.msra.mxu3 %v9791_v28 }
  0x82   : > { %v9774_v35 = vld [vmem:[%s13776_s6 + $0xb20] sm:$0xf]  ;;  %v12705_v40 = vld [vmem:[%s13776_s6 + $0x80c] sm:$0xf0]  ;;  %v9647_v42 = vor.u32 %v12773_v34, %v9646_v33  ;;  %6602 = vmatpush.bf16.msra.mxu0 %v9391_v37 }
  0x83   : > { %v9374_v39 = vld [vmem:[%s13776_s6 + $0x800] sm:$0xf]  ;;  %v12737_v44 = vld [vmem:[%s13776_s6 + $0x90c] sm:$0xf0]  ;;  %v9775_v46 = vor.u32 %v12805_v36, %v9774_v35  ;;  %6615 = vmatpush.bf16.msra.mxu1 %v9519_v41 }
  0x84   : > { %v9502_v43 = vld [vmem:[%s13776_s6 + $0x900] sm:$0xf]  ;;  %v12769_v47 = vld [vmem:[%s13776_s6 + $0xa0c] sm:$0xf0]  ;;  %v9375_v53 = vor.u32 %v12705_v40, %v9374_v39  ;;  %6628 = vmatpush.bf16.msra.mxu2 %v9647_v42 }
  0x85   : > { %v9630_v45 = vld [vmem:[%s13776_s6 + $0xa00] sm:$0xf]  ;;  %v12801_v49 = vld [vmem:[%s13776_s6 + $0xb0c] sm:$0xf0]  ;;  %v9503_v57 = vor.u32 %v12737_v44, %v9502_v43  ;;  %6641 = vmatpush.bf16.msra.mxu3 %v9775_v46 }
  0x86   : > { %v9758_v48 = vld [vmem:[%s13776_s6 + $0xb00] sm:$0xf]  ;;  %v12861_v51 = vld [vmem:[%s13776_s6 + $0xcec] sm:$0xf0]  ;;  %v9631_v58 = vor.u32 %v12769_v47, %v9630_v45  ;;  %6603 = vmatpush.bf16.msra.mxu0 %v9375_v53 }
  0x87   : > { %v9998_v50 = vld [vmem:[%s13776_s6 + $0xce0] sm:$0xf]  ;;  %v12893_v54 = vld [vmem:[%s13776_s6 + $0xdec] sm:$0xf0]  ;;  %v9759_v61 = vor.u32 %v12801_v49, %v9758_v48  ;;  %6616 = vmatpush.bf16.msra.mxu1 %v9503_v57 }
  0x88   : > { %v10126_v52 = vld [vmem:[%s13776_s6 + $0xde0] sm:$0xf]  ;;  %v12925_v56 = vld [vmem:[%s13776_s6 + $0xeec] sm:$0xf0]  ;;  %v9999_v62 = vor.u32 %v12861_v51, %v9998_v50  ;;  %6629 = vmatpush.bf16.msra.mxu2 %v9631_v58 }
  0x89   : > { %v10254_v55 = vld [vmem:[%s13776_s6 + $0xee0] sm:$0xf]  ;;  %v12957_v60 = vld [vmem:[%s13776_s6 + $0xfec] sm:$0xf0]  ;;  %v10127_v63 = vor.u32 %v12893_v54, %v10126_v52  ;;  %6642 = vmatpush.bf16.msra.mxu3 %v9759_v61  ;;  %6604 = vmatmul.bf16.vlgmr.msra.gmra.mxu0 %v14024_v8 }
  0x8a   : > { %v10382_v59 = vld [vmem:[%s13776_s6 + $0xfe0] sm:$0xf]  ;;  %v10255_v0 = vor.u32 %v12925_v56, %v10254_v55  ;;  %v12857_v2 = vld [vmem:[%s13776_s6 + $0xccc] sm:$0xf0]  ;;  %6648 = vmatpush.bf16.msrb.mxu0 %v9999_v62 }
  0x8b   : > { %v9982_v1 = vld [vmem:[%s13776_s6 + $0xcc0] sm:$0xf]  ;;  %v10383_v4 = vor.u32 %v12957_v60, %v10382_v59  ;;  %v12889_v5 = vld [vmem:[%s13776_s6 + $0xdcc] sm:$0xf0]  ;;  %6661 = vmatpush.bf16.msrb.mxu1 %v10127_v63 }
  0x8c   : > { %v10110_v3 = vld [vmem:[%s13776_s6 + $0xdc0] sm:$0xf]  ;;  %v12921_v7 = vld [vmem:[%s13776_s6 + $0xecc] sm:$0xf0]  ;;  %v9983_v13 = vor.u32 %v12857_v2, %v9982_v1  ;;  %6674 = vmatpush.bf16.msrb.mxu2 %v10255_v0 }
  0x8d   : > { %v10238_v6 = vld [vmem:[%s13776_s6 + $0xec0] sm:$0xf]  ;;  %v12953_v10 = vld [vmem:[%s13776_s6 + $0xfcc] sm:$0xf0]  ;;  %v10111_v16 = vor.u32 %v12889_v5, %v10110_v3  ;;  %6687 = vmatpush.bf16.msrb.mxu3 %v10383_v4 }
  0x8e   : > { %v10366_v9 = vld [vmem:[%s13776_s6 + $0xfc0] sm:$0xf]  ;;  %v14028_v11 = vld [vmem:[#allocation1 + $0x12] sm:$0xff]  ;;  %v14033_v15 = vld [vmem:[#allocation1 + $0x1b] sm:$0xff]  ;;  %v10239_v17 = vor.u32 %v12921_v7, %v10238_v6  ;;  %6649 = vmatpush.bf16.msrb.mxu0 %v9983_v13 }
  0x8f   : > { %v14030_v12 = vld [vmem:[#allocation1 + $0x9] sm:$0xff]  ;;  %v12853_v18 = vld [vmem:[%s13776_s6 + $0xcac] sm:$0xf0]  ;;  %v10367_v23 = vor.u32 %v12953_v10, %v10366_v9  ;;  %6630 = vmatmul.bf16.vlgmr.msra.gmra.mxu2 %v14028_v11  ;;  %6643 = vmatmul.bf16.vlgmr.msra.gmra.mxu3 %v14033_v15 }
  0x90   : > { %v9966_v14 = vld [vmem:[%s13776_s6 + $0xca0] sm:$0xf]  ;;  %v12885_v24 = vld [vmem:[%s13776_s6 + $0xdac] sm:$0xf0]  ;;  %6617 = vmatmul.bf16.vlgmr.msra.gmra.mxu1 %v14030_v12  ;;  %6675 = vmatpush.bf16.msrb.mxu2 %v10239_v17 }
  0x91   : > { %v10094_v19 = vld [vmem:[%s13776_s6 + $0xda0] sm:$0xf]  ;;  %v12917_v27 = vld [vmem:[%s13776_s6 + $0xeac] sm:$0xf0]  ;;  %v9967_v33 = vor.u32 %v12853_v18, %v9966_v14  ;;  %6662 = vmatpush.bf16.msrb.mxu1 %v10111_v16  ;;  %6688 = vmatpush.bf16.msrb.mxu3 %v10367_v23 }
  0x92   : > { %v10222_v25 = vld [vmem:[%s13776_s6 + $0xea0] sm:$0xf]  ;;  %v12949_v30 = vld [vmem:[%s13776_s6 + $0xfac] sm:$0xf0]  ;;  %v10095_v34 = vor.u32 %v12885_v24, %v10094_v19 }
  0x93   : > { %v10350_v28 = vld [vmem:[%s13776_s6 + $0xfa0] sm:$0xf]  ;;  %v10223_v35 = vor.u32 %v12917_v27, %v10222_v25  ;;  %v12849_v37 = vld [vmem:[%s13776_s6 + $0xc8c] sm:$0xf0]  ;;  %6650 = vmatpush.bf16.msrb.mxu0 %v9967_v33 }
  0x94   : > { %v9950_v36 = vld [vmem:[%s13776_s6 + $0xc80] sm:$0xf]  ;;  %v10351_v40 = vor.u32 %v12949_v30, %v10350_v28  ;;  %v12881_v41 = vld [vmem:[%s13776_s6 + $0xd8c] sm:$0xf0] }
  0x95   : > { %v10078_v39 = vld [vmem:[%s13776_s6 + $0xd80] sm:$0xf]  ;;  %v12913_v43 = vld [vmem:[%s13776_s6 + $0xe8c] sm:$0xf0]  ;;  %v9951_v46 = vor.u32 %v12849_v37, %v9950_v36  ;;  %6663 = vmatpush.bf16.msrb.mxu1 %v10095_v34  ;;  %6676 = vmatpush.bf16.msrb.mxu2 %v10223_v35 }
  0x96   : > { %v10206_v42 = vld [vmem:[%s13776_s6 + $0xe80] sm:$0xf]  ;;  %v12945_v45 = vld [vmem:[%s13776_s6 + $0xf8c] sm:$0xf0]  ;;  %v10079_v47 = vor.u32 %v12881_v41, %v10078_v39  ;;  %6689 = vmatpush.bf16.msrb.mxu3 %v10351_v40 }
  0x97   : > { %v10334_v44 = vld [vmem:[%s13776_s6 + $0xf80] sm:$0xf]  ;;  %v10207_v48 = vor.u32 %v12913_v43, %v10206_v42  ;;  %v12845_v50 = vld [vmem:[%s13776_s6 + $0xc6c] sm:$0xf0]  ;;  %6651 = vmatpush.bf16.msrb.mxu0 %v9951_v46 }
  0x98   : > { %v9934_v49 = vld [vmem:[%s13776_s6 + $0xc60] sm:$0xf]  ;;  %v10335_v52 = vor.u32 %v12945_v45, %v10334_v44  ;;  %v12877_v53 = vld [vmem:[%s13776_s6 + $0xd6c] sm:$0xf0] }
  0x99   : > { %v10062_v51 = vld [vmem:[%s13776_s6 + $0xd60] sm:$0xf]  ;;  %v12909_v55 = vld [vmem:[%s13776_s6 + $0xe6c] sm:$0xf0]  ;;  %v9935_v58 = vor.u32 %v12845_v50, %v9934_v49  ;;  %6664 = vmatpush.bf16.msrb.mxu1 %v10079_v47  ;;  %6677 = vmatpush.bf16.msrb.mxu2 %v10207_v48  ;;  %v14094_v48 = vld [vmem:[#allocation1 + $0x2d] sm:$0xff] }
  0x9a   : > { %v10190_v54 = vld [vmem:[%s13776_s6 + $0xe60] sm:$0xf]  ;;  %v12941_v57 = vld [vmem:[%s13776_s6 + $0xf6c] sm:$0xf0]  ;;  %v10063_v59 = vor.u32 %v12877_v53, %v10062_v51  ;;  %6690 = vmatpush.bf16.msrb.mxu3 %v10335_v52  ;;  %v14096_v49 = vld [vmem:[#allocation1 + $0x3f] sm:$0xff] }
  0x9b   : > { %v10318_v56 = vld [vmem:[%s13776_s6 + $0xf60] sm:$0xf]  ;;  %v10191_v60 = vor.u32 %v12909_v55, %v10190_v54  ;;  %v12841_v62 = vld [vmem:[%s13776_s6 + $0xc4c] sm:$0xf0]  ;;  %6652 = vmatpush.bf16.msrb.mxu0 %v9935_v58  ;;  %v274_v50 = vld [vmem:[%s16095_s0 + $0x10] sm:$0xff] }
  0x9c   : > { %v9918_v61 = vld [vmem:[%s13776_s6 + $0xc40] sm:$0xf]  ;;  %v10319_v0 = vor.u32 %v12941_v57, %v10318_v56  ;;  %v12873_v1 = vld [vmem:[%s13776_s6 + $0xd4c] sm:$0xf0] }
  0x9d   : > { %v10046_v63 = vld [vmem:[%s13776_s6 + $0xd40] sm:$0xf]  ;;  %v12905_v3 = vld [vmem:[%s13776_s6 + $0xe4c] sm:$0xf0]  ;;  %v9919_v6 = vor.u32 %v12841_v62, %v9918_v61  ;;  %6665 = vmatpush.bf16.msrb.mxu1 %v10063_v59  ;;  %6678 = vmatpush.bf16.msrb.mxu2 %v10191_v60 }
  0x9e   : > { %v10174_v2 = vld [vmem:[%s13776_s6 + $0xe40] sm:$0xf]  ;;  %v12937_v5 = vld [vmem:[%s13776_s6 + $0xf4c] sm:$0xf0]  ;;  %v10047_v9 = vor.u32 %v12873_v1, %v10046_v63  ;;  %6691 = vmatpush.bf16.msrb.mxu3 %v10319_v0 }
  0x9f   : > { %v10302_v4 = vld [vmem:[%s13776_s6 + $0xf40] sm:$0xf]  ;;  %v10175_v10 = vor.u32 %v12905_v3, %v10174_v2  ;;  %v12837_v13 = vld [vmem:[%s13776_s6 + $0xc2c] sm:$0xf0]  ;;  %6653 = vmatpush.bf16.msrb.mxu0 %v9919_v6 }
  0xa0   : > { %v9902_v7 = vld [vmem:[%s13776_s6 + $0xc20] sm:$0xf]  ;;  %v12869_v16 = vld [vmem:[%s13776_s6 + $0xd2c] sm:$0xf0]  ;;  %v10303_v17 = vor.u32 %v12937_v5, %v10302_v4 }
  0xa1   : > { %v10030_v14 = vld [vmem:[%s13776_s6 + $0xd20] sm:$0xf]  ;;  %v12901_v19 = vld [vmem:[%s13776_s6 + $0xe2c] sm:$0xf0]  ;;  %v9903_v28 = vor.u32 %v12837_v13, %v9902_v7  ;;  %6666 = vmatpush.bf16.msrb.mxu1 %v10047_v9  ;;  %6679 = vmatpush.bf16.msrb.mxu2 %v10175_v10 }
  0xa2   : > { %v10158_v18 = vld [vmem:[%s13776_s6 + $0xe20] sm:$0xf]  ;;  %v12933_v24 = vld [vmem:[%s13776_s6 + $0xf2c] sm:$0xf0]  ;;  %v10031_v36 = vor.u32 %v12869_v16, %v10030_v14  ;;  %6692 = vmatpush.bf16.msrb.mxu3 %v10303_v17 }
  0xa3   : > { %v10286_v23 = vld [vmem:[%s13776_s6 + $0xf20] sm:$0xf]  ;;  %v12833_v27 = vld [vmem:[%s13776_s6 + $0xc0c] sm:$0xf0]  ;;  %v10159_v37 = vor.u32 %v12901_v19, %v10158_v18  ;;  %6654 = vmatpush.bf16.msrb.mxu0 %v9903_v28 }
  0xa4   : > { %v9886_v25 = vld [vmem:[%s13776_s6 + $0xc00] sm:$0xf]  ;;  %v12865_v33 = vld [vmem:[%s13776_s6 + $0xd0c] sm:$0xf0]  ;;  %v10287_v43 = vor.u32 %v12933_v24, %v10286_v23 }
  0xa5   : > { %v10014_v30 = vld [vmem:[%s13776_s6 + $0xd00] sm:$0xf]  ;;  %v12897_v35 = vld [vmem:[%s13776_s6 + $0xe0c] sm:$0xf0]  ;;  %v9887_v51 = vor.u32 %v12833_v27, %v9886_v25  ;;  %6667 = vmatpush.bf16.msrb.mxu1 %v10031_v36  ;;  %6680 = vmatpush.bf16.msrb.mxu2 %v10159_v37 }
  0xa6   : > { %v10142_v34 = vld [vmem:[%s13776_s6 + $0xe00] sm:$0xf]  ;;  %v12929_v40 = vld [vmem:[%s13776_s6 + $0xf0c] sm:$0xf0]  ;;  %v10015_v54 = vor.u32 %v12865_v33, %v10014_v30  ;;  %6693 = vmatpush.bf16.msrb.mxu3 %v10287_v43 }
  0xa7   : > { %v10270_v39 = vld [vmem:[%s13776_s6 + $0xf00] sm:$0xf]  ;;  %v12989_v42 = vld [vmem:[%s13776_s6 + $0x10ec] sm:$0xf0]  ;;  %v10143_v55 = vor.u32 %v12897_v35, %v10142_v34  ;;  %6655 = vmatpush.bf16.msrb.mxu0 %v9887_v51 }
  0xa8   : > { %v10510_v41 = vld [vmem:[%s13776_s6 + $0x10e0] sm:$0xf]  ;;  %v13021_v45 = vld [vmem:[%s13776_s6 + $0x11ec] sm:$0xf0]  ;;  %v10271_v58 = vor.u32 %v12929_v40, %v10270_v39 }
  0xa9   : > { %v10638_v44 = vld [vmem:[%s13776_s6 + $0x11e0] sm:$0xf]  ;;  %v14092_v47 = vld [vmem:[#allocation1 + $0x36] sm:$0xff]  ;;  %v10511_v59 = vor.u32 %v12989_v42, %v10510_v41  ;;  %6668 = vmatpush.bf16.msrb.mxu1 %v10015_v54  ;;  %6681 = vmatpush.bf16.msrb.mxu2 %v10143_v55 }
  0xaa   : > { %v14090_v46 = vld [vmem:[#allocation1 + $0x24] sm:$0xff]  ;;  %v13053_v53 = vld [vmem:[%s13776_s6 + $0x12ec] sm:$0xf0]  ;;  %v10639_v60 = vor.u32 %v13021_v45, %v10638_v44  ;;  %6694 = vmatpush.bf16.msrb.mxu3 %v10271_v58 }
  0xab   : > { %v10766_v52 = vld [vmem:[%s13776_s6 + $0x12e0] sm:$0xf]  ;;  %1321 = vst [vmem:[#allocation1] ss:$9 sm:$0xff] %v274_v50  ;;  %v13085_v57 = vld [vmem:[%s13776_s6 + $0x13ec] sm:$0xf0]  ;;  %6700 = vmatpush.bf16.msra.mxu0 %v10511_v59 }
  0xac   : > { %v10894_v56 = vld [vmem:[%s13776_s6 + $0x13e0] sm:$0xf]  ;;  %v10767_v61 = vor.u32 %v13053_v53, %v10766_v52  ;;  %v12985_v63 = vld [vmem:[%s13776_s6 + $0x10cc] sm:$0xf0]  ;;  %6656 = vmatmul.bf16.vlgmr.msrb.gmra.mxu0 %v14090_v46  ;;  %6682 = vmatmul.bf16.vlgmr.msrb.gmra.mxu2 %v14092_v47 }
  0xad   : > { %v10494_v62 = vld [vmem:[%s13776_s6 + $0x10c0] sm:$0xf]  ;;  %v10895_v1 = vor.u32 %v13085_v57, %v10894_v56  ;;  %v13017_v2 = vld [vmem:[%s13776_s6 + $0x11cc] sm:$0xf0]  ;;  %6713 = vmatpush.bf16.msra.mxu1 %v10639_v60  ;;  %6695 = vmatmul.bf16.vlgmr.msrb.gmra.mxu3 %v14096_v49 }
  0xae   : > { %v10622_v0 = vld [vmem:[%s13776_s6 + $0x11c0] sm:$0xf]  ;;  %v13049_v4 = vld [vmem:[%s13776_s6 + $0x12cc] sm:$0xf0]  ;;  %v10495_v7 = vor.u32 %v12985_v63, %v10494_v62  ;;  %6726 = vmatpush.bf16.msra.mxu2 %v10767_v61  ;;  %6669 = vmatmul.bf16.vlgmr.msrb.gmra.mxu1 %v14094_v48 }
  0xaf   : > { %v10750_v3 = vld [vmem:[%s13776_s6 + $0x12c0] sm:$0xf]  ;;  %v13081_v6 = vld [vmem:[%s13776_s6 + $0x13cc] sm:$0xf0]  ;;  %v10623_v9 = vor.u32 %v13017_v2, %v10622_v0  ;;  %6739 = vmatpush.bf16.msra.mxu3 %v10895_v1 }
  0xb0   : > { %v10878_v5 = vld [vmem:[%s13776_s6 + $0x13c0] sm:$0xf]  ;;  %v10751_v10 = vor.u32 %v13049_v4, %v10750_v3  ;;  %v12981_v14 = vld [vmem:[%s13776_s6 + $0x10ac] sm:$0xf0]  ;;  %6701 = vmatpush.bf16.msra.mxu0 %v10495_v7 }
  0xb1   : > { %v10478_v13 = vld [vmem:[%s13776_s6 + $0x10a0] sm:$0xf]  ;;  %v10879_v17 = vor.u32 %v13081_v6, %v10878_v5  ;;  %v13013_v18 = vld [vmem:[%s13776_s6 + $0x11ac] sm:$0xf0]  ;;  %6714 = vmatpush.bf16.msra.mxu1 %v10623_v9 }
  0xb2   : > { %v10606_v16 = vld [vmem:[%s13776_s6 + $0x11a0] sm:$0xf]  ;;  %v13045_v23 = vld [vmem:[%s13776_s6 + $0x12ac] sm:$0xf0]  ;;  %v10479_v27 = vor.u32 %v12981_v14, %v10478_v13  ;;  %6727 = vmatpush.bf16.msra.mxu2 %v10751_v10 }
  0xb3   : > { %v10734_v19 = vld [vmem:[%s13776_s6 + $0x12a0] sm:$0xf]  ;;  %v13077_v25 = vld [vmem:[%s13776_s6 + $0x13ac] sm:$0xf0]  ;;  %v10607_v28 = vor.u32 %v13013_v18, %v10606_v16  ;;  %6740 = vmatpush.bf16.msra.mxu3 %v10879_v17 }
  0xb4   : > { %v10862_v24 = vld [vmem:[%s13776_s6 + $0x13a0] sm:$0xf]  ;;  %v10735_v30 = vor.u32 %v13045_v23, %v10734_v19  ;;  %v12977_v34 = vld [vmem:[%s13776_s6 + $0x108c] sm:$0xf0]  ;;  %6702 = vmatpush.bf16.msra.mxu0 %v10479_v27 }
  0xb5   : > { %v10462_v33 = vld [vmem:[%s13776_s6 + $0x1080] sm:$0xf]  ;;  %v10863_v36 = vor.u32 %v13077_v25, %v10862_v24  ;;  %v13009_v37 = vld [vmem:[%s13776_s6 + $0x118c] sm:$0xf0]  ;;  %6715 = vmatpush.bf16.msra.mxu1 %v10607_v28 }
  0xb6   : > { %v10590_v35 = vld [vmem:[%s13776_s6 + $0x1180] sm:$0xf]  ;;  %v13041_v40 = vld [vmem:[%s13776_s6 + $0x128c] sm:$0xf0]  ;;  %v10463_v43 = vor.u32 %v12977_v34, %v10462_v33  ;;  %6728 = vmatpush.bf16.msra.mxu2 %v10735_v30 }
  0xb7   : > { %v10718_v39 = vld [vmem:[%s13776_s6 + $0x1280] sm:$0xf]  ;;  %v13073_v42 = vld [vmem:[%s13776_s6 + $0x138c] sm:$0xf0]  ;;  %v10591_v44 = vor.u32 %v13009_v37, %v10590_v35  ;;  %6741 = vmatpush.bf16.msra.mxu3 %v10863_v36 }
  0xb8   : > { %v10846_v41 = vld [vmem:[%s13776_s6 + $0x1380] sm:$0xf]  ;;  %v10719_v45 = vor.u32 %v13041_v40, %v10718_v39  ;;  %v12973_v51 = vld [vmem:[%s13776_s6 + $0x106c] sm:$0xf0]  ;;  %6703 = vmatpush.bf16.msra.mxu0 %v10463_v43 }
  0xb9   : > { %v10446_v50 = vld [vmem:[%s13776_s6 + $0x1060] sm:$0xf]  ;;  %v10847_v53 = vor.u32 %v13073_v42, %v10846_v41  ;;  %v13005_v54 = vld [vmem:[%s13776_s6 + $0x116c] sm:$0xf0]  ;;  %6716 = vmatpush.bf16.msra.mxu1 %v10591_v44 }
  0xba   : > { %v10574_v52 = vld [vmem:[%s13776_s6 + $0x1160] sm:$0xf]  ;;  %v13037_v56 = vld [vmem:[%s13776_s6 + $0x126c] sm:$0xf0]  ;;  %v10447_v59 = vor.u32 %v12973_v51, %v10446_v50  ;;  %6729 = vmatpush.bf16.msra.mxu2 %v10719_v45 }
  0xbb   : > { %v10702_v55 = vld [vmem:[%s13776_s6 + $0x1260] sm:$0xf]  ;;  %v13069_v58 = vld [vmem:[%s13776_s6 + $0x136c] sm:$0xf0]  ;;  %v10575_v60 = vor.u32 %v13005_v54, %v10574_v52  ;;  %6742 = vmatpush.bf16.msra.mxu3 %v10847_v53 }
  0xbc   : > { %v10830_v57 = vld [vmem:[%s13776_s6 + $0x1360] sm:$0xf]  ;;  %v10703_v61 = vor.u32 %v13037_v56, %v10702_v55  ;;  %v12969_v63 = vld [vmem:[%s13776_s6 + $0x104c] sm:$0xf0]  ;;  %6704 = vmatpush.bf16.msra.mxu0 %v10447_v59 }
  0xbd   : > { %v10430_v62 = vld [vmem:[%s13776_s6 + $0x1040] sm:$0xf]  ;;  %v10831_v1 = vor.u32 %v13069_v58, %v10830_v57  ;;  %v13001_v2 = vld [vmem:[%s13776_s6 + $0x114c] sm:$0xf0]  ;;  %6717 = vmatpush.bf16.msra.mxu1 %v10575_v60 }
  0xbe   : > { %v10558_v0 = vld [vmem:[%s13776_s6 + $0x1140] sm:$0xf]  ;;  %v13033_v4 = vld [vmem:[%s13776_s6 + $0x124c] sm:$0xf0]  ;;  %v10431_v7 = vor.u32 %v12969_v63, %v10430_v62  ;;  %6730 = vmatpush.bf16.msra.mxu2 %v10703_v61 }
  0xbf   : > { %v10686_v3 = vld [vmem:[%s13776_s6 + $0x1240] sm:$0xf]  ;;  %v13065_v6 = vld [vmem:[%s13776_s6 + $0x134c] sm:$0xf0]  ;;  %v10559_v9 = vor.u32 %v13001_v2, %v10558_v0  ;;  %6743 = vmatpush.bf16.msra.mxu3 %v10831_v1 }
  0xc0   : > { %v10814_v5 = vld [vmem:[%s13776_s6 + $0x1340] sm:$0xf]  ;;  %v10687_v10 = vor.u32 %v13033_v4, %v10686_v3  ;;  %v12965_v14 = vld [vmem:[%s13776_s6 + $0x102c] sm:$0xf0]  ;;  %6705 = vmatpush.bf16.msra.mxu0 %v10431_v7 }
  0xc1   : > { %v10414_v13 = vld [vmem:[%s13776_s6 + $0x1020] sm:$0xf]  ;;  %v10815_v17 = vor.u32 %v13065_v6, %v10814_v5  ;;  %v12997_v18 = vld [vmem:[%s13776_s6 + $0x112c] sm:$0xf0]  ;;  %6718 = vmatpush.bf16.msra.mxu1 %v10559_v9  ;;  %v14179_v5 = vld [vmem:[#allocation1] sm:$0xff] }
  0xc2   : > { %v10542_v16 = vld [vmem:[%s13776_s6 + $0x1120] sm:$0xf]  ;;  %v13029_v23 = vld [vmem:[%s13776_s6 + $0x122c] sm:$0xf0]  ;;  %v10415_v27 = vor.u32 %v12965_v14, %v10414_v13  ;;  %6731 = vmatpush.bf16.msra.mxu2 %v10687_v10 }
  0xc3   : > { %v10670_v19 = vld [vmem:[%s13776_s6 + $0x1220] sm:$0xf]  ;;  %v13061_v25 = vld [vmem:[%s13776_s6 + $0x132c] sm:$0xf0]  ;;  %v10543_v33 = vor.u32 %v12997_v18, %v10542_v16  ;;  %6744 = vmatpush.bf16.msra.mxu3 %v10815_v17 }
  0xc4   : > { %v10798_v24 = vld [vmem:[%s13776_s6 + $0x1320] sm:$0xf]  ;;  %v12961_v30 = vld [vmem:[%s13776_s6 + $0x100c] sm:$0xf0]  ;;  %v10671_v34 = vor.u32 %v13029_v23, %v10670_v19  ;;  %6706 = vmatpush.bf16.msra.mxu0 %v10415_v27 }
  0xc5   : > { %v10398_v28 = vld [vmem:[%s13776_s6 + $0x1000] sm:$0xf]  ;;  %v12993_v36 = vld [vmem:[%s13776_s6 + $0x110c] sm:$0xf0]  ;;  %v10799_v39 = vor.u32 %v13061_v25, %v10798_v24  ;;  %6719 = vmatpush.bf16.msra.mxu1 %v10543_v33 }
  0xc6   : > { %v10526_v35 = vld [vmem:[%s13776_s6 + $0x1100] sm:$0xf]  ;;  %v13025_v40 = vld [vmem:[%s13776_s6 + $0x120c] sm:$0xf0]  ;;  %v10399_v50 = vor.u32 %v12961_v30, %v10398_v28  ;;  %6732 = vmatpush.bf16.msra.mxu2 %v10671_v34 }
  0xc7   : > { %v10654_v37 = vld [vmem:[%s13776_s6 + $0x1200] sm:$0xf]  ;;  %v13057_v42 = vld [vmem:[%s13776_s6 + $0x130c] sm:$0xf0]  ;;  %v10527_v54 = vor.u32 %v12993_v36, %v10526_v35  ;;  %6745 = vmatpush.bf16.msra.mxu3 %v10799_v39 }
  0xc8   : > { %v10782_v41 = vld [vmem:[%s13776_s6 + $0x1300] sm:$0xf]  ;;  %v13117_v44 = vld [vmem:[%s13776_s6 + $0x14ec] sm:$0xf0]  ;;  %v10655_v55 = vor.u32 %v13025_v40, %v10654_v37  ;;  %6707 = vmatpush.bf16.msra.mxu0 %v10399_v50 }
  0xc9   : > { %v11022_v43 = vld [vmem:[%s13776_s6 + $0x14e0] sm:$0xf]  ;;  %v13149_v51 = vld [vmem:[%s13776_s6 + $0x15ec] sm:$0xf0]  ;;  %v10783_v58 = vor.u32 %v13057_v42, %v10782_v41  ;;  %6720 = vmatpush.bf16.msra.mxu1 %v10527_v54 }
  0xca   : > { %v11150_v45 = vld [vmem:[%s13776_s6 + $0x15e0] sm:$0xf]  ;;  %v13181_v53 = vld [vmem:[%s13776_s6 + $0x16ec] sm:$0xf0]  ;;  %v11023_v59 = vor.u32 %v13117_v44, %v11022_v43  ;;  %6733 = vmatpush.bf16.msra.mxu2 %v10655_v55 }
  0xcb   : > { %v11278_v52 = vld [vmem:[%s13776_s6 + $0x16e0] sm:$0xf]  ;;  %v13213_v57 = vld [vmem:[%s13776_s6 + $0x17ec] sm:$0xf0]  ;;  %v11151_v60 = vor.u32 %v13149_v51, %v11150_v45  ;;  %6746 = vmatpush.bf16.msra.mxu3 %v10783_v58  ;;  %6708 = vmatmul.bf16.vlgmr.msra.gmra.mxu0 %v14179_v5 }
  0xcc   : > { %v11406_v56 = vld [vmem:[%s13776_s6 + $0x17e0] sm:$0xf]  ;;  %v11279_v61 = vor.u32 %v13181_v53, %v11278_v52  ;;  %v13113_v63 = vld [vmem:[%s13776_s6 + $0x14cc] sm:$0xf0]  ;;  %6752 = vmatpush.bf16.msrb.mxu0 %v11023_v59 }
  0xcd   : > { %v11006_v62 = vld [vmem:[%s13776_s6 + $0x14c0] sm:$0xf]  ;;  %v11407_v1 = vor.u32 %v13213_v57, %v11406_v56  ;;  %v13145_v2 = vld [vmem:[%s13776_s6 + $0x15cc] sm:$0xf0]  ;;  %6765 = vmatpush.bf16.msrb.mxu1 %v11151_v60 }
  0xce   : > { %v11134_v0 = vld [vmem:[%s13776_s6 + $0x15c0] sm:$0xf]  ;;  %v13177_v4 = vld [vmem:[%s13776_s6 + $0x16cc] sm:$0xf0]  ;;  %v11007_v14 = vor.u32 %v13113_v63, %v11006_v62  ;;  %6778 = vmatpush.bf16.msrb.mxu2 %v11279_v61 }
  0xcf   : > { %v11262_v3 = vld [vmem:[%s13776_s6 + $0x16c0] sm:$0xf]  ;;  %v13209_v7 = vld [vmem:[%s13776_s6 + $0x17cc] sm:$0xf0]  ;;  %v11135_v16 = vor.u32 %v13145_v2, %v11134_v0  ;;  %6791 = vmatpush.bf16.msrb.mxu3 %v11407_v1 }
  0xd0   : > { %v11390_v6 = vld [vmem:[%s13776_s6 + $0x17c0] sm:$0xf]  ;;  %v14183_v9 = vld [vmem:[#allocation1 + $0x12] sm:$0xff]  ;;  %v14187_v13 = vld [vmem:[#allocation1 + $0x1b] sm:$0xff]  ;;  %v11263_v17 = vor.u32 %v13177_v4, %v11262_v3  ;;  %6753 = vmatpush.bf16.msrb.mxu0 %v11007_v14 }
  0xd1   : > { %v14185_v10 = vld [vmem:[#allocation1 + $0x9] sm:$0xff]  ;;  %v13109_v19 = vld [vmem:[%s13776_s6 + $0x14ac] sm:$0xf0]  ;;  %v11391_v24 = vor.u32 %v13209_v7, %v11390_v6  ;;  %6734 = vmatmul.bf16.vlgmr.msra.gmra.mxu2 %v14183_v9  ;;  %6747 = vmatmul.bf16.vlgmr.msra.gmra.mxu3 %v14187_v13 }
  0xd2   : > { %v10990_v18 = vld [vmem:[%s13776_s6 + $0x14a0] sm:$0xf]  ;;  %v13141_v25 = vld [vmem:[%s13776_s6 + $0x15ac] sm:$0xf0]  ;;  %6721 = vmatmul.bf16.vlgmr.msra.gmra.mxu1 %v14185_v10  ;;  %6779 = vmatpush.bf16.msrb.mxu2 %v11263_v17 }
  0xd3   : > { %v11118_v23 = vld [vmem:[%s13776_s6 + $0x15a0] sm:$0xf]  ;;  %v13173_v28 = vld [vmem:[%s13776_s6 + $0x16ac] sm:$0xf0]  ;;  %v10991_v34 = vor.u32 %v13109_v19, %v10990_v18  ;;  %6766 = vmatpush.bf16.msrb.mxu1 %v11135_v16  ;;  %6792 = vmatpush.bf16.msrb.mxu3 %v11391_v24  ;;  %v6501_v24 = vpop.f32.mrf.mxu0 }
  0xd4   : > { %v11246_v27 = vld [vmem:[%s13776_s6 + $0x16a0] sm:$0xf]  ;;  %v13205_v33 = vld [vmem:[%s13776_s6 + $0x17ac] sm:$0xf0]  ;;  %v11119_v35 = vor.u32 %v13141_v25, %v11118_v23 }
  0xd5   : > { %v11374_v30 = vld [vmem:[%s13776_s6 + $0x17a0] sm:$0xf]  ;;  %v11247_v36 = vor.u32 %v13173_v28, %v11246_v27  ;;  %v13105_v39 = vld [vmem:[%s13776_s6 + $0x148c] sm:$0xf0]  ;;  %6754 = vmatpush.bf16.msrb.mxu0 %v10991_v34  ;;  %v6514_v34 = vpop.f32.mrf.mxu1 }
  0xd6   : > { %v10974_v37 = vld [vmem:[%s13776_s6 + $0x1480] sm:$0xf]  ;;  %v11375_v41 = vor.u32 %v13205_v33, %v11374_v30  ;;  %v13137_v42 = vld [vmem:[%s13776_s6 + $0x158c] sm:$0xf0] }
  0xd7   : > { %v11102_v40 = vld [vmem:[%s13776_s6 + $0x1580] sm:$0xf]  ;;  %v13169_v44 = vld [vmem:[%s13776_s6 + $0x168c] sm:$0xf0]  ;;  %v10975_v51 = vor.u32 %v13105_v39, %v10974_v37  ;;  %6767 = vmatpush.bf16.msrb.mxu1 %v11119_v35  ;;  %6780 = vmatpush.bf16.msrb.mxu2 %v11247_v36 }
  0xd8   : > { %v11230_v43 = vld [vmem:[%s13776_s6 + $0x1680] sm:$0xf]  ;;  %v13201_v50 = vld [vmem:[%s13776_s6 + $0x178c] sm:$0xf0]  ;;  %v11103_v52 = vor.u32 %v13137_v42, %v11102_v40  ;;  %6793 = vmatpush.bf16.msrb.mxu3 %v11375_v41  ;;  %v6515_v40 = vadd.f32 %v6514_v34, %v6501_v24 }
  0xd9   : > { %v11358_v45 = vld [vmem:[%s13776_s6 + $0x1780] sm:$0xf]  ;;  %v11231_v53 = vor.u32 %v13169_v44, %v11230_v43  ;;  %v13101_v55 = vld [vmem:[%s13776_s6 + $0x146c] sm:$0xf0]  ;;  %6755 = vmatpush.bf16.msrb.mxu0 %v10975_v51 }
  0xda   : > { %v10958_v54 = vld [vmem:[%s13776_s6 + $0x1460] sm:$0xf]  ;;  %v11359_v57 = vor.u32 %v13201_v50, %v11358_v45  ;;  %v13133_v58 = vld [vmem:[%s13776_s6 + $0x156c] sm:$0xf0] }
  0xdb   : > { %v11086_v56 = vld [vmem:[%s13776_s6 + $0x1560] sm:$0xf]  ;;  %v13165_v60 = vld [vmem:[%s13776_s6 + $0x166c] sm:$0xf0]  ;;  %v10959_v63 = vor.u32 %v13101_v55, %v10958_v54  ;;  %6768 = vmatpush.bf16.msrb.mxu1 %v11103_v52  ;;  %6781 = vmatpush.bf16.msrb.mxu2 %v11231_v53 }
  0xdc   : > { %v11214_v59 = vld [vmem:[%s13776_s6 + $0x1660] sm:$0xf]  ;;  %v13197_v62 = vld [vmem:[%s13776_s6 + $0x176c] sm:$0xf0]  ;;  %v11087_v0 = vor.u32 %v13133_v58, %v11086_v56  ;;  %6794 = vmatpush.bf16.msrb.mxu3 %v11359_v57 }
  0xdd   : > { %v11342_v61 = vld [vmem:[%s13776_s6 + $0x1760] sm:$0xf]  ;;  %v11215_v1 = vor.u32 %v13165_v60, %v11214_v59  ;;  %v13097_v3 = vld [vmem:[%s13776_s6 + $0x144c] sm:$0xf0]  ;;  %6756 = vmatpush.bf16.msrb.mxu0 %v10959_v63  ;;  %v6527_v59 = vpop.f32.mrf.mxu2 }
  0xde   : > { %v10942_v2 = vld [vmem:[%s13776_s6 + $0x1440] sm:$0xf]  ;;  %v11343_v6 = vor.u32 %v13197_v62, %v11342_v61  ;;  %v13129_v7 = vld [vmem:[%s13776_s6 + $0x154c] sm:$0xf0] }
  0xdf   : > { %v11070_v4 = vld [vmem:[%s13776_s6 + $0x1540] sm:$0xf]  ;;  %v13161_v16 = vld [vmem:[%s13776_s6 + $0x164c] sm:$0xf0]  ;;  %v10943_v19 = vor.u32 %v13097_v3, %v10942_v2  ;;  %6769 = vmatpush.bf16.msrb.mxu1 %v11087_v0  ;;  %6782 = vmatpush.bf16.msrb.mxu2 %v11215_v1  ;;  %v6528_v1 = vadd.f32 %v6527_v59, %v6515_v40  ;;  %v6540_v2 = vpop.f32.mrf.mxu3  ;;  %v14249_v3 = vld [vmem:[#allocation1 + $0x2d] sm:$0xff] }
  0xe0   : > { %v11198_v14 = vld [vmem:[%s13776_s6 + $0x1640] sm:$0xf]  ;;  %v13193_v18 = vld [vmem:[%s13776_s6 + $0x174c] sm:$0xf0]  ;;  %v11071_v25 = vor.u32 %v13129_v7, %v11070_v4  ;;  %6795 = vmatpush.bf16.msrb.mxu3 %v11343_v6  ;;  %v14251_v4 = vld [vmem:[#allocation1 + $0x3f] sm:$0xff] }
  0xe1   : > { %v11326_v17 = vld [vmem:[%s13776_s6 + $0x1740] sm:$0xf]  ;;  %v11199_v27 = vor.u32 %v13161_v16, %v11198_v14  ;;  %v13093_v28 = vld [vmem:[%s13776_s6 + $0x142c] sm:$0xf0]  ;;  %6757 = vmatpush.bf16.msrb.mxu0 %v10943_v19 }
  0xe2   : > { %v10926_v23 = vld [vmem:[%s13776_s6 + $0x1420] sm:$0xf]  ;;  %v13125_v33 = vld [vmem:[%s13776_s6 + $0x152c] sm:$0xf0]  ;;  %v11327_v35 = vor.u32 %v13193_v18, %v11326_v17  ;;  %v14258_v17 = vadd.f32 %v6540_v2, %v6528_v1  ;;  %v6503_v18 = vpop.f32.mrf.mxu0 }
  0xe3   : > { %v11054_v30 = vld [vmem:[%s13776_s6 + $0x1520] sm:$0xf]  ;;  %v13157_v37 = vld [vmem:[%s13776_s6 + $0x162c] sm:$0xf0]  ;;  %v10927_v44 = vor.u32 %v13093_v28, %v10926_v23  ;;  %6770 = vmatpush.bf16.msrb.mxu1 %v11071_v25  ;;  %6783 = vmatpush.bf16.msrb.mxu2 %v11199_v27  ;;  %v6516_v27 = vpop.f32.mrf.mxu1 }
  0xe4   : > { %v11182_v36 = vld [vmem:[%s13776_s6 + $0x1620] sm:$0xf]  ;;  %v13189_v41 = vld [vmem:[%s13776_s6 + $0x172c] sm:$0xf0]  ;;  %v11055_v53 = vor.u32 %v13125_v33, %v11054_v30  ;;  %6796 = vmatpush.bf16.msrb.mxu3 %v11327_v35 }
  0xe5   : > { %v11310_v39 = vld [vmem:[%s13776_s6 + $0x1720] sm:$0xf]  ;;  %v13089_v43 = vld [vmem:[%s13776_s6 + $0x140c] sm:$0xf0]  ;;  %v11183_v54 = vor.u32 %v13157_v37, %v11182_v36  ;;  %6758 = vmatpush.bf16.msrb.mxu0 %v10927_v44 }
  0xe6   : > { %v10910_v42 = vld [vmem:[%s13776_s6 + $0x1400] sm:$0xf]  ;;  %v13121_v50 = vld [vmem:[%s13776_s6 + $0x150c] sm:$0xf0]  ;;  %v11311_v60 = vor.u32 %v13189_v41, %v11310_v39 }
  0xe7   : > { %v11038_v45 = vld [vmem:[%s13776_s6 + $0x1500] sm:$0xf]  ;;  %v13153_v52 = vld [vmem:[%s13776_s6 + $0x160c] sm:$0xf0]  ;;  %v10911_v7 = vor.u32 %v13089_v43, %v10910_v42  ;;  %6771 = vmatpush.bf16.msrb.mxu1 %v11055_v53  ;;  %6784 = vmatpush.bf16.msrb.mxu2 %v11183_v54 }
  0xe8   : > { %v11166_v51 = vld [vmem:[%s13776_s6 + $0x1600] sm:$0xf]  ;;  %v13185_v56 = vld [vmem:[%s13776_s6 + $0x170c] sm:$0xf0]  ;;  %v11039_v19 = vor.u32 %v13121_v50, %v11038_v45  ;;  %6797 = vmatpush.bf16.msrb.mxu3 %v11311_v60  ;;  %v6529_v45 = vpop.f32.mrf.mxu2 }
  0xe9   : > { %v11294_v55 = vld [vmem:[%s13776_s6 + $0x1700] sm:$0xf]  ;;  %v13245_v58 = vld [vmem:[%s13776_s6 + $0x18ec] sm:$0xf0]  ;;  %v11167_v23 = vor.u32 %v13153_v52, %v11166_v51  ;;  %6759 = vmatpush.bf16.msrb.mxu0 %v10911_v7  ;;  %v6542_v51 = vpop.f32.mrf.mxu3 }
  0xea   : > { %v11534_v57 = vld [vmem:[%s13776_s6 + $0x18e0] sm:$0xf]  ;;  %v13277_v62 = vld [vmem:[%s13776_s6 + $0x19ec] sm:$0xf0]  ;;  %v11295_v28 = vor.u32 %v13185_v56, %v11294_v55 }
  0xeb   : > { %v11662_v61 = vld [vmem:[%s13776_s6 + $0x19e0] sm:$0xf]  ;;  %v14247_v0 = vld [vmem:[#allocation1 + $0x36] sm:$0xff]  ;;  %v11535_v30 = vor.u32 %v13245_v58, %v11534_v57  ;;  %6772 = vmatpush.bf16.msrb.mxu1 %v11039_v19  ;;  %6785 = vmatpush.bf16.msrb.mxu2 %v11167_v23 }
  0xec   : > { %v14245_v63 = vld [vmem:[#allocation1 + $0x24] sm:$0xff]  ;;  %v275_v6 = vld [vmem:[%s16095_s0 + $0x18] sm:$0xff]  ;;  %v11663_v33 = vor.u32 %v13277_v62, %v11662_v61  ;;  %6798 = vmatpush.bf16.msrb.mxu3 %v11295_v28 }
  0xed   : > { %v11790_v14 = vld [vmem:[%s13776_s6 + $0x1ae0] sm:$0xf]  ;;  %v13309_v16 = vld [vmem:[%s13776_s6 + $0x1aec] sm:$0xf0]  ;;  %1331 = vst [vmem:[#allocation1] ss:$9 sm:$0xff] %v275_v6  ;;  %6804 = vmatpush.bf16.msra.mxu0 %v11535_v30  ;;  %v6553_v30 = vpop.f32.mrf.mxu0 }
  0xee   : > { %v11918_v24 = vld [vmem:[%s13776_s6 + $0x1be0] sm:$0xf]  ;;  %v13341_v25 = vld [vmem:[%s13776_s6 + $0x1bec] sm:$0xf0]  ;;  %v11791_v34 = vor.u32 %v13309_v16, %v11790_v14  ;;  %6760 = vmatmul.bf16.vlgmr.msrb.gmra.mxu0 %v14245_v63  ;;  %6786 = vmatmul.bf16.vlgmr.msrb.gmra.mxu2 %v14247_v0 }
  0xef   : > { %v11518_v35 = vld [vmem:[%s13776_s6 + $0x18c0] sm:$0xf]  ;;  %v13241_v36 = vld [vmem:[%s13776_s6 + $0x18cc] sm:$0xf0]  ;;  %v11919_v39 = vor.u32 %v13341_v25, %v11918_v24  ;;  %6817 = vmatpush.bf16.msra.mxu1 %v11663_v33  ;;  %6799 = vmatmul.bf16.vlgmr.msrb.gmra.mxu3 %v14251_v4 }
  0xf0   : > { %v11646_v37 = vld [vmem:[%s13776_s6 + $0x19c0] sm:$0xf]  ;;  %v13273_v40 = vld [vmem:[%s13776_s6 + $0x19cc] sm:$0xf0]  ;;  %v11519_v50 = vor.u32 %v13241_v36, %v11518_v35  ;;  %6830 = vmatpush.bf16.msra.mxu2 %v11791_v34  ;;  %6773 = vmatmul.bf16.vlgmr.msrb.gmra.mxu1 %v14249_v3 }
  0xf1   : > { %v11774_v41 = vld [vmem:[%s13776_s6 + $0x1ac0] sm:$0xf]  ;;  %v13305_v42 = vld [vmem:[%s13776_s6 + $0x1acc] sm:$0xf0]  ;;  %v11647_v52 = vor.u32 %v13273_v40, %v11646_v37  ;;  %6843 = vmatpush.bf16.msra.mxu3 %v11919_v39  ;;  %v6554_v39 = vadd.f32 %v6553_v30, %v14258_v17  ;;  %v6566_v40 = vpop.f32.mrf.mxu1 }
  0xf2   : > { %v11902_v43 = vld [vmem:[%s13776_s6 + $0x1bc0] sm:$0xf]  ;;  %v13337_v44 = vld [vmem:[%s13776_s6 + $0x1bcc] sm:$0xf0]  ;;  %v11775_v53 = vor.u32 %v13305_v42, %v11774_v41  ;;  %6805 = vmatpush.bf16.msra.mxu0 %v11519_v50 }
  0xf3   : > { %v11502_v54 = vld [vmem:[%s13776_s6 + $0x18a0] sm:$0xf]  ;;  %v13237_v55 = vld [vmem:[%s13776_s6 + $0x18ac] sm:$0xf0]  ;;  %v11903_v57 = vor.u32 %v13337_v44, %v11902_v43  ;;  %6818 = vmatpush.bf16.msra.mxu1 %v11647_v52  ;;  %v6567_v51 = vadd.f32 %v6566_v40, %v6554_v39 }
  0xf4   : > { %v11630_v56 = vld [vmem:[%s13776_s6 + $0x19a0] sm:$0xf]  ;;  %v13269_v58 = vld [vmem:[%s13776_s6 + $0x19ac] sm:$0xf0]  ;;  %v11503_v1 = vor.u32 %v13237_v55, %v11502_v54  ;;  %6831 = vmatpush.bf16.msra.mxu2 %v11775_v53 }
  0xf5   : > { %v11758_v59 = vld [vmem:[%s13776_s6 + $0x1aa0] sm:$0xf]  ;;  %v13301_v60 = vld [vmem:[%s13776_s6 + $0x1aac] sm:$0xf0]  ;;  %v11631_v2 = vor.u32 %v13269_v58, %v11630_v56  ;;  %6844 = vmatpush.bf16.msra.mxu3 %v11903_v57  ;;  %v6579_v57 = vpop.f32.mrf.mxu2 }
  0xf6   : > { %v11886_v61 = vld [vmem:[%s13776_s6 + $0x1ba0] sm:$0xf]  ;;  %v13333_v62 = vld [vmem:[%s13776_s6 + $0x1bac] sm:$0xf0]  ;;  %v11759_v6 = vor.u32 %v13301_v60, %v11758_v59  ;;  %6806 = vmatpush.bf16.msra.mxu0 %v11503_v1  ;;  %v6592_v1 = vpop.f32.mrf.mxu3 }
  0xf7   : > { %v11486_v7 = vld [vmem:[%s13776_s6 + $0x1880] sm:$0xf]  ;;  %v13233_v14 = vld [vmem:[%s13776_s6 + $0x188c] sm:$0xf0]  ;;  %v11887_v18 = vor.u32 %v13333_v62, %v11886_v61  ;;  %6819 = vmatpush.bf16.msra.mxu1 %v11631_v2  ;;  %v6580_v62 = vadd.f32 %v6579_v57, %v6567_v51 }
  0xf8   : > { %v11614_v16 = vld [vmem:[%s13776_s6 + $0x1980] sm:$0xf]  ;;  %v13265_v19 = vld [vmem:[%s13776_s6 + $0x198c] sm:$0xf0]  ;;  %v11487_v28 = vor.u32 %v13233_v14, %v11486_v7  ;;  %6832 = vmatpush.bf16.msra.mxu2 %v11759_v6 }
  0xf9   : > { %v11742_v23 = vld [vmem:[%s13776_s6 + $0x1a80] sm:$0xf]  ;;  %v13297_v24 = vld [vmem:[%s13776_s6 + $0x1a8c] sm:$0xf0]  ;;  %v11615_v33 = vor.u32 %v13265_v19, %v11614_v16  ;;  %6845 = vmatpush.bf16.msra.mxu3 %v11887_v18  ;;  %v14307_v14 = vadd.f32 %v6592_v1, %v6580_v62  ;;  %v6555_v16 = vpop.f32.mrf.mxu0 }
  0xfa   : > { %v11870_v25 = vld [vmem:[%s13776_s6 + $0x1b80] sm:$0xf]  ;;  %v13329_v27 = vld [vmem:[%s13776_s6 + $0x1b8c] sm:$0xf0]  ;;  %v11743_v34 = vor.u32 %v13297_v24, %v11742_v23  ;;  %6807 = vmatpush.bf16.msra.mxu0 %v11487_v28 }
  0xfb   : > { %v11470_v35 = vld [vmem:[%s13776_s6 + $0x1860] sm:$0xf]  ;;  %v13229_v36 = vld [vmem:[%s13776_s6 + $0x186c] sm:$0xf0]  ;;  %v11871_v41 = vor.u32 %v13329_v27, %v11870_v25  ;;  %6820 = vmatpush.bf16.msra.mxu1 %v11615_v33  ;;  %v6568_v27 = vpop.f32.mrf.mxu1 }
  0xfc   : > { %v11598_v37 = vld [vmem:[%s13776_s6 + $0x1960] sm:$0xf]  ;;  %v13261_v42 = vld [vmem:[%s13776_s6 + $0x196c] sm:$0xf0]  ;;  %v11471_v52 = vor.u32 %v13229_v36, %v11470_v35  ;;  %6833 = vmatpush.bf16.msra.mxu2 %v11743_v34 }
  0xfd   : > { %v11726_v43 = vld [vmem:[%s13776_s6 + $0x1a60] sm:$0xf]  ;;  %v13293_v44 = vld [vmem:[%s13776_s6 + $0x1a6c] sm:$0xf0]  ;;  %v11599_v17 = vor.u32 %v13261_v42, %v11598_v37  ;;  %6846 = vmatpush.bf16.msra.mxu3 %v11871_v41 }
  0xfe   : > { %v11854_v45 = vld [vmem:[%s13776_s6 + $0x1b60] sm:$0xf]  ;;  %v13325_v50 = vld [vmem:[%s13776_s6 + $0x1b6c] sm:$0xf0]  ;;  %v11727_v53 = vor.u32 %v13293_v44, %v11726_v43  ;;  %6808 = vmatpush.bf16.msra.mxu0 %v11471_v52 }
  0xff   : > { %v11454_v54 = vld [vmem:[%s13776_s6 + $0x1840] sm:$0xf]  ;;  %v13225_v55 = vld [vmem:[%s13776_s6 + $0x184c] sm:$0xf0]  ;;  %v11855_v58 = vor.u32 %v13325_v50, %v11854_v45  ;;  %6821 = vmatpush.bf16.msra.mxu1 %v11599_v17  ;;  %v6581_v50 = vpop.f32.mrf.mxu2 }
 0x100   : > { %v11582_v56 = vld [vmem:[%s13776_s6 + $0x1940] sm:$0xf]  ;;  %v13257_v59 = vld [vmem:[%s13776_s6 + $0x194c] sm:$0xf0]  ;;  %v11455_v7 = vor.u32 %v13225_v55, %v11454_v54  ;;  %6834 = vmatpush.bf16.msra.mxu2 %v11727_v53  ;;  %v6594_v54 = vpop.f32.mrf.mxu3 }
 0x101   : > { %v11710_v60 = vld [vmem:[%s13776_s6 + $0x1a40] sm:$0xf]  ;;  %v13289_v61 = vld [vmem:[%s13776_s6 + $0x1a4c] sm:$0xf0]  ;;  %v11583_v18 = vor.u32 %v13257_v59, %v11582_v56  ;;  %6847 = vmatpush.bf16.msra.mxu3 %v11855_v58 }
 0x102   : > { %v11838_v2 = vld [vmem:[%s13776_s6 + $0x1b40] sm:$0xf]  ;;  %v13321_v6 = vld [vmem:[%s13776_s6 + $0x1b4c] sm:$0xf0]  ;;  %v11711_v19 = vor.u32 %v13289_v61, %v11710_v60  ;;  %6809 = vmatpush.bf16.msra.mxu0 %v11455_v7 }
 0x103   : > { %v11438_v23 = vld [vmem:[%s13776_s6 + $0x1820] sm:$0xf]  ;;  %v13221_v24 = vld [vmem:[%s13776_s6 + $0x182c] sm:$0xf0]  ;;  %v11839_v28 = vor.u32 %v13321_v6, %v11838_v2  ;;  %6822 = vmatpush.bf16.msra.mxu1 %v11583_v18 }
 0x104   : > { %v11566_v25 = vld [vmem:[%s13776_s6 + $0x1920] sm:$0xf]  ;;  %v13253_v30 = vld [vmem:[%s13776_s6 + $0x192c] sm:$0xf0]  ;;  %v11439_v37 = vor.u32 %v13221_v24, %v11438_v23  ;;  %6835 = vmatpush.bf16.msra.mxu2 %v11711_v19 }
 0x105   : > { %v11694_v33 = vld [vmem:[%s13776_s6 + $0x1a20] sm:$0xf]  ;;  %v13285_v34 = vld [vmem:[%s13776_s6 + $0x1a2c] sm:$0xf0]  ;;  %v11567_v41 = vor.u32 %v13253_v30, %v11566_v25  ;;  %6848 = vmatpush.bf16.msra.mxu3 %v11839_v28 }
 0x106   : > { %v11822_v35 = vld [vmem:[%s13776_s6 + $0x1b20] sm:$0xf]  ;;  %v13317_v36 = vld [vmem:[%s13776_s6 + $0x1b2c] sm:$0xf0]  ;;  %v11695_v42 = vor.u32 %v13285_v34, %v11694_v33  ;;  %6810 = vmatpush.bf16.msra.mxu0 %v11439_v37  ;;  %v1332_v34 = vld [vmem:[#allocation1] sm:$0xff] }
 0x107   : > { %v11422_v39 = vld [vmem:[%s13776_s6 + $0x1800] sm:$0xf]  ;;  %v13217_v40 = vld [vmem:[%s13776_s6 + $0x180c] sm:$0xf0]  ;;  %v11823_v51 = vor.u32 %v13317_v36, %v11822_v35  ;;  %6823 = vmatpush.bf16.msra.mxu1 %v11567_v41 }
 0x108   : > { %v11550_v43 = vld [vmem:[%s13776_s6 + $0x1900] sm:$0xf]  ;;  %v13249_v44 = vld [vmem:[%s13776_s6 + $0x190c] sm:$0xf0]  ;;  %v11423_v58 = vor.u32 %v13217_v40, %v11422_v39  ;;  %6836 = vmatpush.bf16.msra.mxu2 %v11695_v42 }
 0x109   : > { %v11678_v45 = vld [vmem:[%s13776_s6 + $0x1a00] sm:$0xf]  ;;  %v13281_v52 = vld [vmem:[%s13776_s6 + $0x1a0c] sm:$0xf0]  ;;  %v11551_v62 = vor.u32 %v13249_v44, %v11550_v43  ;;  %6849 = vmatpush.bf16.msra.mxu3 %v11823_v51 }
 0x10a   : > { %v11806_v17 = vld [vmem:[%s13776_s6 + $0x1b00] sm:$0xf]  ;;  %v13313_v53 = vld [vmem:[%s13776_s6 + $0x1b0c] sm:$0xf0]  ;;  %v11679_v1 = vor.u32 %v13281_v52, %v11678_v45  ;;  %6811 = vmatpush.bf16.msra.mxu0 %v11423_v58 }
 0x10b   : > { %v12046_v55 = vld [vmem:[%s13776_s6 + $0x1ce0] sm:$0xf]  ;;  %v13373_v56 = vld [vmem:[%s13776_s6 + $0x1cec] sm:$0xf0]  ;;  %v11807_v7 = vor.u32 %v13313_v53, %v11806_v17  ;;  %6824 = vmatpush.bf16.msra.mxu1 %v11551_v62 }
 0x10c   : > { %v12174_v57 = vld [vmem:[%s13776_s6 + $0x1de0] sm:$0xf]  ;;  %v13405_v59 = vld [vmem:[%s13776_s6 + $0x1dec] sm:$0xf0]  ;;  %v12047_v16 = vor.u32 %v13373_v56, %v12046_v55  ;;  %6837 = vmatpush.bf16.msra.mxu2 %v11679_v1 }
 0x10d   : > { %v12302_v60 = vld [vmem:[%s13776_s6 + $0x1ee0] sm:$0xf]  ;;  %v13437_v61 = vld [vmem:[%s13776_s6 + $0x1eec] sm:$0xf0]  ;;  %v12175_v18 = vor.u32 %v13405_v59, %v12174_v57  ;;  %6850 = vmatpush.bf16.msra.mxu3 %v11807_v7  ;;  %6812 = vmatmul.bf16.vlgmr.msra.gmra.mxu0 %v1332_v34  ;;  %v6605_v7 = vpop.f32.mrf.mxu0 }
 0x10e   : > { %v12430_v2 = vld [vmem:[%s13776_s6 + $0x1fe0] sm:$0xf]  ;;  %v13469_v6 = vld [vmem:[%s13776_s6 + $0x1fec] sm:$0xf0]  ;;  %v12303_v19 = vor.u32 %v13437_v61, %v12302_v60  ;;  %6856 = vmatpush.bf16.msrb.mxu0 %v12047_v16 }
 0x10f   : > { %v12030_v23 = vld [vmem:[%s13776_s6 + $0x1cc0] sm:$0xf]  ;;  %v13369_v24 = vld [vmem:[%s13776_s6 + $0x1ccc] sm:$0xf0]  ;;  %v12431_v27 = vor.u32 %v13469_v6, %v12430_v2  ;;  %6869 = vmatpush.bf16.msrb.mxu1 %v12175_v18 }
 0x110   : > { %v12158_v25 = vld [vmem:[%s13776_s6 + $0x1dc0] sm:$0xf]  ;;  %v13401_v28 = vld [vmem:[%s13776_s6 + $0x1dcc] sm:$0xf0]  ;;  %v12031_v41 = vor.u32 %v13369_v24, %v12030_v23  ;;  %6882 = vmatpush.bf16.msrb.mxu2 %v12303_v19  ;;  %v6606_v19 = vadd.f32 %v6605_v7, %v14307_v14  ;;  %v6618_v24 = vpop.f32.mrf.mxu1 }
 0x111   : > { %v12286_v30 = vld [vmem:[%s13776_s6 + $0x1ec0] sm:$0xf]  ;;  %v13433_v33 = vld [vmem:[%s13776_s6 + $0x1ecc] sm:$0xf0]  ;;  %v12159_v42 = vor.u32 %v13401_v28, %v12158_v25  ;;  %6895 = vmatpush.bf16.msrb.mxu3 %v12431_v27 }
 0x112   : > { %v12414_v35 = vld [vmem:[%s13776_s6 + $0x1fc0] sm:$0xf]  ;;  %v13465_v36 = vld [vmem:[%s13776_s6 + $0x1fcc] sm:$0xf0]  ;;  %v12287_v43 = vor.u32 %v13433_v33, %v12286_v30  ;;  %6857 = vmatpush.bf16.msrb.mxu0 %v12031_v41 }
 0x113   : > { %v1334_v37 = vld [vmem:[#allocation1 + $0x12] sm:$0xff]  ;;  %v1333_v39 = vld [vmem:[#allocation1 + $0x9] sm:$0xff]  ;;  %v1335_v40 = vld [vmem:[#allocation1 + $0x1b] sm:$0xff]  ;;  %v12415_v51 = vor.u32 %v13465_v36, %v12414_v35  ;;  %6870 = vmatpush.bf16.msrb.mxu1 %v12159_v42  ;;  %v6619_v35 = vadd.f32 %v6618_v24, %v6606_v19 }
 0x114   : > { %v12014_v44 = vld [vmem:[%s13776_s6 + $0x1ca0] sm:$0xf]  ;;  %v13365_v45 = vld [vmem:[%s13776_s6 + $0x1cac] sm:$0xf0]  ;;  %6838 = vmatmul.bf16.vlgmr.msra.gmra.mxu2 %v1334_v37  ;;  %6825 = vmatmul.bf16.vlgmr.msra.gmra.mxu1 %v1333_v39 }
 0x115   : > { %v12142_v50 = vld [vmem:[%s13776_s6 + $0x1da0] sm:$0xf]  ;;  %v13397_v52 = vld [vmem:[%s13776_s6 + $0x1dac] sm:$0xf0]  ;;  %6851 = vmatmul.bf16.vlgmr.msra.gmra.mxu3 %v1335_v40  ;;  %v12015_v56 = vor.u32 %v13365_v45, %v12014_v44  ;;  %6883 = vmatpush.bf16.msrb.mxu2 %v12287_v43 }
 0x116   : > { %v12270_v17 = vld [vmem:[%s13776_s6 + $0x1ea0] sm:$0xf]  ;;  %v13429_v53 = vld [vmem:[%s13776_s6 + $0x1eac] sm:$0xf0]  ;;  %v12143_v57 = vor.u32 %v13397_v52, %v12142_v50  ;;  %6896 = vmatpush.bf16.msrb.mxu3 %v12415_v51  ;;  %v6631_v52 = vpop.f32.mrf.mxu2 }
 0x117   : > { %v12398_v54 = vld [vmem:[%s13776_s6 + $0x1fa0] sm:$0xf]  ;;  %v13461_v55 = vld [vmem:[%s13776_s6 + $0x1fac] sm:$0xf0]  ;;  %v12271_v58 = vor.u32 %v13429_v53, %v12270_v17  ;;  %6858 = vmatpush.bf16.msrb.mxu0 %v12015_v56  ;;  %v6644_v56 = vpop.f32.mrf.mxu3 }
 0x118   : > { %v11998_v59 = vld [vmem:[%s13776_s6 + $0x1c80] sm:$0xf]  ;;  %v13361_v60 = vld [vmem:[%s13776_s6 + $0x1c8c] sm:$0xf0]  ;;  %v12399_v62 = vor.u32 %v13461_v55, %v12398_v54  ;;  %6871 = vmatpush.bf16.msrb.mxu1 %v12143_v57  ;;  %v6632_v55 = vadd.f32 %v6631_v52, %v6619_v35 }
 0x119   : > { %v12126_v61 = vld [vmem:[%s13776_s6 + $0x1d80] sm:$0xf]  ;;  %v13393_v1 = vld [vmem:[%s13776_s6 + $0x1d8c] sm:$0xf0]  ;;  %v11999_v23 = vor.u32 %v13361_v60, %v11998_v59  ;;  %6884 = vmatpush.bf16.msrb.mxu2 %v12271_v58  ;;  %v6607_v59 = vpop.f32.mrf.mxu0 }
 0x11a   : > { %v12254_v2 = vld [vmem:[%s13776_s6 + $0x1e80] sm:$0xf]  ;;  %v13425_v6 = vld [vmem:[%s13776_s6 + $0x1e8c] sm:$0xf0]  ;;  %v12127_v25 = vor.u32 %v13393_v1, %v12126_v61  ;;  %6897 = vmatpush.bf16.msrb.mxu3 %v12399_v62  ;;  %v6620_v61 = vpop.f32.mrf.mxu1  ;;  %v14374_v62 = vadd.f32 %v6644_v56, %v6632_v55 }
 0x11b   : > { %v12382_v16 = vld [vmem:[%s13776_s6 + $0x1f80] sm:$0xf]  ;;  %v13457_v18 = vld [vmem:[%s13776_s6 + $0x1f8c] sm:$0xf0]  ;;  %v12255_v27 = vor.u32 %v13425_v6, %v12254_v2  ;;  %6859 = vmatpush.bf16.msrb.mxu0 %v11999_v23 }
 0x11c   : > { %v11982_v28 = vld [vmem:[%s13776_s6 + $0x1c60] sm:$0xf]  ;;  %v13357_v30 = vld [vmem:[%s13776_s6 + $0x1c6c] sm:$0xf0]  ;;  %v12383_v34 = vor.u32 %v13457_v18, %v12382_v16  ;;  %6872 = vmatpush.bf16.msrb.mxu1 %v12127_v25 }
 0x11d   : > { %v12110_v33 = vld [vmem:[%s13776_s6 + $0x1d60] sm:$0xf]  ;;  %v13389_v36 = vld [vmem:[%s13776_s6 + $0x1d6c] sm:$0xf0]  ;;  %v11983_v41 = vor.u32 %v13357_v30, %v11982_v28  ;;  %6885 = vmatpush.bf16.msrb.mxu2 %v12255_v27 }
 0x11e   : > { %v12238_v37 = vld [vmem:[%s13776_s6 + $0x1e60] sm:$0xf]  ;;  %v13421_v14 = vld [vmem:[%s13776_s6 + $0x1e6c] sm:$0xf0]  ;;  %v12111_v42 = vor.u32 %v13389_v36, %v12110_v33  ;;  %6898 = vmatpush.bf16.msrb.mxu3 %v12383_v34 }
 0x11f   : > { %v12366_v39 = vld [vmem:[%s13776_s6 + $0x1f60] sm:$0xf]  ;;  %v13453_v40 = vld [vmem:[%s13776_s6 + $0x1f6c] sm:$0xf0]  ;;  %v12239_v43 = vor.u32 %v13421_v14, %v12238_v37  ;;  %6860 = vmatpush.bf16.msrb.mxu0 %v11983_v41 }
 0x120   : > { %v11966_v44 = vld [vmem:[%s13776_s6 + $0x1c40] sm:$0xf]  ;;  %v13353_v45 = vld [vmem:[%s13776_s6 + $0x1c4c] sm:$0xf0]  ;;  %v12367_v51 = vor.u32 %v13453_v40, %v12366_v39  ;;  %6873 = vmatpush.bf16.msrb.mxu1 %v12111_v42 }
 0x121   : > { %v12094_v50 = vld [vmem:[%s13776_s6 + $0x1d40] sm:$0xf]  ;;  %v13385_v17 = vld [vmem:[%s13776_s6 + $0x1d4c] sm:$0xf0]  ;;  %v11967_v60 = vor.u32 %v13353_v45, %v11966_v44  ;;  %6886 = vmatpush.bf16.msrb.mxu2 %v12239_v43  ;;  %v6633_v43 = vpop.f32.mrf.mxu2  ;;  %v12475_v44 = vld [vmem:[%s13776_s6 + $0xe4] sm:$0xf] }
 0x122   : > { %v12222_v53 = vld [vmem:[%s13776_s6 + $0x1e40] sm:$0xf]  ;;  %v13417_v54 = vld [vmem:[%s13776_s6 + $0x1e4c] sm:$0xf0]  ;;  %v12095_v1 = vor.u32 %v13385_v17, %v12094_v50  ;;  %6899 = vmatpush.bf16.msrb.mxu3 %v12367_v51  ;;  %v8464_v45 = vld [vmem:[%s13776_s6 + $0xf0] sm:$0xf0]  ;;  %v6646_v51 = vpop.f32.mrf.mxu3 }
 0x123   : > { %v12350_v57 = vld [vmem:[%s13776_s6 + $0x1f40] sm:$0xf]  ;;  %v13449_v58 = vld [vmem:[%s13776_s6 + $0x1f4c] sm:$0xf0]  ;;  %v12223_v2 = vor.u32 %v13417_v54, %v12222_v53  ;;  %6861 = vmatpush.bf16.msrb.mxu0 %v11967_v60  ;;  %v12507_v50 = vld [vmem:[%s13776_s6 + $0x1e4] sm:$0xf]  ;;  %v8467_v60 = vor.u32 %v12475_v44, %v8464_v45 }
 0x124   : > { %v11950_v6 = vld [vmem:[%s13776_s6 + $0x1c20] sm:$0xf]  ;;  %v13349_v7 = vld [vmem:[%s13776_s6 + $0x1c2c] sm:$0xf0]  ;;  %v12351_v18 = vor.u32 %v13449_v58, %v12350_v57  ;;  %6874 = vmatpush.bf16.msrb.mxu1 %v12095_v1  ;;  %v8592_v17 = vld [vmem:[%s13776_s6 + $0x1f0] sm:$0xf0] }
 0x125   : > { %v12078_v16 = vld [vmem:[%s13776_s6 + $0x1d20] sm:$0xf]  ;;  %v13381_v19 = vld [vmem:[%s13776_s6 + $0x1d2c] sm:$0xf0]  ;;  %v11951_v28 = vor.u32 %v13349_v7, %v11950_v6  ;;  %6887 = vmatpush.bf16.msrb.mxu2 %v12223_v2  ;;  %v12539_v53 = vld [vmem:[%s13776_s6 + $0x2e4] sm:$0xf]  ;;  %v8595_v61 = vor.u32 %v12507_v50, %v8592_v17 }
 0x126   : > { %v12206_v23 = vld [vmem:[%s13776_s6 + $0x1e20] sm:$0xf]  ;;  %v13413_v24 = vld [vmem:[%s13776_s6 + $0x1e2c] sm:$0xf0]  ;;  %v12079_v34 = vor.u32 %v13381_v19, %v12078_v16  ;;  %6900 = vmatpush.bf16.msrb.mxu3 %v12351_v18  ;;  %v8720_v54 = vld [vmem:[%s13776_s6 + $0x2f0] sm:$0xf0] }
 0x127   : > { %v12334_v25 = vld [vmem:[%s13776_s6 + $0x1f20] sm:$0xf]  ;;  %v13445_v27 = vld [vmem:[%s13776_s6 + $0x1f2c] sm:$0xf0]  ;;  %v12207_v35 = vor.u32 %v13413_v24, %v12206_v23  ;;  %6862 = vmatpush.bf16.msrb.mxu0 %v11951_v28  ;;  %v12571_v57 = vld [vmem:[%s13776_s6 + $0x3e4] sm:$0xf]  ;;  %v8723_v1 = vor.u32 %v12539_v53, %v8720_v54 }
 0x128   : > { %v11934_v30 = vld [vmem:[%s13776_s6 + $0x1c00] sm:$0xf]  ;;  %v13345_v33 = vld [vmem:[%s13776_s6 + $0x1c0c] sm:$0xf0]  ;;  %v12335_v39 = vor.u32 %v13445_v27, %v12334_v25  ;;  %6875 = vmatpush.bf16.msrb.mxu1 %v12079_v34  ;;  %v8848_v58 = vld [vmem:[%s13776_s6 + $0x3f0] sm:$0xf0] }
 0x129   : > { %v12062_v36 = vld [vmem:[%s13776_s6 + $0x1d00] sm:$0xf]  ;;  %v13377_v37 = vld [vmem:[%s13776_s6 + $0x1d0c] sm:$0xf0]  ;;  %v11935_v52 = vor.u32 %v13345_v33, %v11934_v30  ;;  %6888 = vmatpush.bf16.msrb.mxu2 %v12207_v35  ;;  %v12471_v2 = vld [vmem:[%s13776_s6 + $0xc4] sm:$0xf]  ;;  %v8851_v16 = vor.u32 %v12571_v57, %v8848_v58 }
 0x12a   : > { %v12190_v14 = vld [vmem:[%s13776_s6 + $0x1e00] sm:$0xf]  ;;  %v13409_v40 = vld [vmem:[%s13776_s6 + $0x1e0c] sm:$0xf0]  ;;  %v12063_v55 = vor.u32 %v13377_v37, %v12062_v36  ;;  %6901 = vmatpush.bf16.msrb.mxu3 %v12335_v39  ;;  %v8448_v6 = vld [vmem:[%s13776_s6 + $0xd0] sm:$0xf0] }
 0x12b   : > { %v12318_v41 = vld [vmem:[%s13776_s6 + $0x1f00] sm:$0xf]  ;;  %v13441_v42 = vld [vmem:[%s13776_s6 + $0x1f0c] sm:$0xf0]  ;;  %v12191_v56 = vor.u32 %v13409_v40, %v12190_v14  ;;  %v12503_v7 = vld [vmem:[%s13776_s6 + $0x1c4] sm:$0xf]  ;;  %6863 = vmatpush.bf16.msrb.mxu0 %v11935_v52  ;;  %v8451_v34 = vor.u32 %v12471_v2, %v8448_v6  ;;  %v6670_v6 = vpop.f32.mrf.mxu1 }
 0x12c   : > { %v12319_v59 = vor.u32 %v13441_v42, %v12318_v41  ;;  %v8576_v18 = vld [vmem:[%s13776_s6 + $0x1d0] sm:$0xf0]  ;;  %v12535_v19 = vld [vmem:[%s13776_s6 + $0x2c4] sm:$0xf]  ;;  %6876 = vmatpush.bf16.msrb.mxu1 %v12063_v55  ;;  %v1336_v24 = vld [vmem:[#allocation1 + $0x24] sm:$0xff] }
 0x12d   : > { %v8704_v23 = vld [vmem:[%s13776_s6 + $0x2d0] sm:$0xf0]  ;;  %6889 = vmatpush.bf16.msrb.mxu2 %v12191_v56  ;;  %v12567_v25 = vld [vmem:[%s13776_s6 + $0x3c4] sm:$0xf]  ;;  %v8579_v35 = vor.u32 %v12503_v7, %v8576_v18 }
 0x12e   : > { %v8832_v27 = vld [vmem:[%s13776_s6 + $0x3d0] sm:$0xf0]  ;;  %6902 = vmatpush.bf16.msrb.mxu3 %v12319_v59  ;;  %v1337_v30 = vld [vmem:[#allocation1 + $0x2d] sm:$0xff]  ;;  %v8707_v36 = vor.u32 %v12535_v19, %v8704_v23  ;;  %6864 = vmatmul.bf16.vlgmr.msrb.gmra.mxu0 %v1336_v24  ;;  %v6657_v59 = vpop.f32.mrf.mxu0 }
 0x12f   : > { %6908 = vmatpush.bf16.msra.mxu0 %v8467_v60  ;;  %v1338_v28 = vld [vmem:[#allocation1 + $0x36] sm:$0xff]  ;;  %v1339_v33 = vld [vmem:[#allocation1 + $0x3f] sm:$0xff]  ;;  %v12467_v37 = vld [vmem:[%s13776_s6 + $0xa4] sm:$0xf]  ;;  %v8835_v40 = vor.u32 %v12567_v25, %v8832_v27  ;;  %6877 = vmatmul.bf16.vlgmr.msrb.gmra.mxu1 %v1337_v30 }
 0x130   : > { %6921 = vmatpush.bf16.msra.mxu1 %v8595_v61  ;;  %v8432_v14 = vld [vmem:[%s13776_s6 + $0xb0] sm:$0xf0]  ;;  %v12499_v39 = vld [vmem:[%s13776_s6 + $0x1a4] sm:$0xf]  ;;  %6890 = vmatmul.bf16.vlgmr.msrb.gmra.mxu2 %v1338_v28 }
 0x131   : > { %6934 = vmatpush.bf16.msra.mxu2 %v8723_v1  ;;  %v8560_v41 = vld [vmem:[%s13776_s6 + $0x1b0] sm:$0xf0]  ;;  %v12531_v42 = vld [vmem:[%s13776_s6 + $0x2a4] sm:$0xf]  ;;  %6903 = vmatmul.bf16.vlgmr.msrb.gmra.mxu3 %v1339_v33  ;;  %v8435_v50 = vor.u32 %v12467_v37, %v8432_v14  ;;  %v6658_v1 = vadd.f32 %v6657_v59, %v14374_v62 }
 0x132   : > { %6947 = vmatpush.bf16.msra.mxu3 %v8851_v16  ;;  %v8688_v43 = vld [vmem:[%s13776_s6 + $0x2b0] sm:$0xf0]  ;;  %v12563_v44 = vld [vmem:[%s13776_s6 + $0x3a4] sm:$0xf]  ;;  %v8563_v51 = vor.u32 %v12499_v39, %v8560_v41  ;;  %v6683_v41 = vpop.f32.mrf.mxu2 }
 0x133   : > { %v8816_v45 = vld [vmem:[%s13776_s6 + $0x3b0] sm:$0xf0]  ;;  %6909 = vmatpush.bf16.msra.mxu0 %v8451_v34  ;;  %v8691_v52 = vor.u32 %v12531_v42, %v8688_v43  ;;  %v12463_v17 = vld [vmem:[%s13776_s6 + $0x84] sm:$0xf]  ;;  %v6671_v25 = vadd.f32 %v6670_v6, %v6658_v1 }
 0x134   : > { %6922 = vmatpush.bf16.msra.mxu1 %v8579_v35  ;;  %v8416_v53 = vld [vmem:[%s13776_s6 + $0x90] sm:$0xf0]  ;;  %v12495_v54 = vld [vmem:[%s13776_s6 + $0x184] sm:$0xf]  ;;  %v8819_v55 = vor.u32 %v12563_v44, %v8816_v45 }
 0x135   : > { %6935 = vmatpush.bf16.msra.mxu2 %v8707_v36  ;;  %v8544_v56 = vld [vmem:[%s13776_s6 + $0x190] sm:$0xf0]  ;;  %v12527_v57 = vld [vmem:[%s13776_s6 + $0x284] sm:$0xf]  ;;  %v8419_v2 = vor.u32 %v12463_v17, %v8416_v53  ;;  %v6684_v45 = vadd.f32 %v6683_v41, %v6671_v25 }
 0x136   : > { %6948 = vmatpush.bf16.msra.mxu3 %v8835_v40  ;;  %v8672_v58 = vld [vmem:[%s13776_s6 + $0x290] sm:$0xf0]  ;;  %v12559_v60 = vld [vmem:[%s13776_s6 + $0x384] sm:$0xf]  ;;  %v8547_v7 = vor.u32 %v12495_v54, %v8544_v56  ;;  %v6659_v17 = vpop.f32.mrf.mxu0  ;;  %v6672_v54 = vpop.f32.mrf.mxu1 }
 0x137   : > { %v8800_v61 = vld [vmem:[%s13776_s6 + $0x390] sm:$0xf0]  ;;  %6910 = vmatpush.bf16.msra.mxu0 %v8435_v50  ;;  %v8675_v16 = vor.u32 %v12527_v57, %v8672_v58  ;;  %v12459_v18 = vld [vmem:[%s13776_s6 + $0x64] sm:$0xf]  ;;  %v6696_v50 = vpop.f32.mrf.mxu3 }
 0x138   : > { %6923 = vmatpush.bf16.msra.mxu1 %v8563_v51  ;;  %v8400_v19 = vld [vmem:[%s13776_s6 + $0x70] sm:$0xf0]  ;;  %v12491_v23 = vld [vmem:[%s13776_s6 + $0x164] sm:$0xf]  ;;  %v8803_v24 = vor.u32 %v12559_v60, %v8800_v61 }
 0x139   : > { %6936 = vmatpush.bf16.msra.mxu2 %v8691_v52  ;;  %v8528_v27 = vld [vmem:[%s13776_s6 + $0x170] sm:$0xf0]  ;;  %v12523_v28 = vld [vmem:[%s13776_s6 + $0x264] sm:$0xf]  ;;  %v8403_v34 = vor.u32 %v12459_v18, %v8400_v19 }
 0x13a   : > { %6949 = vmatpush.bf16.msra.mxu3 %v8819_v55  ;;  %v8656_v62 = vld [vmem:[%s13776_s6 + $0x270] sm:$0xf0]  ;;  %v12555_v30 = vld [vmem:[%s13776_s6 + $0x364] sm:$0xf]  ;;  %v8531_v35 = vor.u32 %v12491_v23, %v8528_v27  ;;  %v14441_v55 = vadd.f32 %v6696_v50, %v6684_v45 }
 0x13b   : > { %v8784_v33 = vld [vmem:[%s13776_s6 + $0x370] sm:$0xf0]  ;;  %6911 = vmatpush.bf16.msra.mxu0 %v8419_v2  ;;  %v8659_v36 = vor.u32 %v12523_v28, %v8656_v62  ;;  %v12455_v37 = vld [vmem:[%s13776_s6 + $0x44] sm:$0xf] }
 0x13c   : > { %6924 = vmatpush.bf16.msra.mxu1 %v8547_v7  ;;  %v8384_v14 = vld [vmem:[%s13776_s6 + $0x50] sm:$0xf0]  ;;  %v12487_v39 = vld [vmem:[%s13776_s6 + $0x144] sm:$0xf]  ;;  %v8787_v40 = vor.u32 %v12555_v30, %v8784_v33 }
 0x13d   : > { %6937 = vmatpush.bf16.msra.mxu2 %v8675_v16  ;;  %v8512_v42 = vld [vmem:[%s13776_s6 + $0x150] sm:$0xf0]  ;;  %v12519_v43 = vld [vmem:[%s13776_s6 + $0x244] sm:$0xf]  ;;  %v8387_v53 = vor.u32 %v12455_v37, %v8384_v14 }
 0x13e   : > { %6950 = vmatpush.bf16.msra.mxu3 %v8803_v24  ;;  %v8640_v44 = vld [vmem:[%s13776_s6 + $0x250] sm:$0xf0]  ;;  %v12551_v51 = vld [vmem:[%s13776_s6 + $0x344] sm:$0xf]  ;;  %v8515_v56 = vor.u32 %v12487_v39, %v8512_v42 }
 0x13f   : > { %v8768_v52 = vld [vmem:[%s13776_s6 + $0x350] sm:$0xf0]  ;;  %6912 = vmatpush.bf16.msra.mxu0 %v8403_v34  ;;  %v8643_v57 = vor.u32 %v12519_v43, %v8640_v44  ;;  %v12451_v58 = vld [vmem:[%s13776_s6 + $0x24] sm:$0xf] }
 0x140   : > { %6925 = vmatpush.bf16.msra.mxu1 %v8531_v35  ;;  %v8368_v59 = vld [vmem:[%s13776_s6 + $0x30] sm:$0xf0]  ;;  %v12483_v60 = vld [vmem:[%s13776_s6 + $0x124] sm:$0xf]  ;;  %v8771_v61 = vor.u32 %v12551_v51, %v8768_v52 }
 0x141   : > { %6938 = vmatpush.bf16.msra.mxu2 %v8659_v36  ;;  %v8496_v1 = vld [vmem:[%s13776_s6 + $0x130] sm:$0xf0]  ;;  %v12515_v2 = vld [vmem:[%s13776_s6 + $0x224] sm:$0xf]  ;;  %v8371_v18 = vor.u32 %v12451_v58, %v8368_v59  ;;  %v6685_v36 = vpop.f32.mrf.mxu2 }
 0x142   : > { %6951 = vmatpush.bf16.msra.mxu3 %v8787_v40  ;;  %v8624_v6 = vld [vmem:[%s13776_s6 + $0x230] sm:$0xf0]  ;;  %v12547_v7 = vld [vmem:[%s13776_s6 + $0x324] sm:$0xf]  ;;  %v8499_v24 = vor.u32 %v12483_v60, %v8496_v1  ;;  %v6698_v40 = vpop.f32.mrf.mxu3 }
 0x143   : > { %v8752_v16 = vld [vmem:[%s13776_s6 + $0x330] sm:$0xf0]  ;;  %6913 = vmatpush.bf16.msra.mxu0 %v8387_v53  ;;  %v12447_v19 = vld [vmem:[%s13776_s6 + $0x4] sm:$0xf]  ;;  %v8627_v25 = vor.u32 %v12515_v2, %v8624_v6 }
 0x144   : > { %v8352_v23 = vld [vmem:[%s13776_s6 + $0x10] sm:$0xf0]  ;;  %6926 = vmatpush.bf16.msra.mxu1 %v8515_v56  ;;  %v12479_v27 = vld [vmem:[%s13776_s6 + $0x104] sm:$0xf]  ;;  %v8755_v30 = vor.u32 %v12547_v7, %v8752_v16 }
 0x145   : > { %6939 = vmatpush.bf16.msra.mxu2 %v8643_v57  ;;  %v8480_v28 = vld [vmem:[%s13776_s6 + $0x110] sm:$0xf0]  ;;  %v12511_v62 = vld [vmem:[%s13776_s6 + $0x204] sm:$0xf]  ;;  %v8355_v41 = vor.u32 %v12447_v19, %v8352_v23 }
 0x146   : > { %6952 = vmatpush.bf16.msra.mxu3 %v8771_v61  ;;  %v8608_v33 = vld [vmem:[%s13776_s6 + $0x210] sm:$0xf0]  ;;  %v12543_v34 = vld [vmem:[%s13776_s6 + $0x304] sm:$0xf]  ;;  %v8483_v45 = vor.u32 %v12479_v27, %v8480_v28 }
 0x147   : > { %v8736_v35 = vld [vmem:[%s13776_s6 + $0x310] sm:$0xf0]  ;;  %v12603_v37 = vld [vmem:[%s13776_s6 + $0x4e4] sm:$0xf]  ;;  %6914 = vmatpush.bf16.msra.mxu0 %v8371_v18  ;;  %v8611_v50 = vor.u32 %v12511_v62, %v8608_v33 }
 0x148   : > { %v8976_v14 = vld [vmem:[%s13776_s6 + $0x4f0] sm:$0xf0]  ;;  %v12635_v39 = vld [vmem:[%s13776_s6 + $0x5e4] sm:$0xf]  ;;  %6927 = vmatpush.bf16.msra.mxu1 %v8499_v24  ;;  %v8739_v17 = vor.u32 %v12543_v34, %v8736_v35 }
 0x149   : > { %v9104_v42 = vld [vmem:[%s13776_s6 + $0x5f0] sm:$0xf0]  ;;  %v12667_v43 = vld [vmem:[%s13776_s6 + $0x6e4] sm:$0xf]  ;;  %6940 = vmatpush.bf16.msra.mxu2 %v8627_v25  ;;  %v8979_v53 = vor.u32 %v12603_v37, %v8976_v14 }
 0x14a   : > { %v9232_v44 = vld [vmem:[%s13776_s6 + $0x6f0] sm:$0xf0]  ;;  %v12699_v51 = vld [vmem:[%s13776_s6 + $0x7e4] sm:$0xf]  ;;  %6953 = vmatpush.bf16.msra.mxu3 %v8755_v30  ;;  %v9107_v54 = vor.u32 %v12635_v39, %v9104_v42 }
 0x14b   : > { %v9360_v52 = vld [vmem:[%s13776_s6 + $0x7f0] sm:$0xf0]  ;;  %v9235_v56 = vor.u32 %v12667_v43, %v9232_v44  ;;  %v12599_v57 = vld [vmem:[%s13776_s6 + $0x4c4] sm:$0xf]  ;;  %6915 = vmatpush.bf16.msra.mxu0 %v8355_v41 }
 0x14c   : > { %v8960_v58 = vld [vmem:[%s13776_s6 + $0x4d0] sm:$0xf0]  ;;  %v12631_v59 = vld [vmem:[%s13776_s6 + $0x5c4] sm:$0xf]  ;;  %v9363_v60 = vor.u32 %v12699_v51, %v9360_v52  ;;  %6928 = vmatpush.bf16.msra.mxu1 %v8483_v45  ;;  %v6709_v45 = vpop.f32.mrf.mxu0 }
 0x14d   : > { %v9088_v61 = vld [vmem:[%s13776_s6 + $0x5d0] sm:$0xf0]  ;;  %v12663_v1 = vld [vmem:[%s13776_s6 + $0x6c4] sm:$0xf]  ;;  %6941 = vmatpush.bf16.msra.mxu2 %v8611_v50  ;;  %v8963_v16 = vor.u32 %v12599_v57, %v8960_v58  ;;  %v6710_v52 = vadd.f32 %v6709_v45, %v14441_v55 }
 0x14e   : > { %v9216_v2 = vld [vmem:[%s13776_s6 + $0x6d0] sm:$0xf0]  ;;  %v12695_v6 = vld [vmem:[%s13776_s6 + $0x7c4] sm:$0xf]  ;;  %6954 = vmatpush.bf16.msra.mxu3 %v8739_v17  ;;  %v9091_v18 = vor.u32 %v12631_v59, %v9088_v61  ;;  %6916 = vmatmul.bf16.vlgmr.msra.gmra.mxu0 %v13893_v21 }
 0x14f   : > { %v9344_v7 = vld [vmem:[%s13776_s6 + $0x7d0] sm:$0xf0]  ;;  %6960 = vmatpush.bf16.msrb.mxu0 %v8979_v53  ;;  %v9219_v19 = vor.u32 %v12663_v1, %v9216_v2  ;;  %v12595_v23 = vld [vmem:[%s13776_s6 + $0x4a4] sm:$0xf]  ;;  %6929 = vmatmul.bf16.vlgmr.msra.gmra.mxu1 %v13900_v26  ;;  %v6722_v53 = vpop.f32.mrf.mxu1 }
 0x150   : > { %6973 = vmatpush.bf16.msrb.mxu1 %v9107_v54  ;;  %v8944_v24 = vld [vmem:[%s13776_s6 + $0x4b0] sm:$0xf0]  ;;  %v12627_v25 = vld [vmem:[%s13776_s6 + $0x5a4] sm:$0xf]  ;;  %v9347_v27 = vor.u32 %v12695_v6, %v9344_v7  ;;  %6942 = vmatmul.bf16.vlgmr.msra.gmra.mxu2 %v13891_v20  ;;  %v6723_v61 = vadd.f32 %v6722_v53, %v6710_v52 }
 0x151   : > { %6986 = vmatpush.bf16.msrb.mxu2 %v9235_v56  ;;  %v9072_v28 = vld [vmem:[%s13776_s6 + $0x5b0] sm:$0xf0]  ;;  %v12659_v62 = vld [vmem:[%s13776_s6 + $0x6a4] sm:$0xf]  ;;  %6955 = vmatmul.bf16.vlgmr.msra.gmra.mxu3 %v13895_v22  ;;  %v8947_v35 = vor.u32 %v12595_v23, %v8944_v24 }
 0x152   : > { %6999 = vmatpush.bf16.msrb.mxu3 %v9363_v60  ;;  %v9200_v30 = vld [vmem:[%s13776_s6 + $0x6b0] sm:$0xf0]  ;;  %v12691_v33 = vld [vmem:[%s13776_s6 + $0x7a4] sm:$0xf]  ;;  %v9075_v36 = vor.u32 %v12627_v25, %v9072_v28 }
 0x153   : > { %v9328_v34 = vld [vmem:[%s13776_s6 + $0x7b0] sm:$0xf0]  ;;  %6961 = vmatpush.bf16.msrb.mxu0 %v8963_v16  ;;  %v9203_v37 = vor.u32 %v12659_v62, %v9200_v30  ;;  %v12591_v14 = vld [vmem:[%s13776_s6 + $0x484] sm:$0xf] }
 0x154   : > { %6974 = vmatpush.bf16.msrb.mxu1 %v9091_v18  ;;  %v8928_v39 = vld [vmem:[%s13776_s6 + $0x490] sm:$0xf0]  ;;  %v12623_v40 = vld [vmem:[%s13776_s6 + $0x584] sm:$0xf]  ;;  %v9331_v41 = vor.u32 %v12691_v33, %v9328_v34  ;;  %v6735_v28 = vpop.f32.mrf.mxu2 }
 0x155   : > { %6987 = vmatpush.bf16.msrb.mxu2 %v9219_v19  ;;  %v9056_v42 = vld [vmem:[%s13776_s6 + $0x590] sm:$0xf0]  ;;  %v12655_v43 = vld [vmem:[%s13776_s6 + $0x684] sm:$0xf]  ;;  %v8931_v17 = vor.u32 %v12591_v14, %v8928_v39  ;;  %v6736_v34 = vadd.f32 %v6735_v28, %v6723_v61  ;;  %v6711_v14 = vpop.f32.mrf.mxu0 }
 0x156   : > { %7000 = vmatpush.bf16.msrb.mxu3 %v9347_v27  ;;  %v9184_v44 = vld [vmem:[%s13776_s6 + $0x690] sm:$0xf0]  ;;  %v12687_v50 = vld [vmem:[%s13776_s6 + $0x784] sm:$0xf]  ;;  %v9059_v54 = vor.u32 %v12623_v40, %v9056_v42 }
 0x157   : > { %v9312_v51 = vld [vmem:[%s13776_s6 + $0x790] sm:$0xf0]  ;;  %6962 = vmatpush.bf16.msrb.mxu0 %v8947_v35  ;;  %v9187_v56 = vor.u32 %v12655_v43, %v9184_v44  ;;  %v12587_v57 = vld [vmem:[%s13776_s6 + $0x464] sm:$0xf]  ;;  %v6748_v35 = vpop.f32.mrf.mxu3  ;;  %v6724_v40 = vpop.f32.mrf.mxu1 }
 0x158   : > { %6975 = vmatpush.bf16.msrb.mxu1 %v9075_v36  ;;  %v8912_v58 = vld [vmem:[%s13776_s6 + $0x470] sm:$0xf0]  ;;  %v12619_v59 = vld [vmem:[%s13776_s6 + $0x564] sm:$0xf]  ;;  %v9315_v60 = vor.u32 %v12687_v50, %v9312_v51 }
 0x159   : > { %6988 = vmatpush.bf16.msrb.mxu2 %v9203_v37  ;;  %v9040_v1 = vld [vmem:[%s13776_s6 + $0x570] sm:$0xf0]  ;;  %v12651_v2 = vld [vmem:[%s13776_s6 + $0x664] sm:$0xf]  ;;  %v8915_v16 = vor.u32 %v12587_v57, %v8912_v58 }
 0x15a   : > { %7001 = vmatpush.bf16.msrb.mxu3 %v9331_v41  ;;  %v9168_v55 = vld [vmem:[%s13776_s6 + $0x670] sm:$0xf0]  ;;  %v12683_v6 = vld [vmem:[%s13776_s6 + $0x764] sm:$0xf]  ;;  %v9043_v18 = vor.u32 %v12619_v59, %v9040_v1  ;;  %v14512_v41 = vadd.f32 %v6748_v35, %v6736_v34 }
 0x15b   : > { %v9296_v7 = vld [vmem:[%s13776_s6 + $0x770] sm:$0xf0]  ;;  %6963 = vmatpush.bf16.msrb.mxu0 %v8931_v17  ;;  %v9171_v19 = vor.u32 %v12651_v2, %v9168_v55  ;;  %v12583_v23 = vld [vmem:[%s13776_s6 + $0x444] sm:$0xf] }
 0x15c   : > { %6976 = vmatpush.bf16.msrb.mxu1 %v9059_v54  ;;  %v8896_v24 = vld [vmem:[%s13776_s6 + $0x450] sm:$0xf0]  ;;  %v12615_v25 = vld [vmem:[%s13776_s6 + $0x544] sm:$0xf]  ;;  %v9299_v27 = vor.u32 %v12683_v6, %v9296_v7 }
 0x15d   : > { %6989 = vmatpush.bf16.msrb.mxu2 %v9187_v56  ;;  %v9024_v62 = vld [vmem:[%s13776_s6 + $0x550] sm:$0xf0]  ;;  %v12647_v30 = vld [vmem:[%s13776_s6 + $0x644] sm:$0xf]  ;;  %v8899_v39 = vor.u32 %v12583_v23, %v8896_v24 }
 0x15e   : > { %7002 = vmatpush.bf16.msrb.mxu3 %v9315_v60  ;;  %v9152_v33 = vld [vmem:[%s13776_s6 + $0x650] sm:$0xf0]  ;;  %v12679_v36 = vld [vmem:[%s13776_s6 + $0x744] sm:$0xf]  ;;  %v9027_v42 = vor.u32 %v12615_v25, %v9024_v62 }
 0x15f   : > { %v9280_v37 = vld [vmem:[%s13776_s6 + $0x750] sm:$0xf0]  ;;  %6964 = vmatpush.bf16.msrb.mxu0 %v8915_v16  ;;  %v9155_v43 = vor.u32 %v12647_v30, %v9152_v33  ;;  %v12579_v44 = vld [vmem:[%s13776_s6 + $0x424] sm:$0xf] }
 0x160   : > { %6977 = vmatpush.bf16.msrb.mxu1 %v9043_v18  ;;  %v8880_v45 = vld [vmem:[%s13776_s6 + $0x430] sm:$0xf0]  ;;  %v12611_v50 = vld [vmem:[%s13776_s6 + $0x524] sm:$0xf]  ;;  %v9283_v51 = vor.u32 %v12679_v36, %v9280_v37 }
 0x161   : > { %6990 = vmatpush.bf16.msrb.mxu2 %v9171_v19  ;;  %v9008_v52 = vld [vmem:[%s13776_s6 + $0x530] sm:$0xf0]  ;;  %v12643_v17 = vld [vmem:[%s13776_s6 + $0x624] sm:$0xf]  ;;  %v8883_v57 = vor.u32 %v12579_v44, %v8880_v45  ;;  %v6737_v19 = vpop.f32.mrf.mxu2 }
 0x162   : > { %7003 = vmatpush.bf16.msrb.mxu3 %v9299_v27  ;;  %v9136_v53 = vld [vmem:[%s13776_s6 + $0x630] sm:$0xf0]  ;;  %v12675_v54 = vld [vmem:[%s13776_s6 + $0x724] sm:$0xf]  ;;  %v9011_v60 = vor.u32 %v12611_v50, %v9008_v52  ;;  %v6750_v27 = vpop.f32.mrf.mxu3 }
 0x163   : > { %v9264_v56 = vld [vmem:[%s13776_s6 + $0x730] sm:$0xf0]  ;;  %6965 = vmatpush.bf16.msrb.mxu0 %v8899_v39  ;;  %v12575_v58 = vld [vmem:[%s13776_s6 + $0x404] sm:$0xf]  ;;  %v9139_v61 = vor.u32 %v12643_v17, %v9136_v53 }
 0x164   : > { %v8864_v59 = vld [vmem:[%s13776_s6 + $0x410] sm:$0xf0]  ;;  %6978 = vmatpush.bf16.msrb.mxu1 %v9027_v42  ;;  %v12607_v1 = vld [vmem:[%s13776_s6 + $0x504] sm:$0xf]  ;;  %v9267_v6 = vor.u32 %v12675_v54, %v9264_v56 }
 0x165   : > { %6991 = vmatpush.bf16.msrb.mxu2 %v9155_v43  ;;  %v8992_v2 = vld [vmem:[%s13776_s6 + $0x510] sm:$0xf0]  ;;  %v12639_v55 = vld [vmem:[%s13776_s6 + $0x604] sm:$0xf]  ;;  %v8867_v28 = vor.u32 %v12575_v58, %v8864_v59 }
 0x166   : > { %7004 = vmatpush.bf16.msrb.mxu3 %v9283_v51  ;;  %v9120_v7 = vld [vmem:[%s13776_s6 + $0x610] sm:$0xf0]  ;;  %v12671_v16 = vld [vmem:[%s13776_s6 + $0x704] sm:$0xf]  ;;  %v8995_v34 = vor.u32 %v12607_v1, %v8992_v2 }
 0x167   : > { %v9248_v18 = vld [vmem:[%s13776_s6 + $0x710] sm:$0xf0]  ;;  %v12731_v23 = vld [vmem:[%s13776_s6 + $0x8e4] sm:$0xf]  ;;  %6966 = vmatpush.bf16.msrb.mxu0 %v8883_v57  ;;  %v9123_v35 = vor.u32 %v12639_v55, %v9120_v7 }
 0x168   : > { %v9488_v24 = vld [vmem:[%s13776_s6 + $0x8f0] sm:$0xf0]  ;;  %v12763_v25 = vld [vmem:[%s13776_s6 + $0x9e4] sm:$0xf]  ;;  %6979 = vmatpush.bf16.msrb.mxu1 %v9011_v60  ;;  %v9251_v14 = vor.u32 %v12671_v16, %v9248_v18 }
 0x169   : > { %v9616_v62 = vld [vmem:[%s13776_s6 + $0x9f0] sm:$0xf0]  ;;  %v12795_v30 = vld [vmem:[%s13776_s6 + $0xae4] sm:$0xf]  ;;  %6992 = vmatpush.bf16.msrb.mxu2 %v9139_v61  ;;  %v9491_v39 = vor.u32 %v12731_v23, %v9488_v24 }
 0x16a   : > { %v9744_v33 = vld [vmem:[%s13776_s6 + $0xaf0] sm:$0xf0]  ;;  %v12827_v36 = vld [vmem:[%s13776_s6 + $0xbe4] sm:$0xf]  ;;  %7005 = vmatpush.bf16.msrb.mxu3 %v9267_v6  ;;  %v9619_v40 = vor.u32 %v12763_v25, %v9616_v62 }
 0x16b   : > { %v9872_v37 = vld [vmem:[%s13776_s6 + $0xbf0] sm:$0xf0]  ;;  %v9747_v42 = vor.u32 %v12795_v30, %v9744_v33  ;;  %v12727_v43 = vld [vmem:[%s13776_s6 + $0x8c4] sm:$0xf]  ;;  %6967 = vmatpush.bf16.msrb.mxu0 %v8867_v28 }
 0x16c   : > { %v9472_v44 = vld [vmem:[%s13776_s6 + $0x8d0] sm:$0xf0]  ;;  %v12759_v45 = vld [vmem:[%s13776_s6 + $0x9c4] sm:$0xf]  ;;  %v9875_v50 = vor.u32 %v12827_v36, %v9872_v37  ;;  %6980 = vmatpush.bf16.msrb.mxu1 %v8995_v34  ;;  %v6761_v34 = vpop.f32.mrf.mxu0 }
 0x16d   : > { %v9600_v51 = vld [vmem:[%s13776_s6 + $0x9d0] sm:$0xf0]  ;;  %v12791_v52 = vld [vmem:[%s13776_s6 + $0xac4] sm:$0xf]  ;;  %6993 = vmatpush.bf16.msrb.mxu2 %v9123_v35  ;;  %v9475_v56 = vor.u32 %v12727_v43, %v9472_v44  ;;  %v6762_v37 = vadd.f32 %v6761_v34, %v14512_v41 }
 0x16e   : > { %v9728_v17 = vld [vmem:[%s13776_s6 + $0xad0] sm:$0xf0]  ;;  %v12823_v53 = vld [vmem:[%s13776_s6 + $0xbc4] sm:$0xf]  ;;  %7006 = vmatpush.bf16.msrb.mxu3 %v9251_v14  ;;  %v9603_v57 = vor.u32 %v12759_v45, %v9600_v51  ;;  %6968 = vmatmul.bf16.vlgmr.msrb.gmra.mxu0 %v13949_v31 }
 0x16f   : > { %v9856_v54 = vld [vmem:[%s13776_s6 + $0xbd0] sm:$0xf0]  ;;  %7012 = vmatpush.bf16.msra.mxu0 %v9491_v39  ;;  %v9731_v58 = vor.u32 %v12791_v52, %v9728_v17  ;;  %v12723_v59 = vld [vmem:[%s13776_s6 + $0x8a4] sm:$0xf]  ;;  %6981 = vmatmul.bf16.vlgmr.msrb.gmra.mxu1 %v13956_v38  ;;  %v6774_v39 = vpop.f32.mrf.mxu1 }
 0x170   : > { %7025 = vmatpush.bf16.msra.mxu1 %v9619_v40  ;;  %v9456_v60 = vld [vmem:[%s13776_s6 + $0x8b0] sm:$0xf0]  ;;  %v12755_v61 = vld [vmem:[%s13776_s6 + $0x9a4] sm:$0xf]  ;;  %v9859_v1 = vor.u32 %v12823_v53, %v9856_v54  ;;  %6994 = vmatmul.bf16.vlgmr.msrb.gmra.mxu2 %v13947_v29  ;;  %v6775_v51 = vadd.f32 %v6774_v39, %v6762_v37 }
 0x171   : > { %7038 = vmatpush.bf16.msra.mxu2 %v9747_v42  ;;  %v9584_v2 = vld [vmem:[%s13776_s6 + $0x9b0] sm:$0xf0]  ;;  %v12787_v55 = vld [vmem:[%s13776_s6 + $0xaa4] sm:$0xf]  ;;  %7007 = vmatmul.bf16.vlgmr.msrb.gmra.mxu3 %v13951_v32  ;;  %v9459_v18 = vor.u32 %v12723_v59, %v9456_v60 }
 0x172   : > { %7051 = vmatpush.bf16.msra.mxu3 %v9875_v50  ;;  %v9712_v6 = vld [vmem:[%s13776_s6 + $0xab0] sm:$0xf0]  ;;  %v12819_v7 = vld [vmem:[%s13776_s6 + $0xba4] sm:$0xf]  ;;  %v9587_v19 = vor.u32 %v12755_v61, %v9584_v2  ;;  %v6787_v2 = vpop.f32.mrf.mxu2 }
 0x173   : > { %v9840_v16 = vld [vmem:[%s13776_s6 + $0xbb0] sm:$0xf0]  ;;  %7013 = vmatpush.bf16.msra.mxu0 %v9475_v56  ;;  %v9715_v23 = vor.u32 %v12787_v55, %v9712_v6  ;;  %v12719_v24 = vld [vmem:[%s13776_s6 + $0x884] sm:$0xf] }
 0x174   : > { %7026 = vmatpush.bf16.msra.mxu1 %v9603_v57  ;;  %v9440_v25 = vld [vmem:[%s13776_s6 + $0x890] sm:$0xf0]  ;;  %v12751_v27 = vld [vmem:[%s13776_s6 + $0x984] sm:$0xf]  ;;  %v9843_v28 = vor.u32 %v12819_v7, %v9840_v16  ;;  %v6788_v16 = vadd.f32 %v6787_v2, %v6775_v51 }
 0x175   : > { %7039 = vmatpush.bf16.msra.mxu2 %v9731_v58  ;;  %v9568_v62 = vld [vmem:[%s13776_s6 + $0x990] sm:$0xf0]  ;;  %v12783_v30 = vld [vmem:[%s13776_s6 + $0xa84] sm:$0xf]  ;;  %v9443_v14 = vor.u32 %v12719_v24, %v9440_v25  ;;  %v6763_v24 = vpop.f32.mrf.mxu0 }
 0x176   : > { %7052 = vmatpush.bf16.msra.mxu3 %v9859_v1  ;;  %v9696_v33 = vld [vmem:[%s13776_s6 + $0xa90] sm:$0xf0]  ;;  %v12815_v35 = vld [vmem:[%s13776_s6 + $0xb84] sm:$0xf]  ;;  %v9571_v40 = vor.u32 %v12751_v27, %v9568_v62 }
 0x177   : > { %v9824_v36 = vld [vmem:[%s13776_s6 + $0xb90] sm:$0xf0]  ;;  %7014 = vmatpush.bf16.msra.mxu0 %v9459_v18  ;;  %v9699_v42 = vor.u32 %v12783_v30, %v9696_v33  ;;  %v12715_v43 = vld [vmem:[%s13776_s6 + $0x864] sm:$0xf]  ;;  %v6800_v18 = vpop.f32.mrf.mxu3  ;;  %v6776_v27 = vpop.f32.mrf.mxu1 }
 0x178   : > { %7027 = vmatpush.bf16.msra.mxu1 %v9587_v19  ;;  %v9424_v44 = vld [vmem:[%s13776_s6 + $0x870] sm:$0xf0]  ;;  %v12747_v45 = vld [vmem:[%s13776_s6 + $0x964] sm:$0xf]  ;;  %v9827_v50 = vor.u32 %v12815_v35, %v9824_v36 }
 0x179   : > { %7040 = vmatpush.bf16.msra.mxu2 %v9715_v23  ;;  %v9552_v52 = vld [vmem:[%s13776_s6 + $0x970] sm:$0xf0]  ;;  %v12779_v17 = vld [vmem:[%s13776_s6 + $0xa64] sm:$0xf]  ;;  %v9427_v56 = vor.u32 %v12715_v43, %v9424_v44 }
 0x17a   : > { %7053 = vmatpush.bf16.msra.mxu3 %v9843_v28  ;;  %v9680_v41 = vld [vmem:[%s13776_s6 + $0xa70] sm:$0xf0]  ;;  %v12811_v53 = vld [vmem:[%s13776_s6 + $0xb64] sm:$0xf]  ;;  %v9555_v57 = vor.u32 %v12747_v45, %v9552_v52  ;;  %v14583_v28 = vadd.f32 %v6800_v18, %v6788_v16 }
 0x17b   : > { %v9808_v54 = vld [vmem:[%s13776_s6 + $0xb70] sm:$0xf0]  ;;  %7015 = vmatpush.bf16.msra.mxu0 %v9443_v14  ;;  %v9683_v58 = vor.u32 %v12779_v17, %v9680_v41  ;;  %v12711_v59 = vld [vmem:[%s13776_s6 + $0x844] sm:$0xf] }
 0x17c   : > { %7028 = vmatpush.bf16.msra.mxu1 %v9571_v40  ;;  %v9408_v60 = vld [vmem:[%s13776_s6 + $0x850] sm:$0xf0]  ;;  %v12743_v61 = vld [vmem:[%s13776_s6 + $0x944] sm:$0xf]  ;;  %v9811_v1 = vor.u32 %v12811_v53, %v9808_v54 }
 0x17d   : > { %7041 = vmatpush.bf16.msra.mxu2 %v9699_v42  ;;  %v9536_v55 = vld [vmem:[%s13776_s6 + $0x950] sm:$0xf0]  ;;  %v12775_v6 = vld [vmem:[%s13776_s6 + $0xa44] sm:$0xf]  ;;  %v9411_v25 = vor.u32 %v12711_v59, %v9408_v60 }
 0x17e   : > { %7054 = vmatpush.bf16.msra.mxu3 %v9827_v50  ;;  %v9664_v7 = vld [vmem:[%s13776_s6 + $0xa50] sm:$0xf0]  ;;  %v12807_v19 = vld [vmem:[%s13776_s6 + $0xb44] sm:$0xf]  ;;  %v9539_v62 = vor.u32 %v12743_v61, %v9536_v55 }
 0x17f   : > { %v9792_v23 = vld [vmem:[%s13776_s6 + $0xb50] sm:$0xf0]  ;;  %7016 = vmatpush.bf16.msra.mxu0 %v9427_v56  ;;  %v9667_v30 = vor.u32 %v12775_v6, %v9664_v7  ;;  %v12707_v33 = vld [vmem:[%s13776_s6 + $0x824] sm:$0xf] }
 0x180   : > { %7029 = vmatpush.bf16.msra.mxu1 %v9555_v57  ;;  %v9392_v34 = vld [vmem:[%s13776_s6 + $0x830] sm:$0xf0]  ;;  %v12739_v35 = vld [vmem:[%s13776_s6 + $0x924] sm:$0xf]  ;;  %v9795_v36 = vor.u32 %v12807_v19, %v9792_v23 }
 0x181   : > { %7042 = vmatpush.bf16.msra.mxu2 %v9683_v58  ;;  %v9520_v37 = vld [vmem:[%s13776_s6 + $0x930] sm:$0xf0]  ;;  %v12771_v14 = vld [vmem:[%s13776_s6 + $0xa24] sm:$0xf]  ;;  %v9395_v43 = vor.u32 %v12707_v33, %v9392_v34  ;;  %v6789_v58 = vpop.f32.mrf.mxu2 }
 0x182   : > { %7055 = vmatpush.bf16.msra.mxu3 %v9811_v1  ;;  %v9648_v39 = vld [vmem:[%s13776_s6 + $0xa30] sm:$0xf0]  ;;  %v12803_v40 = vld [vmem:[%s13776_s6 + $0xb24] sm:$0xf]  ;;  %v9523_v50 = vor.u32 %v12739_v35, %v9520_v37  ;;  %v6802_v1 = vpop.f32.mrf.mxu3 }
 0x183   : > { %v9776_v42 = vld [vmem:[%s13776_s6 + $0xb30] sm:$0xf0]  ;;  %7017 = vmatpush.bf16.msra.mxu0 %v9411_v25  ;;  %v12703_v44 = vld [vmem:[%s13776_s6 + $0x804] sm:$0xf]  ;;  %v9651_v51 = vor.u32 %v12771_v14, %v9648_v39 }
 0x184   : > { %v9376_v45 = vld [vmem:[%s13776_s6 + $0x810] sm:$0xf0]  ;;  %7030 = vmatpush.bf16.msra.mxu1 %v9539_v62  ;;  %v12735_v52 = vld [vmem:[%s13776_s6 + $0x904] sm:$0xf]  ;;  %v9779_v53 = vor.u32 %v12803_v40, %v9776_v42 }
 0x185   : > { %7043 = vmatpush.bf16.msra.mxu2 %v9667_v30  ;;  %v9504_v17 = vld [vmem:[%s13776_s6 + $0x910] sm:$0xf0]  ;;  %v12767_v41 = vld [vmem:[%s13776_s6 + $0xa04] sm:$0xf]  ;;  %v9379_v2 = vor.u32 %v12703_v44, %v9376_v45 }
 0x186   : > { %7056 = vmatpush.bf16.msra.mxu3 %v9795_v36  ;;  %v9632_v54 = vld [vmem:[%s13776_s6 + $0xa10] sm:$0xf0]  ;;  %v12799_v56 = vld [vmem:[%s13776_s6 + $0xb04] sm:$0xf]  ;;  %v9507_v16 = vor.u32 %v12735_v52, %v9504_v17 }
 0x187   : > { %v9760_v57 = vld [vmem:[%s13776_s6 + $0xb10] sm:$0xf0]  ;;  %v12859_v59 = vld [vmem:[%s13776_s6 + $0xce4] sm:$0xf]  ;;  %7018 = vmatpush.bf16.msra.mxu0 %v9395_v43  ;;  %v9635_v18 = vor.u32 %v12767_v41, %v9632_v54 }
 0x188   : > { %v10000_v60 = vld [vmem:[%s13776_s6 + $0xcf0] sm:$0xf0]  ;;  %v12891_v61 = vld [vmem:[%s13776_s6 + $0xde4] sm:$0xf]  ;;  %7031 = vmatpush.bf16.msra.mxu1 %v9523_v50  ;;  %v9763_v24 = vor.u32 %v12799_v56, %v9760_v57 }
 0x189   : > { %v10128_v55 = vld [vmem:[%s13776_s6 + $0xdf0] sm:$0xf0]  ;;  %v12923_v6 = vld [vmem:[%s13776_s6 + $0xee4] sm:$0xf]  ;;  %7044 = vmatpush.bf16.msra.mxu2 %v9651_v51  ;;  %v10003_v25 = vor.u32 %v12859_v59, %v10000_v60 }
 0x18a   : > { %v10256_v7 = vld [vmem:[%s13776_s6 + $0xef0] sm:$0xf0]  ;;  %v12955_v19 = vld [vmem:[%s13776_s6 + $0xfe4] sm:$0xf]  ;;  %7057 = vmatpush.bf16.msra.mxu3 %v9779_v53  ;;  %v10131_v27 = vor.u32 %v12891_v61, %v10128_v55 }
 0x18b   : > { %v10384_v23 = vld [vmem:[%s13776_s6 + $0xff0] sm:$0xf0]  ;;  %v10259_v62 = vor.u32 %v12923_v6, %v10256_v7  ;;  %v12855_v30 = vld [vmem:[%s13776_s6 + $0xcc4] sm:$0xf]  ;;  %7019 = vmatpush.bf16.msra.mxu0 %v9379_v2 }
 0x18c   : > { %v9984_v33 = vld [vmem:[%s13776_s6 + $0xcd0] sm:$0xf0]  ;;  %v12887_v34 = vld [vmem:[%s13776_s6 + $0xdc4] sm:$0xf]  ;;  %v10387_v35 = vor.u32 %v12955_v19, %v10384_v23  ;;  %7032 = vmatpush.bf16.msra.mxu1 %v9507_v16  ;;  %v6813_v16 = vpop.f32.mrf.mxu0 }
 0x18d   : > { %v10112_v36 = vld [vmem:[%s13776_s6 + $0xdd0] sm:$0xf0]  ;;  %v12919_v37 = vld [vmem:[%s13776_s6 + $0xec4] sm:$0xf]  ;;  %7045 = vmatpush.bf16.msra.mxu2 %v9635_v18  ;;  %v9987_v42 = vor.u32 %v12855_v30, %v9984_v33  ;;  %v6814_v23 = vadd.f32 %v6813_v16, %v14583_v28 }
 0x18e   : > { %v10240_v14 = vld [vmem:[%s13776_s6 + $0xed0] sm:$0xf0]  ;;  %v12951_v39 = vld [vmem:[%s13776_s6 + $0xfc4] sm:$0xf]  ;;  %7058 = vmatpush.bf16.msra.mxu3 %v9763_v24  ;;  %v10115_v43 = vor.u32 %v12887_v34, %v10112_v36  ;;  %7020 = vmatmul.bf16.vlgmr.msra.gmra.mxu0 %v14024_v8 }
 0x18f   : > { %v10368_v40 = vld [vmem:[%s13776_s6 + $0xfd0] sm:$0xf0]  ;;  %7064 = vmatpush.bf16.msrb.mxu0 %v10003_v25  ;;  %v10243_v44 = vor.u32 %v12919_v37, %v10240_v14  ;;  %v12851_v45 = vld [vmem:[%s13776_s6 + $0xca4] sm:$0xf]  ;;  %7033 = vmatmul.bf16.vlgmr.msra.gmra.mxu1 %v14030_v12 }
 0x190   : > { %7077 = vmatpush.bf16.msrb.mxu1 %v10131_v27  ;;  %v9968_v50 = vld [vmem:[%s13776_s6 + $0xcb0] sm:$0xf0]  ;;  %v12883_v51 = vld [vmem:[%s13776_s6 + $0xda4] sm:$0xf]  ;;  %v10371_v52 = vor.u32 %v12951_v39, %v10368_v40  ;;  %7046 = vmatmul.bf16.vlgmr.msra.gmra.mxu2 %v14028_v11 }
 0x191   : > { %7090 = vmatpush.bf16.msrb.mxu2 %v10259_v62  ;;  %v10096_v17 = vld [vmem:[%s13776_s6 + $0xdb0] sm:$0xf0]  ;;  %v12915_v41 = vld [vmem:[%s13776_s6 + $0xea4] sm:$0xf]  ;;  %7059 = vmatmul.bf16.vlgmr.msra.gmra.mxu3 %v14033_v15  ;;  %v9971_v57 = vor.u32 %v12851_v45, %v9968_v50  ;;  %v6826_v25 = vpop.f32.mrf.mxu1 }
 0x192   : > { %7103 = vmatpush.bf16.msrb.mxu3 %v10387_v35  ;;  %v10224_v53 = vld [vmem:[%s13776_s6 + $0xeb0] sm:$0xf0]  ;;  %v12947_v54 = vld [vmem:[%s13776_s6 + $0xfa4] sm:$0xf]  ;;  %v10099_v58 = vor.u32 %v12883_v51, %v10096_v17  ;;  %v6827_v36 = vadd.f32 %v6826_v25, %v6814_v23 }
 0x193   : > { %v10352_v56 = vld [vmem:[%s13776_s6 + $0xfb0] sm:$0xf0]  ;;  %7065 = vmatpush.bf16.msrb.mxu0 %v9987_v42  ;;  %v10227_v59 = vor.u32 %v12915_v41, %v10224_v53  ;;  %v12847_v60 = vld [vmem:[%s13776_s6 + $0xc84] sm:$0xf] }
 0x194   : > { %7078 = vmatpush.bf16.msrb.mxu1 %v10115_v43  ;;  %v9952_v61 = vld [vmem:[%s13776_s6 + $0xc90] sm:$0xf0]  ;;  %v12879_v1 = vld [vmem:[%s13776_s6 + $0xd84] sm:$0xf]  ;;  %v10355_v2 = vor.u32 %v12947_v54, %v10352_v56 }
 0x195   : > { %7091 = vmatpush.bf16.msrb.mxu2 %v10243_v44  ;;  %v10080_v55 = vld [vmem:[%s13776_s6 + $0xd90] sm:$0xf0]  ;;  %v12911_v6 = vld [vmem:[%s13776_s6 + $0xe84] sm:$0xf]  ;;  %v9955_v24 = vor.u32 %v12847_v60, %v9952_v61  ;;  %v6815_v60 = vpop.f32.mrf.mxu0 }
 0x196   : > { %7104 = vmatpush.bf16.msrb.mxu3 %v10371_v52  ;;  %v10208_v7 = vld [vmem:[%s13776_s6 + $0xe90] sm:$0xf0]  ;;  %v12943_v18 = vld [vmem:[%s13776_s6 + $0xf84] sm:$0xf]  ;;  %v10083_v27 = vor.u32 %v12879_v1, %v10080_v55 }
 0x197   : > { %v10336_v19 = vld [vmem:[%s13776_s6 + $0xf90] sm:$0xf0]  ;;  %7066 = vmatpush.bf16.msrb.mxu0 %v9971_v57  ;;  %v10211_v62 = vor.u32 %v12911_v6, %v10208_v7  ;;  %v12843_v30 = vld [vmem:[%s13776_s6 + $0xc64] sm:$0xf]  ;;  %v6839_v17 = vpop.f32.mrf.mxu2 }
 0x198   : > { %7079 = vmatpush.bf16.msrb.mxu1 %v10099_v58  ;;  %v9936_v33 = vld [vmem:[%s13776_s6 + $0xc70] sm:$0xf0]  ;;  %v12875_v34 = vld [vmem:[%s13776_s6 + $0xd64] sm:$0xf]  ;;  %v10339_v35 = vor.u32 %v12943_v18, %v10336_v19  ;;  %v6840_v56 = vadd.f32 %v6839_v17, %v6827_v36  ;;  %v6852_v57 = vpop.f32.mrf.mxu3 }
 0x199   : > { %7092 = vmatpush.bf16.msrb.mxu2 %v10227_v59  ;;  %v10064_v37 = vld [vmem:[%s13776_s6 + $0xd70] sm:$0xf0]  ;;  %v12907_v14 = vld [vmem:[%s13776_s6 + $0xe64] sm:$0xf]  ;;  %v9939_v42 = vor.u32 %v12843_v30, %v9936_v33  ;;  %v6828_v1 = vpop.f32.mrf.mxu1 }
 0x19a   : > { %7105 = vmatpush.bf16.msrb.mxu3 %v10355_v2  ;;  %v10192_v28 = vld [vmem:[%s13776_s6 + $0xe70] sm:$0xf0]  ;;  %v12939_v39 = vld [vmem:[%s13776_s6 + $0xf64] sm:$0xf]  ;;  %v10067_v43 = vor.u32 %v12875_v34, %v10064_v37  ;;  %v14654_v2 = vadd.f32 %v6852_v57, %v6840_v56 }
 0x19b   : > { %v10320_v40 = vld [vmem:[%s13776_s6 + $0xf70] sm:$0xf0]  ;;  %7067 = vmatpush.bf16.msrb.mxu0 %v9955_v24  ;;  %v10195_v44 = vor.u32 %v12907_v14, %v10192_v28  ;;  %v12839_v45 = vld [vmem:[%s13776_s6 + $0xc44] sm:$0xf] }
 0x19c   : > { %7080 = vmatpush.bf16.msrb.mxu1 %v10083_v27  ;;  %v9920_v50 = vld [vmem:[%s13776_s6 + $0xc50] sm:$0xf0]  ;;  %v12871_v51 = vld [vmem:[%s13776_s6 + $0xd44] sm:$0xf]  ;;  %v10323_v52 = vor.u32 %v12939_v39, %v10320_v40 }
 0x19d   : > { %7093 = vmatpush.bf16.msrb.mxu2 %v10211_v62  ;;  %v10048_v41 = vld [vmem:[%s13776_s6 + $0xd50] sm:$0xf0]  ;;  %v12903_v53 = vld [vmem:[%s13776_s6 + $0xe44] sm:$0xf]  ;;  %v9923_v61 = vor.u32 %v12839_v45, %v9920_v50 }
 0x19e   : > { %7106 = vmatpush.bf16.msrb.mxu3 %v10339_v35  ;;  %v10176_v54 = vld [vmem:[%s13776_s6 + $0xe50] sm:$0xf0]  ;;  %v12935_v58 = vld [vmem:[%s13776_s6 + $0xf44] sm:$0xf]  ;;  %v10051_v55 = vor.u32 %v12871_v51, %v10048_v41 }
 0x19f   : > { %v10304_v59 = vld [vmem:[%s13776_s6 + $0xf50] sm:$0xf0]  ;;  %7068 = vmatpush.bf16.msrb.mxu0 %v9939_v42  ;;  %v10179_v6 = vor.u32 %v12903_v53, %v10176_v54  ;;  %v12835_v7 = vld [vmem:[%s13776_s6 + $0xc24] sm:$0xf] }
 0x1a0   : > { %7081 = vmatpush.bf16.msrb.mxu1 %v10067_v43  ;;  %v9904_v16 = vld [vmem:[%s13776_s6 + $0xc30] sm:$0xf0]  ;;  %v12867_v18 = vld [vmem:[%s13776_s6 + $0xd24] sm:$0xf]  ;;  %v10307_v19 = vor.u32 %v12935_v58, %v10304_v59 }
 0x1a1   : > { %7094 = vmatpush.bf16.msrb.mxu2 %v10195_v44  ;;  %v10032_v23 = vld [vmem:[%s13776_s6 + $0xd30] sm:$0xf0]  ;;  %v12899_v24 = vld [vmem:[%s13776_s6 + $0xe24] sm:$0xf]  ;;  %v9907_v30 = vor.u32 %v12835_v7, %v9904_v16  ;;  %v6841_v44 = vpop.f32.mrf.mxu2 }
 0x1a2   : > { %7107 = vmatpush.bf16.msrb.mxu3 %v10323_v52  ;;  %v10160_v25 = vld [vmem:[%s13776_s6 + $0xe30] sm:$0xf0]  ;;  %v12931_v27 = vld [vmem:[%s13776_s6 + $0xf24] sm:$0xf]  ;;  %v10035_v35 = vor.u32 %v12867_v18, %v10032_v23  ;;  %v6854_v52 = vpop.f32.mrf.mxu3 }
 0x1a3   : > { %v10288_v62 = vld [vmem:[%s13776_s6 + $0xf30] sm:$0xf0]  ;;  %7069 = vmatpush.bf16.msrb.mxu0 %v9923_v61  ;;  %v12831_v33 = vld [vmem:[%s13776_s6 + $0xc04] sm:$0xf]  ;;  %v10163_v36 = vor.u32 %v12899_v24, %v10160_v25 }
 0x1a4   : > { %v9888_v34 = vld [vmem:[%s13776_s6 + $0xc10] sm:$0xf0]  ;;  %7082 = vmatpush.bf16.msrb.mxu1 %v10051_v55  ;;  %v12863_v37 = vld [vmem:[%s13776_s6 + $0xd04] sm:$0xf]  ;;  %v10291_v39 = vor.u32 %v12931_v27, %v10288_v62 }
 0x1a5   : > { %7095 = vmatpush.bf16.msrb.mxu2 %v10179_v6  ;;  %v10016_v14 = vld [vmem:[%s13776_s6 + $0xd10] sm:$0xf0]  ;;  %v12895_v28 = vld [vmem:[%s13776_s6 + $0xe04] sm:$0xf]  ;;  %v9891_v17 = vor.u32 %v12831_v33, %v9888_v34 }
 0x1a6   : > { %7108 = vmatpush.bf16.msrb.mxu3 %v10307_v19  ;;  %v10144_v40 = vld [vmem:[%s13776_s6 + $0xe10] sm:$0xf0]  ;;  %v12927_v42 = vld [vmem:[%s13776_s6 + $0xf04] sm:$0xf]  ;;  %v10019_v56 = vor.u32 %v12863_v37, %v10016_v14 }
 0x1a7   : > { %v10272_v43 = vld [vmem:[%s13776_s6 + $0xf10] sm:$0xf0]  ;;  %v12987_v45 = vld [vmem:[%s13776_s6 + $0x10e4] sm:$0xf]  ;;  %7070 = vmatpush.bf16.msrb.mxu0 %v9907_v30  ;;  %v10147_v57 = vor.u32 %v12895_v28, %v10144_v40 }
 0x1a8   : > { %v10512_v50 = vld [vmem:[%s13776_s6 + $0x10f0] sm:$0xf0]  ;;  %v13019_v51 = vld [vmem:[%s13776_s6 + $0x11e4] sm:$0xf]  ;;  %7083 = vmatpush.bf16.msrb.mxu1 %v10035_v35  ;;  %v10275_v60 = vor.u32 %v12927_v42, %v10272_v43 }
 0x1a9   : > { %v10640_v41 = vld [vmem:[%s13776_s6 + $0x11f0] sm:$0xf0]  ;;  %v13051_v53 = vld [vmem:[%s13776_s6 + $0x12e4] sm:$0xf]  ;;  %7096 = vmatpush.bf16.msrb.mxu2 %v10163_v36  ;;  %v10515_v61 = vor.u32 %v12987_v45, %v10512_v50 }
 0x1aa   : > { %v10768_v54 = vld [vmem:[%s13776_s6 + $0x12f0] sm:$0xf0]  ;;  %v13083_v58 = vld [vmem:[%s13776_s6 + $0x13e4] sm:$0xf]  ;;  %7109 = vmatpush.bf16.msrb.mxu3 %v10291_v39  ;;  %v10643_v1 = vor.u32 %v13019_v51, %v10640_v41 }
 0x1ab   : > { %v10896_v59 = vld [vmem:[%s13776_s6 + $0x13f0] sm:$0xf0]  ;;  %v10771_v55 = vor.u32 %v13051_v53, %v10768_v54  ;;  %v12983_v6 = vld [vmem:[%s13776_s6 + $0x10c4] sm:$0xf]  ;;  %7071 = vmatpush.bf16.msrb.mxu0 %v9891_v17 }
 0x1ac   : > { %v10496_v7 = vld [vmem:[%s13776_s6 + $0x10d0] sm:$0xf0]  ;;  %v13015_v16 = vld [vmem:[%s13776_s6 + $0x11c4] sm:$0xf]  ;;  %v10899_v18 = vor.u32 %v13083_v58, %v10896_v59  ;;  %7084 = vmatpush.bf16.msrb.mxu1 %v10019_v56  ;;  %v6865_v56 = vpop.f32.mrf.mxu0 }
 0x1ad   : > { %v10624_v19 = vld [vmem:[%s13776_s6 + $0x11d0] sm:$0xf0]  ;;  %v13047_v23 = vld [vmem:[%s13776_s6 + $0x12c4] sm:$0xf]  ;;  %7097 = vmatpush.bf16.msrb.mxu2 %v10147_v57  ;;  %v10499_v62 = vor.u32 %v12983_v6, %v10496_v7  ;;  %v6866_v59 = vadd.f32 %v6865_v56, %v14654_v2 }
 0x1ae   : > { %v10752_v24 = vld [vmem:[%s13776_s6 + $0x12d0] sm:$0xf0]  ;;  %v13079_v25 = vld [vmem:[%s13776_s6 + $0x13c4] sm:$0xf]  ;;  %7110 = vmatpush.bf16.msrb.mxu3 %v10275_v60  ;;  %v10627_v30 = vor.u32 %v13015_v16, %v10624_v19  ;;  %7072 = vmatmul.bf16.vlgmr.msrb.gmra.mxu0 %v14090_v46 }
 0x1af   : > { %v10880_v27 = vld [vmem:[%s13776_s6 + $0x13d0] sm:$0xf0]  ;;  %7116 = vmatpush.bf16.msra.mxu0 %v10515_v61  ;;  %v10755_v33 = vor.u32 %v13047_v23, %v10752_v24  ;;  %v12979_v34 = vld [vmem:[%s13776_s6 + $0x10a4] sm:$0xf]  ;;  %7085 = vmatmul.bf16.vlgmr.msrb.gmra.mxu1 %v14094_v48  ;;  %v6878_v61 = vpop.f32.mrf.mxu1 }
 0x1b0   : > { %7129 = vmatpush.bf16.msra.mxu1 %v10643_v1  ;;  %v10480_v35 = vld [vmem:[%s13776_s6 + $0x10b0] sm:$0xf0]  ;;  %v13011_v36 = vld [vmem:[%s13776_s6 + $0x11a4] sm:$0xf]  ;;  %v10883_v37 = vor.u32 %v13079_v25, %v10880_v27  ;;  %7098 = vmatmul.bf16.vlgmr.msrb.gmra.mxu2 %v14092_v47  ;;  %v6879_v19 = vadd.f32 %v6878_v61, %v6866_v59 }
 0x1b1   : > { %7142 = vmatpush.bf16.msra.mxu2 %v10771_v55  ;;  %v10608_v14 = vld [vmem:[%s13776_s6 + $0x11b0] sm:$0xf0]  ;;  %v13043_v28 = vld [vmem:[%s13776_s6 + $0x12a4] sm:$0xf]  ;;  %7111 = vmatmul.bf16.vlgmr.msrb.gmra.mxu3 %v14096_v49  ;;  %v10483_v43 = vor.u32 %v12979_v34, %v10480_v35 }
 0x1b2   : > { %7155 = vmatpush.bf16.msra.mxu3 %v10899_v18  ;;  %v10736_v39 = vld [vmem:[%s13776_s6 + $0x12b0] sm:$0xf0]  ;;  %v13075_v40 = vld [vmem:[%s13776_s6 + $0x13a4] sm:$0xf]  ;;  %v10611_v44 = vor.u32 %v13011_v36, %v10608_v14 }
 0x1b3   : > { %v10864_v42 = vld [vmem:[%s13776_s6 + $0x13b0] sm:$0xf0]  ;;  %7117 = vmatpush.bf16.msra.mxu0 %v10499_v62  ;;  %v10739_v45 = vor.u32 %v13043_v28, %v10736_v39  ;;  %v12975_v50 = vld [vmem:[%s13776_s6 + $0x1084] sm:$0xf]  ;;  %v6891_v14 = vpop.f32.mrf.mxu2 }
 0x1b4   : > { %7130 = vmatpush.bf16.msra.mxu1 %v10627_v30  ;;  %v10464_v51 = vld [vmem:[%s13776_s6 + $0x1090] sm:$0xf0]  ;;  %v13007_v52 = vld [vmem:[%s13776_s6 + $0x1184] sm:$0xf]  ;;  %v10867_v17 = vor.u32 %v13075_v40, %v10864_v42  ;;  %v6892_v42 = vadd.f32 %v6891_v14, %v6879_v19 }
 0x1b5   : > { %7143 = vmatpush.bf16.msra.mxu2 %v10755_v33  ;;  %v10592_v41 = vld [vmem:[%s13776_s6 + $0x1190] sm:$0xf0]  ;;  %v13039_v53 = vld [vmem:[%s13776_s6 + $0x1284] sm:$0xf]  ;;  %v10467_v60 = vor.u32 %v12975_v50, %v10464_v51  ;;  %v6867_v50 = vpop.f32.mrf.mxu0 }
 0x1b6   : > { %7156 = vmatpush.bf16.msra.mxu3 %v10883_v37  ;;  %v10720_v54 = vld [vmem:[%s13776_s6 + $0x1290] sm:$0xf0]  ;;  %v13071_v57 = vld [vmem:[%s13776_s6 + $0x1384] sm:$0xf]  ;;  %v10595_v1 = vor.u32 %v13007_v52, %v10592_v41 }
 0x1b7   : > { %v10848_v58 = vld [vmem:[%s13776_s6 + $0x1390] sm:$0xf0]  ;;  %7118 = vmatpush.bf16.msra.mxu0 %v10483_v43  ;;  %v10723_v55 = vor.u32 %v13039_v53, %v10720_v54  ;;  %v12971_v6 = vld [vmem:[%s13776_s6 + $0x1064] sm:$0xf]  ;;  %v6904_v43 = vpop.f32.mrf.mxu3  ;;  %v6880_v52 = vpop.f32.mrf.mxu1 }
 0x1b8   : > { %7131 = vmatpush.bf16.msra.mxu1 %v10611_v44  ;;  %v10448_v7 = vld [vmem:[%s13776_s6 + $0x1070] sm:$0xf0]  ;;  %v13003_v16 = vld [vmem:[%s13776_s6 + $0x1164] sm:$0xf]  ;;  %v10851_v18 = vor.u32 %v13071_v57, %v10848_v58 }
 0x1b9   : > { %7144 = vmatpush.bf16.msra.mxu2 %v10739_v45  ;;  %v10576_v23 = vld [vmem:[%s13776_s6 + $0x1170] sm:$0xf0]  ;;  %v13035_v24 = vld [vmem:[%s13776_s6 + $0x1264] sm:$0xf]  ;;  %v10451_v62 = vor.u32 %v12971_v6, %v10448_v7 }
 0x1ba   : > { %7157 = vmatpush.bf16.msra.mxu3 %v10867_v17  ;;  %v10704_v2 = vld [vmem:[%s13776_s6 + $0x1270] sm:$0xf0]  ;;  %v13067_v25 = vld [vmem:[%s13776_s6 + $0x1364] sm:$0xf]  ;;  %v10579_v30 = vor.u32 %v13003_v16, %v10576_v23  ;;  %v14725_v17 = vadd.f32 %v6904_v43, %v6892_v42 }
 0x1bb   : > { %v10832_v27 = vld [vmem:[%s13776_s6 + $0x1370] sm:$0xf0]  ;;  %7119 = vmatpush.bf16.msra.mxu0 %v10467_v60  ;;  %v10707_v33 = vor.u32 %v13035_v24, %v10704_v2  ;;  %v12967_v34 = vld [vmem:[%s13776_s6 + $0x1044] sm:$0xf] }
 0x1bc   : > { %7132 = vmatpush.bf16.msra.mxu1 %v10595_v1  ;;  %v10432_v35 = vld [vmem:[%s13776_s6 + $0x1050] sm:$0xf0]  ;;  %v12999_v36 = vld [vmem:[%s13776_s6 + $0x1144] sm:$0xf]  ;;  %v10835_v37 = vor.u32 %v13067_v25, %v10832_v27 }
 0x1bd   : > { %7145 = vmatpush.bf16.msra.mxu2 %v10723_v55  ;;  %v10560_v28 = vld [vmem:[%s13776_s6 + $0x1150] sm:$0xf0]  ;;  %v13031_v39 = vld [vmem:[%s13776_s6 + $0x1244] sm:$0xf]  ;;  %v10435_v51 = vor.u32 %v12967_v34, %v10432_v35 }
 0x1be   : > { %7158 = vmatpush.bf16.msra.mxu3 %v10851_v18  ;;  %v10688_v40 = vld [vmem:[%s13776_s6 + $0x1250] sm:$0xf0]  ;;  %v13063_v44 = vld [vmem:[%s13776_s6 + $0x1344] sm:$0xf]  ;;  %v10563_v41 = vor.u32 %v12999_v36, %v10560_v28 }
 0x1bf   : > { %v10816_v45 = vld [vmem:[%s13776_s6 + $0x1350] sm:$0xf0]  ;;  %7120 = vmatpush.bf16.msra.mxu0 %v10451_v62  ;;  %v10691_v53 = vor.u32 %v13031_v39, %v10688_v40  ;;  %v12963_v54 = vld [vmem:[%s13776_s6 + $0x1024] sm:$0xf] }
 0x1c0   : > { %7133 = vmatpush.bf16.msra.mxu1 %v10579_v30  ;;  %v10416_v56 = vld [vmem:[%s13776_s6 + $0x1030] sm:$0xf0]  ;;  %v12995_v57 = vld [vmem:[%s13776_s6 + $0x1124] sm:$0xf]  ;;  %v10819_v58 = vor.u32 %v13063_v44, %v10816_v45 }
 0x1c1   : > { %7146 = vmatpush.bf16.msra.mxu2 %v10707_v33  ;;  %v10544_v59 = vld [vmem:[%s13776_s6 + $0x1130] sm:$0xf0]  ;;  %v13027_v60 = vld [vmem:[%s13776_s6 + $0x1224] sm:$0xf]  ;;  %v10419_v6 = vor.u32 %v12963_v54, %v10416_v56  ;;  %v6893_v33 = vpop.f32.mrf.mxu2 }
 0x1c2   : > { %7159 = vmatpush.bf16.msra.mxu3 %v10835_v37  ;;  %v10672_v61 = vld [vmem:[%s13776_s6 + $0x1230] sm:$0xf0]  ;;  %v13059_v1 = vld [vmem:[%s13776_s6 + $0x1324] sm:$0xf]  ;;  %v10547_v18 = vor.u32 %v12995_v57, %v10544_v59  ;;  %v6906_v37 = vpop.f32.mrf.mxu3 }
 0x1c3   : > { %v10800_v55 = vld [vmem:[%s13776_s6 + $0x1330] sm:$0xf0]  ;;  %7121 = vmatpush.bf16.msra.mxu0 %v10435_v51  ;;  %v12959_v7 = vld [vmem:[%s13776_s6 + $0x1004] sm:$0xf]  ;;  %v10675_v19 = vor.u32 %v13027_v60, %v10672_v61 }
 0x1c4   : > { %v10400_v16 = vld [vmem:[%s13776_s6 + $0x1010] sm:$0xf0]  ;;  %7134 = vmatpush.bf16.msra.mxu1 %v10563_v41  ;;  %v12991_v23 = vld [vmem:[%s13776_s6 + $0x1104] sm:$0xf]  ;;  %v10803_v25 = vor.u32 %v13059_v1, %v10800_v55 }
 0x1c5   : > { %7147 = vmatpush.bf16.msra.mxu2 %v10691_v53  ;;  %v10528_v24 = vld [vmem:[%s13776_s6 + $0x1110] sm:$0xf0]  ;;  %v13023_v2 = vld [vmem:[%s13776_s6 + $0x1204] sm:$0xf]  ;;  %v10403_v14 = vor.u32 %v12959_v7, %v10400_v16 }
 0x1c6   : > { %7160 = vmatpush.bf16.msra.mxu3 %v10819_v58  ;;  %v10656_v27 = vld [vmem:[%s13776_s6 + $0x1210] sm:$0xf0]  ;;  %v13055_v62 = vld [vmem:[%s13776_s6 + $0x1304] sm:$0xf]  ;;  %v10531_v42 = vor.u32 %v12991_v23, %v10528_v24 }
 0x1c7   : > { %v10784_v30 = vld [vmem:[%s13776_s6 + $0x1310] sm:$0xf0]  ;;  %v13115_v34 = vld [vmem:[%s13776_s6 + $0x14e4] sm:$0xf]  ;;  %7122 = vmatpush.bf16.msra.mxu0 %v10419_v6  ;;  %v10659_v43 = vor.u32 %v13023_v2, %v10656_v27 }
 0x1c8   : > { %v11024_v35 = vld [vmem:[%s13776_s6 + $0x14f0] sm:$0xf0]  ;;  %v13147_v36 = vld [vmem:[%s13776_s6 + $0x15e4] sm:$0xf]  ;;  %7135 = vmatpush.bf16.msra.mxu1 %v10547_v18  ;;  %v10787_v50 = vor.u32 %v13055_v62, %v10784_v30 }
 0x1c9   : > { %v11152_v28 = vld [vmem:[%s13776_s6 + $0x15f0] sm:$0xf0]  ;;  %v13179_v39 = vld [vmem:[%s13776_s6 + $0x16e4] sm:$0xf]  ;;  %7148 = vmatpush.bf16.msra.mxu2 %v10675_v19  ;;  %v11027_v51 = vor.u32 %v13115_v34, %v11024_v35 }
 0x1ca   : > { %v11280_v40 = vld [vmem:[%s13776_s6 + $0x16f0] sm:$0xf0]  ;;  %v13211_v44 = vld [vmem:[%s13776_s6 + $0x17e4] sm:$0xf]  ;;  %7161 = vmatpush.bf16.msra.mxu3 %v10803_v25  ;;  %v11155_v52 = vor.u32 %v13147_v36, %v11152_v28 }
 0x1cb   : > { %v11408_v45 = vld [vmem:[%s13776_s6 + $0x17f0] sm:$0xf0]  ;;  %v11283_v41 = vor.u32 %v13179_v39, %v11280_v40  ;;  %v13111_v53 = vld [vmem:[%s13776_s6 + $0x14c4] sm:$0xf]  ;;  %7123 = vmatpush.bf16.msra.mxu0 %v10403_v14 }
 0x1cc   : > { %v11008_v54 = vld [vmem:[%s13776_s6 + $0x14d0] sm:$0xf0]  ;;  %v13143_v56 = vld [vmem:[%s13776_s6 + $0x15c4] sm:$0xf]  ;;  %v11411_v57 = vor.u32 %v13211_v44, %v11408_v45  ;;  %7136 = vmatpush.bf16.msra.mxu1 %v10531_v42  ;;  %v6917_v45 = vpop.f32.mrf.mxu0 }
 0x1cd   : > { %v11136_v58 = vld [vmem:[%s13776_s6 + $0x15d0] sm:$0xf0]  ;;  %v13175_v59 = vld [vmem:[%s13776_s6 + $0x16c4] sm:$0xf]  ;;  %7149 = vmatpush.bf16.msra.mxu2 %v10659_v43  ;;  %v11011_v55 = vor.u32 %v13111_v53, %v11008_v54  ;;  %v6930_v54 = vpop.f32.mrf.mxu1 }
 0x1ce   : > { %v11264_v60 = vld [vmem:[%s13776_s6 + $0x16d0] sm:$0xf0]  ;;  %v13207_v61 = vld [vmem:[%s13776_s6 + $0x17c4] sm:$0xf]  ;;  %7162 = vmatpush.bf16.msra.mxu3 %v10787_v50  ;;  %v11139_v6 = vor.u32 %v13143_v56, %v11136_v58  ;;  %7124 = vmatmul.bf16.vlgmr.msra.gmra.mxu0 %v14179_v5 }
 0x1cf   : > { %v11392_v1 = vld [vmem:[%s13776_s6 + $0x17d0] sm:$0xf0]  ;;  %7168 = vmatpush.bf16.msrb.mxu0 %v11027_v51  ;;  %v11267_v7 = vor.u32 %v13175_v59, %v11264_v60  ;;  %v13107_v16 = vld [vmem:[%s13776_s6 + $0x14a4] sm:$0xf]  ;;  %7137 = vmatmul.bf16.vlgmr.msra.gmra.mxu1 %v14185_v10  ;;  %v6931_v60 = vadd.f32 %v6930_v54, %v6917_v45 }
 0x1d0   : > { %7181 = vmatpush.bf16.msrb.mxu1 %v11155_v52  ;;  %v10992_v18 = vld [vmem:[%s13776_s6 + $0x14b0] sm:$0xf0]  ;;  %v13139_v19 = vld [vmem:[%s13776_s6 + $0x15a4] sm:$0xf]  ;;  %v11395_v23 = vor.u32 %v13207_v61, %v11392_v1  ;;  %7150 = vmatmul.bf16.vlgmr.msra.gmra.mxu2 %v14183_v9 }
 0x1d1   : > { %7194 = vmatpush.bf16.msrb.mxu2 %v11283_v41  ;;  %v11120_v24 = vld [vmem:[%s13776_s6 + $0x15b0] sm:$0xf0]  ;;  %v13171_v2 = vld [vmem:[%s13776_s6 + $0x16a4] sm:$0xf]  ;;  %7163 = vmatmul.bf16.vlgmr.msra.gmra.mxu3 %v14187_v13  ;;  %v10995_v30 = vor.u32 %v13107_v16, %v10992_v18 }
 0x1d2   : > { %7207 = vmatpush.bf16.msrb.mxu3 %v11411_v57  ;;  %v11248_v25 = vld [vmem:[%s13776_s6 + $0x16b0] sm:$0xf0]  ;;  %v13203_v27 = vld [vmem:[%s13776_s6 + $0x17a4] sm:$0xf]  ;;  %v11123_v33 = vor.u32 %v13139_v19, %v11120_v24 }
 0x1d3   : > { %v11376_v62 = vld [vmem:[%s13776_s6 + $0x17b0] sm:$0xf0]  ;;  %7169 = vmatpush.bf16.msrb.mxu0 %v11011_v55  ;;  %v11251_v34 = vor.u32 %v13171_v2, %v11248_v25  ;;  %v13103_v35 = vld [vmem:[%s13776_s6 + $0x1484] sm:$0xf] }
 0x1d4   : > { %7182 = vmatpush.bf16.msrb.mxu1 %v11139_v6  ;;  %v10976_v36 = vld [vmem:[%s13776_s6 + $0x1490] sm:$0xf0]  ;;  %v13135_v37 = vld [vmem:[%s13776_s6 + $0x1584] sm:$0xf]  ;;  %v11379_v14 = vor.u32 %v13203_v27, %v11376_v62 }
 0x1d5   : > { %7195 = vmatpush.bf16.msrb.mxu2 %v11267_v7  ;;  %v11104_v28 = vld [vmem:[%s13776_s6 + $0x1590] sm:$0xf0]  ;;  %v13167_v39 = vld [vmem:[%s13776_s6 + $0x1684] sm:$0xf]  ;;  %v10979_v44 = vor.u32 %v13103_v35, %v10976_v36 }
 0x1d6   : > { %7208 = vmatpush.bf16.msrb.mxu3 %v11395_v23  ;;  %v11232_v40 = vld [vmem:[%s13776_s6 + $0x1690] sm:$0xf0]  ;;  %v13199_v42 = vld [vmem:[%s13776_s6 + $0x1784] sm:$0xf]  ;;  %v11107_v50 = vor.u32 %v13135_v37, %v11104_v28  ;;  %v6943_v23 = vpop.f32.mrf.mxu2  ;;  %v6919_v37 = vpop.f32.mrf.mxu0 }
 0x1d7   : > { %v11360_v43 = vld [vmem:[%s13776_s6 + $0x1790] sm:$0xf0]  ;;  %7170 = vmatpush.bf16.msrb.mxu0 %v10995_v30  ;;  %v11235_v51 = vor.u32 %v13167_v39, %v11232_v40  ;;  %v13099_v52 = vld [vmem:[%s13776_s6 + $0x1464] sm:$0xf]  ;;  %v6944_v62 = vadd.f32 %v6943_v23, %v6931_v60  ;;  %v6956_v30 = vpop.f32.mrf.mxu3 }
 0x1d8   : > { %7183 = vmatpush.bf16.msrb.mxu1 %v11123_v33  ;;  %v10960_v41 = vld [vmem:[%s13776_s6 + $0x1470] sm:$0xf0]  ;;  %v13131_v53 = vld [vmem:[%s13776_s6 + $0x1564] sm:$0xf]  ;;  %v11363_v56 = vor.u32 %v13199_v42, %v11360_v43  ;;  %v6932_v43 = vpop.f32.mrf.mxu1 }
 0x1d9   : > { %7196 = vmatpush.bf16.msrb.mxu2 %v11251_v34  ;;  %v11088_v57 = vld [vmem:[%s13776_s6 + $0x1570] sm:$0xf0]  ;;  %v13163_v58 = vld [vmem:[%s13776_s6 + $0x1664] sm:$0xf]  ;;  %v10963_v55 = vor.u32 %v13099_v52, %v10960_v41  ;;  %v14795_v36 = vadd.f32 %v6956_v30, %v6944_v62 }
 0x1da   : > { %7209 = vmatpush.bf16.msrb.mxu3 %v11379_v14  ;;  %v11216_v59 = vld [vmem:[%s13776_s6 + $0x1670] sm:$0xf0]  ;;  %v13195_v61 = vld [vmem:[%s13776_s6 + $0x1764] sm:$0xf]  ;;  %v11091_v6 = vor.u32 %v13131_v53, %v11088_v57 }
 0x1db   : > { %v11344_v1 = vld [vmem:[%s13776_s6 + $0x1770] sm:$0xf0]  ;;  %7171 = vmatpush.bf16.msrb.mxu0 %v10979_v44  ;;  %v11219_v7 = vor.u32 %v13163_v58, %v11216_v59  ;;  %v13095_v16 = vld [vmem:[%s13776_s6 + $0x1444] sm:$0xf] }
 0x1dc   : > { %7184 = vmatpush.bf16.msrb.mxu1 %v11107_v50  ;;  %v10944_v18 = vld [vmem:[%s13776_s6 + $0x1450] sm:$0xf0]  ;;  %v13127_v19 = vld [vmem:[%s13776_s6 + $0x1544] sm:$0xf]  ;;  %v11347_v24 = vor.u32 %v13195_v61, %v11344_v1 }
 0x1dd   : > { %7197 = vmatpush.bf16.msrb.mxu2 %v11235_v51  ;;  %v11072_v2 = vld [vmem:[%s13776_s6 + $0x1550] sm:$0xf0]  ;;  %v13159_v25 = vld [vmem:[%s13776_s6 + $0x1644] sm:$0xf]  ;;  %v10947_v35 = vor.u32 %v13095_v16, %v10944_v18 }
 0x1de   : > { %7210 = vmatpush.bf16.msrb.mxu3 %v11363_v56  ;;  %v11200_v27 = vld [vmem:[%s13776_s6 + $0x1650] sm:$0xf0]  ;;  %v13191_v33 = vld [vmem:[%s13776_s6 + $0x1744] sm:$0xf]  ;;  %v11075_v14 = vor.u32 %v13127_v19, %v11072_v2  ;;  %v6945_v1 = vpop.f32.mrf.mxu2 }
 0x1df   : > { %v11328_v34 = vld [vmem:[%s13776_s6 + $0x1750] sm:$0xf0]  ;;  %7172 = vmatpush.bf16.msrb.mxu0 %v10963_v55  ;;  %v11203_v28 = vor.u32 %v13159_v25, %v11200_v27  ;;  %v13091_v39 = vld [vmem:[%s13776_s6 + $0x1424] sm:$0xf]  ;;  %v6958_v18 = vpop.f32.mrf.mxu3 }
 0x1e0   : > { %7185 = vmatpush.bf16.msrb.mxu1 %v11091_v6  ;;  %v10928_v40 = vld [vmem:[%s13776_s6 + $0x1430] sm:$0xf0]  ;;  %v13123_v42 = vld [vmem:[%s13776_s6 + $0x1524] sm:$0xf]  ;;  %v11331_v44 = vor.u32 %v13191_v33, %v11328_v34 }
 0x1e1   : > { %7198 = vmatpush.bf16.msrb.mxu2 %v11219_v7  ;;  %v11056_v45 = vld [vmem:[%s13776_s6 + $0x1530] sm:$0xf0]  ;;  %v13155_v50 = vld [vmem:[%s13776_s6 + $0x1624] sm:$0xf]  ;;  %v10931_v53 = vor.u32 %v13091_v39, %v10928_v40 }
 0x1e2   : > { %7211 = vmatpush.bf16.msrb.mxu3 %v11347_v24  ;;  %v11184_v51 = vld [vmem:[%s13776_s6 + $0x1630] sm:$0xf0]  ;;  %v13187_v52 = vld [vmem:[%s13776_s6 + $0x1724] sm:$0xf]  ;;  %v11059_v57 = vor.u32 %v13123_v42, %v11056_v45 }
 0x1e3   : > { %v11312_v41 = vld [vmem:[%s13776_s6 + $0x1730] sm:$0xf0]  ;;  %7173 = vmatpush.bf16.msrb.mxu0 %v10947_v35  ;;  %v13087_v54 = vld [vmem:[%s13776_s6 + $0x1404] sm:$0xf]  ;;  %v11187_v58 = vor.u32 %v13155_v50, %v11184_v51 }
 0x1e4   : > { %v10912_v56 = vld [vmem:[%s13776_s6 + $0x1410] sm:$0xf0]  ;;  %7186 = vmatpush.bf16.msrb.mxu1 %v11075_v14  ;;  %v13119_v59 = vld [vmem:[%s13776_s6 + $0x1504] sm:$0xf]  ;;  %v11315_v55 = vor.u32 %v13187_v52, %v11312_v41 }
 0x1e5   : > { %7199 = vmatpush.bf16.msrb.mxu2 %v11203_v28  ;;  %v11040_v60 = vld [vmem:[%s13776_s6 + $0x1510] sm:$0xf0]  ;;  %v13151_v61 = vld [vmem:[%s13776_s6 + $0x1604] sm:$0xf]  ;;  %v10915_v2 = vor.u32 %v13087_v54, %v10912_v56 }
 0x1e6   : > { %7212 = vmatpush.bf16.msrb.mxu3 %v11331_v44  ;;  %v11168_v6 = vld [vmem:[%s13776_s6 + $0x1610] sm:$0xf0]  ;;  %v13183_v7 = vld [vmem:[%s13776_s6 + $0x1704] sm:$0xf]  ;;  %v11043_v30 = vor.u32 %v13119_v59, %v11040_v60 }
 0x1e7   : > { %v11296_v16 = vld [vmem:[%s13776_s6 + $0x1710] sm:$0xf0]  ;;  %v13243_v19 = vld [vmem:[%s13776_s6 + $0x18e4] sm:$0xf]  ;;  %7174 = vmatpush.bf16.msrb.mxu0 %v10931_v53  ;;  %v11171_v33 = vor.u32 %v13151_v61, %v11168_v6 }
 0x1e8   : > { %v11536_v23 = vld [vmem:[%s13776_s6 + $0x18f0] sm:$0xf0]  ;;  %v13275_v24 = vld [vmem:[%s13776_s6 + $0x19e4] sm:$0xf]  ;;  %7187 = vmatpush.bf16.msrb.mxu1 %v11059_v57  ;;  %v11299_v37 = vor.u32 %v13183_v7, %v11296_v16 }
 0x1e9   : > { %v11664_v25 = vld [vmem:[%s13776_s6 + $0x19f0] sm:$0xf0]  ;;  %v13307_v27 = vld [vmem:[%s13776_s6 + $0x1ae4] sm:$0xf]  ;;  %7200 = vmatpush.bf16.msrb.mxu2 %v11187_v58  ;;  %v11539_v14 = vor.u32 %v13243_v19, %v11536_v23 }
 0x1ea   : > { %v11792_v62 = vld [vmem:[%s13776_s6 + $0x1af0] sm:$0xf0]  ;;  %v13339_v34 = vld [vmem:[%s13776_s6 + $0x1be4] sm:$0xf]  ;;  %7213 = vmatpush.bf16.msrb.mxu3 %v11315_v55  ;;  %v11667_v28 = vor.u32 %v13275_v24, %v11664_v25 }
 0x1eb   : > { %v11920_v35 = vld [vmem:[%s13776_s6 + $0x1bf0] sm:$0xf0]  ;;  %v11795_v39 = vor.u32 %v13307_v27, %v11792_v62  ;;  %v13239_v40 = vld [vmem:[%s13776_s6 + $0x18c4] sm:$0xf]  ;;  %7175 = vmatpush.bf16.msrb.mxu0 %v10915_v2 }
 0x1ec   : > { %v11520_v42 = vld [vmem:[%s13776_s6 + $0x18d0] sm:$0xf0]  ;;  %v13271_v43 = vld [vmem:[%s13776_s6 + $0x19c4] sm:$0xf]  ;;  %v11923_v44 = vor.u32 %v13339_v34, %v11920_v35  ;;  %7188 = vmatpush.bf16.msrb.mxu1 %v11043_v30 }
 0x1ed   : > { %v11648_v45 = vld [vmem:[%s13776_s6 + $0x19d0] sm:$0xf0]  ;;  %v13303_v50 = vld [vmem:[%s13776_s6 + $0x1ac4] sm:$0xf]  ;;  %7201 = vmatpush.bf16.msrb.mxu2 %v11171_v33  ;;  %v11523_v53 = vor.u32 %v13239_v40, %v11520_v42 }
 0x1ee   : > { %v11776_v51 = vld [vmem:[%s13776_s6 + $0x1ad0] sm:$0xf0]  ;;  %v13335_v52 = vld [vmem:[%s13776_s6 + $0x1bc4] sm:$0xf]  ;;  %7214 = vmatpush.bf16.msrb.mxu3 %v11299_v37  ;;  %v11651_v54 = vor.u32 %v13271_v43, %v11648_v45  ;;  %7176 = vmatmul.bf16.vlgmr.msrb.gmra.mxu0 %v14245_v63  ;;  %v6969_v37 = vpop.f32.mrf.mxu0 }
 0x1ef   : > { %v11904_v41 = vld [vmem:[%s13776_s6 + $0x1bd0] sm:$0xf0]  ;;  %7220 = vmatpush.bf16.msra.mxu0 %v11539_v14  ;;  %v11779_v56 = vor.u32 %v13303_v50, %v11776_v51  ;;  %v13235_v57 = vld [vmem:[%s13776_s6 + $0x18a4] sm:$0xf]  ;;  %7189 = vmatmul.bf16.vlgmr.msrb.gmra.mxu1 %v14249_v3  ;;  %v6970_v43 = vadd.f32 %v6969_v37, %v14795_v36 }
 0x1f0   : > { %7233 = vmatpush.bf16.msra.mxu1 %v11667_v28  ;;  %v11504_v58 = vld [vmem:[%s13776_s6 + $0x18b0] sm:$0xf0]  ;;  %v13267_v59 = vld [vmem:[%s13776_s6 + $0x19a4] sm:$0xf]  ;;  %v11907_v60 = vor.u32 %v13335_v52, %v11904_v41  ;;  %7202 = vmatmul.bf16.vlgmr.msrb.gmra.mxu2 %v14247_v0 }
 0x1f1   : > { %7246 = vmatpush.bf16.msra.mxu2 %v11795_v39  ;;  %v11632_v61 = vld [vmem:[%s13776_s6 + $0x19b0] sm:$0xf0]  ;;  %v13299_v1 = vld [vmem:[%s13776_s6 + $0x1aa4] sm:$0xf]  ;;  %7215 = vmatmul.bf16.vlgmr.msrb.gmra.mxu3 %v14251_v4  ;;  %v11507_v16 = vor.u32 %v13235_v57, %v11504_v58 }
 0x1f2   : > { %7259 = vmatpush.bf16.msra.mxu3 %v11923_v44  ;;  %v11760_v55 = vld [vmem:[%s13776_s6 + $0x1ab0] sm:$0xf0]  ;;  %v13331_v6 = vld [vmem:[%s13776_s6 + $0x1ba4] sm:$0xf]  ;;  %v11635_v18 = vor.u32 %v13267_v59, %v11632_v61  ;;  %v6982_v44 = vpop.f32.mrf.mxu1 }
 0x1f3   : > { %v11888_v7 = vld [vmem:[%s13776_s6 + $0x1bb0] sm:$0xf0]  ;;  %7221 = vmatpush.bf16.msra.mxu0 %v11523_v53  ;;  %v11763_v19 = vor.u32 %v13299_v1, %v11760_v55  ;;  %v13231_v23 = vld [vmem:[%s13776_s6 + $0x1884] sm:$0xf]  ;;  %v6995_v61 = vpop.f32.mrf.mxu2 }
 0x1f4   : > { %7234 = vmatpush.bf16.msra.mxu1 %v11651_v54  ;;  %v11488_v24 = vld [vmem:[%s13776_s6 + $0x1890] sm:$0xf0]  ;;  %v13263_v2 = vld [vmem:[%s13776_s6 + $0x1984] sm:$0xf]  ;;  %v11891_v25 = vor.u32 %v13331_v6, %v11888_v7  ;;  %v6983_v54 = vadd.f32 %v6982_v44, %v6970_v43 }
 0x1f5   : > { %7247 = vmatpush.bf16.msra.mxu2 %v11779_v56  ;;  %v11616_v27 = vld [vmem:[%s13776_s6 + $0x1990] sm:$0xf0]  ;;  %v13295_v62 = vld [vmem:[%s13776_s6 + $0x1a84] sm:$0xf]  ;;  %v11491_v35 = vor.u32 %v13231_v23, %v11488_v24 }
 0x1f6   : > { %7260 = vmatpush.bf16.msra.mxu3 %v11907_v60  ;;  %v11744_v30 = vld [vmem:[%s13776_s6 + $0x1a90] sm:$0xf0]  ;;  %v13327_v33 = vld [vmem:[%s13776_s6 + $0x1b84] sm:$0xf]  ;;  %v11619_v14 = vor.u32 %v13263_v2, %v11616_v27 }
 0x1f7   : > { %v11872_v34 = vld [vmem:[%s13776_s6 + $0x1b90] sm:$0xf0]  ;;  %7222 = vmatpush.bf16.msra.mxu0 %v11507_v16  ;;  %v11747_v28 = vor.u32 %v13295_v62, %v11744_v30  ;;  %v13227_v39 = vld [vmem:[%s13776_s6 + $0x1864] sm:$0xf]  ;;  %v6996_v16 = vadd.f32 %v6995_v61, %v6983_v54 }
 0x1f8   : > { %7235 = vmatpush.bf16.msra.mxu1 %v11635_v18  ;;  %v11472_v40 = vld [vmem:[%s13776_s6 + $0x1870] sm:$0xf0]  ;;  %v13259_v42 = vld [vmem:[%s13776_s6 + $0x1964] sm:$0xf]  ;;  %v11875_v45 = vor.u32 %v13327_v33, %v11872_v34  ;;  %v7008_v18 = vpop.f32.mrf.mxu3 }
 0x1f9   : > { %7248 = vmatpush.bf16.msra.mxu2 %v11763_v19  ;;  %v11600_v50 = vld [vmem:[%s13776_s6 + $0x1970] sm:$0xf0]  ;;  %v13291_v51 = vld [vmem:[%s13776_s6 + $0x1a64] sm:$0xf]  ;;  %v11475_v56 = vor.u32 %v13227_v39, %v11472_v40  ;;  %v14866_v2 = vadd.f32 %v7008_v18, %v6996_v16 }
 0x1fa   : > { %7261 = vmatpush.bf16.msra.mxu3 %v11891_v25  ;;  %v11728_v52 = vld [vmem:[%s13776_s6 + $0x1a70] sm:$0xf0]  ;;  %v13323_v41 = vld [vmem:[%s13776_s6 + $0x1b64] sm:$0xf]  ;;  %v11603_v36 = vor.u32 %v13259_v42, %v11600_v50  ;;  %v6971_v25 = vpop.f32.mrf.mxu0 }
 0x1fb   : > { %v11856_v53 = vld [vmem:[%s13776_s6 + $0x1b70] sm:$0xf0]  ;;  %7223 = vmatpush.bf16.msra.mxu0 %v11491_v35  ;;  %v11731_v57 = vor.u32 %v13291_v51, %v11728_v52  ;;  %v13223_v58 = vld [vmem:[%s13776_s6 + $0x1844] sm:$0xf]  ;;  %v6984_v35 = vpop.f32.mrf.mxu1  ;;  %v6997_v54 = vpop.f32.mrf.mxu2 }
 0x1fc   : > { %7236 = vmatpush.bf16.msra.mxu1 %v11619_v14  ;;  %v11456_v59 = vld [vmem:[%s13776_s6 + $0x1850] sm:$0xf0]  ;;  %v13255_v60 = vld [vmem:[%s13776_s6 + $0x1944] sm:$0xf]  ;;  %v11859_v1 = vor.u32 %v13323_v41, %v11856_v53 }
 0x1fd   : > { %7249 = vmatpush.bf16.msra.mxu2 %v11747_v28  ;;  %v11584_v55 = vld [vmem:[%s13776_s6 + $0x1950] sm:$0xf0]  ;;  %v13287_v6 = vld [vmem:[%s13776_s6 + $0x1a44] sm:$0xf]  ;;  %v11459_v24 = vor.u32 %v13223_v58, %v11456_v59 }
 0x1fe   : > { %7262 = vmatpush.bf16.msra.mxu3 %v11875_v45  ;;  %v11712_v7 = vld [vmem:[%s13776_s6 + $0x1a50] sm:$0xf0]  ;;  %v13319_v19 = vld [vmem:[%s13776_s6 + $0x1b44] sm:$0xf]  ;;  %v11587_v27 = vor.u32 %v13255_v60, %v11584_v55 }
 0x1ff   : > { %v11840_v23 = vld [vmem:[%s13776_s6 + $0x1b50] sm:$0xf0]  ;;  %7224 = vmatpush.bf16.msra.mxu0 %v11475_v56  ;;  %v11715_v62 = vor.u32 %v13287_v6, %v11712_v7  ;;  %v13219_v30 = vld [vmem:[%s13776_s6 + $0x1824] sm:$0xf] }
 0x200   : > { %7237 = vmatpush.bf16.msra.mxu1 %v11603_v36  ;;  %v11440_v33 = vld [vmem:[%s13776_s6 + $0x1830] sm:$0xf0]  ;;  %v13251_v34 = vld [vmem:[%s13776_s6 + $0x1924] sm:$0xf]  ;;  %v11843_v37 = vor.u32 %v13319_v19, %v11840_v23  ;;  %v7010_v59 = vpop.f32.mrf.mxu3 }
 0x201   : > { %7250 = vmatpush.bf16.msra.mxu2 %v11731_v57  ;;  %v11568_v14 = vld [vmem:[%s13776_s6 + $0x1930] sm:$0xf0]  ;;  %v13283_v28 = vld [vmem:[%s13776_s6 + $0x1a24] sm:$0xf]  ;;  %v11443_v43 = vor.u32 %v13219_v30, %v11440_v33 }
 0x202   : > { %7263 = vmatpush.bf16.msra.mxu3 %v11859_v1  ;;  %v11696_v39 = vld [vmem:[%s13776_s6 + $0x1a30] sm:$0xf0]  ;;  %v13315_v40 = vld [vmem:[%s13776_s6 + $0x1b24] sm:$0xf]  ;;  %v11571_v50 = vor.u32 %v13251_v34, %v11568_v14 }
 0x203   : > { %v11824_v42 = vld [vmem:[%s13776_s6 + $0x1b30] sm:$0xf0]  ;;  %7225 = vmatpush.bf16.msra.mxu0 %v11459_v24  ;;  %v13215_v44 = vld [vmem:[%s13776_s6 + $0x1804] sm:$0xf]  ;;  %v11699_v51 = vor.u32 %v13283_v28, %v11696_v39 }
 0x204   : > { %v11424_v45 = vld [vmem:[%s13776_s6 + $0x1810] sm:$0xf0]  ;;  %7238 = vmatpush.bf16.msra.mxu1 %v11587_v27  ;;  %v13247_v52 = vld [vmem:[%s13776_s6 + $0x1904] sm:$0xf]  ;;  %v11827_v56 = vor.u32 %v13315_v40, %v11824_v42 }
 0x205   : > { %7251 = vmatpush.bf16.msra.mxu2 %v11715_v62  ;;  %v11552_v41 = vld [vmem:[%s13776_s6 + $0x1910] sm:$0xf0]  ;;  %v13279_v53 = vld [vmem:[%s13776_s6 + $0x1a04] sm:$0xf]  ;;  %v11427_v55 = vor.u32 %v13215_v44, %v11424_v45 }
 0x206   : > { %7264 = vmatpush.bf16.msra.mxu3 %v11843_v37  ;;  %v11680_v36 = vld [vmem:[%s13776_s6 + $0x1a10] sm:$0xf0]  ;;  %v13311_v57 = vld [vmem:[%s13776_s6 + $0x1b04] sm:$0xf]  ;;  %v11555_v18 = vor.u32 %v13247_v52, %v11552_v41  ;;  %v13534_v41 = vld [vmem:[#allocation1] sm:$0xff] }
 0x207   : > { %v11808_v58 = vld [vmem:[%s13776_s6 + $0x1b10] sm:$0xf0]  ;;  %v13371_v60 = vld [vmem:[%s13776_s6 + $0x1ce4] sm:$0xf]  ;;  %7226 = vmatpush.bf16.msra.mxu0 %v11443_v43  ;;  %v11683_v19 = vor.u32 %v13279_v53, %v11680_v36 }
 0x208   : > { %v12048_v61 = vld [vmem:[%s13776_s6 + $0x1cf0] sm:$0xf0]  ;;  %v13403_v1 = vld [vmem:[%s13776_s6 + $0x1de4] sm:$0xf]  ;;  %7239 = vmatpush.bf16.msra.mxu1 %v11571_v50  ;;  %v11811_v25 = vor.u32 %v13311_v57, %v11808_v58  ;;  %v13535_v57 = vld [vmem:[#allocation1 + $0x12] sm:$0xff] }
 0x209   : > { %v12176_v6 = vld [vmem:[%s13776_s6 + $0x1df0] sm:$0xf0]  ;;  %v13435_v7 = vld [vmem:[%s13776_s6 + $0x1ee4] sm:$0xf]  ;;  %7252 = vmatpush.bf16.msra.mxu2 %v11699_v51  ;;  %v12051_v27 = vor.u32 %v13371_v60, %v12048_v61 }
 0x20a   : > { %v12304_v16 = vld [vmem:[%s13776_s6 + $0x1ef0] sm:$0xf0]  ;;  %v13467_v23 = vld [vmem:[%s13776_s6 + $0x1fe4] sm:$0xf]  ;;  %7265 = vmatpush.bf16.msra.mxu3 %v11827_v56  ;;  %v12179_v62 = vor.u32 %v13403_v1, %v12176_v6 }
 0x20b   : > { %v12432_v24 = vld [vmem:[%s13776_s6 + $0x1ff0] sm:$0xf0]  ;;  %v12307_v30 = vor.u32 %v13435_v7, %v12304_v16  ;;  %v13367_v33 = vld [vmem:[%s13776_s6 + $0x1cc4] sm:$0xf]  ;;  %7227 = vmatpush.bf16.msra.mxu0 %v11427_v55 }
 0x20c   : > { %v12032_v34 = vld [vmem:[%s13776_s6 + $0x1cd0] sm:$0xf0]  ;;  %v13399_v35 = vld [vmem:[%s13776_s6 + $0x1dc4] sm:$0xf]  ;;  %v12435_v37 = vor.u32 %v13467_v23, %v12432_v24  ;;  %7240 = vmatpush.bf16.msra.mxu1 %v11555_v18 }
 0x20d   : > { %v12160_v14 = vld [vmem:[%s13776_s6 + $0x1dd0] sm:$0xf0]  ;;  %v13431_v28 = vld [vmem:[%s13776_s6 + $0x1ec4] sm:$0xf]  ;;  %7253 = vmatpush.bf16.msra.mxu2 %v11683_v19  ;;  %v12035_v43 = vor.u32 %v13367_v33, %v12032_v34 }
 0x20e   : > { %v12288_v39 = vld [vmem:[%s13776_s6 + $0x1ed0] sm:$0xf0]  ;;  %v13463_v40 = vld [vmem:[%s13776_s6 + $0x1fc4] sm:$0xf]  ;;  %7266 = vmatpush.bf16.msra.mxu3 %v11811_v25  ;;  %v12163_v44 = vor.u32 %v13399_v35, %v12160_v14  ;;  %7228 = vmatmul.bf16.vlgmr.msra.gmra.mxu0 %v13534_v41  ;;  %v7034_v35 = vpop.f32.mrf.mxu1 }
 0x20f   : > { %v12416_v42 = vld [vmem:[%s13776_s6 + $0x1fd0] sm:$0xf0]  ;;  %7272 = vmatpush.bf16.msrb.mxu0 %v12051_v27  ;;  %v12291_v45 = vor.u32 %v13431_v28, %v12288_v39  ;;  %v13363_v50 = vld [vmem:[%s13776_s6 + $0x1ca4] sm:$0xf]  ;;  %v7021_v27 = vpop.f32.mrf.mxu0 }
 0x210   : > { %7285 = vmatpush.bf16.msrb.mxu1 %v12179_v62  ;;  %v12016_v51 = vld [vmem:[%s13776_s6 + $0x1cb0] sm:$0xf0]  ;;  %v13395_v52 = vld [vmem:[%s13776_s6 + $0x1da4] sm:$0xf]  ;;  %v12419_v53 = vor.u32 %v13463_v40, %v12416_v42  ;;  %7254 = vmatmul.bf16.vlgmr.msra.gmra.mxu2 %v13535_v57  ;;  %v7022_v33 = vadd.f32 %v7021_v27, %v14866_v2 }
 0x211   : > { %7298 = vmatpush.bf16.msrb.mxu2 %v12307_v30  ;;  %v12144_v54 = vld [vmem:[%s13776_s6 + $0x1db0] sm:$0xf0]  ;;  %v13427_v56 = vld [vmem:[%s13776_s6 + $0x1ea4] sm:$0xf]  ;;  %v12019_v1 = vor.u32 %v13363_v50, %v12016_v51 }
 0x212   : > { %7311 = vmatpush.bf16.msrb.mxu3 %v12435_v37  ;;  %v12272_v36 = vld [vmem:[%s13776_s6 + $0x1eb0] sm:$0xf0]  ;;  %v13536_v58 = vld [vmem:[#allocation1 + $0x9] sm:$0xff]  ;;  %v12147_v55 = vor.u32 %v13395_v52, %v12144_v54 }
 0x213   : > { %7241 = vmatmul.bf16.vlgmr.msra.gmra.mxu1 %v13536_v58  ;;  %v13459_v59 = vld [vmem:[%s13776_s6 + $0x1fa4] sm:$0xf]  ;;  %v12400_v60 = vld [vmem:[%s13776_s6 + $0x1fb0] sm:$0xf0]  ;;  %7273 = vmatpush.bf16.msrb.mxu0 %v12035_v43  ;;  %v12275_v6 = vor.u32 %v13427_v56, %v12272_v36  ;;  %v7035_v43 = vadd.f32 %v7034_v35, %v7022_v33  ;;  %v7047_v58 = vpop.f32.mrf.mxu2 }
 0x214   : > { %v13537_v61 = vld [vmem:[#allocation1 + $0x1b] sm:$0xff]  ;;  %7286 = vmatpush.bf16.msrb.mxu1 %v12163_v44  ;;  %v13359_v7 = vld [vmem:[%s13776_s6 + $0x1c84] sm:$0xf]  ;;  %v12403_v19 = vor.u32 %v13459_v59, %v12400_v60 }
 0x215   : > { %7267 = vmatmul.bf16.vlgmr.msra.gmra.mxu3 %v13537_v61  ;;  %7299 = vmatpush.bf16.msrb.mxu2 %v12291_v45  ;;  %v12000_v16 = vld [vmem:[%s13776_s6 + $0x1c90] sm:$0xf0]  ;;  %v13391_v18 = vld [vmem:[%s13776_s6 + $0x1d84] sm:$0xf] }
 0x216   : > { %7312 = vmatpush.bf16.msrb.mxu3 %v12419_v53  ;;  %v12128_v23 = vld [vmem:[%s13776_s6 + $0x1d90] sm:$0xf0]  ;;  %v13423_v24 = vld [vmem:[%s13776_s6 + $0x1e84] sm:$0xf]  ;;  %v12003_v34 = vor.u32 %v13359_v7, %v12000_v16 }
 0x217   : > { %v12256_v25 = vld [vmem:[%s13776_s6 + $0x1e90] sm:$0xf0]  ;;  %v13455_v62 = vld [vmem:[%s13776_s6 + $0x1f84] sm:$0xf]  ;;  %7274 = vmatpush.bf16.msrb.mxu0 %v12019_v1  ;;  %v12131_v37 = vor.u32 %v13391_v18, %v12128_v23  ;;  %v7048_v1 = vadd.f32 %v7047_v58, %v7035_v43  ;;  %v7023_v16 = vpop.f32.mrf.mxu0 }
 0x218   : > { %v12384_v30 = vld [vmem:[%s13776_s6 + $0x1f90] sm:$0xf0]  ;;  %7287 = vmatpush.bf16.msrb.mxu1 %v12147_v55  ;;  %v12259_v14 = vor.u32 %v13423_v24, %v12256_v25  ;;  %v13355_v28 = vld [vmem:[%s13776_s6 + $0x1c64] sm:$0xf]  ;;  %v7060_v55 = vpop.f32.mrf.mxu3  ;;  %v12574_v16 = vld [vmem:[%s13776_s6 + $0x3f4] sm:$0xf0] }
 0x219   : > { %7300 = vmatpush.bf16.msrb.mxu2 %v12275_v6  ;;  %v11984_v39 = vld [vmem:[%s13776_s6 + $0x1c70] sm:$0xf0]  ;;  %v13387_v40 = vld [vmem:[%s13776_s6 + $0x1d64] sm:$0xf]  ;;  %v12387_v42 = vor.u32 %v13455_v62, %v12384_v30  ;;  %v14933_v23 = vadd.f32 %v7060_v55, %v7048_v1  ;;  %v12542_v1 = vld [vmem:[%s13776_s6 + $0x2f4] sm:$0xf0] }
 0x21a   : > { %7313 = vmatpush.bf16.msrb.mxu3 %v12403_v19  ;;  %v12112_v44 = vld [vmem:[%s13776_s6 + $0x1d70] sm:$0xf0]  ;;  %v13419_v45 = vld [vmem:[%s13776_s6 + $0x1e64] sm:$0xf]  ;;  %v11987_v52 = vor.u32 %v13355_v28, %v11984_v39  ;;  %v7036_v19 = vpop.f32.mrf.mxu1 }
 0x21b   : > { %v12240_v2 = vld [vmem:[%s13776_s6 + $0x1e70] sm:$0xf0]  ;;  %v13451_v50 = vld [vmem:[%s13776_s6 + $0x1f64] sm:$0xf]  ;;  %7275 = vmatpush.bf16.msrb.mxu0 %v12003_v34  ;;  %v12115_v41 = vor.u32 %v13387_v40, %v12112_v44 }
 0x21c   : > { %v12368_v51 = vld [vmem:[%s13776_s6 + $0x1f70] sm:$0xf0]  ;;  %7288 = vmatpush.bf16.msrb.mxu1 %v12131_v37  ;;  %v12243_v53 = vor.u32 %v13419_v45, %v12240_v2  ;;  %v13351_v54 = vld [vmem:[%s13776_s6 + $0x1c44] sm:$0xf] }
 0x21d   : > { %7301 = vmatpush.bf16.msrb.mxu2 %v12259_v14  ;;  %v11968_v56 = vld [vmem:[%s13776_s6 + $0x1c50] sm:$0xf0]  ;;  %v13383_v36 = vld [vmem:[%s13776_s6 + $0x1d44] sm:$0xf]  ;;  %v12371_v57 = vor.u32 %v13451_v50, %v12368_v51 }
 0x21e   : > { %7314 = vmatpush.bf16.msrb.mxu3 %v12387_v42  ;;  %v12096_v59 = vld [vmem:[%s13776_s6 + $0x1d50] sm:$0xf0]  ;;  %v13415_v60 = vld [vmem:[%s13776_s6 + $0x1e44] sm:$0xf]  ;;  %v11971_v18 = vor.u32 %v13351_v54, %v11968_v56  ;;  %v7049_v54 = vpop.f32.mrf.mxu2  ;;  %v8470_v56 = vld [vmem:[%s13776_s6 + $0xe8] sm:$0xf] }
 0x21f   : > { %v12224_v61 = vld [vmem:[%s13776_s6 + $0x1e50] sm:$0xf0]  ;;  %v13447_v6 = vld [vmem:[%s13776_s6 + $0x1f44] sm:$0xf]  ;;  %7276 = vmatpush.bf16.msrb.mxu0 %v11987_v52  ;;  %v12099_v24 = vor.u32 %v13383_v36, %v12096_v59  ;;  %v12478_v36 = vld [vmem:[%s13776_s6 + $0xf4] sm:$0xf0] }
 0x220   : > { %v12352_v7 = vld [vmem:[%s13776_s6 + $0x1f50] sm:$0xf0]  ;;  %7289 = vmatpush.bf16.msrb.mxu1 %v12115_v41  ;;  %v12227_v25 = vor.u32 %v13415_v60, %v12224_v61  ;;  %v13347_v27 = vld [vmem:[%s13776_s6 + $0x1c24] sm:$0xf]  ;;  %v7062_v58 = vpop.f32.mrf.mxu3  ;;  %v12510_v60 = vld [vmem:[%s13776_s6 + $0x1f4] sm:$0xf0]  ;;  %v8471_v19 = vor.u32 %v12478_v36, %v8470_v56 }
 0x221   : > { %7302 = vmatpush.bf16.msrb.mxu2 %v12243_v53  ;;  %v11952_v62 = vld [vmem:[%s13776_s6 + $0x1c30] sm:$0xf0]  ;;  %v13379_v30 = vld [vmem:[%s13776_s6 + $0x1d24] sm:$0xf]  ;;  %v12355_v33 = vor.u32 %v13447_v6, %v12352_v7  ;;  %v8726_v61 = vld [vmem:[%s13776_s6 + $0x2e8] sm:$0xf] }
 0x222   : > { %7315 = vmatpush.bf16.msrb.mxu3 %v12371_v57  ;;  %v12080_v34 = vld [vmem:[%s13776_s6 + $0x1d30] sm:$0xf0]  ;;  %v13411_v35 = vld [vmem:[%s13776_s6 + $0x1e24] sm:$0xf]  ;;  %v11955_v39 = vor.u32 %v13347_v27, %v11952_v62  ;;  %v8598_v57 = vld [vmem:[%s13776_s6 + $0x1e8] sm:$0xf] }
 0x223   : > { %v12208_v37 = vld [vmem:[%s13776_s6 + $0x1e30] sm:$0xf0]  ;;  %v13443_v14 = vld [vmem:[%s13776_s6 + $0x1f24] sm:$0xf]  ;;  %7277 = vmatpush.bf16.msrb.mxu0 %v11971_v18  ;;  %v12083_v43 = vor.u32 %v13379_v30, %v12080_v34  ;;  %v8854_v7 = vld [vmem:[%s13776_s6 + $0x3e8] sm:$0xf] }
 0x224   : > { %v12336_v28 = vld [vmem:[%s13776_s6 + $0x1f30] sm:$0xf0]  ;;  %v13343_v40 = vld [vmem:[%s13776_s6 + $0x1c04] sm:$0xf]  ;;  %7290 = vmatpush.bf16.msrb.mxu1 %v12099_v24  ;;  %v12211_v44 = vor.u32 %v13411_v35, %v12208_v37  ;;  %v8599_v24 = vor.u32 %v12510_v60, %v8598_v57  ;;  %v8454_v27 = vld [vmem:[%s13776_s6 + $0xc8] sm:$0xf] }
 0x225   : > { %v11936_v42 = vld [vmem:[%s13776_s6 + $0x1c10] sm:$0xf0]  ;;  %7303 = vmatpush.bf16.msrb.mxu2 %v12227_v25  ;;  %v13375_v45 = vld [vmem:[%s13776_s6 + $0x1d04] sm:$0xf]  ;;  %v12339_v51 = vor.u32 %v13443_v14, %v12336_v28  ;;  %v8727_v25 = vor.u32 %v12542_v1, %v8726_v61  ;;  %v12474_v62 = vld [vmem:[%s13776_s6 + $0xd4] sm:$0xf0] }
 0x226   : > { %v12064_v2 = vld [vmem:[%s13776_s6 + $0x1d10] sm:$0xf0]  ;;  %v13407_v50 = vld [vmem:[%s13776_s6 + $0x1e04] sm:$0xf]  ;;  %7316 = vmatpush.bf16.msrb.mxu3 %v12355_v33  ;;  %v11939_v59 = vor.u32 %v13343_v40, %v11936_v42  ;;  %v8582_v30 = vld [vmem:[%s13776_s6 + $0x1c8] sm:$0xf]  ;;  %v8855_v33 = vor.u32 %v12574_v16, %v8854_v7 }
 0x227   : > { %v12192_v52 = vld [vmem:[%s13776_s6 + $0x1e10] sm:$0xf0]  ;;  %v13439_v41 = vld [vmem:[%s13776_s6 + $0x1f04] sm:$0xf]  ;;  %7278 = vmatpush.bf16.msrb.mxu0 %v11955_v39  ;;  %v12067_v55 = vor.u32 %v13375_v45, %v12064_v2  ;;  %v12506_v34 = vld [vmem:[%s13776_s6 + $0x1d4] sm:$0xf0]  ;;  %v8455_v39 = vor.u32 %v12474_v62, %v8454_v27 }
 0x228   : > { %v12320_v53 = vld [vmem:[%s13776_s6 + $0x1f10] sm:$0xf0]  ;;  %7291 = vmatpush.bf16.msrb.mxu1 %v12083_v43  ;;  %v12195_v6 = vor.u32 %v13407_v50, %v12192_v52  ;;  %v8710_v35 = vld [vmem:[%s13776_s6 + $0x2c8] sm:$0xf]  ;;  %v12538_v37 = vld [vmem:[%s13776_s6 + $0x2d4] sm:$0xf0]  ;;  %v8583_v40 = vor.u32 %v12506_v34, %v8582_v30 }
 0x229   : > { %7304 = vmatpush.bf16.msrb.mxu2 %v12211_v44  ;;  %v12323_v18 = vor.u32 %v13439_v41, %v12320_v53  ;;  %v8838_v14 = vld [vmem:[%s13776_s6 + $0x3c8] sm:$0xf]  ;;  %v12570_v28 = vld [vmem:[%s13776_s6 + $0x3d4] sm:$0xf0]  ;;  %v8711_v42 = vor.u32 %v12538_v37, %v8710_v35  ;;  %v13538_v2 = vld [vmem:[#allocation1 + $0x24] sm:$0xff] }
 0x22a   : > { %7317 = vmatpush.bf16.msrb.mxu3 %v12339_v51  ;;  %v8438_v43 = vld [vmem:[%s13776_s6 + $0xa8] sm:$0xf]  ;;  %v12470_v44 = vld [vmem:[%s13776_s6 + $0xb4] sm:$0xf0]  ;;  %v8839_v50 = vor.u32 %v12570_v28, %v8838_v14  ;;  %v13539_v53 = vld [vmem:[#allocation1 + $0x36] sm:$0xff] }
 0x22b   : > { %7279 = vmatpush.bf16.msrb.mxu0 %v11939_v59  ;;  %v8566_v45 = vld [vmem:[%s13776_s6 + $0x1a8] sm:$0xf]  ;;  %v12502_v51 = vld [vmem:[%s13776_s6 + $0x1b4] sm:$0xf0]  ;;  %v8439_v58 = vor.u32 %v12470_v44, %v8438_v43 }
 0x22c   : > { %7292 = vmatpush.bf16.msrb.mxu1 %v12067_v55  ;;  %v8694_v52 = vld [vmem:[%s13776_s6 + $0x2a8] sm:$0xf]  ;;  %v12534_v41 = vld [vmem:[%s13776_s6 + $0x2b4] sm:$0xf0]  ;;  %v8567_v59 = vor.u32 %v12502_v51, %v8566_v45  ;;  %v7086_v30 = vpop.f32.mrf.mxu1 }
 0x22d   : > { %7305 = vmatpush.bf16.msrb.mxu2 %v12195_v6  ;;  %v13540_v54 = vld [vmem:[#allocation1 + $0x2d] sm:$0xff]  ;;  %v12566_v36 = vld [vmem:[%s13776_s6 + $0x3b4] sm:$0xf0]  ;;  %v8695_v60 = vor.u32 %v12534_v41, %v8694_v52 }
 0x22e   : > { %7318 = vmatpush.bf16.msrb.mxu3 %v12323_v18  ;;  %7280 = vmatmul.bf16.vlgmr.msrb.gmra.mxu0 %v13538_v2  ;;  %v8822_v56 = vld [vmem:[%s13776_s6 + $0x3a8] sm:$0xf]  ;;  %v13541_v57 = vld [vmem:[#allocation1 + $0x3f] sm:$0xff] }
 0x22f   : > { %7324 = vmatpush.bf16.msra.mxu0 %v8471_v19  ;;  %7293 = vmatmul.bf16.vlgmr.msrb.gmra.mxu1 %v13540_v54  ;;  %v8422_v61 = vld [vmem:[%s13776_s6 + $0x88] sm:$0xf]  ;;  %v12466_v1 = vld [vmem:[%s13776_s6 + $0x94] sm:$0xf0]  ;;  %v8823_v6 = vor.u32 %v12566_v36, %v8822_v56  ;;  %v7073_v19 = vpop.f32.mrf.mxu0 }
 0x230   : > { %7337 = vmatpush.bf16.msra.mxu1 %v8599_v24  ;;  %7306 = vmatmul.bf16.vlgmr.msrb.gmra.mxu2 %v13539_v53  ;;  %v8550_v55 = vld [vmem:[%s13776_s6 + $0x188] sm:$0xf]  ;;  %v12498_v7 = vld [vmem:[%s13776_s6 + $0x194] sm:$0xf0]  ;;  %v7074_v27 = vadd.f32 %v7073_v19, %v14933_v23  ;;  %v8423_v62 = vor.u32 %v12466_v1, %v8422_v61 }
 0x231   : > { %7350 = vmatpush.bf16.msra.mxu2 %v8727_v25  ;;  %7319 = vmatmul.bf16.vlgmr.msrb.gmra.mxu3 %v13541_v57  ;;  %v8678_v16 = vld [vmem:[%s13776_s6 + $0x288] sm:$0xf]  ;;  %v12530_v18 = vld [vmem:[%s13776_s6 + $0x294] sm:$0xf0] }
 0x232   : > { %7363 = vmatpush.bf16.msra.mxu3 %v8855_v33  ;;  %v8806_v24 = vld [vmem:[%s13776_s6 + $0x388] sm:$0xf]  ;;  %v12562_v25 = vld [vmem:[%s13776_s6 + $0x394] sm:$0xf0]  ;;  %v8551_v33 = vor.u32 %v12498_v7, %v8550_v55  ;;  %v8679_v34 = vor.u32 %v12530_v18, %v8678_v16 }
 0x233   : > { %7325 = vmatpush.bf16.msra.mxu0 %v8455_v39  ;;  %v8406_v35 = vld [vmem:[%s13776_s6 + $0x68] sm:$0xf]  ;;  %v12462_v37 = vld [vmem:[%s13776_s6 + $0x74] sm:$0xf0]  ;;  %v8807_v28 = vor.u32 %v12562_v25, %v8806_v24  ;;  %v7087_v39 = vadd.f32 %v7086_v30, %v7074_v27  ;;  %v7099_v54 = vpop.f32.mrf.mxu2 }
 0x234   : > { %7338 = vmatpush.bf16.msra.mxu1 %v8583_v40  ;;  %v8534_v14 = vld [vmem:[%s13776_s6 + $0x168] sm:$0xf]  ;;  %v12494_v40 = vld [vmem:[%s13776_s6 + $0x174] sm:$0xf0]  ;;  %v8407_v45 = vor.u32 %v12462_v37, %v8406_v35 }
 0x235   : > { %7351 = vmatpush.bf16.msra.mxu2 %v8711_v42  ;;  %v8662_v42 = vld [vmem:[%s13776_s6 + $0x268] sm:$0xf]  ;;  %v12526_v23 = vld [vmem:[%s13776_s6 + $0x274] sm:$0xf0]  ;;  %v8535_v2 = vor.u32 %v12494_v40, %v8534_v14 }
 0x236   : > { %7364 = vmatpush.bf16.msra.mxu3 %v8839_v50  ;;  %v8790_v43 = vld [vmem:[%s13776_s6 + $0x368] sm:$0xf]  ;;  %v12558_v44 = vld [vmem:[%s13776_s6 + $0x374] sm:$0xf0]  ;;  %v8663_v50 = vor.u32 %v12526_v23, %v8662_v42 }
 0x237   : > { %7326 = vmatpush.bf16.msra.mxu0 %v8439_v58  ;;  %v8390_v51 = vld [vmem:[%s13776_s6 + $0x48] sm:$0xf]  ;;  %v12458_v52 = vld [vmem:[%s13776_s6 + $0x54] sm:$0xf0]  ;;  %v8791_v53 = vor.u32 %v12558_v44, %v8790_v43  ;;  %v7100_v58 = vadd.f32 %v7099_v54, %v7087_v39  ;;  %v7075_v1 = vpop.f32.mrf.mxu0 }
 0x238   : > { %7339 = vmatpush.bf16.msra.mxu1 %v8567_v59  ;;  %v8518_v41 = vld [vmem:[%s13776_s6 + $0x148] sm:$0xf]  ;;  %v12490_v56 = vld [vmem:[%s13776_s6 + $0x154] sm:$0xf0]  ;;  %v7112_v59 = vpop.f32.mrf.mxu3  ;;  %v8391_v55 = vor.u32 %v12458_v52, %v8390_v51 }
 0x239   : > { %7352 = vmatpush.bf16.msra.mxu2 %v8695_v60  ;;  %v8646_v36 = vld [vmem:[%s13776_s6 + $0x248] sm:$0xf]  ;;  %v12522_v57 = vld [vmem:[%s13776_s6 + $0x254] sm:$0xf0]  ;;  %v15000_v7 = vadd.f32 %v7112_v59, %v7100_v58  ;;  %v8519_v16 = vor.u32 %v12490_v56, %v8518_v41 }
 0x23a   : > { %7365 = vmatpush.bf16.msra.mxu3 %v8823_v6  ;;  %v8774_v60 = vld [vmem:[%s13776_s6 + $0x348] sm:$0xf]  ;;  %v12554_v61 = vld [vmem:[%s13776_s6 + $0x354] sm:$0xf0]  ;;  %v7088_v6 = vpop.f32.mrf.mxu1  ;;  %v8647_v18 = vor.u32 %v12522_v57, %v8646_v36 }
 0x23b   : > { %7327 = vmatpush.bf16.msra.mxu0 %v8423_v62  ;;  %v8374_v19 = vld [vmem:[%s13776_s6 + $0x28] sm:$0xf]  ;;  %v12454_v24 = vld [vmem:[%s13776_s6 + $0x34] sm:$0xf0]  ;;  %v8775_v27 = vor.u32 %v12554_v61, %v8774_v60  ;;  %v7101_v51 = vpop.f32.mrf.mxu2 }
 0x23c   : > { %7340 = vmatpush.bf16.msra.mxu1 %v8551_v33  ;;  %v8502_v25 = vld [vmem:[%s13776_s6 + $0x128] sm:$0xf]  ;;  %v12486_v62 = vld [vmem:[%s13776_s6 + $0x134] sm:$0xf0]  ;;  %v8375_v37 = vor.u32 %v12454_v24, %v8374_v19 }
 0x23d   : > { %7353 = vmatpush.bf16.msra.mxu2 %v8679_v34  ;;  %v8630_v30 = vld [vmem:[%s13776_s6 + $0x228] sm:$0xf]  ;;  %v12518_v33 = vld [vmem:[%s13776_s6 + $0x234] sm:$0xf0]  ;;  %v8503_v39 = vor.u32 %v12486_v62, %v8502_v25 }
 0x23e   : > { %7366 = vmatpush.bf16.msra.mxu3 %v8807_v28  ;;  %v8758_v34 = vld [vmem:[%s13776_s6 + $0x328] sm:$0xf]  ;;  %v12550_v35 = vld [vmem:[%s13776_s6 + $0x334] sm:$0xf0]  ;;  %v8631_v40 = vor.u32 %v12518_v33, %v8630_v30 }
 0x23f   : > { %7328 = vmatpush.bf16.msra.mxu0 %v8407_v45  ;;  %v8358_v14 = vld [vmem:[%s13776_s6 + $0x8] sm:$0xf]  ;;  %v12450_v28 = vld [vmem:[%s13776_s6 + $0x14] sm:$0xf0]  ;;  %v8759_v44 = vor.u32 %v12550_v35, %v8758_v34 }
 0x240   : > { %7341 = vmatpush.bf16.msra.mxu1 %v8535_v2  ;;  %v8486_v42 = vld [vmem:[%s13776_s6 + $0x108] sm:$0xf]  ;;  %v12482_v23 = vld [vmem:[%s13776_s6 + $0x114] sm:$0xf0]  ;;  %v7114_v54 = vpop.f32.mrf.mxu3  ;;  %v8359_v56 = vor.u32 %v12450_v28, %v8358_v14 }
 0x241   : > { %7354 = vmatpush.bf16.msra.mxu2 %v8663_v50  ;;  %v8614_v43 = vld [vmem:[%s13776_s6 + $0x208] sm:$0xf]  ;;  %v12514_v45 = vld [vmem:[%s13776_s6 + $0x214] sm:$0xf0]  ;;  %v8487_v59 = vor.u32 %v12482_v23, %v8486_v42 }
 0x242   : > { %7367 = vmatpush.bf16.msra.mxu3 %v8791_v53  ;;  %v8742_v2 = vld [vmem:[%s13776_s6 + $0x308] sm:$0xf]  ;;  %v12546_v50 = vld [vmem:[%s13776_s6 + $0x314] sm:$0xf0]  ;;  %v8615_v60 = vor.u32 %v12514_v45, %v8614_v43 }
 0x243   : > { %7329 = vmatpush.bf16.msra.mxu0 %v8391_v55  ;;  %v8982_v52 = vld [vmem:[%s13776_s6 + $0x4e8] sm:$0xf]  ;;  %v12606_v41 = vld [vmem:[%s13776_s6 + $0x4f4] sm:$0xf0]  ;;  %v8743_v55 = vor.u32 %v12546_v50, %v8742_v2 }
 0x244   : > { %7342 = vmatpush.bf16.msra.mxu1 %v8519_v16  ;;  %v9110_v53 = vld [vmem:[%s13776_s6 + $0x5e8] sm:$0xf]  ;;  %v12638_v36 = vld [vmem:[%s13776_s6 + $0x5f4] sm:$0xf0]  ;;  %v8983_v6 = vor.u32 %v12606_v41, %v8982_v52 }
 0x245   : > { %7355 = vmatpush.bf16.msra.mxu2 %v8647_v18  ;;  %v9238_v57 = vld [vmem:[%s13776_s6 + $0x6e8] sm:$0xf]  ;;  %v12670_v58 = vld [vmem:[%s13776_s6 + $0x6f4] sm:$0xf0]  ;;  %v9111_v16 = vor.u32 %v12638_v36, %v9110_v53 }
 0x246   : > { %7368 = vmatpush.bf16.msra.mxu3 %v8775_v27  ;;  %v9366_v61 = vld [vmem:[%s13776_s6 + $0x7e8] sm:$0xf]  ;;  %v12702_v1 = vld [vmem:[%s13776_s6 + $0x7f4] sm:$0xf0]  ;;  %v9239_v18 = vor.u32 %v12670_v58, %v9238_v57 }
 0x247   : > { %7330 = vmatpush.bf16.msra.mxu0 %v8375_v37  ;;  %v8966_v19 = vld [vmem:[%s13776_s6 + $0x4c8] sm:$0xf]  ;;  %v12602_v24 = vld [vmem:[%s13776_s6 + $0x4d4] sm:$0xf0]  ;;  %v9367_v27 = vor.u32 %v12702_v1, %v9366_v61 }
 0x248   : > { %7343 = vmatpush.bf16.msra.mxu1 %v8503_v39  ;;  %v9094_v25 = vld [vmem:[%s13776_s6 + $0x5c8] sm:$0xf]  ;;  %v12634_v62 = vld [vmem:[%s13776_s6 + $0x5d4] sm:$0xf0]  ;;  %v8967_v37 = vor.u32 %v12602_v24, %v8966_v19 }
 0x249   : > { %7356 = vmatpush.bf16.msra.mxu2 %v8631_v40  ;;  %v9222_v30 = vld [vmem:[%s13776_s6 + $0x6c8] sm:$0xf]  ;;  %v12666_v33 = vld [vmem:[%s13776_s6 + $0x6d4] sm:$0xf0]  ;;  %v9095_v14 = vor.u32 %v12634_v62, %v9094_v25 }
 0x24a   : > { %7369 = vmatpush.bf16.msra.mxu3 %v8759_v44  ;;  %v9350_v34 = vld [vmem:[%s13776_s6 + $0x7c8] sm:$0xf]  ;;  %v12698_v35 = vld [vmem:[%s13776_s6 + $0x7d4] sm:$0xf0]  ;;  %v9223_v28 = vor.u32 %v12666_v33, %v9222_v30 }
 0x24b   : > { %7331 = vmatpush.bf16.msra.mxu0 %v8359_v56  ;;  %v8950_v39 = vld [vmem:[%s13776_s6 + $0x4a8] sm:$0xf]  ;;  %v12598_v40 = vld [vmem:[%s13776_s6 + $0x4b4] sm:$0xf0]  ;;  %v9351_v23 = vor.u32 %v12698_v35, %v9350_v34 }
 0x24c   : > { %7344 = vmatpush.bf16.msra.mxu1 %v8487_v59  ;;  %v9078_v42 = vld [vmem:[%s13776_s6 + $0x5a8] sm:$0xf]  ;;  %v12630_v43 = vld [vmem:[%s13776_s6 + $0x5b4] sm:$0xf0]  ;;  %v8951_v51 = vor.u32 %v12598_v40, %v8950_v39 }
 0x24d   : > { %7357 = vmatpush.bf16.msra.mxu2 %v8615_v60  ;;  %v9206_v44 = vld [vmem:[%s13776_s6 + $0x6a8] sm:$0xf]  ;;  %v12662_v45 = vld [vmem:[%s13776_s6 + $0x6b4] sm:$0xf0]  ;;  %v9079_v52 = vor.u32 %v12630_v43, %v9078_v42  ;;  %v7125_v60 = vpop.f32.mrf.mxu0 }
 0x24e   : > { %7370 = vmatpush.bf16.msra.mxu3 %v8743_v55  ;;  %v9334_v2 = vld [vmem:[%s13776_s6 + $0x7a8] sm:$0xf]  ;;  %v12694_v50 = vld [vmem:[%s13776_s6 + $0x7b4] sm:$0xf0]  ;;  %7332 = vmatmul.bf16.vlgmr.msra.gmra.mxu0 %v13893_v21  ;;  %v9207_v41 = vor.u32 %v12662_v45, %v9206_v44  ;;  %v7126_v55 = vadd.f32 %v7125_v60, %v15000_v7 }
 0x24f   : > { %7376 = vmatpush.bf16.msrb.mxu0 %v8983_v6  ;;  %7345 = vmatmul.bf16.vlgmr.msra.gmra.mxu1 %v13900_v26  ;;  %v8934_v53 = vld [vmem:[%s13776_s6 + $0x488] sm:$0xf]  ;;  %v12594_v54 = vld [vmem:[%s13776_s6 + $0x494] sm:$0xf0]  ;;  %v9335_v36 = vor.u32 %v12694_v50, %v9334_v2 }
 0x250   : > { %7389 = vmatpush.bf16.msrb.mxu1 %v9111_v16  ;;  %7358 = vmatmul.bf16.vlgmr.msra.gmra.mxu2 %v13891_v20  ;;  %v9062_v56 = vld [vmem:[%s13776_s6 + $0x588] sm:$0xf]  ;;  %v12626_v57 = vld [vmem:[%s13776_s6 + $0x594] sm:$0xf0]  ;;  %v8935_v6 = vor.u32 %v12594_v54, %v8934_v53  ;;  %v7138_v16 = vpop.f32.mrf.mxu1 }
 0x251   : > { %7402 = vmatpush.bf16.msrb.mxu2 %v9239_v18  ;;  %7371 = vmatmul.bf16.vlgmr.msra.gmra.mxu3 %v13895_v22  ;;  %v9190_v58 = vld [vmem:[%s13776_s6 + $0x688] sm:$0xf]  ;;  %v12658_v59 = vld [vmem:[%s13776_s6 + $0x694] sm:$0xf0]  ;;  %v9063_v18 = vor.u32 %v12626_v57, %v9062_v56  ;;  %v7139_v30 = vadd.f32 %v7138_v16, %v7126_v55 }
 0x252   : > { %7415 = vmatpush.bf16.msrb.mxu3 %v9367_v27  ;;  %v9318_v61 = vld [vmem:[%s13776_s6 + $0x788] sm:$0xf]  ;;  %v12690_v1 = vld [vmem:[%s13776_s6 + $0x794] sm:$0xf0]  ;;  %v9191_v19 = vor.u32 %v12658_v59, %v9190_v58 }
 0x253   : > { %7377 = vmatpush.bf16.msrb.mxu0 %v8967_v37  ;;  %v8918_v24 = vld [vmem:[%s13776_s6 + $0x468] sm:$0xf]  ;;  %v12590_v25 = vld [vmem:[%s13776_s6 + $0x474] sm:$0xf0]  ;;  %v9319_v62 = vor.u32 %v12690_v1, %v9318_v61  ;;  %v7151_v44 = vpop.f32.mrf.mxu2 }
 0x254   : > { %7390 = vmatpush.bf16.msrb.mxu1 %v9095_v14  ;;  %v9046_v27 = vld [vmem:[%s13776_s6 + $0x568] sm:$0xf]  ;;  %v12622_v33 = vld [vmem:[%s13776_s6 + $0x574] sm:$0xf0]  ;;  %v8919_v14 = vor.u32 %v12590_v25, %v8918_v24 }
 0x255   : > { %7403 = vmatpush.bf16.msrb.mxu2 %v9223_v28  ;;  %v9174_v34 = vld [vmem:[%s13776_s6 + $0x668] sm:$0xf]  ;;  %v12654_v7 = vld [vmem:[%s13776_s6 + $0x674] sm:$0xf0]  ;;  %v9047_v28 = vor.u32 %v12622_v33, %v9046_v27  ;;  %v7127_v54 = vpop.f32.mrf.mxu0 }
 0x256   : > { %7416 = vmatpush.bf16.msrb.mxu3 %v9351_v23  ;;  %v9302_v35 = vld [vmem:[%s13776_s6 + $0x768] sm:$0xf]  ;;  %v12686_v37 = vld [vmem:[%s13776_s6 + $0x774] sm:$0xf0]  ;;  %v9175_v39 = vor.u32 %v12654_v7, %v9174_v34 }
 0x257   : > { %7378 = vmatpush.bf16.msrb.mxu0 %v8951_v51  ;;  %v8902_v40 = vld [vmem:[%s13776_s6 + $0x448] sm:$0xf]  ;;  %v12586_v42 = vld [vmem:[%s13776_s6 + $0x454] sm:$0xf0]  ;;  %v9303_v43 = vor.u32 %v12686_v37, %v9302_v35  ;;  %v7152_v51 = vadd.f32 %v7151_v44, %v7139_v30 }
 0x258   : > { %7391 = vmatpush.bf16.msrb.mxu1 %v9079_v52  ;;  %v9030_v23 = vld [vmem:[%s13776_s6 + $0x548] sm:$0xf]  ;;  %v12618_v45 = vld [vmem:[%s13776_s6 + $0x554] sm:$0xf0]  ;;  %v7164_v52 = vpop.f32.mrf.mxu3  ;;  %v8903_v56 = vor.u32 %v12586_v42, %v8902_v40 }
 0x259   : > { %7404 = vmatpush.bf16.msrb.mxu2 %v9207_v41  ;;  %v9158_v2 = vld [vmem:[%s13776_s6 + $0x648] sm:$0xf]  ;;  %v12650_v50 = vld [vmem:[%s13776_s6 + $0x654] sm:$0xf0]  ;;  %v15071_v57 = vadd.f32 %v7164_v52, %v7152_v51  ;;  %v9031_v58 = vor.u32 %v12618_v45, %v9030_v23 }
 0x25a   : > { %7417 = vmatpush.bf16.msrb.mxu3 %v9335_v36  ;;  %v9286_v41 = vld [vmem:[%s13776_s6 + $0x748] sm:$0xf]  ;;  %v12682_v53 = vld [vmem:[%s13776_s6 + $0x754] sm:$0xf0]  ;;  %v7140_v36 = vpop.f32.mrf.mxu1  ;;  %v9159_v59 = vor.u32 %v12650_v50, %v9158_v2 }
 0x25b   : > { %7379 = vmatpush.bf16.msrb.mxu0 %v8935_v6  ;;  %v8886_v60 = vld [vmem:[%s13776_s6 + $0x428] sm:$0xf]  ;;  %v12582_v61 = vld [vmem:[%s13776_s6 + $0x434] sm:$0xf0]  ;;  %v9287_v55 = vor.u32 %v12682_v53, %v9286_v41  ;;  %v7153_v40 = vpop.f32.mrf.mxu2 }
 0x25c   : > { %7392 = vmatpush.bf16.msrb.mxu1 %v9063_v18  ;;  %v9014_v1 = vld [vmem:[%s13776_s6 + $0x528] sm:$0xf]  ;;  %v12614_v6 = vld [vmem:[%s13776_s6 + $0x534] sm:$0xf0]  ;;  %v8887_v25 = vor.u32 %v12582_v61, %v8886_v60 }
 0x25d   : > { %7405 = vmatpush.bf16.msrb.mxu2 %v9191_v19  ;;  %v9142_v16 = vld [vmem:[%s13776_s6 + $0x628] sm:$0xf]  ;;  %v12646_v18 = vld [vmem:[%s13776_s6 + $0x634] sm:$0xf0]  ;;  %v9015_v30 = vor.u32 %v12614_v6, %v9014_v1 }
 0x25e   : > { %7418 = vmatpush.bf16.msrb.mxu3 %v9319_v62  ;;  %v9270_v19 = vld [vmem:[%s13776_s6 + $0x728] sm:$0xf]  ;;  %v12678_v24 = vld [vmem:[%s13776_s6 + $0x734] sm:$0xf0]  ;;  %v9143_v33 = vor.u32 %v12646_v18, %v9142_v16 }
 0x25f   : > { %7380 = vmatpush.bf16.msrb.mxu0 %v8919_v14  ;;  %v8870_v27 = vld [vmem:[%s13776_s6 + $0x408] sm:$0xf]  ;;  %v12578_v62 = vld [vmem:[%s13776_s6 + $0x414] sm:$0xf0]  ;;  %v9271_v37 = vor.u32 %v12678_v24, %v9270_v19 }
 0x260   : > { %7393 = vmatpush.bf16.msrb.mxu1 %v9047_v28  ;;  %v8998_v34 = vld [vmem:[%s13776_s6 + $0x508] sm:$0xf]  ;;  %v12610_v7 = vld [vmem:[%s13776_s6 + $0x514] sm:$0xf0]  ;;  %v7166_v44 = vpop.f32.mrf.mxu3  ;;  %v8871_v45 = vor.u32 %v12578_v62, %v8870_v27 }
 0x261   : > { %7406 = vmatpush.bf16.msrb.mxu2 %v9175_v39  ;;  %v9126_v35 = vld [vmem:[%s13776_s6 + $0x608] sm:$0xf]  ;;  %v12642_v14 = vld [vmem:[%s13776_s6 + $0x614] sm:$0xf0]  ;;  %v8999_v52 = vor.u32 %v12610_v7, %v8998_v34 }
 0x262   : > { %7419 = vmatpush.bf16.msrb.mxu3 %v9303_v43  ;;  %v9254_v28 = vld [vmem:[%s13776_s6 + $0x708] sm:$0xf]  ;;  %v12674_v39 = vld [vmem:[%s13776_s6 + $0x714] sm:$0xf0]  ;;  %v9127_v41 = vor.u32 %v12642_v14, %v9126_v35 }
 0x263   : > { %7381 = vmatpush.bf16.msrb.mxu0 %v8903_v56  ;;  %v9494_v42 = vld [vmem:[%s13776_s6 + $0x8e8] sm:$0xf]  ;;  %v12734_v23 = vld [vmem:[%s13776_s6 + $0x8f4] sm:$0xf0]  ;;  %v9255_v56 = vor.u32 %v12674_v39, %v9254_v28 }
 0x264   : > { %7394 = vmatpush.bf16.msrb.mxu1 %v9031_v58  ;;  %v9622_v43 = vld [vmem:[%s13776_s6 + $0x9e8] sm:$0xf]  ;;  %v12766_v2 = vld [vmem:[%s13776_s6 + $0x9f4] sm:$0xf0]  ;;  %v9495_v36 = vor.u32 %v12734_v23, %v9494_v42 }
 0x265   : > { %7407 = vmatpush.bf16.msrb.mxu2 %v9159_v59  ;;  %v9750_v50 = vld [vmem:[%s13776_s6 + $0xae8] sm:$0xf]  ;;  %v12798_v51 = vld [vmem:[%s13776_s6 + $0xaf4] sm:$0xf0]  ;;  %v9623_v58 = vor.u32 %v12766_v2, %v9622_v43 }
 0x266   : > { %7420 = vmatpush.bf16.msrb.mxu3 %v9287_v55  ;;  %v9878_v53 = vld [vmem:[%s13776_s6 + $0xbe8] sm:$0xf]  ;;  %v12830_v54 = vld [vmem:[%s13776_s6 + $0xbf4] sm:$0xf0]  ;;  %v9751_v59 = vor.u32 %v12798_v51, %v9750_v50 }
 0x267   : > { %7382 = vmatpush.bf16.msrb.mxu0 %v8887_v25  ;;  %v9478_v60 = vld [vmem:[%s13776_s6 + $0x8c8] sm:$0xf]  ;;  %v12730_v61 = vld [vmem:[%s13776_s6 + $0x8d4] sm:$0xf0]  ;;  %v9879_v55 = vor.u32 %v12830_v54, %v9878_v53 }
 0x268   : > { %7395 = vmatpush.bf16.msrb.mxu1 %v9015_v30  ;;  %v9606_v1 = vld [vmem:[%s13776_s6 + $0x9c8] sm:$0xf]  ;;  %v12762_v6 = vld [vmem:[%s13776_s6 + $0x9d4] sm:$0xf0]  ;;  %v9479_v25 = vor.u32 %v12730_v61, %v9478_v60 }
 0x269   : > { %7408 = vmatpush.bf16.msrb.mxu2 %v9143_v33  ;;  %v9734_v16 = vld [vmem:[%s13776_s6 + $0xac8] sm:$0xf]  ;;  %v12794_v18 = vld [vmem:[%s13776_s6 + $0xad4] sm:$0xf0]  ;;  %v9607_v27 = vor.u32 %v12762_v6, %v9606_v1 }
 0x26a   : > { %7421 = vmatpush.bf16.msrb.mxu3 %v9271_v37  ;;  %v9862_v19 = vld [vmem:[%s13776_s6 + $0xbc8] sm:$0xf]  ;;  %v12826_v24 = vld [vmem:[%s13776_s6 + $0xbd4] sm:$0xf0]  ;;  %v9735_v62 = vor.u32 %v12794_v18, %v9734_v16 }
 0x26b   : > { %7383 = vmatpush.bf16.msrb.mxu0 %v8871_v45  ;;  %v9462_v30 = vld [vmem:[%s13776_s6 + $0x8a8] sm:$0xf]  ;;  %v12726_v33 = vld [vmem:[%s13776_s6 + $0x8b4] sm:$0xf0]  ;;  %v9863_v7 = vor.u32 %v12826_v24, %v9862_v19 }
 0x26c   : > { %7396 = vmatpush.bf16.msrb.mxu1 %v8999_v52  ;;  %v9590_v34 = vld [vmem:[%s13776_s6 + $0x9a8] sm:$0xf]  ;;  %v12758_v35 = vld [vmem:[%s13776_s6 + $0x9b4] sm:$0xf0]  ;;  %v9463_v40 = vor.u32 %v12726_v33, %v9462_v30 }
 0x26d   : > { %7409 = vmatpush.bf16.msrb.mxu2 %v9127_v41  ;;  %v9718_v37 = vld [vmem:[%s13776_s6 + $0xaa8] sm:$0xf]  ;;  %v12790_v14 = vld [vmem:[%s13776_s6 + $0xab4] sm:$0xf0]  ;;  %v9591_v42 = vor.u32 %v12758_v35, %v9590_v34  ;;  %v7177_v41 = vpop.f32.mrf.mxu0 }
 0x26e   : > { %7422 = vmatpush.bf16.msrb.mxu3 %v9255_v56  ;;  %7384 = vmatmul.bf16.vlgmr.msrb.gmra.mxu0 %v13949_v31  ;;  %v9846_v28 = vld [vmem:[%s13776_s6 + $0xba8] sm:$0xf]  ;;  %v12822_v39 = vld [vmem:[%s13776_s6 + $0xbb4] sm:$0xf0]  ;;  %v9719_v23 = vor.u32 %v12790_v14, %v9718_v37  ;;  %v7178_v56 = vadd.f32 %v7177_v41, %v15071_v57 }
 0x26f   : > { %7428 = vmatpush.bf16.msra.mxu0 %v9495_v36  ;;  %7397 = vmatmul.bf16.vlgmr.msrb.gmra.mxu1 %v13956_v38  ;;  %v9446_v43 = vld [vmem:[%s13776_s6 + $0x888] sm:$0xf]  ;;  %v12722_v44 = vld [vmem:[%s13776_s6 + $0x894] sm:$0xf0]  ;;  %v9847_v2 = vor.u32 %v12822_v39, %v9846_v28 }
 0x270   : > { %7441 = vmatpush.bf16.msra.mxu1 %v9623_v58  ;;  %7410 = vmatmul.bf16.vlgmr.msrb.gmra.mxu2 %v13947_v29  ;;  %v9574_v45 = vld [vmem:[%s13776_s6 + $0x988] sm:$0xf]  ;;  %v12754_v50 = vld [vmem:[%s13776_s6 + $0x994] sm:$0xf0]  ;;  %v9447_v36 = vor.u32 %v12722_v44, %v9446_v43  ;;  %v7190_v58 = vpop.f32.mrf.mxu1 }
 0x271   : > { %7454 = vmatpush.bf16.msra.mxu2 %v9751_v59  ;;  %7423 = vmatmul.bf16.vlgmr.msrb.gmra.mxu3 %v13951_v32  ;;  %v9702_v51 = vld [vmem:[%s13776_s6 + $0xa88] sm:$0xf]  ;;  %v12786_v52 = vld [vmem:[%s13776_s6 + $0xa94] sm:$0xf0]  ;;  %v9575_v59 = vor.u32 %v12754_v50, %v9574_v45  ;;  %v7191_v16 = vadd.f32 %v7190_v58, %v7178_v56 }
 0x272   : > { %7467 = vmatpush.bf16.msra.mxu3 %v9879_v55  ;;  %v9830_v53 = vld [vmem:[%s13776_s6 + $0xb88] sm:$0xf]  ;;  %v12818_v54 = vld [vmem:[%s13776_s6 + $0xb94] sm:$0xf0]  ;;  %v9703_v60 = vor.u32 %v12786_v52, %v9702_v51 }
 0x273   : > { %7429 = vmatpush.bf16.msra.mxu0 %v9479_v25  ;;  %v9430_v61 = vld [vmem:[%s13776_s6 + $0x868] sm:$0xf]  ;;  %v12718_v1 = vld [vmem:[%s13776_s6 + $0x874] sm:$0xf0]  ;;  %v9831_v6 = vor.u32 %v12818_v54, %v9830_v53  ;;  %v7203_v37 = vpop.f32.mrf.mxu2 }
 0x274   : > { %7442 = vmatpush.bf16.msra.mxu1 %v9607_v27  ;;  %v9558_v55 = vld [vmem:[%s13776_s6 + $0x968] sm:$0xf]  ;;  %v12750_v18 = vld [vmem:[%s13776_s6 + $0x974] sm:$0xf0]  ;;  %v9431_v27 = vor.u32 %v12718_v1, %v9430_v61 }
 0x275   : > { %7455 = vmatpush.bf16.msra.mxu2 %v9735_v62  ;;  %v9686_v19 = vld [vmem:[%s13776_s6 + $0xa68] sm:$0xf]  ;;  %v12782_v57 = vld [vmem:[%s13776_s6 + $0xa74] sm:$0xf0]  ;;  %v9559_v62 = vor.u32 %v12750_v18, %v9558_v55  ;;  %v7179_v44 = vpop.f32.mrf.mxu0 }
 0x276   : > { %7468 = vmatpush.bf16.msra.mxu3 %v9863_v7  ;;  %v9814_v24 = vld [vmem:[%s13776_s6 + $0xb68] sm:$0xf]  ;;  %v12814_v25 = vld [vmem:[%s13776_s6 + $0xb74] sm:$0xf0]  ;;  %v9687_v30 = vor.u32 %v12782_v57, %v9686_v19 }
 0x277   : > { %7430 = vmatpush.bf16.msra.mxu0 %v9463_v40  ;;  %v9414_v33 = vld [vmem:[%s13776_s6 + $0x848] sm:$0xf]  ;;  %v12714_v34 = vld [vmem:[%s13776_s6 + $0x854] sm:$0xf0]  ;;  %v9815_v35 = vor.u32 %v12814_v25, %v9814_v24  ;;  %v7204_v40 = vadd.f32 %v7203_v37, %v7191_v16 }
 0x278   : > { %7443 = vmatpush.bf16.msra.mxu1 %v9591_v42  ;;  %v9542_v7 = vld [vmem:[%s13776_s6 + $0x948] sm:$0xf]  ;;  %v12746_v14 = vld [vmem:[%s13776_s6 + $0x954] sm:$0xf0]  ;;  %v7216_v42 = vpop.f32.mrf.mxu3  ;;  %v9415_v45 = vor.u32 %v12714_v34, %v9414_v33 }
 0x279   : > { %7456 = vmatpush.bf16.msra.mxu2 %v9719_v23  ;;  %v9670_v28 = vld [vmem:[%s13776_s6 + $0xa48] sm:$0xf]  ;;  %v12778_v39 = vld [vmem:[%s13776_s6 + $0xa54] sm:$0xf0]  ;;  %v15142_v50 = vadd.f32 %v7216_v42, %v7204_v40  ;;  %v9543_v51 = vor.u32 %v12746_v14, %v9542_v7 }
 0x27a   : > { %7469 = vmatpush.bf16.msra.mxu3 %v9847_v2  ;;  %v9798_v23 = vld [vmem:[%s13776_s6 + $0xb48] sm:$0xf]  ;;  %v12810_v43 = vld [vmem:[%s13776_s6 + $0xb54] sm:$0xf0]  ;;  %v7192_v2 = vpop.f32.mrf.mxu1  ;;  %v9671_v52 = vor.u32 %v12778_v39, %v9670_v28 }
 0x27b   : > { %7431 = vmatpush.bf16.msra.mxu0 %v9447_v36  ;;  %v9398_v41 = vld [vmem:[%s13776_s6 + $0x828] sm:$0xf]  ;;  %v12710_v53 = vld [vmem:[%s13776_s6 + $0x834] sm:$0xf0]  ;;  %v9799_v56 = vor.u32 %v12810_v43, %v9798_v23  ;;  %v7205_v33 = vpop.f32.mrf.mxu2 }
 0x27c   : > { %7444 = vmatpush.bf16.msra.mxu1 %v9575_v59  ;;  %v9526_v54 = vld [vmem:[%s13776_s6 + $0x928] sm:$0xf]  ;;  %v12742_v36 = vld [vmem:[%s13776_s6 + $0x934] sm:$0xf0]  ;;  %v9399_v1 = vor.u32 %v12710_v53, %v9398_v41 }
 0x27d   : > { %7457 = vmatpush.bf16.msra.mxu2 %v9703_v60  ;;  %v9654_v58 = vld [vmem:[%s13776_s6 + $0xa28] sm:$0xf]  ;;  %v12774_v59 = vld [vmem:[%s13776_s6 + $0xa34] sm:$0xf0]  ;;  %v9527_v16 = vor.u32 %v12742_v36, %v9526_v54 }
 0x27e   : > { %7470 = vmatpush.bf16.msra.mxu3 %v9831_v6  ;;  %v9782_v60 = vld [vmem:[%s13776_s6 + $0xb28] sm:$0xf]  ;;  %v12806_v61 = vld [vmem:[%s13776_s6 + $0xb34] sm:$0xf0]  ;;  %v9655_v18 = vor.u32 %v12774_v59, %v9654_v58 }
 0x27f   : > { %7432 = vmatpush.bf16.msra.mxu0 %v9431_v27  ;;  %v9382_v55 = vld [vmem:[%s13776_s6 + $0x808] sm:$0xf]  ;;  %v12706_v6 = vld [vmem:[%s13776_s6 + $0x814] sm:$0xf0]  ;;  %v9783_v25 = vor.u32 %v12806_v61, %v9782_v60 }
 0x280   : > { %7445 = vmatpush.bf16.msra.mxu1 %v9559_v62  ;;  %v9510_v19 = vld [vmem:[%s13776_s6 + $0x908] sm:$0xf]  ;;  %v12738_v57 = vld [vmem:[%s13776_s6 + $0x914] sm:$0xf0]  ;;  %v7218_v37 = vpop.f32.mrf.mxu3  ;;  %v9383_v14 = vor.u32 %v12706_v6, %v9382_v55 }
 0x281   : > { %7458 = vmatpush.bf16.msra.mxu2 %v9687_v30  ;;  %v9638_v24 = vld [vmem:[%s13776_s6 + $0xa08] sm:$0xf]  ;;  %v12770_v27 = vld [vmem:[%s13776_s6 + $0xa14] sm:$0xf0]  ;;  %v9511_v42 = vor.u32 %v12738_v57, %v9510_v19 }
 0x282   : > { %7471 = vmatpush.bf16.msra.mxu3 %v9815_v35  ;;  %v9766_v62 = vld [vmem:[%s13776_s6 + $0xb08] sm:$0xf]  ;;  %v12802_v30 = vld [vmem:[%s13776_s6 + $0xb14] sm:$0xf0]  ;;  %v9639_v23 = vor.u32 %v12770_v27, %v9638_v24 }
 0x283   : > { %7433 = vmatpush.bf16.msra.mxu0 %v9415_v45  ;;  %v10006_v34 = vld [vmem:[%s13776_s6 + $0xce8] sm:$0xf]  ;;  %v12862_v7 = vld [vmem:[%s13776_s6 + $0xcf4] sm:$0xf0]  ;;  %v9767_v45 = vor.u32 %v12802_v30, %v9766_v62 }
 0x284   : > { %7446 = vmatpush.bf16.msra.mxu1 %v9543_v51  ;;  %v10134_v35 = vld [vmem:[%s13776_s6 + $0xde8] sm:$0xf]  ;;  %v12894_v28 = vld [vmem:[%s13776_s6 + $0xdf4] sm:$0xf0]  ;;  %v10007_v2 = vor.u32 %v12862_v7, %v10006_v34 }
 0x285   : > { %7459 = vmatpush.bf16.msra.mxu2 %v9671_v52  ;;  %v10262_v39 = vld [vmem:[%s13776_s6 + $0xee8] sm:$0xf]  ;;  %v12926_v40 = vld [vmem:[%s13776_s6 + $0xef4] sm:$0xf0]  ;;  %v10135_v51 = vor.u32 %v12894_v28, %v10134_v35 }
 0x286   : > { %7472 = vmatpush.bf16.msra.mxu3 %v9799_v56  ;;  %v10390_v43 = vld [vmem:[%s13776_s6 + $0xfe8] sm:$0xf]  ;;  %v12958_v44 = vld [vmem:[%s13776_s6 + $0xff4] sm:$0xf0]  ;;  %v10263_v52 = vor.u32 %v12926_v40, %v10262_v39 }
 0x287   : > { %7434 = vmatpush.bf16.msra.mxu0 %v9399_v1  ;;  %v9990_v41 = vld [vmem:[%s13776_s6 + $0xcc8] sm:$0xf]  ;;  %v12858_v53 = vld [vmem:[%s13776_s6 + $0xcd4] sm:$0xf0]  ;;  %v10391_v56 = vor.u32 %v12958_v44, %v10390_v43 }
 0x288   : > { %7447 = vmatpush.bf16.msra.mxu1 %v9527_v16  ;;  %v10118_v54 = vld [vmem:[%s13776_s6 + $0xdc8] sm:$0xf]  ;;  %v12890_v36 = vld [vmem:[%s13776_s6 + $0xdd4] sm:$0xf0]  ;;  %v9991_v1 = vor.u32 %v12858_v53, %v9990_v41 }
 0x289   : > { %7460 = vmatpush.bf16.msra.mxu2 %v9655_v18  ;;  %v10246_v58 = vld [vmem:[%s13776_s6 + $0xec8] sm:$0xf]  ;;  %v12922_v59 = vld [vmem:[%s13776_s6 + $0xed4] sm:$0xf0]  ;;  %v10119_v55 = vor.u32 %v12890_v36, %v10118_v54 }
 0x28a   : > { %7473 = vmatpush.bf16.msra.mxu3 %v9783_v25  ;;  %v10374_v60 = vld [vmem:[%s13776_s6 + $0xfc8] sm:$0xf]  ;;  %v12954_v61 = vld [vmem:[%s13776_s6 + $0xfd4] sm:$0xf0]  ;;  %v10247_v6 = vor.u32 %v12922_v59, %v10246_v58 }
 0x28b   : > { %7435 = vmatpush.bf16.msra.mxu0 %v9383_v14  ;;  %v9974_v16 = vld [vmem:[%s13776_s6 + $0xca8] sm:$0xf]  ;;  %v12854_v18 = vld [vmem:[%s13776_s6 + $0xcb4] sm:$0xf0]  ;;  %v10375_v57 = vor.u32 %v12954_v61, %v10374_v60 }
 0x28c   : > { %7448 = vmatpush.bf16.msra.mxu1 %v9511_v42  ;;  %v10102_v19 = vld [vmem:[%s13776_s6 + $0xda8] sm:$0xf]  ;;  %v12886_v24 = vld [vmem:[%s13776_s6 + $0xdb4] sm:$0xf0]  ;;  %v9975_v33 = vor.u32 %v12854_v18, %v9974_v16 }
 0x28d   : > { %7461 = vmatpush.bf16.msra.mxu2 %v9639_v23  ;;  %v10230_v25 = vld [vmem:[%s13776_s6 + $0xea8] sm:$0xf]  ;;  %v12918_v27 = vld [vmem:[%s13776_s6 + $0xeb4] sm:$0xf0]  ;;  %v10103_v34 = vor.u32 %v12886_v24, %v10102_v19  ;;  %v7229_v23 = vpop.f32.mrf.mxu0 }
 0x28e   : > { %7474 = vmatpush.bf16.msra.mxu3 %v9767_v45  ;;  %7436 = vmatmul.bf16.vlgmr.msra.gmra.mxu0 %v14024_v8  ;;  %v10358_v62 = vld [vmem:[%s13776_s6 + $0xfa8] sm:$0xf]  ;;  %v12950_v30 = vld [vmem:[%s13776_s6 + $0xfb4] sm:$0xf0]  ;;  %v10231_v7 = vor.u32 %v12918_v27, %v10230_v25  ;;  %v7230_v45 = vadd.f32 %v7229_v23, %v15142_v50 }
 0x28f   : > { %7480 = vmatpush.bf16.msrb.mxu0 %v10007_v2  ;;  %7449 = vmatmul.bf16.vlgmr.msra.gmra.mxu1 %v14030_v12  ;;  %v9958_v35 = vld [vmem:[%s13776_s6 + $0xc88] sm:$0xf]  ;;  %v12850_v37 = vld [vmem:[%s13776_s6 + $0xc94] sm:$0xf0]  ;;  %v10359_v28 = vor.u32 %v12950_v30, %v10358_v62 }
 0x290   : > { %7493 = vmatpush.bf16.msrb.mxu1 %v10135_v51  ;;  %7462 = vmatmul.bf16.vlgmr.msra.gmra.mxu2 %v14028_v11  ;;  %v10086_v14 = vld [vmem:[%s13776_s6 + $0xd88] sm:$0xf]  ;;  %v12882_v39 = vld [vmem:[%s13776_s6 + $0xd94] sm:$0xf0]  ;;  %v9959_v2 = vor.u32 %v12850_v37, %v9958_v35  ;;  %v7242_v51 = vpop.f32.mrf.mxu1 }
 0x291   : > { %7506 = vmatpush.bf16.msrb.mxu2 %v10263_v52  ;;  %7475 = vmatmul.bf16.vlgmr.msra.gmra.mxu3 %v14033_v15  ;;  %v10214_v40 = vld [vmem:[%s13776_s6 + $0xe88] sm:$0xf]  ;;  %v12914_v42 = vld [vmem:[%s13776_s6 + $0xe94] sm:$0xf0]  ;;  %v10087_v52 = vor.u32 %v12882_v39, %v10086_v14  ;;  %v7243_v58 = vadd.f32 %v7242_v51, %v7230_v45 }
 0x292   : > { %7519 = vmatpush.bf16.msrb.mxu3 %v10391_v56  ;;  %v10342_v43 = vld [vmem:[%s13776_s6 + $0xf88] sm:$0xf]  ;;  %v12946_v44 = vld [vmem:[%s13776_s6 + $0xf94] sm:$0xf0]  ;;  %v10215_v41 = vor.u32 %v12914_v42, %v10214_v40 }
 0x293   : > { %7481 = vmatpush.bf16.msrb.mxu0 %v9991_v1  ;;  %v9942_v53 = vld [vmem:[%s13776_s6 + $0xc68] sm:$0xf]  ;;  %v12846_v54 = vld [vmem:[%s13776_s6 + $0xc74] sm:$0xf0]  ;;  %v10343_v36 = vor.u32 %v12946_v44, %v10342_v43  ;;  %v7255_v25 = vpop.f32.mrf.mxu2 }
 0x294   : > { %7494 = vmatpush.bf16.msrb.mxu1 %v10119_v55  ;;  %v10070_v56 = vld [vmem:[%s13776_s6 + $0xd68] sm:$0xf]  ;;  %v12878_v59 = vld [vmem:[%s13776_s6 + $0xd74] sm:$0xf0]  ;;  %v9943_v55 = vor.u32 %v12846_v54, %v9942_v53 }
 0x295   : > { %7507 = vmatpush.bf16.msrb.mxu2 %v10247_v6  ;;  %v10198_v60 = vld [vmem:[%s13776_s6 + $0xe68] sm:$0xf]  ;;  %v12910_v50 = vld [vmem:[%s13776_s6 + $0xe74] sm:$0xf0]  ;;  %v10071_v6 = vor.u32 %v12878_v59, %v10070_v56  ;;  %v7231_v37 = vpop.f32.mrf.mxu0 }
 0x296   : > { %7520 = vmatpush.bf16.msrb.mxu3 %v10375_v57  ;;  %v10326_v61 = vld [vmem:[%s13776_s6 + $0xf68] sm:$0xf]  ;;  %v12942_v1 = vld [vmem:[%s13776_s6 + $0xf74] sm:$0xf0]  ;;  %v10199_v16 = vor.u32 %v12910_v50, %v10198_v60 }
 0x297   : > { %7482 = vmatpush.bf16.msrb.mxu0 %v9975_v33  ;;  %v9926_v18 = vld [vmem:[%s13776_s6 + $0xc48] sm:$0xf]  ;;  %v12842_v19 = vld [vmem:[%s13776_s6 + $0xc54] sm:$0xf0]  ;;  %v10327_v24 = vor.u32 %v12942_v1, %v10326_v61  ;;  %v7256_v33 = vadd.f32 %v7255_v25, %v7243_v58 }
 0x298   : > { %7495 = vmatpush.bf16.msrb.mxu1 %v10103_v34  ;;  %v10054_v57 = vld [vmem:[%s13776_s6 + $0xd48] sm:$0xf]  ;;  %v12874_v27 = vld [vmem:[%s13776_s6 + $0xd54] sm:$0xf0]  ;;  %v7268_v34 = vpop.f32.mrf.mxu3  ;;  %v9927_v14 = vor.u32 %v12842_v19, %v9926_v18 }
 0x299   : > { %7508 = vmatpush.bf16.msrb.mxu2 %v10231_v7  ;;  %v10182_v62 = vld [vmem:[%s13776_s6 + $0xe48] sm:$0xf]  ;;  %v12906_v30 = vld [vmem:[%s13776_s6 + $0xe54] sm:$0xf0]  ;;  %v15213_v39 = vadd.f32 %v7268_v34, %v7256_v33  ;;  %v10055_v40 = vor.u32 %v12874_v27, %v10054_v57 }
 0x29a   : > { %7521 = vmatpush.bf16.msrb.mxu3 %v10359_v28  ;;  %v10310_v7 = vld [vmem:[%s13776_s6 + $0xf48] sm:$0xf]  ;;  %v12938_v35 = vld [vmem:[%s13776_s6 + $0xf54] sm:$0xf0]  ;;  %v7244_v28 = vpop.f32.mrf.mxu1  ;;  %v10183_v42 = vor.u32 %v12906_v30, %v10182_v62 }
 0x29b   : > { %7483 = vmatpush.bf16.msrb.mxu0 %v9959_v2  ;;  %v9910_v23 = vld [vmem:[%s13776_s6 + $0xc28] sm:$0xf]  ;;  %v12838_v43 = vld [vmem:[%s13776_s6 + $0xc34] sm:$0xf0]  ;;  %v10311_v45 = vor.u32 %v12938_v35, %v10310_v7  ;;  %v7257_v18 = vpop.f32.mrf.mxu2 }
 0x29c   : > { %7496 = vmatpush.bf16.msrb.mxu1 %v10087_v52  ;;  %v10038_v44 = vld [vmem:[%s13776_s6 + $0xd28] sm:$0xf]  ;;  %v12870_v2 = vld [vmem:[%s13776_s6 + $0xd34] sm:$0xf0]  ;;  %v9911_v54 = vor.u32 %v12838_v43, %v9910_v23 }
 0x29d   : > { %7509 = vmatpush.bf16.msrb.mxu2 %v10215_v41  ;;  %v10166_v51 = vld [vmem:[%s13776_s6 + $0xe28] sm:$0xf]  ;;  %v12902_v52 = vld [vmem:[%s13776_s6 + $0xe34] sm:$0xf0]  ;;  %v10039_v58 = vor.u32 %v12870_v2, %v10038_v44 }
 0x29e   : > { %7522 = vmatpush.bf16.msrb.mxu3 %v10343_v36  ;;  %v10294_v41 = vld [vmem:[%s13776_s6 + $0xf28] sm:$0xf]  ;;  %v12934_v53 = vld [vmem:[%s13776_s6 + $0xf34] sm:$0xf0]  ;;  %v10167_v59 = vor.u32 %v12902_v52, %v10166_v51 }
 0x29f   : > { %7484 = vmatpush.bf16.msrb.mxu0 %v9943_v55  ;;  %v9894_v56 = vld [vmem:[%s13776_s6 + $0xc08] sm:$0xf]  ;;  %v12834_v36 = vld [vmem:[%s13776_s6 + $0xc14] sm:$0xf0]  ;;  %v10295_v1 = vor.u32 %v12934_v53, %v10294_v41 }
 0x2a0   : > { %7497 = vmatpush.bf16.msrb.mxu1 %v10071_v6  ;;  %v10022_v60 = vld [vmem:[%s13776_s6 + $0xd08] sm:$0xf]  ;;  %v12866_v50 = vld [vmem:[%s13776_s6 + $0xd14] sm:$0xf0]  ;;  %v7270_v25 = vpop.f32.mrf.mxu3  ;;  %v9895_v27 = vor.u32 %v12834_v36, %v9894_v56 }
 0x2a1   : > { %7510 = vmatpush.bf16.msrb.mxu2 %v10199_v16  ;;  %v10150_v61 = vld [vmem:[%s13776_s6 + $0xe08] sm:$0xf]  ;;  %v12898_v55 = vld [vmem:[%s13776_s6 + $0xe14] sm:$0xf0]  ;;  %v10023_v34 = vor.u32 %v12866_v50, %v10022_v60 }
 0x2a2   : > { %7523 = vmatpush.bf16.msrb.mxu3 %v10327_v24  ;;  %v10278_v6 = vld [vmem:[%s13776_s6 + $0xf08] sm:$0xf]  ;;  %v12930_v16 = vld [vmem:[%s13776_s6 + $0xf14] sm:$0xf0]  ;;  %v10151_v7 = vor.u32 %v12898_v55, %v10150_v61 }
 0x2a3   : > { %7485 = vmatpush.bf16.msrb.mxu0 %v9927_v14  ;;  %v10518_v19 = vld [vmem:[%s13776_s6 + $0x10e8] sm:$0xf]  ;;  %v12990_v57 = vld [vmem:[%s13776_s6 + $0x10f4] sm:$0xf0]  ;;  %v10279_v14 = vor.u32 %v12930_v16, %v10278_v6 }
 0x2a4   : > { %7498 = vmatpush.bf16.msrb.mxu1 %v10055_v40  ;;  %v10646_v24 = vld [vmem:[%s13776_s6 + $0x11e8] sm:$0xf]  ;;  %v13022_v62 = vld [vmem:[%s13776_s6 + $0x11f4] sm:$0xf0]  ;;  %v10519_v28 = vor.u32 %v12990_v57, %v10518_v19 }
 0x2a5   : > { %7511 = vmatpush.bf16.msrb.mxu2 %v10183_v42  ;;  %v10774_v30 = vld [vmem:[%s13776_s6 + $0x12e8] sm:$0xf]  ;;  %v13054_v33 = vld [vmem:[%s13776_s6 + $0x12f4] sm:$0xf0]  ;;  %v10647_v40 = vor.u32 %v13022_v62, %v10646_v24 }
 0x2a6   : > { %7524 = vmatpush.bf16.msrb.mxu3 %v10311_v45  ;;  %v10902_v35 = vld [vmem:[%s13776_s6 + $0x13e8] sm:$0xf]  ;;  %v13086_v37 = vld [vmem:[%s13776_s6 + $0x13f4] sm:$0xf0]  ;;  %v10775_v42 = vor.u32 %v13054_v33, %v10774_v30 }
 0x2a7   : > { %7486 = vmatpush.bf16.msrb.mxu0 %v9911_v54  ;;  %v10502_v23 = vld [vmem:[%s13776_s6 + $0x10c8] sm:$0xf]  ;;  %v12986_v43 = vld [vmem:[%s13776_s6 + $0x10d4] sm:$0xf0]  ;;  %v10903_v45 = vor.u32 %v13086_v37, %v10902_v35 }
 0x2a8   : > { %7499 = vmatpush.bf16.msrb.mxu1 %v10039_v58  ;;  %v10630_v44 = vld [vmem:[%s13776_s6 + $0x11c8] sm:$0xf]  ;;  %v13018_v2 = vld [vmem:[%s13776_s6 + $0x11d4] sm:$0xf0]  ;;  %v10503_v54 = vor.u32 %v12986_v43, %v10502_v23 }
 0x2a9   : > { %7512 = vmatpush.bf16.msrb.mxu2 %v10167_v59  ;;  %v10758_v51 = vld [vmem:[%s13776_s6 + $0x12c8] sm:$0xf]  ;;  %v13050_v52 = vld [vmem:[%s13776_s6 + $0x12d4] sm:$0xf0]  ;;  %v10631_v56 = vor.u32 %v13018_v2, %v10630_v44 }
 0x2aa   : > { %7525 = vmatpush.bf16.msrb.mxu3 %v10295_v1  ;;  %v10886_v41 = vld [vmem:[%s13776_s6 + $0x13c8] sm:$0xf]  ;;  %v13082_v53 = vld [vmem:[%s13776_s6 + $0x13d4] sm:$0xf0]  ;;  %v10759_v36 = vor.u32 %v13050_v52, %v10758_v51 }
 0x2ab   : > { %7487 = vmatpush.bf16.msrb.mxu0 %v9895_v27  ;;  %v10486_v58 = vld [vmem:[%s13776_s6 + $0x10a8] sm:$0xf]  ;;  %v12982_v59 = vld [vmem:[%s13776_s6 + $0x10b4] sm:$0xf0]  ;;  %v10887_v50 = vor.u32 %v13082_v53, %v10886_v41 }
 0x2ac   : > { %7500 = vmatpush.bf16.msrb.mxu1 %v10023_v34  ;;  %v10614_v60 = vld [vmem:[%s13776_s6 + $0x11a8] sm:$0xf]  ;;  %v13014_v61 = vld [vmem:[%s13776_s6 + $0x11b4] sm:$0xf0]  ;;  %v10487_v18 = vor.u32 %v12982_v59, %v10486_v58 }
 0x2ad   : > { %7513 = vmatpush.bf16.msrb.mxu2 %v10151_v7  ;;  %v10742_v1 = vld [vmem:[%s13776_s6 + $0x12a8] sm:$0xf]  ;;  %v13046_v55 = vld [vmem:[%s13776_s6 + $0x12b4] sm:$0xf0]  ;;  %v10615_v19 = vor.u32 %v13014_v61, %v10614_v60  ;;  %v7281_v7 = vpop.f32.mrf.mxu0 }
 0x2ae   : > { %7526 = vmatpush.bf16.msrb.mxu3 %v10279_v14  ;;  %7488 = vmatmul.bf16.vlgmr.msrb.gmra.mxu0 %v14090_v46  ;;  %v10870_v6 = vld [vmem:[%s13776_s6 + $0x13a8] sm:$0xf]  ;;  %v13078_v16 = vld [vmem:[%s13776_s6 + $0x13b4] sm:$0xf0]  ;;  %v10743_v57 = vor.u32 %v13046_v55, %v10742_v1  ;;  %v7282_v14 = vadd.f32 %v7281_v7, %v15213_v39 }
 0x2af   : > { %7532 = vmatpush.bf16.msra.mxu0 %v10519_v28  ;;  %7501 = vmatmul.bf16.vlgmr.msrb.gmra.mxu1 %v14094_v48  ;;  %v10470_v24 = vld [vmem:[%s13776_s6 + $0x1088] sm:$0xf]  ;;  %v12978_v25 = vld [vmem:[%s13776_s6 + $0x1094] sm:$0xf0]  ;;  %v10871_v62 = vor.u32 %v13078_v16, %v10870_v6 }
 0x2b0   : > { %7545 = vmatpush.bf16.msra.mxu1 %v10647_v40  ;;  %7514 = vmatmul.bf16.vlgmr.msrb.gmra.mxu2 %v14092_v47  ;;  %v10598_v27 = vld [vmem:[%s13776_s6 + $0x1188] sm:$0xf]  ;;  %v13010_v30 = vld [vmem:[%s13776_s6 + $0x1194] sm:$0xf0]  ;;  %v10471_v28 = vor.u32 %v12978_v25, %v10470_v24  ;;  %v7294_v40 = vpop.f32.mrf.mxu1 }
 0x2b1   : > { %7558 = vmatpush.bf16.msra.mxu2 %v10775_v42  ;;  %7527 = vmatmul.bf16.vlgmr.msrb.gmra.mxu3 %v14096_v49  ;;  %v10726_v33 = vld [vmem:[%s13776_s6 + $0x1288] sm:$0xf]  ;;  %v13042_v34 = vld [vmem:[%s13776_s6 + $0x1294] sm:$0xf0]  ;;  %v10599_v42 = vor.u32 %v13010_v30, %v10598_v27  ;;  %v7295_v51 = vadd.f32 %v7294_v40, %v7282_v14 }
 0x2b2   : > { %7571 = vmatpush.bf16.msra.mxu3 %v10903_v45  ;;  %v10854_v35 = vld [vmem:[%s13776_s6 + $0x1388] sm:$0xf]  ;;  %v13074_v37 = vld [vmem:[%s13776_s6 + $0x1394] sm:$0xf0]  ;;  %v10727_v23 = vor.u32 %v13042_v34, %v10726_v33 }
 0x2b3   : > { %7533 = vmatpush.bf16.msra.mxu0 %v10503_v54  ;;  %v10454_v43 = vld [vmem:[%s13776_s6 + $0x1068] sm:$0xf]  ;;  %v12974_v44 = vld [vmem:[%s13776_s6 + $0x1074] sm:$0xf0]  ;;  %v10855_v2 = vor.u32 %v13074_v37, %v10854_v35  ;;  %v7307_v1 = vpop.f32.mrf.mxu2 }
 0x2b4   : > { %7546 = vmatpush.bf16.msra.mxu1 %v10631_v56  ;;  %v10582_v45 = vld [vmem:[%s13776_s6 + $0x1168] sm:$0xf]  ;;  %v13006_v52 = vld [vmem:[%s13776_s6 + $0x1174] sm:$0xf0]  ;;  %v10455_v56 = vor.u32 %v12974_v44, %v10454_v43 }
 0x2b5   : > { %7559 = vmatpush.bf16.msra.mxu2 %v10759_v36  ;;  %v10710_v41 = vld [vmem:[%s13776_s6 + $0x1268] sm:$0xf]  ;;  %v13038_v39 = vld [vmem:[%s13776_s6 + $0x1274] sm:$0xf0]  ;;  %v10583_v36 = vor.u32 %v13006_v52, %v10582_v45  ;;  %v7283_v25 = vpop.f32.mrf.mxu0 }
 0x2b6   : > { %7572 = vmatpush.bf16.msra.mxu3 %v10887_v50  ;;  %v10838_v53 = vld [vmem:[%s13776_s6 + $0x1368] sm:$0xf]  ;;  %v13070_v54 = vld [vmem:[%s13776_s6 + $0x1374] sm:$0xf0]  ;;  %v10711_v58 = vor.u32 %v13038_v39, %v10710_v41 }
 0x2b7   : > { %7534 = vmatpush.bf16.msra.mxu0 %v10487_v18  ;;  %v10438_v59 = vld [vmem:[%s13776_s6 + $0x1048] sm:$0xf]  ;;  %v12970_v60 = vld [vmem:[%s13776_s6 + $0x1054] sm:$0xf0]  ;;  %v10839_v61 = vor.u32 %v13070_v54, %v10838_v53  ;;  %v7308_v18 = vadd.f32 %v7307_v1, %v7295_v51 }
 0x2b8   : > { %7547 = vmatpush.bf16.msra.mxu1 %v10615_v19  ;;  %v10566_v50 = vld [vmem:[%s13776_s6 + $0x1148] sm:$0xf]  ;;  %v13002_v55 = vld [vmem:[%s13776_s6 + $0x1154] sm:$0xf0]  ;;  %v7320_v19 = vpop.f32.mrf.mxu3  ;;  %v10439_v27 = vor.u32 %v12970_v60, %v10438_v59 }
 0x2b9   : > { %7560 = vmatpush.bf16.msra.mxu2 %v10743_v57  ;;  %v10694_v6 = vld [vmem:[%s13776_s6 + $0x1248] sm:$0xf]  ;;  %v13034_v16 = vld [vmem:[%s13776_s6 + $0x1254] sm:$0xf0]  ;;  %v7321_v30 = vadd.f32 %v7320_v19, %v7308_v18  ;;  %v10567_v33 = vor.u32 %v13002_v55, %v10566_v50 }
 0x2ba   : > { %7573 = vmatpush.bf16.msra.mxu3 %v10871_v62  ;;  %v10822_v57 = vld [vmem:[%s13776_s6 + $0x1348] sm:$0xf]  ;;  %v13066_v24 = vld [vmem:[%s13776_s6 + $0x1354] sm:$0xf0]  ;;  %v7296_v62 = vpop.f32.mrf.mxu1  ;;  %v10695_v34 = vor.u32 %v13034_v16, %v10694_v6 }
 0x2bb   : > { %7535 = vmatpush.bf16.msra.mxu0 %v10471_v28  ;;  %v10422_v7 = vld [vmem:[%s13776_s6 + $0x1028] sm:$0xf]  ;;  %v12966_v35 = vld [vmem:[%s13776_s6 + $0x1034] sm:$0xf0]  ;;  %v10823_v14 = vor.u32 %v13066_v24, %v10822_v57 }
 0x2bc   : > { %7548 = vmatpush.bf16.msra.mxu1 %v10599_v42  ;;  %v10550_v37 = vld [vmem:[%s13776_s6 + $0x1128] sm:$0xf]  ;;  %v12998_v28 = vld [vmem:[%s13776_s6 + $0x1134] sm:$0xf0]  ;;  %v10423_v45 = vor.u32 %v12966_v35, %v10422_v7 }
 0x2bd   : > { %7561 = vmatpush.bf16.msra.mxu2 %v10727_v23  ;;  %v10678_v40 = vld [vmem:[%s13776_s6 + $0x1228] sm:$0xf]  ;;  %v13030_v42 = vld [vmem:[%s13776_s6 + $0x1234] sm:$0xf0]  ;;  %v8164_v23 = vrot.slane %v7321_v30, 6  ;;  %v10551_v41 = vor.u32 %v12998_v28, %v10550_v37 }
 0x2be   : > { %7574 = vmatpush.bf16.msra.mxu3 %v10855_v2  ;;  %v10806_v43 = vld [vmem:[%s13776_s6 + $0x1328] sm:$0xf]  ;;  %v13062_v44 = vld [vmem:[%s13776_s6 + $0x1334] sm:$0xf0]  ;;  %v10679_v39 = vor.u32 %v13030_v42, %v10678_v40 }
 0x2bf   : > { %7536 = vmatpush.bf16.msra.mxu0 %v10455_v56  ;;  %v10406_v2 = vld [vmem:[%s13776_s6 + $0x1008] sm:$0xf]  ;;  %v12962_v51 = vld [vmem:[%s13776_s6 + $0x1014] sm:$0xf0]  ;;  %v15296_v52 = vsel %vm8167_vm0, %v14725_v17, %v8164_v23  ;;  %v7309_v17 = vpop.f32.mrf.mxu2 }
 0x2c0   : > { %7549 = vmatpush.bf16.msra.mxu1 %v10583_v36  ;;  %v10534_v53 = vld [vmem:[%s13776_s6 + $0x1108] sm:$0xf]  ;;  %v12994_v54 = vld [vmem:[%s13776_s6 + $0x1114] sm:$0xf0]  ;;  %v10807_v36 = vor.u32 %v13062_v44, %v10806_v43  ;;  %v7322_v55 = vpop.f32.mrf.mxu3  ;;  %v10407_v6 = vor.u32 %v12962_v51, %v10406_v2 }
 0x2c1   : > { %7562 = vmatpush.bf16.msra.mxu2 %v10711_v58  ;;  %v10662_v56 = vld [vmem:[%s13776_s6 + $0x1208] sm:$0xf]  ;;  %v13026_v58 = vld [vmem:[%s13776_s6 + $0x1214] sm:$0xf0]  ;;  %v10535_v57 = vor.u32 %v12994_v54, %v10534_v53 }
 0x2c2   : > { %7575 = vmatpush.bf16.msra.mxu3 %v10839_v61  ;;  %v10790_v59 = vld [vmem:[%s13776_s6 + $0x1308] sm:$0xf]  ;;  %v13058_v60 = vld [vmem:[%s13776_s6 + $0x1314] sm:$0xf0]  ;;  %v10663_v24 = vor.u32 %v13026_v58, %v10662_v56 }
 0x2c3   : > { %7537 = vmatpush.bf16.msra.mxu0 %v10439_v27  ;;  %v11030_v50 = vld [vmem:[%s13776_s6 + $0x14e8] sm:$0xf]  ;;  %v13118_v61 = vld [vmem:[%s13776_s6 + $0x14f4] sm:$0xf0]  ;;  %v10791_v62 = vor.u32 %v13058_v60, %v10790_v59 }
 0x2c4   : > { %7550 = vmatpush.bf16.msra.mxu1 %v10567_v33  ;;  %v11158_v1 = vld [vmem:[%s13776_s6 + $0x15e8] sm:$0xf]  ;;  %v13150_v16 = vld [vmem:[%s13776_s6 + $0x15f4] sm:$0xf0]  ;;  %v11031_v30 = vor.u32 %v13118_v61, %v11030_v50 }
 0x2c5   : > { %7563 = vmatpush.bf16.msra.mxu2 %v10695_v34  ;;  %v11286_v18 = vld [vmem:[%s13776_s6 + $0x16e8] sm:$0xf]  ;;  %v13182_v19 = vld [vmem:[%s13776_s6 + $0x16f4] sm:$0xf0]  ;;  %v11159_v33 = vor.u32 %v13150_v16, %v11158_v1 }
 0x2c6   : > { %7576 = vmatpush.bf16.msra.mxu3 %v10823_v14  ;;  %v11414_v25 = vld [vmem:[%s13776_s6 + $0x17e8] sm:$0xf]  ;;  %v13214_v27 = vld [vmem:[%s13776_s6 + $0x17f4] sm:$0xf0]  ;;  %v11287_v34 = vor.u32 %v13182_v19, %v11286_v18 }
 0x2c7   : > { %7538 = vmatpush.bf16.msra.mxu0 %v10423_v45  ;;  %v11014_v7 = vld [vmem:[%s13776_s6 + $0x14c8] sm:$0xf]  ;;  %v13114_v35 = vld [vmem:[%s13776_s6 + $0x14d4] sm:$0xf0]  ;;  %v11415_v14 = vor.u32 %v13214_v27, %v11414_v25 }
 0x2c8   : > { %7551 = vmatpush.bf16.msra.mxu1 %v10551_v41  ;;  %v11142_v37 = vld [vmem:[%s13776_s6 + $0x15c8] sm:$0xf]  ;;  %v13146_v28 = vld [vmem:[%s13776_s6 + $0x15d4] sm:$0xf0]  ;;  %v11015_v44 = vor.u32 %v13114_v35, %v11014_v7 }
 0x2c9   : > { %7564 = vmatpush.bf16.msra.mxu2 %v10679_v39  ;;  %v11270_v40 = vld [vmem:[%s13776_s6 + $0x16c8] sm:$0xf]  ;;  %v13178_v42 = vld [vmem:[%s13776_s6 + $0x16d4] sm:$0xf0]  ;;  %v11143_v45 = vor.u32 %v13146_v28, %v11142_v37 }
 0x2ca   : > { %7577 = vmatpush.bf16.msra.mxu3 %v10807_v36  ;;  %v11398_v23 = vld [vmem:[%s13776_s6 + $0x17c8] sm:$0xf]  ;;  %v13210_v43 = vld [vmem:[%s13776_s6 + $0x17d4] sm:$0xf0]  ;;  %v11271_v2 = vor.u32 %v13178_v42, %v11270_v40 }
 0x2cb   : > { %7539 = vmatpush.bf16.msra.mxu0 %v10407_v6  ;;  %v10998_v51 = vld [vmem:[%s13776_s6 + $0x14a8] sm:$0xf]  ;;  %v13110_v41 = vld [vmem:[%s13776_s6 + $0x14b4] sm:$0xf0]  ;;  %v11399_v53 = vor.u32 %v13210_v43, %v11398_v23  ;;  %v7333_v27 = vpop.f32.mrf.mxu0 }
 0x2cc   : > { %7552 = vmatpush.bf16.msra.mxu1 %v10535_v57  ;;  %v11126_v39 = vld [vmem:[%s13776_s6 + $0x15a8] sm:$0xf]  ;;  %v13142_v54 = vld [vmem:[%s13776_s6 + $0x15b4] sm:$0xf0]  ;;  %v10999_v60 = vor.u32 %v13110_v41, %v10998_v51  ;;  %v7346_v35 = vpop.f32.mrf.mxu1 }
 0x2cd   : > { %7565 = vmatpush.bf16.msra.mxu2 %v10663_v24  ;;  %v11254_v56 = vld [vmem:[%s13776_s6 + $0x16a8] sm:$0xf]  ;;  %v13174_v36 = vld [vmem:[%s13776_s6 + $0x16b4] sm:$0xf0]  ;;  %v11127_v17 = vor.u32 %v13142_v54, %v11126_v39  ;;  %v7347_v42 = vadd.f32 %v7346_v35, %v7333_v27 }
 0x2ce   : > { %7578 = vmatpush.bf16.msra.mxu3 %v10791_v62  ;;  %7540 = vmatmul.bf16.vlgmr.msra.gmra.mxu0 %v14179_v5  ;;  %v11382_v58 = vld [vmem:[%s13776_s6 + $0x17a8] sm:$0xf]  ;;  %v13206_v59 = vld [vmem:[%s13776_s6 + $0x17b4] sm:$0xf0]  ;;  %v11255_v50 = vor.u32 %v13174_v36, %v11254_v56 }
 0x2cf   : > { %7584 = vmatpush.bf16.msrb.mxu0 %v11031_v30  ;;  %7553 = vmatmul.bf16.vlgmr.msra.gmra.mxu1 %v14185_v10  ;;  %v10982_v61 = vld [vmem:[%s13776_s6 + $0x1488] sm:$0xf]  ;;  %v13106_v1 = vld [vmem:[%s13776_s6 + $0x1494] sm:$0xf0]  ;;  %v11383_v6 = vor.u32 %v13206_v59, %v11382_v58 }
 0x2d0   : > { %7597 = vmatpush.bf16.msrb.mxu1 %v11159_v33  ;;  %7566 = vmatmul.bf16.vlgmr.msra.gmra.mxu2 %v14183_v9  ;;  %v11110_v55 = vld [vmem:[%s13776_s6 + $0x1588] sm:$0xf]  ;;  %v13138_v16 = vld [vmem:[%s13776_s6 + $0x1594] sm:$0xf0]  ;;  %v10983_v25 = vor.u32 %v13106_v1, %v10982_v61 }
 0x2d1   : > { %7610 = vmatpush.bf16.msrb.mxu2 %v11287_v34  ;;  %7579 = vmatmul.bf16.vlgmr.msra.gmra.mxu3 %v14187_v13  ;;  %v11238_v18 = vld [vmem:[%s13776_s6 + $0x1688] sm:$0xf]  ;;  %v13170_v19 = vld [vmem:[%s13776_s6 + $0x1694] sm:$0xf0]  ;;  %v11111_v62 = vor.u32 %v13138_v16, %v11110_v55 }
 0x2d2   : > { %7623 = vmatpush.bf16.msrb.mxu3 %v11415_v14  ;;  %v11366_v57 = vld [vmem:[%s13776_s6 + $0x1788] sm:$0xf]  ;;  %v13202_v24 = vld [vmem:[%s13776_s6 + $0x1794] sm:$0xf0]  ;;  %v11239_v30 = vor.u32 %v13170_v19, %v11238_v18 }
 0x2d3   : > { %7585 = vmatpush.bf16.msrb.mxu0 %v11015_v44  ;;  %v10966_v33 = vld [vmem:[%s13776_s6 + $0x1468] sm:$0xf]  ;;  %v13102_v34 = vld [vmem:[%s13776_s6 + $0x1474] sm:$0xf0]  ;;  %v11367_v37 = vor.u32 %v13202_v24, %v11366_v57  ;;  %v7335_v55 = vpop.f32.mrf.mxu0 }
 0x2d4   : > { %7598 = vmatpush.bf16.msrb.mxu1 %v11143_v45  ;;  %v11094_v7 = vld [vmem:[%s13776_s6 + $0x1568] sm:$0xf]  ;;  %v13134_v14 = vld [vmem:[%s13776_s6 + $0x1574] sm:$0xf0]  ;;  %v10967_v44 = vor.u32 %v13102_v34, %v10966_v33  ;;  %v7348_v24 = vpop.f32.mrf.mxu1 }
 0x2d5   : > { %7611 = vmatpush.bf16.msrb.mxu2 %v11271_v2  ;;  %v11222_v28 = vld [vmem:[%s13776_s6 + $0x1668] sm:$0xf]  ;;  %v13166_v40 = vld [vmem:[%s13776_s6 + $0x1674] sm:$0xf0]  ;;  %v11095_v45 = vor.u32 %v13134_v14, %v11094_v7 }
 0x2d6   : > { %7624 = vmatpush.bf16.msrb.mxu3 %v11399_v53  ;;  %v11350_v23 = vld [vmem:[%s13776_s6 + $0x1768] sm:$0xf]  ;;  %v13198_v43 = vld [vmem:[%s13776_s6 + $0x1774] sm:$0xf0]  ;;  %v11223_v2 = vor.u32 %v13166_v40, %v11222_v28  ;;  %v7359_v53 = vpop.f32.mrf.mxu2 }
 0x2d7   : > { %7586 = vmatpush.bf16.msrb.mxu0 %v10999_v60  ;;  %v10950_v51 = vld [vmem:[%s13776_s6 + $0x1448] sm:$0xf]  ;;  %v13098_v41 = vld [vmem:[%s13776_s6 + $0x1454] sm:$0xf0]  ;;  %v11351_v54 = vor.u32 %v13198_v43, %v11350_v23  ;;  %v7360_v59 = vadd.f32 %v7359_v53, %v7347_v42  ;;  %v7372_v60 = vpop.f32.mrf.mxu3 }
 0x2d8   : > { %7599 = vmatpush.bf16.msrb.mxu1 %v11127_v17  ;;  %v11078_v39 = vld [vmem:[%s13776_s6 + $0x1548] sm:$0xf]  ;;  %v13130_v56 = vld [vmem:[%s13776_s6 + $0x1554] sm:$0xf0]  ;;  %v10951_v61 = vor.u32 %v13098_v41, %v10950_v51 }
 0x2d9   : > { %7612 = vmatpush.bf16.msrb.mxu2 %v11255_v50  ;;  %v11206_v36 = vld [vmem:[%s13776_s6 + $0x1648] sm:$0xf]  ;;  %v13162_v58 = vld [vmem:[%s13776_s6 + $0x1654] sm:$0xf0]  ;;  %v15356_v1 = vadd.f32 %v7372_v60, %v7360_v59 }
 0x2da   : > { %7625 = vmatpush.bf16.msrb.mxu3 %v11383_v6  ;;  %v11334_v17 = vld [vmem:[%s13776_s6 + $0x1748] sm:$0xf]  ;;  %v13194_v50 = vld [vmem:[%s13776_s6 + $0x1754] sm:$0xf0]  ;;  %v11079_v6 = vor.u32 %v13130_v56, %v11078_v39  ;;  %v11207_v16 = vor.u32 %v13162_v58, %v11206_v36 }
 0x2db   : > { %7587 = vmatpush.bf16.msrb.mxu0 %v10983_v25  ;;  %v10934_v18 = vld [vmem:[%s13776_s6 + $0x1428] sm:$0xf]  ;;  %v13094_v19 = vld [vmem:[%s13776_s6 + $0x1434] sm:$0xf0]  ;;  %v11335_v25 = vor.u32 %v13194_v50, %v11334_v17 }
 0x2dc   : > { %7600 = vmatpush.bf16.msrb.mxu1 %v11111_v62  ;;  %v11062_v57 = vld [vmem:[%s13776_s6 + $0x1528] sm:$0xf]  ;;  %v13126_v27 = vld [vmem:[%s13776_s6 + $0x1534] sm:$0xf0]  ;;  %v10935_v7 = vor.u32 %v13094_v19, %v10934_v18 }
 0x2dd   : > { %7613 = vmatpush.bf16.msrb.mxu2 %v11239_v30  ;;  %v11190_v62 = vld [vmem:[%s13776_s6 + $0x1628] sm:$0xf]  ;;  %v13158_v30 = vld [vmem:[%s13776_s6 + $0x1634] sm:$0xf0]  ;;  %v11063_v14 = vor.u32 %v13126_v27, %v11062_v57 }
 0x2de   : > { %7626 = vmatpush.bf16.msrb.mxu3 %v11367_v37  ;;  %v11318_v33 = vld [vmem:[%s13776_s6 + $0x1728] sm:$0xf]  ;;  %v13190_v34 = vld [vmem:[%s13776_s6 + $0x1734] sm:$0xf0]  ;;  %v11191_v28 = vor.u32 %v13158_v30, %v11190_v62  ;;  %v7361_v43 = vpop.f32.mrf.mxu2 }
 0x2df   : > { %7588 = vmatpush.bf16.msrb.mxu0 %v10967_v44  ;;  %v10918_v35 = vld [vmem:[%s13776_s6 + $0x1408] sm:$0xf]  ;;  %v13090_v37 = vld [vmem:[%s13776_s6 + $0x1414] sm:$0xf0]  ;;  %v11319_v44 = vor.u32 %v13190_v34, %v11318_v33  ;;  %v7374_v41 = vpop.f32.mrf.mxu3 }
 0x2e0   : > { %7601 = vmatpush.bf16.msrb.mxu1 %v11095_v45  ;;  %v11046_v40 = vld [vmem:[%s13776_s6 + $0x1508] sm:$0xf]  ;;  %v13122_v42 = vld [vmem:[%s13776_s6 + $0x1514] sm:$0xf0]  ;;  %v10919_v56 = vor.u32 %v13090_v37, %v10918_v35 }
 0x2e1   : > { %7614 = vmatpush.bf16.msrb.mxu2 %v11223_v2  ;;  %v11174_v23 = vld [vmem:[%s13776_s6 + $0x1608] sm:$0xf]  ;;  %v13154_v45 = vld [vmem:[%s13776_s6 + $0x1614] sm:$0xf0]  ;;  %v11047_v60 = vor.u32 %v13122_v42, %v11046_v40 }
 0x2e2   : > { %7627 = vmatpush.bf16.msrb.mxu3 %v11351_v54  ;;  %v11302_v2 = vld [vmem:[%s13776_s6 + $0x1708] sm:$0xf]  ;;  %v13186_v51 = vld [vmem:[%s13776_s6 + $0x1714] sm:$0xf0]  ;;  %v11175_v17 = vor.u32 %v13154_v45, %v11174_v23 }
 0x2e3   : > { %7589 = vmatpush.bf16.msrb.mxu0 %v10951_v61  ;;  %v11542_v39 = vld [vmem:[%s13776_s6 + $0x18e8] sm:$0xf]  ;;  %v13246_v53 = vld [vmem:[%s13776_s6 + $0x18f4] sm:$0xf0]  ;;  %v11303_v55 = vor.u32 %v13186_v51, %v11302_v2 }
 0x2e4   : > { %7602 = vmatpush.bf16.msrb.mxu1 %v11079_v6  ;;  %v11670_v54 = vld [vmem:[%s13776_s6 + $0x19e8] sm:$0xf]  ;;  %v13278_v36 = vld [vmem:[%s13776_s6 + $0x19f4] sm:$0xf0]  ;;  %v11543_v6 = vor.u32 %v13246_v53, %v11542_v39 }
 0x2e5   : > { %7615 = vmatpush.bf16.msrb.mxu2 %v11207_v16  ;;  %v11798_v58 = vld [vmem:[%s13776_s6 + $0x1ae8] sm:$0xf]  ;;  %v13310_v59 = vld [vmem:[%s13776_s6 + $0x1af4] sm:$0xf0]  ;;  %v11671_v16 = vor.u32 %v13278_v36, %v11670_v54 }
 0x2e6   : > { %7628 = vmatpush.bf16.msrb.mxu3 %v11335_v25  ;;  %v11926_v50 = vld [vmem:[%s13776_s6 + $0x1be8] sm:$0xf]  ;;  %v13342_v61 = vld [vmem:[%s13776_s6 + $0x1bf4] sm:$0xf0]  ;;  %v11799_v18 = vor.u32 %v13310_v59, %v11798_v58 }
 0x2e7   : > { %7590 = vmatpush.bf16.msrb.mxu0 %v10935_v7  ;;  %v11526_v19 = vld [vmem:[%s13776_s6 + $0x18c8] sm:$0xf]  ;;  %v13242_v57 = vld [vmem:[%s13776_s6 + $0x18d4] sm:$0xf0]  ;;  %v11927_v25 = vor.u32 %v13342_v61, %v11926_v50 }
 0x2e8   : > { %7603 = vmatpush.bf16.msrb.mxu1 %v11063_v14  ;;  %v11654_v24 = vld [vmem:[%s13776_s6 + $0x19c8] sm:$0xf]  ;;  %v13274_v27 = vld [vmem:[%s13776_s6 + $0x19d4] sm:$0xf0]  ;;  %v11527_v7 = vor.u32 %v13242_v57, %v11526_v19 }
 0x2e9   : > { %7616 = vmatpush.bf16.msrb.mxu2 %v11191_v28  ;;  %v11782_v62 = vld [vmem:[%s13776_s6 + $0x1ac8] sm:$0xf]  ;;  %v13306_v30 = vld [vmem:[%s13776_s6 + $0x1ad4] sm:$0xf0]  ;;  %v11655_v35 = vor.u32 %v13274_v27, %v11654_v24 }
 0x2ea   : > { %7629 = vmatpush.bf16.msrb.mxu3 %v11319_v44  ;;  %v11910_v33 = vld [vmem:[%s13776_s6 + $0x1bc8] sm:$0xf]  ;;  %v13338_v34 = vld [vmem:[%s13776_s6 + $0x1bd4] sm:$0xf0]  ;;  %v11783_v37 = vor.u32 %v13306_v30, %v11782_v62 }
 0x2eb   : > { %7591 = vmatpush.bf16.msrb.mxu0 %v10919_v56  ;;  %v11510_v14 = vld [vmem:[%s13776_s6 + $0x18a8] sm:$0xf]  ;;  %v13238_v28 = vld [vmem:[%s13776_s6 + $0x18b4] sm:$0xf0]  ;;  %v11911_v42 = vor.u32 %v13338_v34, %v11910_v33 }
 0x2ec   : > { %7604 = vmatpush.bf16.msrb.mxu1 %v11047_v60  ;;  %v11638_v40 = vld [vmem:[%s13776_s6 + $0x19a8] sm:$0xf]  ;;  %v13270_v23 = vld [vmem:[%s13776_s6 + $0x19b4] sm:$0xf0]  ;;  %v11511_v51 = vor.u32 %v13238_v28, %v11510_v14 }
 0x2ed   : > { %7617 = vmatpush.bf16.msrb.mxu2 %v11175_v17  ;;  %v11766_v43 = vld [vmem:[%s13776_s6 + $0x1aa8] sm:$0xf]  ;;  %v13302_v44 = vld [vmem:[%s13776_s6 + $0x1ab4] sm:$0xf0]  ;;  %v11639_v41 = vor.u32 %v13270_v23, %v11638_v40 }
 0x2ee   : > { %7630 = vmatpush.bf16.msrb.mxu3 %v11303_v55  ;;  %7592 = vmatmul.bf16.vlgmr.msrb.gmra.mxu0 %v14245_v63  ;;  %v11894_v45 = vld [vmem:[%s13776_s6 + $0x1ba8] sm:$0xf]  ;;  %v13334_v2 = vld [vmem:[%s13776_s6 + $0x1bb4] sm:$0xf0]  ;;  %v11767_v39 = vor.u32 %v13302_v44, %v11766_v43  ;;  %v7385_v55 = vpop.f32.mrf.mxu0 }
 0x2ef   : > { %7636 = vmatpush.bf16.msra.mxu0 %v11543_v6  ;;  %7605 = vmatmul.bf16.vlgmr.msrb.gmra.mxu1 %v14249_v3  ;;  %v11494_v53 = vld [vmem:[%s13776_s6 + $0x1888] sm:$0xf]  ;;  %v13234_v54 = vld [vmem:[%s13776_s6 + $0x1894] sm:$0xf0]  ;;  %v11895_v36 = vor.u32 %v13334_v2, %v11894_v45  ;;  %v7386_v24 = vadd.f32 %v7385_v55, %v15356_v1 }
 0x2f0   : > { %7649 = vmatpush.bf16.msra.mxu1 %v11671_v16  ;;  %7618 = vmatmul.bf16.vlgmr.msrb.gmra.mxu2 %v14247_v0  ;;  %v11622_v56 = vld [vmem:[%s13776_s6 + $0x1988] sm:$0xf]  ;;  %v13266_v58 = vld [vmem:[%s13776_s6 + $0x1994] sm:$0xf0]  ;;  %v11495_v61 = vor.u32 %v13234_v54, %v11494_v53 }
 0x2f1   : > { %7662 = vmatpush.bf16.msra.mxu2 %v11799_v18  ;;  %7631 = vmatmul.bf16.vlgmr.msrb.gmra.mxu3 %v14251_v4  ;;  %v11750_v59 = vld [vmem:[%s13776_s6 + $0x1a88] sm:$0xf]  ;;  %v13298_v60 = vld [vmem:[%s13776_s6 + $0x1a94] sm:$0xf0]  ;;  %v11623_v6 = vor.u32 %v13266_v58, %v11622_v56 }
 0x2f2   : > { %7675 = vmatpush.bf16.msra.mxu3 %v11927_v25  ;;  %v11878_v17 = vld [vmem:[%s13776_s6 + $0x1b88] sm:$0xf]  ;;  %v13330_v50 = vld [vmem:[%s13776_s6 + $0x1b94] sm:$0xf0]  ;;  %v11751_v16 = vor.u32 %v13298_v60, %v11750_v59  ;;  %v7398_v25 = vpop.f32.mrf.mxu1 }
 0x2f3   : > { %7637 = vmatpush.bf16.msra.mxu0 %v11527_v7  ;;  %v11478_v18 = vld [vmem:[%s13776_s6 + $0x1868] sm:$0xf]  ;;  %v13230_v19 = vld [vmem:[%s13776_s6 + $0x1874] sm:$0xf0]  ;;  %v11879_v27 = vor.u32 %v13330_v50, %v11878_v17  ;;  %v7411_v23 = vpop.f32.mrf.mxu2 }
 0x2f4   : > { %7650 = vmatpush.bf16.msra.mxu1 %v11655_v35  ;;  %v11606_v57 = vld [vmem:[%s13776_s6 + $0x1968] sm:$0xf]  ;;  %v13262_v62 = vld [vmem:[%s13776_s6 + $0x1974] sm:$0xf0]  ;;  %v7399_v35 = vadd.f32 %v7398_v25, %v7386_v24 }
 0x2f5   : > { %7663 = vmatpush.bf16.msra.mxu2 %v11783_v37  ;;  %v11734_v30 = vld [vmem:[%s13776_s6 + $0x1a68] sm:$0xf]  ;;  %v13294_v33 = vld [vmem:[%s13776_s6 + $0x1a74] sm:$0xf0]  ;;  %v11479_v37 = vor.u32 %v13230_v19, %v11478_v18  ;;  %v11607_v1 = vor.u32 %v13262_v62, %v11606_v57 }
 0x2f6   : > { %7676 = vmatpush.bf16.msra.mxu3 %v11911_v42  ;;  %v11862_v34 = vld [vmem:[%s13776_s6 + $0x1b68] sm:$0xf]  ;;  %v13326_v7 = vld [vmem:[%s13776_s6 + $0x1b74] sm:$0xf0]  ;;  %v11735_v14 = vor.u32 %v13294_v33, %v11734_v30 }
 0x2f7   : > { %7638 = vmatpush.bf16.msra.mxu0 %v11511_v51  ;;  %v11462_v28 = vld [vmem:[%s13776_s6 + $0x1848] sm:$0xf]  ;;  %v13226_v40 = vld [vmem:[%s13776_s6 + $0x1854] sm:$0xf0]  ;;  %v11863_v43 = vor.u32 %v13326_v7, %v11862_v34  ;;  %v7412_v51 = vadd.f32 %v7411_v23, %v7399_v35 }
 0x2f8   : > { %7651 = vmatpush.bf16.msra.mxu1 %v11639_v41  ;;  %v11590_v42 = vld [vmem:[%s13776_s6 + $0x1948] sm:$0xf]  ;;  %v13258_v44 = vld [vmem:[%s13776_s6 + $0x1954] sm:$0xf0]  ;;  %v7424_v41 = vpop.f32.mrf.mxu3  ;;  %v11463_v54 = vor.u32 %v13226_v40, %v11462_v28 }
 0x2f9   : > { %7664 = vmatpush.bf16.msra.mxu2 %v11767_v39  ;;  %v11718_v45 = vld [vmem:[%s13776_s6 + $0x1a48] sm:$0xf]  ;;  %v13290_v2 = vld [vmem:[%s13776_s6 + $0x1a54] sm:$0xf0]  ;;  %v15427_v56 = vadd.f32 %v7424_v41, %v7412_v51  ;;  %v11591_v58 = vor.u32 %v13258_v44, %v11590_v42 }
 0x2fa   : > { %7677 = vmatpush.bf16.msra.mxu3 %v11895_v36  ;;  %v11846_v39 = vld [vmem:[%s13776_s6 + $0x1b48] sm:$0xf]  ;;  %v13322_v53 = vld [vmem:[%s13776_s6 + $0x1b54] sm:$0xf0]  ;;  %v7387_v36 = vpop.f32.mrf.mxu0  ;;  %v11719_v59 = vor.u32 %v13290_v2, %v11718_v45 }
 0x2fb   : > { %7639 = vmatpush.bf16.msra.mxu0 %v11495_v61  ;;  %v11446_v60 = vld [vmem:[%s13776_s6 + $0x1828] sm:$0xf]  ;;  %v13222_v17 = vld [vmem:[%s13776_s6 + $0x1834] sm:$0xf0]  ;;  %v7400_v61 = vpop.f32.mrf.mxu1  ;;  %v11847_v55 = vor.u32 %v13322_v53, %v11846_v39  ;;  %v7413_v35 = vpop.f32.mrf.mxu2 }
 0x2fc   : > { %7652 = vmatpush.bf16.msra.mxu1 %v11623_v6  ;;  %v11574_v50 = vld [vmem:[%s13776_s6 + $0x1928] sm:$0xf]  ;;  %v13254_v6 = vld [vmem:[%s13776_s6 + $0x1934] sm:$0xf0]  ;;  %v11447_v24 = vor.u32 %v13222_v17, %v11446_v60 }
 0x2fd   : > { %7665 = vmatpush.bf16.msra.mxu2 %v11751_v16  ;;  %v11702_v16 = vld [vmem:[%s13776_s6 + $0x1a28] sm:$0xf]  ;;  %v13286_v18 = vld [vmem:[%s13776_s6 + $0x1a34] sm:$0xf0]  ;;  %v11575_v62 = vor.u32 %v13254_v6, %v11574_v50 }
 0x2fe   : > { %7678 = vmatpush.bf16.msra.mxu3 %v11879_v27  ;;  %v11830_v19 = vld [vmem:[%s13776_s6 + $0x1b28] sm:$0xf]  ;;  %v13318_v57 = vld [vmem:[%s13776_s6 + $0x1b34] sm:$0xf0]  ;;  %v11703_v30 = vor.u32 %v13286_v18, %v11702_v16 }
 0x2ff   : > { %7640 = vmatpush.bf16.msra.mxu0 %v11479_v37  ;;  %v11430_v25 = vld [vmem:[%s13776_s6 + $0x1808] sm:$0xf]  ;;  %v13218_v27 = vld [vmem:[%s13776_s6 + $0x1814] sm:$0xf0]  ;;  %v11831_v37 = vor.u32 %v13318_v57, %v11830_v19 }
 0x300   : > { %7653 = vmatpush.bf16.msra.mxu1 %v11607_v1  ;;  %v11558_v33 = vld [vmem:[%s13776_s6 + $0x1908] sm:$0xf]  ;;  %v13250_v34 = vld [vmem:[%s13776_s6 + $0x1914] sm:$0xf0]  ;;  %v7426_v40 = vpop.f32.mrf.mxu3  ;;  %v11431_v44 = vor.u32 %v13218_v27, %v11430_v25 }
 0x301   : > { %7666 = vmatpush.bf16.msra.mxu2 %v11735_v14  ;;  %v11686_v7 = vld [vmem:[%s13776_s6 + $0x1a08] sm:$0xf]  ;;  %v13282_v1 = vld [vmem:[%s13776_s6 + $0x1a14] sm:$0xf0]  ;;  %v11559_v41 = vor.u32 %v13250_v34, %v11558_v33 }
 0x302   : > { %7679 = vmatpush.bf16.msra.mxu3 %v11863_v43  ;;  %v11814_v14 = vld [vmem:[%s13776_s6 + $0x1b08] sm:$0xf]  ;;  %v13314_v28 = vld [vmem:[%s13776_s6 + $0x1b14] sm:$0xf0]  ;;  %v11687_v39 = vor.u32 %v13282_v1, %v11686_v7 }
 0x303   : > { %7641 = vmatpush.bf16.msra.mxu0 %v11463_v54  ;;  %v12054_v42 = vld [vmem:[%s13776_s6 + $0x1ce8] sm:$0xf]  ;;  %v13374_v23 = vld [vmem:[%s13776_s6 + $0x1cf4] sm:$0xf0]  ;;  %v11815_v36 = vor.u32 %v13314_v28, %v11814_v14 }
 0x304   : > { %7654 = vmatpush.bf16.msra.mxu1 %v11591_v58  ;;  %v12182_v43 = vld [vmem:[%s13776_s6 + $0x1de8] sm:$0xf]  ;;  %v13406_v45 = vld [vmem:[%s13776_s6 + $0x1df4] sm:$0xf0]  ;;  %v12055_v58 = vor.u32 %v13374_v23, %v12054_v42 }
 0x305   : > { %7667 = vmatpush.bf16.msra.mxu2 %v11719_v59  ;;  %v12310_v2 = vld [vmem:[%s13776_s6 + $0x1ee8] sm:$0xf]  ;;  %v13438_v51 = vld [vmem:[%s13776_s6 + $0x1ef4] sm:$0xf0]  ;;  %v12183_v59 = vor.u32 %v13406_v45, %v12182_v43 }
 0x306   : > { %7680 = vmatpush.bf16.msra.mxu3 %v11847_v55  ;;  %v12438_v53 = vld [vmem:[%s13776_s6 + $0x1fe8] sm:$0xf]  ;;  %v13470_v54 = vld [vmem:[%s13776_s6 + $0x1ff4] sm:$0xf0]  ;;  %v12311_v60 = vor.u32 %v13438_v51, %v12310_v2 }
 0x307   : > { %7642 = vmatpush.bf16.msra.mxu0 %v11447_v24  ;;  %v12038_v17 = vld [vmem:[%s13776_s6 + $0x1cc8] sm:$0xf]  ;;  %v13370_v50 = vld [vmem:[%s13776_s6 + $0x1cd4] sm:$0xf0]  ;;  %v12439_v55 = vor.u32 %v13470_v54, %v12438_v53 }
 0x308   : > { %7655 = vmatpush.bf16.msra.mxu1 %v11575_v62  ;;  %v12166_v61 = vld [vmem:[%s13776_s6 + $0x1dc8] sm:$0xf]  ;;  %v13402_v6 = vld [vmem:[%s13776_s6 + $0x1dd4] sm:$0xf0]  ;;  %v12039_v24 = vor.u32 %v13370_v50, %v12038_v17 }
 0x309   : > { %7668 = vmatpush.bf16.msra.mxu2 %v11703_v30  ;;  %v12294_v16 = vld [vmem:[%s13776_s6 + $0x1ec8] sm:$0xf]  ;;  %v13434_v18 = vld [vmem:[%s13776_s6 + $0x1ed4] sm:$0xf0]  ;;  %v12167_v25 = vor.u32 %v13402_v6, %v12166_v61 }
 0x30a   : > { %7681 = vmatpush.bf16.msra.mxu3 %v11831_v37  ;;  %v12422_v19 = vld [vmem:[%s13776_s6 + $0x1fc8] sm:$0xf]  ;;  %v13466_v57 = vld [vmem:[%s13776_s6 + $0x1fd4] sm:$0xf0]  ;;  %v12295_v27 = vor.u32 %v13434_v18, %v12294_v16 }
 0x30b   : > { %7643 = vmatpush.bf16.msra.mxu0 %v11431_v44  ;;  %v12022_v62 = vld [vmem:[%s13776_s6 + $0x1ca8] sm:$0xf]  ;;  %v13366_v30 = vld [vmem:[%s13776_s6 + $0x1cb4] sm:$0xf0]  ;;  %v12423_v7 = vor.u32 %v13466_v57, %v12422_v19 }
 0x30c   : > { %7656 = vmatpush.bf16.msra.mxu1 %v11559_v41  ;;  %v12150_v33 = vld [vmem:[%s13776_s6 + $0x1da8] sm:$0xf]  ;;  %v13542_v34 = vld [vmem:[#allocation1] sm:$0xff]  ;;  %v12023_v43 = vor.u32 %v13366_v30, %v12022_v62  ;;  %v7450_v61 = vpop.f32.mrf.mxu1 }
 0x30d   : > { %7669 = vmatpush.bf16.msra.mxu2 %v11687_v39  ;;  %v13398_v35 = vld [vmem:[%s13776_s6 + $0x1db4] sm:$0xf0]  ;;  %v12278_v37 = vld [vmem:[%s13776_s6 + $0x1ea8] sm:$0xf] }
 0x30e   : > { %7682 = vmatpush.bf16.msra.mxu3 %v11815_v36  ;;  %7644 = vmatmul.bf16.vlgmr.msra.gmra.mxu0 %v13542_v34  ;;  %v13430_v1 = vld [vmem:[%s13776_s6 + $0x1eb4] sm:$0xf0]  ;;  %v13543_v14 = vld [vmem:[#allocation1 + $0x12] sm:$0xff]  ;;  %v13544_v28 = vld [vmem:[#allocation1 + $0x9] sm:$0xff]  ;;  %v12151_v44 = vor.u32 %v13398_v35, %v12150_v33 }
 0x30f   : > { %7688 = vmatpush.bf16.msrb.mxu0 %v12055_v58  ;;  %7657 = vmatmul.bf16.vlgmr.msra.gmra.mxu1 %v13544_v28  ;;  %v12406_v40 = vld [vmem:[%s13776_s6 + $0x1fa8] sm:$0xf]  ;;  %v13462_v42 = vld [vmem:[%s13776_s6 + $0x1fb4] sm:$0xf0]  ;;  %v12279_v45 = vor.u32 %v13430_v1, %v12278_v37  ;;  %v7437_v58 = vpop.f32.mrf.mxu0 }
 0x310   : > { %7701 = vmatpush.bf16.msrb.mxu1 %v12183_v59  ;;  %7670 = vmatmul.bf16.vlgmr.msra.gmra.mxu2 %v13543_v14  ;;  %v13545_v23 = vld [vmem:[#allocation1 + $0x1b] sm:$0xff]  ;;  %v12006_v2 = vld [vmem:[%s13776_s6 + $0x1c88] sm:$0xf]  ;;  %v12407_v39 = vor.u32 %v13462_v42, %v12406_v40  ;;  %v7438_v17 = vadd.f32 %v7437_v58, %v15427_v56 }
 0x311   : > { %7714 = vmatpush.bf16.msrb.mxu2 %v12311_v60  ;;  %7683 = vmatmul.bf16.vlgmr.msra.gmra.mxu3 %v13545_v23  ;;  %v13362_v51 = vld [vmem:[%s13776_s6 + $0x1c94] sm:$0xf0]  ;;  %v12134_v41 = vld [vmem:[%s13776_s6 + $0x1d88] sm:$0xf] }
 0x312   : > { %7727 = vmatpush.bf16.msrb.mxu3 %v12439_v55  ;;  %v13394_v53 = vld [vmem:[%s13776_s6 + $0x1d94] sm:$0xf0]  ;;  %v12262_v54 = vld [vmem:[%s13776_s6 + $0x1e88] sm:$0xf]  ;;  %v12007_v50 = vor.u32 %v13362_v51, %v12006_v2 }
 0x313   : > { %7689 = vmatpush.bf16.msrb.mxu0 %v12039_v24  ;;  %v13426_v36 = vld [vmem:[%s13776_s6 + $0x1e94] sm:$0xf0]  ;;  %v12390_v59 = vld [vmem:[%s13776_s6 + $0x1f88] sm:$0xf]  ;;  %v12135_v55 = vor.u32 %v13394_v53, %v12134_v41  ;;  %v7451_v24 = vadd.f32 %v7450_v61, %v7438_v17  ;;  %v7463_v28 = vpop.f32.mrf.mxu2 }
 0x314   : > { %7702 = vmatpush.bf16.msrb.mxu1 %v12167_v25  ;;  %v13458_v60 = vld [vmem:[%s13776_s6 + $0x1f94] sm:$0xf0]  ;;  %v12263_v6 = vor.u32 %v13426_v36, %v12262_v54  ;;  %v11990_v16 = vld [vmem:[%s13776_s6 + $0x1c68] sm:$0xf] }
 0x315   : > { %7715 = vmatpush.bf16.msrb.mxu2 %v12295_v27  ;;  %v13358_v18 = vld [vmem:[%s13776_s6 + $0x1c74] sm:$0xf0]  ;;  %v12118_v19 = vld [vmem:[%s13776_s6 + $0x1d68] sm:$0xf]  ;;  %v12391_v57 = vor.u32 %v13458_v60, %v12390_v59 }
 0x316   : > { %7728 = vmatpush.bf16.msrb.mxu3 %v12423_v7  ;;  %v13390_v25 = vld [vmem:[%s13776_s6 + $0x1d74] sm:$0xf0]  ;;  %v12246_v27 = vld [vmem:[%s13776_s6 + $0x1e68] sm:$0xf]  ;;  %v11991_v33 = vor.u32 %v13358_v18, %v11990_v16 }
 0x317   : > { %7690 = vmatpush.bf16.msrb.mxu0 %v12023_v43  ;;  %v13422_v56 = vld [vmem:[%s13776_s6 + $0x1e74] sm:$0xf0]  ;;  %v12374_v62 = vld [vmem:[%s13776_s6 + $0x1f68] sm:$0xf]  ;;  %v12119_v34 = vor.u32 %v13390_v25, %v12118_v19  ;;  %v7464_v43 = vadd.f32 %v7463_v28, %v7451_v24  ;;  %v7439_v51 = vpop.f32.mrf.mxu0 }
 0x318   : > { %7703 = vmatpush.bf16.msrb.mxu1 %v12151_v44  ;;  %v13454_v30 = vld [vmem:[%s13776_s6 + $0x1f74] sm:$0xf0]  ;;  %v12247_v7 = vor.u32 %v13422_v56, %v12246_v27  ;;  %v11974_v35 = vld [vmem:[%s13776_s6 + $0x1c48] sm:$0xf]  ;;  %v7476_v44 = vpop.f32.mrf.mxu3  ;;  %v8856_v51 = vld [vmem:[%s13776_s6 + $0x3f8] sm:$0xf0] }
 0x319   : > { %7716 = vmatpush.bf16.msrb.mxu2 %v12279_v45  ;;  %v13354_v37 = vld [vmem:[%s13776_s6 + $0x1c54] sm:$0xf0]  ;;  %v12102_v1 = vld [vmem:[%s13776_s6 + $0x1d48] sm:$0xf]  ;;  %v12375_v14 = vor.u32 %v13454_v30, %v12374_v62  ;;  %v15494_v53 = vadd.f32 %v7476_v44, %v7464_v43  ;;  %v8728_v43 = vld [vmem:[%s13776_s6 + $0x2f8] sm:$0xf0] }
 0x31a   : > { %7729 = vmatpush.bf16.msrb.mxu3 %v12407_v39  ;;  %v13386_v40 = vld [vmem:[%s13776_s6 + $0x1d54] sm:$0xf0]  ;;  %v12230_v42 = vld [vmem:[%s13776_s6 + $0x1e48] sm:$0xf]  ;;  %v11975_v41 = vor.u32 %v13354_v37, %v11974_v35  ;;  %v7452_v39 = vpop.f32.mrf.mxu1  ;;  %v12476_v37 = vld [vmem:[%s13776_s6 + $0xec] sm:$0xf] }
 0x31b   : > { %7691 = vmatpush.bf16.msrb.mxu0 %v12007_v50  ;;  %v13418_v23 = vld [vmem:[%s13776_s6 + $0x1e54] sm:$0xf0]  ;;  %v12358_v45 = vld [vmem:[%s13776_s6 + $0x1f48] sm:$0xf]  ;;  %v12103_v54 = vor.u32 %v13386_v40, %v12102_v1  ;;  %v7465_v35 = vpop.f32.mrf.mxu2  ;;  %v8472_v1 = vld [vmem:[%s13776_s6 + $0xf8] sm:$0xf0] }
 0x31c   : > { %7704 = vmatpush.bf16.msrb.mxu1 %v12135_v55  ;;  %v13450_v2 = vld [vmem:[%s13776_s6 + $0x1f54] sm:$0xf0]  ;;  %v12231_v36 = vor.u32 %v13418_v23, %v12230_v42  ;;  %v11958_v58 = vld [vmem:[%s13776_s6 + $0x1c28] sm:$0xf]  ;;  %v8600_v42 = vld [vmem:[%s13776_s6 + $0x1f8] sm:$0xf0]  ;;  %v8475_v39 = vor.u32 %v12476_v37, %v8472_v1 }
 0x31d   : > { %7717 = vmatpush.bf16.msrb.mxu2 %v12263_v6  ;;  %v13350_v59 = vld [vmem:[%s13776_s6 + $0x1c34] sm:$0xf0]  ;;  %v12086_v60 = vld [vmem:[%s13776_s6 + $0x1d28] sm:$0xf]  ;;  %v12359_v17 = vor.u32 %v13450_v2, %v12358_v45  ;;  %v12540_v23 = vld [vmem:[%s13776_s6 + $0x2ec] sm:$0xf] }
 0x31e   : > { %7730 = vmatpush.bf16.msrb.mxu3 %v12391_v57  ;;  %v13382_v50 = vld [vmem:[%s13776_s6 + $0x1d34] sm:$0xf0]  ;;  %v12214_v61 = vld [vmem:[%s13776_s6 + $0x1e28] sm:$0xf]  ;;  %v11959_v18 = vor.u32 %v13350_v59, %v11958_v58  ;;  %v12572_v2 = vld [vmem:[%s13776_s6 + $0x3ec] sm:$0xf] }
 0x31f   : > { %7692 = vmatpush.bf16.msrb.mxu0 %v11991_v33  ;;  %v13414_v55 = vld [vmem:[%s13776_s6 + $0x1e34] sm:$0xf0]  ;;  %v12342_v6 = vld [vmem:[%s13776_s6 + $0x1f28] sm:$0xf]  ;;  %v12087_v24 = vor.u32 %v13382_v50, %v12086_v60  ;;  %v12472_v58 = vld [vmem:[%s13776_s6 + $0xcc] sm:$0xf] }
 0x320   : > { %7705 = vmatpush.bf16.msrb.mxu1 %v12119_v34  ;;  %v13446_v16 = vld [vmem:[%s13776_s6 + $0x1f34] sm:$0xf0]  ;;  %v11942_v19 = vld [vmem:[%s13776_s6 + $0x1c08] sm:$0xf]  ;;  %v12215_v25 = vor.u32 %v13414_v55, %v12214_v61  ;;  %v7478_v28 = vpop.f32.mrf.mxu3  ;;  %v8456_v59 = vld [vmem:[%s13776_s6 + $0xd8] sm:$0xf0] }
 0x321   : > { %7718 = vmatpush.bf16.msrb.mxu2 %v12247_v7  ;;  %v13346_v57 = vld [vmem:[%s13776_s6 + $0x1c14] sm:$0xf0]  ;;  %v12070_v27 = vld [vmem:[%s13776_s6 + $0x1d08] sm:$0xf]  ;;  %v12343_v30 = vor.u32 %v13446_v16, %v12342_v6  ;;  %v12504_v60 = vld [vmem:[%s13776_s6 + $0x1cc] sm:$0xf] }
 0x322   : > { %7731 = vmatpush.bf16.msrb.mxu3 %v12375_v14  ;;  %v13378_v56 = vld [vmem:[%s13776_s6 + $0x1d14] sm:$0xf0]  ;;  %v12198_v62 = vld [vmem:[%s13776_s6 + $0x1e08] sm:$0xf]  ;;  %v12508_v14 = vld [vmem:[%s13776_s6 + $0x1ec] sm:$0xf]  ;;  %v11943_v40 = vor.u32 %v13346_v57, %v11942_v19 }
 0x323   : > { %7693 = vmatpush.bf16.msrb.mxu0 %v11975_v41  ;;  %v13410_v33 = vld [vmem:[%s13776_s6 + $0x1e14] sm:$0xf0]  ;;  %v12326_v34 = vld [vmem:[%s13776_s6 + $0x1f08] sm:$0xf]  ;;  %v12071_v44 = vor.u32 %v13378_v56, %v12070_v27  ;;  %v8584_v50 = vld [vmem:[%s13776_s6 + $0x1d8] sm:$0xf0] }
 0x324   : > { %7706 = vmatpush.bf16.msrb.mxu1 %v12103_v54  ;;  %v13442_v7 = vld [vmem:[%s13776_s6 + $0x1f14] sm:$0xf0]  ;;  %v12199_v45 = vor.u32 %v13410_v33, %v12198_v62  ;;  %v8603_v54 = vor.u32 %v12508_v14, %v8600_v42  ;;  %v12536_v61 = vld [vmem:[%s13776_s6 + $0x2cc] sm:$0xf]  ;;  %v8712_v55 = vld [vmem:[%s13776_s6 + $0x2d8] sm:$0xf0]  ;;  %v8587_v19 = vor.u32 %v12504_v60, %v8584_v50 }
 0x325   : > { %7719 = vmatpush.bf16.msrb.mxu2 %v12231_v36  ;;  %v12327_v41 = vor.u32 %v13442_v7, %v12326_v34  ;;  %v8731_v36 = vor.u32 %v12540_v23, %v8728_v43  ;;  %v12568_v6 = vld [vmem:[%s13776_s6 + $0x3cc] sm:$0xf]  ;;  %v8840_v16 = vld [vmem:[%s13776_s6 + $0x3d8] sm:$0xf0]  ;;  %v8715_v57 = vor.u32 %v12536_v61, %v8712_v55 }
 0x326   : > { %7732 = vmatpush.bf16.msrb.mxu3 %v12359_v17  ;;  %v8859_v17 = vor.u32 %v12572_v2, %v8856_v51  ;;  %v12500_v27 = vld [vmem:[%s13776_s6 + $0x1ac] sm:$0xf]  ;;  %v13546_v56 = vld [vmem:[#allocation1 + $0x24] sm:$0xff]  ;;  %v8843_v62 = vor.u32 %v12568_v6, %v8840_v16 }
 0x327   : > { %7694 = vmatpush.bf16.msrb.mxu0 %v11959_v18  ;;  %v8459_v18 = vor.u32 %v12472_v58, %v8456_v59  ;;  %v12532_v33 = vld [vmem:[%s13776_s6 + $0x2ac] sm:$0xf]  ;;  %v8696_v34 = vld [vmem:[%s13776_s6 + $0x2b8] sm:$0xf0] }
 0x328   : > { %7707 = vmatpush.bf16.msrb.mxu1 %v12087_v24  ;;  %v12468_v24 = vld [vmem:[%s13776_s6 + $0xac] sm:$0xf]  ;;  %v8824_v1 = vld [vmem:[%s13776_s6 + $0x3b8] sm:$0xf0]  ;;  %v8699_v42 = vor.u32 %v12532_v33, %v8696_v34 }
 0x329   : > { %7720 = vmatpush.bf16.msrb.mxu2 %v12215_v25  ;;  %v8440_v25 = vld [vmem:[%s13776_s6 + $0xb8] sm:$0xf0]  ;;  %v13547_v7 = vld [vmem:[#allocation1 + $0x36] sm:$0xff]  ;;  %v13548_v35 = vld [vmem:[#allocation1 + $0x2d] sm:$0xff] }
 0x32a   : > { %7733 = vmatpush.bf16.msrb.mxu3 %v12343_v30  ;;  %v8568_v30 = vld [vmem:[%s13776_s6 + $0x1b8] sm:$0xf0]  ;;  %v12564_v37 = vld [vmem:[%s13776_s6 + $0x3ac] sm:$0xf]  ;;  %v8443_v28 = vor.u32 %v12468_v24, %v8440_v25 }
 0x32b   : > { %7695 = vmatpush.bf16.msrb.mxu0 %v11943_v40  ;;  %v13549_v14 = vld [vmem:[#allocation1 + $0x3f] sm:$0xff]  ;;  %v8571_v40 = vor.u32 %v12500_v27, %v8568_v30  ;;  %v12464_v23 = vld [vmem:[%s13776_s6 + $0x8c] sm:$0xf] }
 0x32c   : > { %7708 = vmatpush.bf16.msrb.mxu1 %v12071_v44  ;;  %v8424_v43 = vld [vmem:[%s13776_s6 + $0x98] sm:$0xf0]  ;;  %v12496_v44 = vld [vmem:[%s13776_s6 + $0x18c] sm:$0xf]  ;;  %v7502_v60 = vpop.f32.mrf.mxu1 }
 0x32d   : > { %7721 = vmatpush.bf16.msrb.mxu2 %v12199_v45  ;;  %v8827_v45 = vor.u32 %v12564_v37, %v8824_v1  ;;  %v8552_v2 = vld [vmem:[%s13776_s6 + $0x198] sm:$0xf0]  ;;  %v12528_v51 = vld [vmem:[%s13776_s6 + $0x28c] sm:$0xf]  ;;  %v8427_v59 = vor.u32 %v12464_v23, %v8424_v43 }
 0x32e   : > { %7734 = vmatpush.bf16.msrb.mxu3 %v12327_v41  ;;  %7696 = vmatmul.bf16.vlgmr.msrb.gmra.mxu0 %v13546_v56  ;;  %v8680_v41 = vld [vmem:[%s13776_s6 + $0x298] sm:$0xf0]  ;;  %v12460_v61 = vld [vmem:[%s13776_s6 + $0x6c] sm:$0xf] }
 0x32f   : > { %7740 = vmatpush.bf16.msra.mxu0 %v8475_v39  ;;  %7709 = vmatmul.bf16.vlgmr.msrb.gmra.mxu1 %v13548_v35  ;;  %v7489_v39 = vpop.f32.mrf.mxu0  ;;  %v8683_v50 = vor.u32 %v12528_v51, %v8680_v41  ;;  %v8408_v55 = vld [vmem:[%s13776_s6 + $0x78] sm:$0xf0]  ;;  %v12492_v6 = vld [vmem:[%s13776_s6 + $0x16c] sm:$0xf] }
 0x330   : > { %7753 = vmatpush.bf16.msra.mxu1 %v8603_v54  ;;  %7722 = vmatmul.bf16.vlgmr.msrb.gmra.mxu2 %v13547_v7  ;;  %v12560_v54 = vld [vmem:[%s13776_s6 + $0x38c] sm:$0xf]  ;;  %v7490_v58 = vadd.f32 %v7489_v39, %v15494_v53  ;;  %v8664_v53 = vld [vmem:[%s13776_s6 + $0x278] sm:$0xf0]  ;;  %v8411_v27 = vor.u32 %v12460_v61, %v8408_v55 }
 0x331   : > { %7766 = vmatpush.bf16.msra.mxu2 %v8731_v36  ;;  %7735 = vmatmul.bf16.vlgmr.msrb.gmra.mxu3 %v13549_v14  ;;  %v8808_v36 = vld [vmem:[%s13776_s6 + $0x398] sm:$0xf0]  ;;  %v12556_v24 = vld [vmem:[%s13776_s6 + $0x36c] sm:$0xf] }
 0x332   : > { %7779 = vmatpush.bf16.msra.mxu3 %v8859_v17  ;;  %v8555_v17 = vor.u32 %v12496_v44, %v8552_v2  ;;  %v8811_v16 = vor.u32 %v12560_v54, %v8808_v36  ;;  %v8792_v25 = vld [vmem:[%s13776_s6 + $0x378] sm:$0xf0]  ;;  %v12456_v30 = vld [vmem:[%s13776_s6 + $0x4c] sm:$0xf] }
 0x333   : > { %7741 = vmatpush.bf16.msra.mxu0 %v8459_v18  ;;  %v7503_v18 = vadd.f32 %v7502_v60, %v7490_v58  ;;  %v8392_v33 = vld [vmem:[%s13776_s6 + $0x58] sm:$0xf0]  ;;  %v12488_v34 = vld [vmem:[%s13776_s6 + $0x14c] sm:$0xf]  ;;  %v8795_v7 = vor.u32 %v12556_v24, %v8792_v25  ;;  %v7515_v35 = vpop.f32.mrf.mxu2 }
 0x334   : > { %7754 = vmatpush.bf16.msra.mxu1 %v8587_v19  ;;  %v8536_v19 = vld [vmem:[%s13776_s6 + $0x178] sm:$0xf0]  ;;  %v12520_v1 = vld [vmem:[%s13776_s6 + $0x24c] sm:$0xf]  ;;  %v8395_v44 = vor.u32 %v12456_v30, %v8392_v33 }
 0x335   : > { %7767 = vmatpush.bf16.msra.mxu2 %v8715_v57  ;;  %v12524_v57 = vld [vmem:[%s13776_s6 + $0x26c] sm:$0xf]  ;;  %v8539_v56 = vor.u32 %v12492_v6, %v8536_v19  ;;  %v8520_v37 = vld [vmem:[%s13776_s6 + $0x158] sm:$0xf0] }
 0x336   : > { %7780 = vmatpush.bf16.msra.mxu3 %v8843_v62  ;;  %v8667_v62 = vor.u32 %v12524_v57, %v8664_v53  ;;  %v8648_v14 = vld [vmem:[%s13776_s6 + $0x258] sm:$0xf0]  ;;  %v8523_v51 = vor.u32 %v12488_v34, %v8520_v37  ;;  %v12452_v39 = vld [vmem:[%s13776_s6 + $0x2c] sm:$0xf] }
 0x337   : > { %7742 = vmatpush.bf16.msra.mxu0 %v8443_v28  ;;  %v7516_v28 = vadd.f32 %v7515_v35, %v7503_v18  ;;  %v8776_v23 = vld [vmem:[%s13776_s6 + $0x358] sm:$0xf0]  ;;  %v7491_v43 = vpop.f32.mrf.mxu0  ;;  %v8651_v41 = vor.u32 %v12520_v1, %v8648_v14  ;;  %v12484_v36 = vld [vmem:[%s13776_s6 + $0x12c] sm:$0xf] }
 0x338   : > { %7755 = vmatpush.bf16.msra.mxu1 %v8571_v40  ;;  %v7528_v40 = vpop.f32.mrf.mxu3  ;;  %v8376_v54 = vld [vmem:[%s13776_s6 + $0x38] sm:$0xf0]  ;;  %v12516_v60 = vld [vmem:[%s13776_s6 + $0x22c] sm:$0xf] }
 0x339   : > { %7768 = vmatpush.bf16.msra.mxu2 %v8699_v42  ;;  %v12552_v42 = vld [vmem:[%s13776_s6 + $0x34c] sm:$0xf]  ;;  %v15561_v2 = vadd.f32 %v7528_v40, %v7516_v28  ;;  %v8760_v61 = vld [vmem:[%s13776_s6 + $0x338] sm:$0xf0]  ;;  %v8379_v55 = vor.u32 %v12452_v39, %v8376_v54 }
 0x33a   : > { %7781 = vmatpush.bf16.msra.mxu3 %v8827_v45  ;;  %v7504_v45 = vpop.f32.mrf.mxu1  ;;  %v8779_v58 = vor.u32 %v12552_v42, %v8776_v23  ;;  %v12448_v6 = vld [vmem:[%s13776_s6 + $0xc] sm:$0xf]  ;;  %v8488_v53 = vld [vmem:[%s13776_s6 + $0x118] sm:$0xf0] }
 0x33b   : > { %7743 = vmatpush.bf16.msra.mxu0 %v8427_v59  ;;  %v8504_v59 = vld [vmem:[%s13776_s6 + $0x138] sm:$0xf0]  ;;  %v12480_v57 = vld [vmem:[%s13776_s6 + $0x10c] sm:$0xf]  ;;  %v7517_v30 = vpop.f32.mrf.mxu2 }
 0x33c   : > { %7756 = vmatpush.bf16.msra.mxu1 %v8555_v17  ;;  %v8632_v17 = vld [vmem:[%s13776_s6 + $0x238] sm:$0xf0]  ;;  %v8507_v18 = vor.u32 %v12484_v36, %v8504_v59  ;;  %v12512_v24 = vld [vmem:[%s13776_s6 + $0x20c] sm:$0xf]  ;;  %v8491_v40 = vor.u32 %v12480_v57, %v8488_v53 }
 0x33d   : > { %7769 = vmatpush.bf16.msra.mxu2 %v8683_v50  ;;  %v12548_v50 = vld [vmem:[%s13776_s6 + $0x32c] sm:$0xf]  ;;  %v8635_v19 = vor.u32 %v12516_v60, %v8632_v17  ;;  %v8984_v34 = vld [vmem:[%s13776_s6 + $0x4f8] sm:$0xf0] }
 0x33e   : > { %7782 = vmatpush.bf16.msra.mxu3 %v8811_v16  ;;  %v8360_v16 = vld [vmem:[%s13776_s6 + $0x18] sm:$0xf0]  ;;  %v8763_v25 = vor.u32 %v12548_v50, %v8760_v61  ;;  %v12604_v33 = vld [vmem:[%s13776_s6 + $0x4ec] sm:$0xf] }
 0x33f   : > { %7744 = vmatpush.bf16.msra.mxu0 %v8411_v27  ;;  %v8616_v27 = vld [vmem:[%s13776_s6 + $0x218] sm:$0xf0]  ;;  %v8363_v37 = vor.u32 %v12448_v6, %v8360_v16  ;;  %v12668_v14 = vld [vmem:[%s13776_s6 + $0x6ec] sm:$0xf]  ;;  %v8987_v45 = vor.u32 %v12604_v33, %v8984_v34 }
 0x340   : > { %7757 = vmatpush.bf16.msra.mxu1 %v8539_v56  ;;  %v12544_v56 = vld [vmem:[%s13776_s6 + $0x30c] sm:$0xf]  ;;  %v7530_v35 = vpop.f32.mrf.mxu3  ;;  %v9112_v1 = vld [vmem:[%s13776_s6 + $0x5f8] sm:$0xf0]  ;;  %v8619_v42 = vor.u32 %v12512_v24, %v8616_v27 }
 0x341   : > { %7770 = vmatpush.bf16.msra.mxu2 %v8667_v62  ;;  %v8744_v62 = vld [vmem:[%s13776_s6 + $0x318] sm:$0xf0]  ;;  %v12700_v23 = vld [vmem:[%s13776_s6 + $0x7ec] sm:$0xf] }
 0x342   : > { %7783 = vmatpush.bf16.msra.mxu3 %v8795_v7  ;;  %v12636_v7 = vld [vmem:[%s13776_s6 + $0x5ec] sm:$0xf]  ;;  %v9240_v28 = vld [vmem:[%s13776_s6 + $0x6f8] sm:$0xf0] }
 0x343   : > { %7745 = vmatpush.bf16.msra.mxu0 %v8395_v44  ;;  %v9368_v43 = vld [vmem:[%s13776_s6 + $0x7f8] sm:$0xf0]  ;;  %v8747_v44 = vor.u32 %v12544_v56, %v8744_v62  ;;  %v12600_v39 = vld [vmem:[%s13776_s6 + $0x4cc] sm:$0xf] }
 0x344   : > { %7758 = vmatpush.bf16.msra.mxu1 %v8523_v51  ;;  %v9115_v51 = vor.u32 %v12636_v7, %v9112_v1  ;;  %v8968_v54 = vld [vmem:[%s13776_s6 + $0x4d8] sm:$0xf0]  ;;  %v12632_v36 = vld [vmem:[%s13776_s6 + $0x5cc] sm:$0xf] }
 0x345   : > { %7771 = vmatpush.bf16.msra.mxu2 %v8651_v41  ;;  %v9243_v41 = vor.u32 %v12668_v14, %v9240_v28  ;;  %v9096_v59 = vld [vmem:[%s13776_s6 + $0x5d8] sm:$0xf0]  ;;  %v12664_v60 = vld [vmem:[%s13776_s6 + $0x6cc] sm:$0xf] }
 0x346   : > { %7784 = vmatpush.bf16.msra.mxu3 %v8779_v58  ;;  %v9371_v58 = vor.u32 %v12700_v23, %v9368_v43  ;;  %v9224_v17 = vld [vmem:[%s13776_s6 + $0x6d8] sm:$0xf0]  ;;  %v12696_v50 = vld [vmem:[%s13776_s6 + $0x7cc] sm:$0xf]  ;;  %v9099_v6 = vor.u32 %v12632_v36, %v9096_v59 }
 0x347   : > { %7746 = vmatpush.bf16.msra.mxu0 %v8379_v55  ;;  %v9352_v61 = vld [vmem:[%s13776_s6 + $0x7d8] sm:$0xf0]  ;;  %v8971_v55 = vor.u32 %v12600_v39, %v8968_v54  ;;  %v9227_v16 = vor.u32 %v12664_v60, %v9224_v17  ;;  %v12628_v57 = vld [vmem:[%s13776_s6 + $0x5ac] sm:$0xf] }
 0x348   : > { %7759 = vmatpush.bf16.msra.mxu1 %v8507_v18  ;;  %v12596_v18 = vld [vmem:[%s13776_s6 + $0x4ac] sm:$0xf]  ;;  %v9355_v53 = vor.u32 %v12696_v50, %v9352_v61  ;;  %v9080_v24 = vld [vmem:[%s13776_s6 + $0x5b8] sm:$0xf0] }
 0x349   : > { %7772 = vmatpush.bf16.msra.mxu2 %v8635_v19  ;;  %v8952_v19 = vld [vmem:[%s13776_s6 + $0x4b8] sm:$0xf0]  ;;  %v12692_v56 = vld [vmem:[%s13776_s6 + $0x7ac] sm:$0xf]  ;;  %v9083_v33 = vor.u32 %v12628_v57, %v9080_v24 }
 0x34a   : > { %7785 = vmatpush.bf16.msra.mxu3 %v8763_v25  ;;  %v12660_v25 = vld [vmem:[%s13776_s6 + $0x6ac] sm:$0xf]  ;;  %v9208_v27 = vld [vmem:[%s13776_s6 + $0x6b8] sm:$0xf0]  ;;  %v8955_v30 = vor.u32 %v12596_v18, %v8952_v19 }
 0x34b   : > { %7747 = vmatpush.bf16.msra.mxu0 %v8363_v37  ;;  %v9336_v62 = vld [vmem:[%s13776_s6 + $0x7b8] sm:$0xf0]  ;;  %v9211_v34 = vor.u32 %v12660_v25, %v9208_v27  ;;  %v12624_v35 = vld [vmem:[%s13776_s6 + $0x58c] sm:$0xf]  ;;  %v7541_v14 = vpop.f32.mrf.mxu0 }
 0x34c   : > { %7760 = vmatpush.bf16.msra.mxu1 %v8491_v40  ;;  %v8936_v7 = vld [vmem:[%s13776_s6 + $0x498] sm:$0xf0]  ;;  %v9339_v37 = vor.u32 %v12692_v56, %v9336_v62  ;;  %v12688_v28 = vld [vmem:[%s13776_s6 + $0x78c] sm:$0xf]  ;;  %v7554_v23 = vpop.f32.mrf.mxu1 }
 0x34d   : > { %7773 = vmatpush.bf16.msra.mxu2 %v8619_v42  ;;  %v9192_v1 = vld [vmem:[%s13776_s6 + $0x698] sm:$0xf0]  ;;  %v12684_v59 = vld [vmem:[%s13776_s6 + $0x76c] sm:$0xf] }
 0x34e   : > { %7786 = vmatpush.bf16.msra.mxu3 %v8747_v44  ;;  %7748 = vmatmul.bf16.vlgmr.msra.gmra.mxu0 %v13893_v21  ;;  %v9064_v21 = vld [vmem:[%s13776_s6 + $0x598] sm:$0xf0]  ;;  %v12680_v56 = vld [vmem:[%s13776_s6 + $0x74c] sm:$0xf] }
 0x34f   : > { %7792 = vmatpush.bf16.msrb.mxu0 %v8987_v45  ;;  %7761 = vmatmul.bf16.vlgmr.msra.gmra.mxu1 %v13900_v26  ;;  %v9320_v40 = vld [vmem:[%s13776_s6 + $0x798] sm:$0xf0]  ;;  %v7542_v26 = vadd.f32 %v7541_v14, %v15561_v2  ;;  %v9067_v43 = vor.u32 %v12624_v35, %v9064_v21  ;;  %v12588_v45 = vld [vmem:[%s13776_s6 + $0x46c] sm:$0xf] }
 0x350   : > { %7805 = vmatpush.bf16.msrb.mxu1 %v9115_v51  ;;  %7774 = vmatmul.bf16.vlgmr.msra.gmra.mxu2 %v13891_v20  ;;  %v12592_v20 = vld [vmem:[%s13776_s6 + $0x48c] sm:$0xf]  ;;  %v8920_v51 = vld [vmem:[%s13776_s6 + $0x478] sm:$0xf0]  ;;  %v9323_v39 = vor.u32 %v12688_v28, %v9320_v40 }
 0x351   : > { %7818 = vmatpush.bf16.msrb.mxu2 %v9243_v41  ;;  %7787 = vmatmul.bf16.vlgmr.msra.gmra.mxu3 %v13895_v22  ;;  %v12656_v22 = vld [vmem:[%s13776_s6 + $0x68c] sm:$0xf]  ;;  %v8939_v42 = vor.u32 %v12592_v20, %v8936_v7  ;;  %v7555_v54 = vadd.f32 %v7554_v23, %v7542_v26  ;;  %v9048_v36 = vld [vmem:[%s13776_s6 + $0x578] sm:$0xf0]  ;;  %v8923_v17 = vor.u32 %v12588_v45, %v8920_v51 }
 0x352   : > { %7831 = vmatpush.bf16.msrb.mxu3 %v9371_v58  ;;  %v9195_v44 = vor.u32 %v12656_v22, %v9192_v1  ;;  %v12620_v41 = vld [vmem:[%s13776_s6 + $0x56c] sm:$0xf]  ;;  %v9176_v2 = vld [vmem:[%s13776_s6 + $0x678] sm:$0xf0] }
 0x353   : > { %7793 = vmatpush.bf16.msrb.mxu0 %v8971_v55  ;;  %v12652_v58 = vld [vmem:[%s13776_s6 + $0x66c] sm:$0xf]  ;;  %v9304_v60 = vld [vmem:[%s13776_s6 + $0x778] sm:$0xf0]  ;;  %v9051_v50 = vor.u32 %v12620_v41, %v9048_v36  ;;  %v7567_v19 = vpop.f32.mrf.mxu2 }
 0x354   : > { %7806 = vmatpush.bf16.msrb.mxu1 %v9099_v6  ;;  %v9179_v61 = vor.u32 %v12652_v58, %v9176_v2  ;;  %v12584_v55 = vld [vmem:[%s13776_s6 + $0x44c] sm:$0xf]  ;;  %v8904_v6 = vld [vmem:[%s13776_s6 + $0x458] sm:$0xf0]  ;;  %v9307_v18 = vor.u32 %v12684_v59, %v9304_v60  ;;  %v7568_v25 = vadd.f32 %v7567_v19, %v7555_v54  ;;  %v7580_v27 = vpop.f32.mrf.mxu3 }
 0x355   : > { %7819 = vmatpush.bf16.msrb.mxu2 %v9227_v16  ;;  %v12616_v16 = vld [vmem:[%s13776_s6 + $0x54c] sm:$0xf]  ;;  %v9032_v57 = vld [vmem:[%s13776_s6 + $0x558] sm:$0xf0] }
 0x356   : > { %7832 = vmatpush.bf16.msrb.mxu3 %v9355_v53  ;;  %v12648_v53 = vld [vmem:[%s13776_s6 + $0x64c] sm:$0xf]  ;;  %v9160_v24 = vld [vmem:[%s13776_s6 + $0x658] sm:$0xf0]  ;;  %v15632_v20 = vadd.f32 %v7580_v27, %v7568_v25  ;;  %v9035_v7 = vor.u32 %v12616_v16, %v9032_v57 }
 0x357   : > { %7794 = vmatpush.bf16.msrb.mxu0 %v8955_v30  ;;  %v9288_v62 = vld [vmem:[%s13776_s6 + $0x758] sm:$0xf0]  ;;  %v7543_v30 = vpop.f32.mrf.mxu0  ;;  %v9163_v35 = vor.u32 %v12648_v53, %v9160_v24  ;;  %v12612_v22 = vld [vmem:[%s13776_s6 + $0x52c] sm:$0xf] }
 0x358   : > { %7807 = vmatpush.bf16.msrb.mxu1 %v9083_v33  ;;  %v8907_v33 = vor.u32 %v12584_v55, %v8904_v6  ;;  %v8888_v21 = vld [vmem:[%s13776_s6 + $0x438] sm:$0xf0]  ;;  %v9291_v1 = vor.u32 %v12680_v56, %v9288_v62  ;;  %v12644_v28 = vld [vmem:[%s13776_s6 + $0x62c] sm:$0xf] }
 0x359   : > { %7820 = vmatpush.bf16.msrb.mxu2 %v9211_v34  ;;  %v7556_v34 = vpop.f32.mrf.mxu1  ;;  %v9016_v14 = vld [vmem:[%s13776_s6 + $0x538] sm:$0xf0]  ;;  %v12676_v26 = vld [vmem:[%s13776_s6 + $0x72c] sm:$0xf] }
 0x35a   : > { %7833 = vmatpush.bf16.msrb.mxu3 %v9339_v37  ;;  %v12580_v37 = vld [vmem:[%s13776_s6 + $0x42c] sm:$0xf]  ;;  %v9144_v40 = vld [vmem:[%s13776_s6 + $0x638] sm:$0xf0]  ;;  %v9019_v45 = vor.u32 %v12612_v22, %v9016_v14 }
 0x35b   : > { %7795 = vmatpush.bf16.msrb.mxu0 %v8939_v42  ;;  %v9272_v42 = vld [vmem:[%s13776_s6 + $0x738] sm:$0xf0]  ;;  %v8891_v23 = vor.u32 %v12580_v37, %v8888_v21  ;;  %v9147_v51 = vor.u32 %v12644_v28, %v9144_v40  ;;  %v12608_v41 = vld [vmem:[%s13776_s6 + $0x50c] sm:$0xf]  ;;  %v7569_v60 = vpop.f32.mrf.mxu2 }
 0x35c   : > { %7808 = vmatpush.bf16.msrb.mxu1 %v9067_v43  ;;  %v12576_v43 = vld [vmem:[%s13776_s6 + $0x40c] sm:$0xf]  ;;  %v9275_v36 = vor.u32 %v12676_v26, %v9272_v42  ;;  %v9128_v58 = vld [vmem:[%s13776_s6 + $0x618] sm:$0xf0]  ;;  %v7582_v55 = vpop.f32.mrf.mxu3 }
 0x35d   : > { %7821 = vmatpush.bf16.msrb.mxu2 %v9195_v44  ;;  %v8872_v44 = vld [vmem:[%s13776_s6 + $0x418] sm:$0xf0]  ;;  %v12640_v54 = vld [vmem:[%s13776_s6 + $0x60c] sm:$0xf] }
 0x35e   : > { %7834 = vmatpush.bf16.msrb.mxu3 %v9323_v39  ;;  %v9000_v39 = vld [vmem:[%s13776_s6 + $0x518] sm:$0xf0]  ;;  %v12672_v2 = vld [vmem:[%s13776_s6 + $0x70c] sm:$0xf]  ;;  %v8875_v6 = vor.u32 %v12576_v43, %v8872_v44  ;;  %v9131_v53 = vor.u32 %v12640_v54, %v9128_v58 }
 0x35f   : > { %7796 = vmatpush.bf16.msrb.mxu0 %v8923_v17  ;;  %v9256_v59 = vld [vmem:[%s13776_s6 + $0x718] sm:$0xf0]  ;;  %v12732_v17 = vld [vmem:[%s13776_s6 + $0x8ec] sm:$0xf]  ;;  %v9003_v57 = vor.u32 %v12608_v41, %v9000_v39 }
 0x360   : > { %7809 = vmatpush.bf16.msrb.mxu1 %v9051_v50  ;;  %v9496_v50 = vld [vmem:[%s13776_s6 + $0x8f8] sm:$0xf0]  ;;  %v12828_v24 = vld [vmem:[%s13776_s6 + $0xbec] sm:$0xf]  ;;  %v9259_v27 = vor.u32 %v12672_v2, %v9256_v59 }
 0x361   : > { %7822 = vmatpush.bf16.msrb.mxu2 %v9179_v61  ;;  %v12764_v61 = vld [vmem:[%s13776_s6 + $0x9ec] sm:$0xf]  ;;  %v9624_v16 = vld [vmem:[%s13776_s6 + $0x9f8] sm:$0xf0]  ;;  %v9499_v56 = vor.u32 %v12732_v17, %v9496_v50 }
 0x362   : > { %7835 = vmatpush.bf16.msrb.mxu3 %v9307_v18  ;;  %v12796_v18 = vld [vmem:[%s13776_s6 + $0xaec] sm:$0xf]  ;;  %v9752_v19 = vld [vmem:[%s13776_s6 + $0xaf8] sm:$0xf0]  ;;  %v9627_v62 = vor.u32 %v12764_v61, %v9624_v16 }
 0x363   : > { %7797 = vmatpush.bf16.msrb.mxu0 %v8907_v33  ;;  %v9880_v25 = vld [vmem:[%s13776_s6 + $0xbf8] sm:$0xf0]  ;;  %v9755_v30 = vor.u32 %v12796_v18, %v9752_v19  ;;  %v12728_v33 = vld [vmem:[%s13776_s6 + $0x8cc] sm:$0xf] }
 0x364   : > { %7810 = vmatpush.bf16.msrb.mxu1 %v9035_v7  ;;  %v9480_v34 = vld [vmem:[%s13776_s6 + $0x8d8] sm:$0xf0]  ;;  %v12760_v7 = vld [vmem:[%s13776_s6 + $0x9cc] sm:$0xf] }
 0x365   : > { %7823 = vmatpush.bf16.msrb.mxu2 %v9163_v35  ;;  %v9883_v35 = vor.u32 %v12828_v24, %v9880_v25  ;;  %v9608_v37 = vld [vmem:[%s13776_s6 + $0x9d8] sm:$0xf0]  ;;  %v12792_v21 = vld [vmem:[%s13776_s6 + $0xacc] sm:$0xf]  ;;  %v9483_v28 = vor.u32 %v12728_v33, %v9480_v34 }
 0x366   : > { %7836 = vmatpush.bf16.msrb.mxu3 %v9291_v1  ;;  %v9736_v22 = vld [vmem:[%s13776_s6 + $0xad8] sm:$0xf0]  ;;  %v12824_v1 = vld [vmem:[%s13776_s6 + $0xbcc] sm:$0xf]  ;;  %v9611_v40 = vor.u32 %v12760_v7, %v9608_v37 }
 0x367   : > { %7798 = vmatpush.bf16.msrb.mxu0 %v8891_v23  ;;  %v9864_v14 = vld [vmem:[%s13776_s6 + $0xbd8] sm:$0xf0]  ;;  %v9739_v26 = vor.u32 %v12792_v21, %v9736_v22  ;;  %v12724_v42 = vld [vmem:[%s13776_s6 + $0x8ac] sm:$0xf] }
 0x368   : > { %7811 = vmatpush.bf16.msrb.mxu1 %v9019_v45  ;;  %v9464_v23 = vld [vmem:[%s13776_s6 + $0x8b8] sm:$0xf0]  ;;  %v12756_v43 = vld [vmem:[%s13776_s6 + $0x9ac] sm:$0xf]  ;;  %v9867_v44 = vor.u32 %v12824_v1, %v9864_v14 }
 0x369   : > { %7824 = vmatpush.bf16.msrb.mxu2 %v9147_v51  ;;  %v9592_v45 = vld [vmem:[%s13776_s6 + $0x9b8] sm:$0xf0]  ;;  %v12788_v51 = vld [vmem:[%s13776_s6 + $0xaac] sm:$0xf] }
 0x36a   : > { %7837 = vmatpush.bf16.msrb.mxu3 %v9275_v36  ;;  %v9720_v41 = vld [vmem:[%s13776_s6 + $0xab8] sm:$0xf0]  ;;  %v12820_v39 = vld [vmem:[%s13776_s6 + $0xbac] sm:$0xf]  ;;  %v9467_v36 = vor.u32 %v12724_v42, %v9464_v23 }
 0x36b   : > { %7799 = vmatpush.bf16.msrb.mxu0 %v8875_v6  ;;  %v9848_v54 = vld [vmem:[%s13776_s6 + $0xbb8] sm:$0xf0]  ;;  %v9723_v58 = vor.u32 %v12788_v51, %v9720_v41  ;;  %v12720_v2 = vld [vmem:[%s13776_s6 + $0x88c] sm:$0xf]  ;;  %v7593_v61 = vpop.f32.mrf.mxu0 }
 0x36c   : > { %7812 = vmatpush.bf16.msrb.mxu1 %v9003_v57  ;;  %v9448_v59 = vld [vmem:[%s13776_s6 + $0x898] sm:$0xf0]  ;;  %v12784_v17 = vld [vmem:[%s13776_s6 + $0xa8c] sm:$0xf]  ;;  %v7606_v18 = vpop.f32.mrf.mxu1 }
 0x36d   : > { %7825 = vmatpush.bf16.msrb.mxu2 %v9131_v53  ;;  %v9576_v60 = vld [vmem:[%s13776_s6 + $0x998] sm:$0xf0]  ;;  %v12816_v55 = vld [vmem:[%s13776_s6 + $0xb8c] sm:$0xf]  ;;  %v9451_v16 = vor.u32 %v12720_v2, %v9448_v59 }
 0x36e   : > { %7838 = vmatpush.bf16.msrb.mxu3 %v9259_v27  ;;  %7800 = vmatmul.bf16.vlgmr.msrb.gmra.mxu0 %v13949_v31  ;;  %v12752_v31 = vld [vmem:[%s13776_s6 + $0x98c] sm:$0xf]  ;;  %v9704_v50 = vld [vmem:[%s13776_s6 + $0xa98] sm:$0xf0] }
 0x36f   : > { %7844 = vmatpush.bf16.msra.mxu0 %v9499_v56  ;;  %7813 = vmatmul.bf16.vlgmr.msrb.gmra.mxu1 %v13956_v38  ;;  %v9832_v6 = vld [vmem:[%s13776_s6 + $0xb98] sm:$0xf0]  ;;  %v7594_v38 = vadd.f32 %v7593_v61, %v15632_v20  ;;  %v9579_v19 = vor.u32 %v12752_v31, %v9576_v60  ;;  %v9707_v57 = vor.u32 %v12784_v17, %v9704_v50  ;;  %v12716_v53 = vld [vmem:[%s13776_s6 + $0x86c] sm:$0xf] }
 0x370   : > { %7857 = vmatpush.bf16.msra.mxu1 %v9627_v62  ;;  %7826 = vmatmul.bf16.vlgmr.msrb.gmra.mxu2 %v13947_v29  ;;  %v9595_v29 = vor.u32 %v12756_v43, %v9592_v45  ;;  %v9432_v24 = vld [vmem:[%s13776_s6 + $0x878] sm:$0xf0]  ;;  %v12748_v25 = vld [vmem:[%s13776_s6 + $0x96c] sm:$0xf]  ;;  %v9835_v27 = vor.u32 %v12816_v55, %v9832_v6 }
 0x371   : > { %7870 = vmatpush.bf16.msra.mxu2 %v9755_v30  ;;  %7839 = vmatmul.bf16.vlgmr.msrb.gmra.mxu3 %v13951_v32  ;;  %v9851_v32 = vor.u32 %v12820_v39, %v9848_v54  ;;  %v7607_v56 = vadd.f32 %v7606_v18, %v7594_v38  ;;  %v9560_v62 = vld [vmem:[%s13776_s6 + $0x978] sm:$0xf0]  ;;  %v12780_v30 = vld [vmem:[%s13776_s6 + $0xa6c] sm:$0xf]  ;;  %v9435_v7 = vor.u32 %v12716_v53, %v9432_v24 }
 0x372   : > { %7883 = vmatpush.bf16.msra.mxu3 %v9883_v35  ;;  %v9688_v20 = vld [vmem:[%s13776_s6 + $0xa78] sm:$0xf0]  ;;  %v12812_v33 = vld [vmem:[%s13776_s6 + $0xb6c] sm:$0xf]  ;;  %v9563_v35 = vor.u32 %v12748_v25, %v9560_v62 }
 0x373   : > { %7845 = vmatpush.bf16.msra.mxu0 %v9483_v28  ;;  %v9816_v34 = vld [vmem:[%s13776_s6 + $0xb78] sm:$0xf0]  ;;  %v9691_v37 = vor.u32 %v12780_v30, %v9688_v20  ;;  %v12712_v21 = vld [vmem:[%s13776_s6 + $0x84c] sm:$0xf]  ;;  %v7619_v28 = vpop.f32.mrf.mxu2  ;;  %v7595_v51 = vpop.f32.mrf.mxu0 }
 0x374   : > { %7858 = vmatpush.bf16.msra.mxu1 %v9611_v40  ;;  %v9416_v22 = vld [vmem:[%s13776_s6 + $0x858] sm:$0xf0]  ;;  %v12744_v1 = vld [vmem:[%s13776_s6 + $0x94c] sm:$0xf]  ;;  %v9819_v14 = vor.u32 %v12812_v33, %v9816_v34  ;;  %v7620_v23 = vadd.f32 %v7619_v28, %v7607_v56  ;;  %v7632_v43 = vpop.f32.mrf.mxu3  ;;  %v7608_v39 = vpop.f32.mrf.mxu1 }
 0x375   : > { %7871 = vmatpush.bf16.msra.mxu2 %v9739_v26  ;;  %v9544_v40 = vld [vmem:[%s13776_s6 + $0x958] sm:$0xf0]  ;;  %v12776_v26 = vld [vmem:[%s13776_s6 + $0xa4c] sm:$0xf]  ;;  %v9419_v41 = vor.u32 %v12712_v21, %v9416_v22 }
 0x376   : > { %7884 = vmatpush.bf16.msra.mxu3 %v9867_v44  ;;  %v9672_v42 = vld [vmem:[%s13776_s6 + $0xa58] sm:$0xf0]  ;;  %v12808_v44 = vld [vmem:[%s13776_s6 + $0xb4c] sm:$0xf]  ;;  %v15703_v54 = vadd.f32 %v7632_v43, %v7620_v23 }
 0x377   : > { %7846 = vmatpush.bf16.msra.mxu0 %v9467_v36  ;;  %v9800_v45 = vld [vmem:[%s13776_s6 + $0xb58] sm:$0xf0]  ;;  %v9547_v36 = vor.u32 %v12744_v1, %v9544_v40  ;;  %v12740_v59 = vld [vmem:[%s13776_s6 + $0x92c] sm:$0xf] }
 0x378   : > { %7859 = vmatpush.bf16.msra.mxu1 %v9595_v29  ;;  %v9675_v29 = vor.u32 %v12776_v26, %v9672_v42  ;;  %v9400_v2 = vld [vmem:[%s13776_s6 + $0x838] sm:$0xf0]  ;;  %v9803_v31 = vor.u32 %v12808_v44, %v9800_v45  ;;  %v12772_v60 = vld [vmem:[%s13776_s6 + $0xa2c] sm:$0xf] }
 0x379   : > { %7872 = vmatpush.bf16.msra.mxu2 %v9723_v58  ;;  %v12708_v58 = vld [vmem:[%s13776_s6 + $0x82c] sm:$0xf]  ;;  %v9656_v17 = vld [vmem:[%s13776_s6 + $0xa38] sm:$0xf0] }
 0x37a   : > { %7885 = vmatpush.bf16.msra.mxu3 %v9851_v32  ;;  %v9528_v32 = vld [vmem:[%s13776_s6 + $0x938] sm:$0xf0]  ;;  %v12804_v50 = vld [vmem:[%s13776_s6 + $0xb2c] sm:$0xf]  ;;  %v9403_v55 = vor.u32 %v12708_v58, %v9400_v2  ;;  %v9659_v18 = vor.u32 %v12772_v60, %v9656_v17 }
 0x37b   : > { %7847 = vmatpush.bf16.msra.mxu0 %v9451_v16  ;;  %v9784_v61 = vld [vmem:[%s13776_s6 + $0xb38] sm:$0xf0]  ;;  %v12704_v6 = vld [vmem:[%s13776_s6 + $0x80c] sm:$0xf]  ;;  %v9531_v16 = vor.u32 %v12740_v59, %v9528_v32  ;;  %v7621_v62 = vpop.f32.mrf.mxu2 }
 0x37c   : > { %7860 = vmatpush.bf16.msra.mxu1 %v9579_v19  ;;  %v9384_v38 = vld [vmem:[%s13776_s6 + $0x818] sm:$0xf0]  ;;  %v12736_v19 = vld [vmem:[%s13776_s6 + $0x90c] sm:$0xf]  ;;  %v9787_v24 = vor.u32 %v12804_v50, %v9784_v61  ;;  %v7634_v34 = vpop.f32.mrf.mxu3 }
 0x37d   : > { %7873 = vmatpush.bf16.msra.mxu2 %v9707_v57  ;;  %v9512_v57 = vld [vmem:[%s13776_s6 + $0x918] sm:$0xf0]  ;;  %v12768_v53 = vld [vmem:[%s13776_s6 + $0xa0c] sm:$0xf] }
 0x37e   : > { %7886 = vmatpush.bf16.msra.mxu3 %v9835_v27  ;;  %v9640_v25 = vld [vmem:[%s13776_s6 + $0xa18] sm:$0xf0]  ;;  %v12800_v27 = vld [vmem:[%s13776_s6 + $0xb0c] sm:$0xf]  ;;  %v9515_v22 = vor.u32 %v12736_v19, %v9512_v57 }
 0x37f   : > { %7848 = vmatpush.bf16.msra.mxu0 %v9435_v7  ;;  %v9768_v56 = vld [vmem:[%s13776_s6 + $0xb18] sm:$0xf0]  ;;  %v12860_v30 = vld [vmem:[%s13776_s6 + $0xcec] sm:$0xf]  ;;  %v9387_v7 = vor.u32 %v12704_v6, %v9384_v38  ;;  %v9643_v1 = vor.u32 %v12768_v53, %v9640_v25 }
 0x380   : > { %7861 = vmatpush.bf16.msra.mxu1 %v9563_v35  ;;  %v10008_v20 = vld [vmem:[%s13776_s6 + $0xcf8] sm:$0xf0]  ;;  %v12892_v33 = vld [vmem:[%s13776_s6 + $0xdec] sm:$0xf]  ;;  %v9771_v40 = vor.u32 %v12800_v27, %v9768_v56 }
 0x381   : > { %7874 = vmatpush.bf16.msra.mxu2 %v9691_v37  ;;  %v10136_v35 = vld [vmem:[%s13776_s6 + $0xdf8] sm:$0xf0]  ;;  %v12924_v37 = vld [vmem:[%s13776_s6 + $0xeec] sm:$0xf]  ;;  %v10011_v26 = vor.u32 %v12860_v30, %v10008_v20 }
 0x382   : > { %7887 = vmatpush.bf16.msra.mxu3 %v9819_v14  ;;  %v10264_v21 = vld [vmem:[%s13776_s6 + $0xef8] sm:$0xf0]  ;;  %v12956_v14 = vld [vmem:[%s13776_s6 + $0xfec] sm:$0xf]  ;;  %v10139_v42 = vor.u32 %v12892_v33, %v10136_v35 }
 0x383   : > { %7849 = vmatpush.bf16.msra.mxu0 %v9419_v41  ;;  %v10392_v28 = vld [vmem:[%s13776_s6 + $0xff8] sm:$0xf0]  ;;  %v10267_v23 = vor.u32 %v12924_v37, %v10264_v21  ;;  %v12856_v43 = vld [vmem:[%s13776_s6 + $0xccc] sm:$0xf] }
 0x384   : > { %7862 = vmatpush.bf16.msra.mxu1 %v9547_v36  ;;  %v9992_v44 = vld [vmem:[%s13776_s6 + $0xcd8] sm:$0xf0]  ;;  %v12888_v45 = vld [vmem:[%s13776_s6 + $0xdcc] sm:$0xf]  ;;  %v10395_v51 = vor.u32 %v12956_v14, %v10392_v28 }
 0x385   : > { %7875 = vmatpush.bf16.msra.mxu2 %v9675_v29  ;;  %v10120_v41 = vld [vmem:[%s13776_s6 + $0xdd8] sm:$0xf0]  ;;  %v12920_v39 = vld [vmem:[%s13776_s6 + $0xecc] sm:$0xf]  ;;  %v9995_v2 = vor.u32 %v12856_v43, %v9992_v44 }
 0x386   : > { %7888 = vmatpush.bf16.msra.mxu3 %v9803_v31  ;;  %v10248_v36 = vld [vmem:[%s13776_s6 + $0xed8] sm:$0xf0]  ;;  %v12952_v29 = vld [vmem:[%s13776_s6 + $0xfcc] sm:$0xf]  ;;  %v10123_v59 = vor.u32 %v12888_v45, %v10120_v41 }
 0x387   : > { %7850 = vmatpush.bf16.msra.mxu0 %v9403_v55  ;;  %v10376_v58 = vld [vmem:[%s13776_s6 + $0xfd8] sm:$0xf0]  ;;  %v10251_v31 = vor.u32 %v12920_v39, %v10248_v36  ;;  %v12852_v32 = vld [vmem:[%s13776_s6 + $0xcac] sm:$0xf] }
 0x388   : > { %7863 = vmatpush.bf16.msra.mxu1 %v9531_v16  ;;  %v9976_v60 = vld [vmem:[%s13776_s6 + $0xcb8] sm:$0xf0]  ;;  %v12884_v17 = vld [vmem:[%s13776_s6 + $0xdac] sm:$0xf]  ;;  %v10379_v50 = vor.u32 %v12952_v29, %v10376_v58 }
 0x389   : > { %7876 = vmatpush.bf16.msra.mxu2 %v9659_v18  ;;  %v10104_v61 = vld [vmem:[%s13776_s6 + $0xdb8] sm:$0xf0]  ;;  %v12916_v55 = vld [vmem:[%s13776_s6 + $0xeac] sm:$0xf] }
 0x38a   : > { %7889 = vmatpush.bf16.msra.mxu3 %v9787_v24  ;;  %v10232_v6 = vld [vmem:[%s13776_s6 + $0xeb8] sm:$0xf0]  ;;  %v12948_v38 = vld [vmem:[%s13776_s6 + $0xfac] sm:$0xf]  ;;  %v10107_v18 = vor.u32 %v12884_v17, %v10104_v61 }
 0x38b   : > { %7851 = vmatpush.bf16.msra.mxu0 %v9387_v7  ;;  %v10360_v16 = vld [vmem:[%s13776_s6 + $0xfb8] sm:$0xf0]  ;;  %v10235_v19 = vor.u32 %v12916_v55, %v10232_v6  ;;  %v12848_v57 = vld [vmem:[%s13776_s6 + $0xc8c] sm:$0xf] }
 0x38c   : > { %7864 = vmatpush.bf16.msra.mxu1 %v9515_v22  ;;  %v9960_v53 = vld [vmem:[%s13776_s6 + $0xc98] sm:$0xf0]  ;;  %v12912_v25 = vld [vmem:[%s13776_s6 + $0xe8c] sm:$0xf]  ;;  %v7658_v33 = vpop.f32.mrf.mxu1 }
 0x38d   : > { %7877 = vmatpush.bf16.msra.mxu2 %v9643_v1  ;;  %v10088_v24 = vld [vmem:[%s13776_s6 + $0xd98] sm:$0xf0]  ;;  %v12944_v56 = vld [vmem:[%s13776_s6 + $0xf8c] sm:$0xf]  ;;  %v9963_v20 = vor.u32 %v12848_v57, %v9960_v53 }
 0x38e   : > { %7890 = vmatpush.bf16.msra.mxu3 %v9771_v40  ;;  %7852 = vmatmul.bf16.vlgmr.msra.gmra.mxu0 %v14024_v8  ;;  %v9979_v8 = vor.u32 %v12852_v32, %v9976_v60  ;;  %v10216_v27 = vld [vmem:[%s13776_s6 + $0xe98] sm:$0xf0]  ;;  %v12844_v35 = vld [vmem:[%s13776_s6 + $0xc6c] sm:$0xf] }
 0x38f   : > { %7896 = vmatpush.bf16.msrb.mxu0 %v10011_v26  ;;  %7865 = vmatmul.bf16.vlgmr.msra.gmra.mxu1 %v14030_v12  ;;  %v10363_v12 = vor.u32 %v12948_v38, %v10360_v16  ;;  %v10344_v62 = vld [vmem:[%s13776_s6 + $0xf98] sm:$0xf0]  ;;  %v10219_v7 = vor.u32 %v12912_v25, %v10216_v27  ;;  %v12876_v21 = vld [vmem:[%s13776_s6 + $0xd6c] sm:$0xf] }
 0x390   : > { %7909 = vmatpush.bf16.msrb.mxu1 %v10139_v42  ;;  %7878 = vmatmul.bf16.vlgmr.msra.gmra.mxu2 %v14028_v11  ;;  %v12880_v11 = vld [vmem:[%s13776_s6 + $0xd8c] sm:$0xf]  ;;  %v9944_v37 = vld [vmem:[%s13776_s6 + $0xc78] sm:$0xf0]  ;;  %v10347_v22 = vor.u32 %v12944_v56, %v10344_v62 }
 0x391   : > { %7922 = vmatpush.bf16.msrb.mxu2 %v10267_v23  ;;  %7891 = vmatmul.bf16.vlgmr.msra.gmra.mxu3 %v14033_v15  ;;  %v7645_v15 = vpop.f32.mrf.mxu0  ;;  %v10091_v34 = vor.u32 %v12880_v11, %v10088_v24  ;;  %v10072_v14 = vld [vmem:[%s13776_s6 + $0xd78] sm:$0xf0]  ;;  %v12908_v28 = vld [vmem:[%s13776_s6 + $0xe6c] sm:$0xf]  ;;  %v9947_v42 = vor.u32 %v12844_v35, %v9944_v37 }
 0x392   : > { %7935 = vmatpush.bf16.msrb.mxu3 %v10395_v51  ;;  %v7646_v30 = vadd.f32 %v7645_v15, %v15703_v54  ;;  %v10200_v54 = vld [vmem:[%s13776_s6 + $0xe78] sm:$0xf0]  ;;  %v12940_v40 = vld [vmem:[%s13776_s6 + $0xf6c] sm:$0xf]  ;;  %v10075_v23 = vor.u32 %v12876_v21, %v10072_v14 }
 0x393   : > { %7897 = vmatpush.bf16.msrb.mxu0 %v9995_v2  ;;  %v10328_v26 = vld [vmem:[%s13776_s6 + $0xf78] sm:$0xf0]  ;;  %v10203_v43 = vor.u32 %v12908_v28, %v10200_v54  ;;  %v12840_v44 = vld [vmem:[%s13776_s6 + $0xc4c] sm:$0xf]  ;;  %v7671_v39 = vpop.f32.mrf.mxu2 }
 0x394   : > { %7910 = vmatpush.bf16.msrb.mxu1 %v10123_v59  ;;  %v7659_v1 = vadd.f32 %v7658_v33, %v7646_v30  ;;  %v9928_v45 = vld [vmem:[%s13776_s6 + $0xc58] sm:$0xf0]  ;;  %v12872_v51 = vld [vmem:[%s13776_s6 + $0xd4c] sm:$0xf]  ;;  %v10331_v41 = vor.u32 %v12940_v40, %v10328_v26  ;;  %v7684_v59 = vpop.f32.mrf.mxu3 }
 0x395   : > { %7923 = vmatpush.bf16.msrb.mxu2 %v10251_v31  ;;  %v10056_v36 = vld [vmem:[%s13776_s6 + $0xd58] sm:$0xf0]  ;;  %v12904_v29 = vld [vmem:[%s13776_s6 + $0xe4c] sm:$0xf]  ;;  %v9931_v17 = vor.u32 %v12840_v44, %v9928_v45 }
 0x396   : > { %7936 = vmatpush.bf16.msrb.mxu3 %v10379_v50  ;;  %v10184_v58 = vld [vmem:[%s13776_s6 + $0xe58] sm:$0xf0]  ;;  %v7672_v2 = vadd.f32 %v7671_v39, %v7659_v1  ;;  %v12936_v31 = vld [vmem:[%s13776_s6 + $0xf4c] sm:$0xf]  ;;  %v7660_v50 = vpop.f32.mrf.mxu1  ;;  %v10059_v55 = vor.u32 %v12872_v51, %v10056_v36 }
 0x397   : > { %7898 = vmatpush.bf16.msrb.mxu0 %v9979_v8  ;;  %v10312_v32 = vld [vmem:[%s13776_s6 + $0xf58] sm:$0xf0]  ;;  %v10187_v6 = vor.u32 %v12904_v29, %v10184_v58  ;;  %v12836_v38 = vld [vmem:[%s13776_s6 + $0xc2c] sm:$0xf] }
 0x398   : > { %7911 = vmatpush.bf16.msrb.mxu1 %v10107_v18  ;;  %v15774_v61 = vadd.f32 %v7684_v59, %v7672_v2  ;;  %v9912_v16 = vld [vmem:[%s13776_s6 + $0xc38] sm:$0xf0]  ;;  %v12868_v8 = vld [vmem:[%s13776_s6 + $0xd2c] sm:$0xf]  ;;  %v10315_v18 = vor.u32 %v12936_v31, %v10312_v32 }
 0x399   : > { %7924 = vmatpush.bf16.msrb.mxu2 %v10235_v19  ;;  %v7647_v60 = vpop.f32.mrf.mxu0  ;;  %v10040_v19 = vld [vmem:[%s13776_s6 + $0xd38] sm:$0xf0]  ;;  %v12900_v57 = vld [vmem:[%s13776_s6 + $0xe2c] sm:$0xf]  ;;  %v9915_v24 = vor.u32 %v12836_v38, %v9912_v16 }
 0x39a   : > { %7937 = vmatpush.bf16.msrb.mxu3 %v10363_v12  ;;  %v10168_v53 = vld [vmem:[%s13776_s6 + $0xe38] sm:$0xf0]  ;;  %v12932_v11 = vld [vmem:[%s13776_s6 + $0xf2c] sm:$0xf]  ;;  %v10043_v15 = vor.u32 %v12868_v8, %v10040_v19 }
 0x39b   : > { %7899 = vmatpush.bf16.msrb.mxu0 %v9963_v20  ;;  %v10296_v12 = vld [vmem:[%s13776_s6 + $0xf38] sm:$0xf0]  ;;  %v12832_v25 = vld [vmem:[%s13776_s6 + $0xc0c] sm:$0xf]  ;;  %v10171_v56 = vor.u32 %v12900_v57, %v10168_v53  ;;  %v7673_v37 = vpop.f32.mrf.mxu2 }
 0x39c   : > { %7912 = vmatpush.bf16.msrb.mxu1 %v10091_v34  ;;  %v9896_v27 = vld [vmem:[%s13776_s6 + $0xc18] sm:$0xf0]  ;;  %v12864_v62 = vld [vmem:[%s13776_s6 + $0xd0c] sm:$0xf]  ;;  %v10299_v33 = vor.u32 %v12932_v11, %v10296_v12  ;;  %v7686_v14 = vpop.f32.mrf.mxu3 }
 0x39d   : > { %7925 = vmatpush.bf16.msrb.mxu2 %v10219_v7  ;;  %v10024_v30 = vld [vmem:[%s13776_s6 + $0xd18] sm:$0xf0]  ;;  %v12896_v20 = vld [vmem:[%s13776_s6 + $0xe0c] sm:$0xf]  ;;  %v9899_v28 = vor.u32 %v12832_v25, %v9896_v27 }
 0x39e   : > { %7938 = vmatpush.bf16.msrb.mxu3 %v10347_v22  ;;  %v10152_v34 = vld [vmem:[%s13776_s6 + $0xe18] sm:$0xf0]  ;;  %v12928_v7 = vld [vmem:[%s13776_s6 + $0xf0c] sm:$0xf] }
 0x39f   : > { %7900 = vmatpush.bf16.msrb.mxu0 %v9947_v42  ;;  %v10280_v35 = vld [vmem:[%s13776_s6 + $0xf18] sm:$0xf0]  ;;  %v12988_v21 = vld [vmem:[%s13776_s6 + $0x10ec] sm:$0xf]  ;;  %v10027_v42 = vor.u32 %v12864_v62, %v10024_v30 }
 0x3a0   : > { %7913 = vmatpush.bf16.msrb.mxu1 %v10075_v23  ;;  %v10520_v22 = vld [vmem:[%s13776_s6 + $0x10f8] sm:$0xf0]  ;;  %v13020_v1 = vld [vmem:[%s13776_s6 + $0x11ec] sm:$0xf]  ;;  %v10155_v23 = vor.u32 %v12896_v20, %v10152_v34  ;;  %v10283_v45 = vor.u32 %v12928_v7, %v10280_v35 }
 0x3a1   : > { %7926 = vmatpush.bf16.msrb.mxu2 %v10203_v43  ;;  %v10648_v54 = vld [vmem:[%s13776_s6 + $0x11f8] sm:$0xf0]  ;;  %v13052_v40 = vld [vmem:[%s13776_s6 + $0x12ec] sm:$0xf]  ;;  %v10523_v51 = vor.u32 %v12988_v21, %v10520_v22 }
 0x3a2   : > { %7939 = vmatpush.bf16.msrb.mxu3 %v10331_v41  ;;  %v10776_v26 = vld [vmem:[%s13776_s6 + $0x12f8] sm:$0xf0]  ;;  %v13084_v43 = vld [vmem:[%s13776_s6 + $0x13ec] sm:$0xf]  ;;  %v10651_v41 = vor.u32 %v13020_v1, %v10648_v54 }
 0x3a3   : > { %7901 = vmatpush.bf16.msrb.mxu0 %v9931_v17  ;;  %v10904_v44 = vld [vmem:[%s13776_s6 + $0x13f8] sm:$0xf0]  ;;  %v10779_v39 = vor.u32 %v13052_v40, %v10776_v26  ;;  %v12984_v36 = vld [vmem:[%s13776_s6 + $0x10cc] sm:$0xf] }
 0x3a4   : > { %7914 = vmatpush.bf16.msrb.mxu1 %v10059_v55  ;;  %v10504_v29 = vld [vmem:[%s13776_s6 + $0x10d8] sm:$0xf0]  ;;  %v13016_v58 = vld [vmem:[%s13776_s6 + $0x11cc] sm:$0xf]  ;;  %v10907_v2 = vor.u32 %v13084_v43, %v10904_v44 }
 0x3a5   : > { %7927 = vmatpush.bf16.msrb.mxu2 %v10187_v6  ;;  %v10632_v59 = vld [vmem:[%s13776_s6 + $0x11d8] sm:$0xf0]  ;;  %v13048_v31 = vld [vmem:[%s13776_s6 + $0x12cc] sm:$0xf]  ;;  %v10507_v50 = vor.u32 %v12984_v36, %v10504_v29 }
 0x3a6   : > { %7940 = vmatpush.bf16.msrb.mxu3 %v10315_v18  ;;  %v10760_v32 = vld [vmem:[%s13776_s6 + $0x12d8] sm:$0xf0]  ;;  %v13080_v60 = vld [vmem:[%s13776_s6 + $0x13cc] sm:$0xf]  ;;  %v10635_v55 = vor.u32 %v13016_v58, %v10632_v59 }
 0x3a7   : > { %7902 = vmatpush.bf16.msrb.mxu0 %v9915_v24  ;;  %v10888_v17 = vld [vmem:[%s13776_s6 + $0x13d8] sm:$0xf0]  ;;  %v10763_v6 = vor.u32 %v13048_v31, %v10760_v32  ;;  %v12980_v38 = vld [vmem:[%s13776_s6 + $0x10ac] sm:$0xf] }
 0x3a8   : > { %7915 = vmatpush.bf16.msrb.mxu1 %v10043_v15  ;;  %v10488_v16 = vld [vmem:[%s13776_s6 + $0x10b8] sm:$0xf0]  ;;  %v13012_v8 = vld [vmem:[%s13776_s6 + $0x11ac] sm:$0xf]  ;;  %v10891_v18 = vor.u32 %v13080_v60, %v10888_v17 }
 0x3a9   : > { %7928 = vmatpush.bf16.msrb.mxu2 %v10171_v56  ;;  %v10616_v19 = vld [vmem:[%s13776_s6 + $0x11b8] sm:$0xf0]  ;;  %v13044_v57 = vld [vmem:[%s13776_s6 + $0x12ac] sm:$0xf] }
 0x3aa   : > { %7941 = vmatpush.bf16.msrb.mxu3 %v10299_v33  ;;  %v10744_v53 = vld [vmem:[%s13776_s6 + $0x12b8] sm:$0xf0]  ;;  %v13076_v11 = vld [vmem:[%s13776_s6 + $0x13ac] sm:$0xf]  ;;  %v10619_v24 = vor.u32 %v13012_v8, %v10616_v19 }
 0x3ab   : > { %7903 = vmatpush.bf16.msrb.mxu0 %v9899_v28  ;;  %v10872_v12 = vld [vmem:[%s13776_s6 + $0x13b8] sm:$0xf0]  ;;  %v10747_v25 = vor.u32 %v13044_v57, %v10744_v53  ;;  %v12976_v27 = vld [vmem:[%s13776_s6 + $0x108c] sm:$0xf] }
 0x3ac   : > { %7916 = vmatpush.bf16.msrb.mxu1 %v10027_v42  ;;  %v10472_v15 = vld [vmem:[%s13776_s6 + $0x1098] sm:$0xf0]  ;;  %v13040_v62 = vld [vmem:[%s13776_s6 + $0x128c] sm:$0xf]  ;;  %v7710_v35 = vpop.f32.mrf.mxu1 }
 0x3ad   : > { %7929 = vmatpush.bf16.msrb.mxu2 %v10155_v23  ;;  %v10600_v56 = vld [vmem:[%s13776_s6 + $0x1198] sm:$0xf0]  ;;  %v13072_v20 = vld [vmem:[%s13776_s6 + $0x138c] sm:$0xf]  ;;  %v10475_v7 = vor.u32 %v12976_v27, %v10472_v15 }
 0x3ae   : > { %7942 = vmatpush.bf16.msrb.mxu3 %v10283_v45  ;;  %7904 = vmatmul.bf16.vlgmr.msrb.gmra.mxu0 %v14090_v46  ;;  %v10491_v46 = vor.u32 %v12980_v38, %v10488_v16  ;;  %v10728_v30 = vld [vmem:[%s13776_s6 + $0x1298] sm:$0xf0]  ;;  %v12972_v22 = vld [vmem:[%s13776_s6 + $0x106c] sm:$0xf] }
 0x3af   : > { %7948 = vmatpush.bf16.msra.mxu0 %v10523_v51  ;;  %7917 = vmatmul.bf16.vlgmr.msrb.gmra.mxu1 %v14094_v48  ;;  %v10875_v48 = vor.u32 %v13076_v11, %v10872_v12  ;;  %v10856_v33 = vld [vmem:[%s13776_s6 + $0x1398] sm:$0xf0]  ;;  %v10731_v21 = vor.u32 %v13040_v62, %v10728_v30  ;;  %v13004_v14 = vld [vmem:[%s13776_s6 + $0x116c] sm:$0xf] }
 0x3b0   : > { %7961 = vmatpush.bf16.msra.mxu1 %v10651_v41  ;;  %7930 = vmatmul.bf16.vlgmr.msrb.gmra.mxu2 %v14092_v47  ;;  %v13008_v47 = vld [vmem:[%s13776_s6 + $0x118c] sm:$0xf]  ;;  %v10456_v1 = vld [vmem:[%s13776_s6 + $0x1078] sm:$0xf0]  ;;  %v10859_v28 = vor.u32 %v13072_v20, %v10856_v33 }
 0x3b1   : > { %7974 = vmatpush.bf16.msra.mxu2 %v10779_v39  ;;  %7943 = vmatmul.bf16.vlgmr.msrb.gmra.mxu3 %v14096_v49  ;;  %v7697_v49 = vpop.f32.mrf.mxu0  ;;  %v10603_v37 = vor.u32 %v13008_v47, %v10600_v56  ;;  %v10584_v40 = vld [vmem:[%s13776_s6 + $0x1178] sm:$0xf0]  ;;  %v13036_v26 = vld [vmem:[%s13776_s6 + $0x126c] sm:$0xf]  ;;  %v10459_v43 = vor.u32 %v12972_v22, %v10456_v1 }
 0x3b2   : > { %7987 = vmatpush.bf16.msra.mxu3 %v10907_v2  ;;  %v7698_v34 = vadd.f32 %v7697_v49, %v15774_v61  ;;  %v10712_v61 = vld [vmem:[%s13776_s6 + $0x1278] sm:$0xf0]  ;;  %v13068_v42 = vld [vmem:[%s13776_s6 + $0x136c] sm:$0xf]  ;;  %v10587_v44 = vor.u32 %v13004_v14, %v10584_v40 }
 0x3b3   : > { %7949 = vmatpush.bf16.msra.mxu0 %v10507_v50  ;;  %v10840_v23 = vld [vmem:[%s13776_s6 + $0x1378] sm:$0xf0]  ;;  %v10715_v45 = vor.u32 %v13036_v26, %v10712_v61  ;;  %v12968_v51 = vld [vmem:[%s13776_s6 + $0x104c] sm:$0xf]  ;;  %v7723_v29 = vpop.f32.mrf.mxu2 }
 0x3b4   : > { %7962 = vmatpush.bf16.msra.mxu1 %v10635_v55  ;;  %v7711_v54 = vadd.f32 %v7710_v35, %v7698_v34  ;;  %v10440_v41 = vld [vmem:[%s13776_s6 + $0x1058] sm:$0xf0]  ;;  %v13000_v39 = vld [vmem:[%s13776_s6 + $0x114c] sm:$0xf]  ;;  %v10843_v36 = vor.u32 %v13068_v42, %v10840_v23  ;;  %v7736_v32 = vpop.f32.mrf.mxu3 }
 0x3b5   : > { %7975 = vmatpush.bf16.msra.mxu2 %v10763_v6  ;;  %v10568_v58 = vld [vmem:[%s13776_s6 + $0x1158] sm:$0xf0]  ;;  %v13032_v2 = vld [vmem:[%s13776_s6 + $0x124c] sm:$0xf]  ;;  %v10443_v55 = vor.u32 %v12968_v51, %v10440_v41  ;;  %v7712_v6 = vpop.f32.mrf.mxu1 }
 0x3b6   : > { %7988 = vmatpush.bf16.msra.mxu3 %v10891_v18  ;;  %v10696_v59 = vld [vmem:[%s13776_s6 + $0x1258] sm:$0xf0]  ;;  %v7724_v31 = vadd.f32 %v7723_v29, %v7711_v54  ;;  %v13064_v60 = vld [vmem:[%s13776_s6 + $0x134c] sm:$0xf]  ;;  %v10571_v16 = vor.u32 %v13000_v39, %v10568_v58 }
 0x3b7   : > { %7950 = vmatpush.bf16.msra.mxu0 %v10491_v46  ;;  %v10824_v17 = vld [vmem:[%s13776_s6 + $0x1358] sm:$0xf0]  ;;  %v10699_v8 = vor.u32 %v13032_v2, %v10696_v59  ;;  %v12964_v18 = vld [vmem:[%s13776_s6 + $0x102c] sm:$0xf] }
 0x3b8   : > { %7963 = vmatpush.bf16.msra.mxu1 %v10619_v24  ;;  %v15845_v38 = vadd.f32 %v7736_v32, %v7724_v31  ;;  %v10424_v19 = vld [vmem:[%s13776_s6 + $0x1038] sm:$0xf0]  ;;  %v12996_v57 = vld [vmem:[%s13776_s6 + $0x112c] sm:$0xf]  ;;  %v10827_v53 = vor.u32 %v13064_v60, %v10824_v17 }
 0x3b9   : > { %7976 = vmatpush.bf16.msra.mxu2 %v10747_v25  ;;  %v7699_v50 = vpop.f32.mrf.mxu0  ;;  %v10552_v11 = vld [vmem:[%s13776_s6 + $0x1138] sm:$0xf0]  ;;  %v13028_v12 = vld [vmem:[%s13776_s6 + $0x122c] sm:$0xf]  ;;  %v10427_v27 = vor.u32 %v12964_v18, %v10424_v19 }
 0x3ba   : > { %7989 = vmatpush.bf16.msra.mxu3 %v10875_v48  ;;  %v10680_v46 = vld [vmem:[%s13776_s6 + $0x1238] sm:$0xf0]  ;;  %v13060_v24 = vld [vmem:[%s13776_s6 + $0x132c] sm:$0xf]  ;;  %v10555_v48 = vor.u32 %v12996_v57, %v10552_v11 }
 0x3bb   : > { %7951 = vmatpush.bf16.msra.mxu0 %v10475_v7  ;;  %v10808_v25 = vld [vmem:[%s13776_s6 + $0x1338] sm:$0xf0]  ;;  %v12960_v15 = vld [vmem:[%s13776_s6 + $0x100c] sm:$0xf]  ;;  %v10683_v56 = vor.u32 %v13028_v12, %v10680_v46  ;;  %v7725_v35 = vpop.f32.mrf.mxu2 }
 0x3bc   : > { %7964 = vmatpush.bf16.msra.mxu1 %v10603_v37  ;;  %v10408_v47 = vld [vmem:[%s13776_s6 + $0x1018] sm:$0xf0]  ;;  %v12992_v62 = vld [vmem:[%s13776_s6 + $0x110c] sm:$0xf]  ;;  %v10811_v20 = vor.u32 %v13060_v24, %v10808_v25  ;;  %v7738_v1 = vpop.f32.mrf.mxu3 }
 0x3bd   : > { %7977 = vmatpush.bf16.msra.mxu2 %v10731_v21  ;;  %v10536_v30 = vld [vmem:[%s13776_s6 + $0x1118] sm:$0xf0]  ;;  %v13024_v49 = vld [vmem:[%s13776_s6 + $0x120c] sm:$0xf]  ;;  %v10411_v14 = vor.u32 %v12960_v15, %v10408_v47 }
 0x3be   : > { %7990 = vmatpush.bf16.msra.mxu3 %v10859_v28  ;;  %v10664_v33 = vld [vmem:[%s13776_s6 + $0x1218] sm:$0xf0]  ;;  %v13056_v34 = vld [vmem:[%s13776_s6 + $0x130c] sm:$0xf]  ;;  %v10539_v26 = vor.u32 %v12992_v62, %v10536_v30 }
 0x3bf   : > { %7952 = vmatpush.bf16.msra.mxu0 %v10459_v43  ;;  %v10792_v7 = vld [vmem:[%s13776_s6 + $0x1318] sm:$0xf0]  ;;  %v13116_v37 = vld [vmem:[%s13776_s6 + $0x14ec] sm:$0xf]  ;;  %v10667_v61 = vor.u32 %v13024_v49, %v10664_v33 }
 0x3c0   : > { %7965 = vmatpush.bf16.msra.mxu1 %v10587_v44  ;;  %v11032_v21 = vld [vmem:[%s13776_s6 + $0x14f8] sm:$0xf0]  ;;  %v13148_v22 = vld [vmem:[%s13776_s6 + $0x15ec] sm:$0xf]  ;;  %v10795_v43 = vor.u32 %v13056_v34, %v10792_v7 }
 0x3c1   : > { %7978 = vmatpush.bf16.msra.mxu2 %v10715_v45  ;;  %v11160_v28 = vld [vmem:[%s13776_s6 + $0x15f8] sm:$0xf0]  ;;  %v13180_v54 = vld [vmem:[%s13776_s6 + $0x16ec] sm:$0xf]  ;;  %v11035_v44 = vor.u32 %v13116_v37, %v11032_v21 }
 0x3c2   : > { %7991 = vmatpush.bf16.msra.mxu3 %v10843_v36  ;;  %v11288_v40 = vld [vmem:[%s13776_s6 + $0x16f8] sm:$0xf0]  ;;  %v13212_v42 = vld [vmem:[%s13776_s6 + $0x17ec] sm:$0xf]  ;;  %v11163_v45 = vor.u32 %v13148_v22, %v11160_v28 }
 0x3c3   : > { %7953 = vmatpush.bf16.msra.mxu0 %v10443_v55  ;;  %v11416_v23 = vld [vmem:[%s13776_s6 + $0x17f8] sm:$0xf0]  ;;  %v11291_v51 = vor.u32 %v13180_v54, %v11288_v40  ;;  %v13112_v41 = vld [vmem:[%s13776_s6 + $0x14cc] sm:$0xf] }
 0x3c4   : > { %7966 = vmatpush.bf16.msra.mxu1 %v10571_v16  ;;  %v11016_v39 = vld [vmem:[%s13776_s6 + $0x14d8] sm:$0xf0]  ;;  %v13144_v36 = vld [vmem:[%s13776_s6 + $0x15cc] sm:$0xf]  ;;  %v11419_v29 = vor.u32 %v13212_v42, %v11416_v23 }
 0x3c5   : > { %7979 = vmatpush.bf16.msra.mxu2 %v10699_v8  ;;  %v11144_v58 = vld [vmem:[%s13776_s6 + $0x15d8] sm:$0xf0]  ;;  %v13176_v2 = vld [vmem:[%s13776_s6 + $0x16cc] sm:$0xf]  ;;  %v11019_v60 = vor.u32 %v13112_v41, %v11016_v39 }
 0x3c6   : > { %7992 = vmatpush.bf16.msra.mxu3 %v10827_v53  ;;  %v11272_v59 = vld [vmem:[%s13776_s6 + $0x16d8] sm:$0xf0]  ;;  %v13208_v31 = vld [vmem:[%s13776_s6 + $0x17cc] sm:$0xf]  ;;  %v11147_v17 = vor.u32 %v13144_v36, %v11144_v58 }
 0x3c7   : > { %7954 = vmatpush.bf16.msra.mxu0 %v10427_v27  ;;  %v11400_v32 = vld [vmem:[%s13776_s6 + $0x17d8] sm:$0xf0]  ;;  %v11275_v50 = vor.u32 %v13176_v2, %v11272_v59  ;;  %v13108_v55 = vld [vmem:[%s13776_s6 + $0x14ac] sm:$0xf] }
 0x3c8   : > { %7967 = vmatpush.bf16.msra.mxu1 %v10555_v48  ;;  %v11000_v6 = vld [vmem:[%s13776_s6 + $0x14b8] sm:$0xf0]  ;;  %v13140_v16 = vld [vmem:[%s13776_s6 + $0x15ac] sm:$0xf]  ;;  %v11403_v8 = vor.u32 %v13208_v31, %v11400_v32 }
 0x3c9   : > { %7980 = vmatpush.bf16.msra.mxu2 %v10683_v56  ;;  %v11128_v18 = vld [vmem:[%s13776_s6 + $0x15b8] sm:$0xf0]  ;;  %v13172_v19 = vld [vmem:[%s13776_s6 + $0x16ac] sm:$0xf] }
 0x3ca   : > { %7993 = vmatpush.bf16.msra.mxu3 %v10811_v20  ;;  %v11256_v57 = vld [vmem:[%s13776_s6 + $0x16b8] sm:$0xf0]  ;;  %v13204_v53 = vld [vmem:[%s13776_s6 + $0x17ac] sm:$0xf]  ;;  %v11131_v12 = vor.u32 %v13140_v16, %v11128_v18 }
 0x3cb   : > { %7955 = vmatpush.bf16.msra.mxu0 %v10411_v14  ;;  %v11384_v11 = vld [vmem:[%s13776_s6 + $0x17b8] sm:$0xf0]  ;;  %v11259_v46 = vor.u32 %v13172_v19, %v11256_v57  ;;  %v13104_v24 = vld [vmem:[%s13776_s6 + $0x148c] sm:$0xf]  ;;  %v7749_v62 = vpop.f32.mrf.mxu0 }
 0x3cc   : > { %7968 = vmatpush.bf16.msra.mxu1 %v10539_v26  ;;  %v10984_v25 = vld [vmem:[%s13776_s6 + $0x1498] sm:$0xf0]  ;;  %v13168_v15 = vld [vmem:[%s13776_s6 + $0x168c] sm:$0xf]  ;;  %v7762_v7 = vpop.f32.mrf.mxu1 }
 0x3cd   : > { %7981 = vmatpush.bf16.msra.mxu2 %v10667_v61  ;;  %v11112_v27 = vld [vmem:[%s13776_s6 + $0x1598] sm:$0xf0]  ;;  %v10987_v56 = vor.u32 %v13104_v24, %v10984_v25  ;;  %v13100_v20 = vld [vmem:[%s13776_s6 + $0x146c] sm:$0xf]  ;;  %v7763_v1 = vadd.f32 %v7762_v7, %v7749_v62 }
 0x3ce   : > { %7994 = vmatpush.bf16.msra.mxu3 %v10795_v43  ;;  %7956 = vmatmul.bf16.vlgmr.msra.gmra.mxu0 %v14179_v5  ;;  %v11003_v5 = vor.u32 %v13108_v55, %v11000_v6  ;;  %v11240_v47 = vld [vmem:[%s13776_s6 + $0x1698] sm:$0xf0]  ;;  %v13132_v34 = vld [vmem:[%s13776_s6 + $0x156c] sm:$0xf] }
 0x3cf   : > { %8000 = vmatpush.bf16.msrb.mxu0 %v11035_v44  ;;  %7969 = vmatmul.bf16.vlgmr.msra.gmra.mxu1 %v14185_v10  ;;  %v11387_v10 = vor.u32 %v13204_v53, %v11384_v11  ;;  %v11368_v48 = vld [vmem:[%s13776_s6 + $0x1798] sm:$0xf0]  ;;  %v11243_v49 = vor.u32 %v13168_v15, %v11240_v47  ;;  %v13164_v21 = vld [vmem:[%s13776_s6 + $0x166c] sm:$0xf] }
 0x3d0   : > { %8013 = vmatpush.bf16.msrb.mxu1 %v11163_v45  ;;  %7982 = vmatmul.bf16.vlgmr.msra.gmra.mxu2 %v14183_v9  ;;  %v13136_v9 = vld [vmem:[%s13776_s6 + $0x158c] sm:$0xf]  ;;  %v10968_v33 = vld [vmem:[%s13776_s6 + $0x1478] sm:$0xf0] }
 0x3d1   : > { %8026 = vmatpush.bf16.msrb.mxu2 %v11291_v51  ;;  %7995 = vmatmul.bf16.vlgmr.msra.gmra.mxu3 %v14187_v13  ;;  %v13200_v13 = vld [vmem:[%s13776_s6 + $0x178c] sm:$0xf]  ;;  %v11115_v30 = vor.u32 %v13136_v9, %v11112_v27  ;;  %v11096_v37 = vld [vmem:[%s13776_s6 + $0x1578] sm:$0xf0]  ;;  %v10971_v54 = vor.u32 %v13100_v20, %v10968_v33 }
 0x3d2   : > { %8039 = vmatpush.bf16.msrb.mxu3 %v11419_v29  ;;  %v11371_v35 = vor.u32 %v13200_v13, %v11368_v48  ;;  %v11224_v22 = vld [vmem:[%s13776_s6 + $0x1678] sm:$0xf0]  ;;  %v13196_v14 = vld [vmem:[%s13776_s6 + $0x176c] sm:$0xf]  ;;  %v11099_v40 = vor.u32 %v13132_v34, %v11096_v37 }
 0x3d3   : > { %8001 = vmatpush.bf16.msrb.mxu0 %v11019_v60  ;;  %v11352_v28 = vld [vmem:[%s13776_s6 + $0x1778] sm:$0xf0]  ;;  %v11227_v26 = vor.u32 %v13164_v21, %v11224_v22  ;;  %v13096_v61 = vld [vmem:[%s13776_s6 + $0x144c] sm:$0xf]  ;;  %v7775_v43 = vpop.f32.mrf.mxu2  ;;  %v7751_v31 = vpop.f32.mrf.mxu0 }
 0x3d4   : > { %8014 = vmatpush.bf16.msrb.mxu1 %v11147_v17  ;;  %v10952_v42 = vld [vmem:[%s13776_s6 + $0x1458] sm:$0xf0]  ;;  %v13128_v23 = vld [vmem:[%s13776_s6 + $0x154c] sm:$0xf]  ;;  %v11355_v44 = vor.u32 %v13196_v14, %v11352_v28  ;;  %v7776_v39 = vadd.f32 %v7775_v43, %v7763_v1  ;;  %v7788_v36 = vpop.f32.mrf.mxu3  ;;  %v7764_v6 = vpop.f32.mrf.mxu1 }
 0x3d5   : > { %8027 = vmatpush.bf16.msrb.mxu2 %v11275_v50  ;;  %v11080_v45 = vld [vmem:[%s13776_s6 + $0x1558] sm:$0xf0]  ;;  %v13160_v51 = vld [vmem:[%s13776_s6 + $0x164c] sm:$0xf]  ;;  %v10955_v2 = vor.u32 %v13096_v61, %v10952_v42 }
 0x3d6   : > { %8040 = vmatpush.bf16.msrb.mxu3 %v11403_v8  ;;  %v11208_v41 = vld [vmem:[%s13776_s6 + $0x1658] sm:$0xf0]  ;;  %v13192_v29 = vld [vmem:[%s13776_s6 + $0x174c] sm:$0xf]  ;;  %v15915_v59 = vadd.f32 %v7788_v36, %v7776_v39  ;;  %v11083_v32 = vor.u32 %v13128_v23, %v11080_v45 }
 0x3d7   : > { %8002 = vmatpush.bf16.msrb.mxu0 %v11003_v5  ;;  %v11336_v58 = vld [vmem:[%s13776_s6 + $0x1758] sm:$0xf0]  ;;  %v11211_v60 = vor.u32 %v13160_v51, %v11208_v41  ;;  %v13092_v17 = vld [vmem:[%s13776_s6 + $0x142c] sm:$0xf] }
 0x3d8   : > { %8015 = vmatpush.bf16.msrb.mxu1 %v11131_v12  ;;  %v10936_v50 = vld [vmem:[%s13776_s6 + $0x1438] sm:$0xf0]  ;;  %v13124_v55 = vld [vmem:[%s13776_s6 + $0x152c] sm:$0xf]  ;;  %v11339_v16 = vor.u32 %v13192_v29, %v11336_v58 }
 0x3d9   : > { %8028 = vmatpush.bf16.msrb.mxu2 %v11259_v46  ;;  %v11064_v8 = vld [vmem:[%s13776_s6 + $0x1538] sm:$0xf0]  ;;  %v13156_v18 = vld [vmem:[%s13776_s6 + $0x162c] sm:$0xf]  ;;  %v10939_v11 = vor.u32 %v13092_v17, %v10936_v50 }
 0x3da   : > { %8041 = vmatpush.bf16.msrb.mxu3 %v11387_v10  ;;  %v11192_v19 = vld [vmem:[%s13776_s6 + $0x1638] sm:$0xf0]  ;;  %v13188_v57 = vld [vmem:[%s13776_s6 + $0x172c] sm:$0xf]  ;;  %v11067_v46 = vor.u32 %v13124_v55, %v11064_v8 }
 0x3db   : > { %8003 = vmatpush.bf16.msrb.mxu0 %v10987_v56  ;;  %v11320_v53 = vld [vmem:[%s13776_s6 + $0x1738] sm:$0xf0]  ;;  %v13088_v5 = vld [vmem:[%s13776_s6 + $0x140c] sm:$0xf]  ;;  %v11195_v24 = vor.u32 %v13156_v18, %v11192_v19  ;;  %v7777_v27 = vpop.f32.mrf.mxu2 }
 0x3dc   : > { %8016 = vmatpush.bf16.msrb.mxu1 %v11115_v30  ;;  %v10920_v12 = vld [vmem:[%s13776_s6 + $0x1418] sm:$0xf0]  ;;  %v13120_v25 = vld [vmem:[%s13776_s6 + $0x150c] sm:$0xf]  ;;  %v11323_v15 = vor.u32 %v13188_v57, %v11320_v53  ;;  %v7790_v56 = vpop.f32.mrf.mxu3 }
 0x3dd   : > { %8029 = vmatpush.bf16.msrb.mxu2 %v11243_v49  ;;  %v11048_v9 = vld [vmem:[%s13776_s6 + $0x1518] sm:$0xf0]  ;;  %v13152_v10 = vld [vmem:[%s13776_s6 + $0x160c] sm:$0xf]  ;;  %v10923_v20 = vor.u32 %v13088_v5, %v10920_v12 }
 0x3de   : > { %8042 = vmatpush.bf16.msrb.mxu3 %v11371_v35  ;;  %v11176_v47 = vld [vmem:[%s13776_s6 + $0x1618] sm:$0xf0]  ;;  %v13184_v13 = vld [vmem:[%s13776_s6 + $0x170c] sm:$0xf]  ;;  %v11051_v35 = vor.u32 %v13120_v25, %v11048_v9 }
 0x3df   : > { %8004 = vmatpush.bf16.msrb.mxu0 %v10971_v54  ;;  %v11304_v48 = vld [vmem:[%s13776_s6 + $0x1718] sm:$0xf0]  ;;  %v13244_v62 = vld [vmem:[%s13776_s6 + $0x18ec] sm:$0xf]  ;;  %v11179_v37 = vor.u32 %v13152_v10, %v11176_v47 }
 0x3e0   : > { %8017 = vmatpush.bf16.msrb.mxu1 %v11099_v40  ;;  %v11544_v30 = vld [vmem:[%s13776_s6 + $0x18f8] sm:$0xf0]  ;;  %v13276_v49 = vld [vmem:[%s13776_s6 + $0x19ec] sm:$0xf]  ;;  %v11307_v1 = vor.u32 %v13184_v13, %v11304_v48 }
 0x3e1   : > { %8030 = vmatpush.bf16.msrb.mxu2 %v11227_v26  ;;  %v11672_v33 = vld [vmem:[%s13776_s6 + $0x19f8] sm:$0xf0]  ;;  %v13308_v34 = vld [vmem:[%s13776_s6 + $0x1aec] sm:$0xf]  ;;  %v11547_v14 = vor.u32 %v13244_v62, %v11544_v30 }
 0x3e2   : > { %8043 = vmatpush.bf16.msrb.mxu3 %v11355_v44  ;;  %v11800_v7 = vld [vmem:[%s13776_s6 + $0x1af8] sm:$0xf0]  ;;  %v13340_v21 = vld [vmem:[%s13776_s6 + $0x1bec] sm:$0xf]  ;;  %v11675_v28 = vor.u32 %v13276_v49, %v11672_v33 }
 0x3e3   : > { %8005 = vmatpush.bf16.msrb.mxu0 %v10955_v2  ;;  %v11928_v22 = vld [vmem:[%s13776_s6 + $0x1bf8] sm:$0xf0]  ;;  %v11803_v54 = vor.u32 %v13308_v34, %v11800_v7  ;;  %v13240_v40 = vld [vmem:[%s13776_s6 + $0x18cc] sm:$0xf] }
 0x3e4   : > { %8018 = vmatpush.bf16.msrb.mxu1 %v11083_v32  ;;  %v11528_v26 = vld [vmem:[%s13776_s6 + $0x18d8] sm:$0xf0]  ;;  %v13272_v61 = vld [vmem:[%s13776_s6 + $0x19cc] sm:$0xf]  ;;  %v11931_v42 = vor.u32 %v13340_v21, %v11928_v22 }
 0x3e5   : > { %8031 = vmatpush.bf16.msrb.mxu2 %v11211_v60  ;;  %v11656_v23 = vld [vmem:[%s13776_s6 + $0x19d8] sm:$0xf0]  ;;  %v13304_v43 = vld [vmem:[%s13776_s6 + $0x1acc] sm:$0xf]  ;;  %v11531_v41 = vor.u32 %v13240_v40, %v11528_v26 }
 0x3e6   : > { %8044 = vmatpush.bf16.msrb.mxu3 %v11339_v16  ;;  %v11784_v44 = vld [vmem:[%s13776_s6 + $0x1ad8] sm:$0xf0]  ;;  %v13336_v45 = vld [vmem:[%s13776_s6 + $0x1bcc] sm:$0xf]  ;;  %v11659_v39 = vor.u32 %v13272_v61, %v11656_v23 }
 0x3e7   : > { %8006 = vmatpush.bf16.msrb.mxu0 %v10939_v11  ;;  %v11912_v51 = vld [vmem:[%s13776_s6 + $0x1bd8] sm:$0xf0]  ;;  %v11787_v36 = vor.u32 %v13304_v43, %v11784_v44  ;;  %v13236_v29 = vld [vmem:[%s13776_s6 + $0x18ac] sm:$0xf] }
 0x3e8   : > { %8019 = vmatpush.bf16.msrb.mxu1 %v11067_v46  ;;  %v11512_v58 = vld [vmem:[%s13776_s6 + $0x18b8] sm:$0xf0]  ;;  %v13268_v2 = vld [vmem:[%s13776_s6 + $0x19ac] sm:$0xf]  ;;  %v11915_v31 = vor.u32 %v13336_v45, %v11912_v51 }
 0x3e9   : > { %8032 = vmatpush.bf16.msrb.mxu2 %v11195_v24  ;;  %v11640_v32 = vld [vmem:[%s13776_s6 + $0x19b8] sm:$0xf0]  ;;  %v13300_v60 = vld [vmem:[%s13776_s6 + $0x1aac] sm:$0xf] }
 0x3ea   : > { %8045 = vmatpush.bf16.msrb.mxu3 %v11323_v15  ;;  %v11768_v17 = vld [vmem:[%s13776_s6 + $0x1ab8] sm:$0xf0]  ;;  %v13332_v50 = vld [vmem:[%s13776_s6 + $0x1bac] sm:$0xf]  ;;  %v11643_v6 = vor.u32 %v13268_v2, %v11640_v32 }
 0x3eb   : > { %8007 = vmatpush.bf16.msrb.mxu0 %v10923_v20  ;;  %v11896_v55 = vld [vmem:[%s13776_s6 + $0x1bb8] sm:$0xf0]  ;;  %v11771_v16 = vor.u32 %v13300_v60, %v11768_v17  ;;  %v13232_v8 = vld [vmem:[%s13776_s6 + $0x188c] sm:$0xf]  ;;  %v7801_v12 = vpop.f32.mrf.mxu0 }
 0x3ec   : > { %8020 = vmatpush.bf16.msrb.mxu1 %v11051_v35  ;;  %v11496_v18 = vld [vmem:[%s13776_s6 + $0x1898] sm:$0xf0]  ;;  %v13296_v57 = vld [vmem:[%s13776_s6 + $0x1a8c] sm:$0xf]  ;;  %v7802_v27 = vadd.f32 %v7801_v12, %v15915_v59  ;;  %v7814_v15 = vpop.f32.mrf.mxu1 }
 0x3ed   : > { %8033 = vmatpush.bf16.msrb.mxu2 %v11179_v37  ;;  %v11624_v19 = vld [vmem:[%s13776_s6 + $0x1998] sm:$0xf0]  ;;  %v13328_v11 = vld [vmem:[%s13776_s6 + $0x1b8c] sm:$0xf]  ;;  %v11499_v5 = vor.u32 %v13232_v8, %v11496_v18 }
 0x3ee   : > { %8046 = vmatpush.bf16.msrb.mxu3 %v11307_v1  ;;  %8008 = vmatmul.bf16.vlgmr.msrb.gmra.mxu0 %v14245_v63  ;;  %v11515_v63 = vor.u32 %v13236_v29, %v11512_v58  ;;  %v11752_v53 = vld [vmem:[%s13776_s6 + $0x1a98] sm:$0xf0]  ;;  %v13228_v25 = vld [vmem:[%s13776_s6 + $0x186c] sm:$0xf]  ;;  %v7815_v49 = vadd.f32 %v7814_v15, %v7802_v27 }
 0x3ef   : > { %8052 = vmatpush.bf16.msra.mxu0 %v11547_v14  ;;  %8021 = vmatmul.bf16.vlgmr.msrb.gmra.mxu1 %v14249_v3  ;;  %v11899_v3 = vor.u32 %v13332_v50, %v11896_v55  ;;  %v11755_v24 = vor.u32 %v13296_v57, %v11752_v53  ;;  %v11480_v9 = vld [vmem:[%s13776_s6 + $0x1878] sm:$0xf0]  ;;  %v13260_v10 = vld [vmem:[%s13776_s6 + $0x196c] sm:$0xf] }
 0x3f0   : > { %8065 = vmatpush.bf16.msra.mxu1 %v11675_v28  ;;  %8034 = vmatmul.bf16.vlgmr.msrb.gmra.mxu2 %v14247_v0  ;;  %v13264_v0 = vld [vmem:[%s13776_s6 + $0x198c] sm:$0xf]  ;;  %v11608_v13 = vld [vmem:[%s13776_s6 + $0x1978] sm:$0xf0]  ;;  %v11483_v20 = vor.u32 %v13228_v25, %v11480_v9 }
 0x3f1   : > { %8078 = vmatpush.bf16.msra.mxu2 %v11803_v54  ;;  %8047 = vmatmul.bf16.vlgmr.msrb.gmra.mxu3 %v14251_v4  ;;  %v11880_v4 = vld [vmem:[%s13776_s6 + $0x1b98] sm:$0xf0]  ;;  %v11627_v46 = vor.u32 %v13264_v0, %v11624_v19  ;;  %v13292_v48 = vld [vmem:[%s13776_s6 + $0x1a6c] sm:$0xf]  ;;  %v11611_v59 = vor.u32 %v13260_v10, %v11608_v13 }
 0x3f2   : > { %8091 = vmatpush.bf16.msra.mxu3 %v11931_v42  ;;  %v11883_v47 = vor.u32 %v13328_v11, %v11880_v4  ;;  %v11736_v56 = vld [vmem:[%s13776_s6 + $0x1a78] sm:$0xf0]  ;;  %v13324_v62 = vld [vmem:[%s13776_s6 + $0x1b6c] sm:$0xf] }
 0x3f3   : > { %8053 = vmatpush.bf16.msra.mxu0 %v11531_v41  ;;  %v11864_v30 = vld [vmem:[%s13776_s6 + $0x1b78] sm:$0xf0]  ;;  %v11739_v33 = vor.u32 %v13292_v48, %v11736_v56  ;;  %v13224_v34 = vld [vmem:[%s13776_s6 + $0x184c] sm:$0xf]  ;;  %v7827_v37 = vpop.f32.mrf.mxu2  ;;  %v7803_v23 = vpop.f32.mrf.mxu0 }
 0x3f4   : > { %8066 = vmatpush.bf16.msra.mxu1 %v11659_v39  ;;  %v11464_v7 = vld [vmem:[%s13776_s6 + $0x1858] sm:$0xf0]  ;;  %v13256_v35 = vld [vmem:[%s13776_s6 + $0x194c] sm:$0xf]  ;;  %v11867_v21 = vor.u32 %v13324_v62, %v11864_v30  ;;  %v7828_v28 = vadd.f32 %v7827_v37, %v7815_v49  ;;  %v7840_v54 = vpop.f32.mrf.mxu3  ;;  %v7816_v39 = vpop.f32.mrf.mxu1 }
 0x3f5   : > { %8079 = vmatpush.bf16.msra.mxu2 %v11787_v36  ;;  %v11592_v22 = vld [vmem:[%s13776_s6 + $0x1958] sm:$0xf0]  ;;  %v13288_v1 = vld [vmem:[%s13776_s6 + $0x1a4c] sm:$0xf]  ;;  %v11467_v61 = vor.u32 %v13224_v34, %v11464_v7 }
 0x3f6   : > { %8092 = vmatpush.bf16.msra.mxu3 %v11915_v31  ;;  %v11720_v14 = vld [vmem:[%s13776_s6 + $0x1a58] sm:$0xf0]  ;;  %v13320_v40 = vld [vmem:[%s13776_s6 + $0x1b4c] sm:$0xf]  ;;  %v15986_v42 = vadd.f32 %v7840_v54, %v7828_v28  ;;  %v11595_v43 = vor.u32 %v13256_v35, %v11592_v22 }
 0x3f7   : > { %8054 = vmatpush.bf16.msra.mxu0 %v11515_v63  ;;  %v11848_v26 = vld [vmem:[%s13776_s6 + $0x1b58] sm:$0xf0]  ;;  %v11723_v44 = vor.u32 %v13288_v1, %v11720_v14  ;;  %v13220_v45 = vld [vmem:[%s13776_s6 + $0x182c] sm:$0xf] }
 0x3f8   : > { %8067 = vmatpush.bf16.msra.mxu1 %v11643_v6  ;;  %v11448_v51 = vld [vmem:[%s13776_s6 + $0x1838] sm:$0xf0]  ;;  %v13252_v41 = vld [vmem:[%s13776_s6 + $0x192c] sm:$0xf]  ;;  %v11851_v36 = vor.u32 %v13320_v40, %v11848_v26 }
 0x3f9   : > { %8080 = vmatpush.bf16.msra.mxu2 %v11771_v16  ;;  %v11576_v29 = vld [vmem:[%s13776_s6 + $0x1938] sm:$0xf0]  ;;  %v13284_v58 = vld [vmem:[%s13776_s6 + $0x1a2c] sm:$0xf]  ;;  %v11451_v60 = vor.u32 %v13220_v45, %v11448_v51 }
 0x3fa   : > { %8093 = vmatpush.bf16.msra.mxu3 %v11899_v3  ;;  %v11704_v2 = vld [vmem:[%s13776_s6 + $0x1a38] sm:$0xf0]  ;;  %v13316_v31 = vld [vmem:[%s13776_s6 + $0x1b2c] sm:$0xf]  ;;  %v11579_v55 = vor.u32 %v13252_v41, %v11576_v29  ;;  %v13553_v41 = vld [vmem:[#allocation1 + $0x1b] sm:$0xff] }
 0x3fb   : > { %8055 = vmatpush.bf16.msra.mxu0 %v11499_v5  ;;  %v11832_v32 = vld [vmem:[%s13776_s6 + $0x1b38] sm:$0xf0]  ;;  %v13216_v17 = vld [vmem:[%s13776_s6 + $0x180c] sm:$0xf]  ;;  %v11707_v63 = vor.u32 %v13284_v58, %v11704_v2  ;;  %v7829_v18 = vpop.f32.mrf.mxu2 }
 0x3fc   : > { %8068 = vmatpush.bf16.msra.mxu1 %v11627_v46  ;;  %v11432_v50 = vld [vmem:[%s13776_s6 + $0x1818] sm:$0xf0]  ;;  %v13248_v6 = vld [vmem:[%s13776_s6 + $0x190c] sm:$0xf]  ;;  %v11835_v0 = vor.u32 %v13316_v31, %v11832_v32  ;;  %v7842_v53 = vpop.f32.mrf.mxu3 }
 0x3fd   : > { %8081 = vmatpush.bf16.msra.mxu2 %v11755_v24  ;;  %v11560_v16 = vld [vmem:[%s13776_s6 + $0x1918] sm:$0xf0]  ;;  %v13280_v8 = vld [vmem:[%s13776_s6 + $0x1a0c] sm:$0xf]  ;;  %v11435_v12 = vor.u32 %v13216_v17, %v11432_v50 }
 0x3fe   : > { %8094 = vmatpush.bf16.msra.mxu3 %v11883_v47  ;;  %v11688_v3 = vld [vmem:[%s13776_s6 + $0x1a18] sm:$0xf0]  ;;  %v13312_v19 = vld [vmem:[%s13776_s6 + $0x1b0c] sm:$0xf]  ;;  %v11563_v9 = vor.u32 %v13248_v6, %v11560_v16 }
 0x3ff   : > { %8056 = vmatpush.bf16.msra.mxu0 %v11483_v20  ;;  %v11816_v57 = vld [vmem:[%s13776_s6 + $0x1b18] sm:$0xf0]  ;;  %v13372_v11 = vld [vmem:[%s13776_s6 + $0x1cec] sm:$0xf]  ;;  %v11691_v10 = vor.u32 %v13280_v8, %v11688_v3 }
 0x400   : > { %8069 = vmatpush.bf16.msra.mxu1 %v11611_v59  ;;  %v12056_v4 = vld [vmem:[%s13776_s6 + $0x1cf8] sm:$0xf0]  ;;  %v13404_v5 = vld [vmem:[%s13776_s6 + $0x1dec] sm:$0xf]  ;;  %v11819_v47 = vor.u32 %v13312_v19, %v11816_v57 }
 0x401   : > { %8082 = vmatpush.bf16.msra.mxu2 %v11739_v33  ;;  %v12184_v46 = vld [vmem:[%s13776_s6 + $0x1df8] sm:$0xf0]  ;;  %v13436_v24 = vld [vmem:[%s13776_s6 + $0x1eec] sm:$0xf]  ;;  %v12059_v13 = vor.u32 %v13372_v11, %v12056_v4 }
 0x402   : > { %8095 = vmatpush.bf16.msra.mxu3 %v11867_v21  ;;  %v12312_v25 = vld [vmem:[%s13776_s6 + $0x1ef8] sm:$0xf0]  ;;  %v13468_v27 = vld [vmem:[%s13776_s6 + $0x1fec] sm:$0xf]  ;;  %v12187_v48 = vor.u32 %v13404_v5, %v12184_v46 }
 0x403   : > { %8057 = vmatpush.bf16.msra.mxu0 %v11467_v61  ;;  %v12440_v15 = vld [vmem:[%s13776_s6 + $0x1ff8] sm:$0xf0]  ;;  %v12315_v56 = vor.u32 %v13436_v24, %v12312_v25  ;;  %v13368_v62 = vld [vmem:[%s13776_s6 + $0x1ccc] sm:$0xf] }
 0x404   : > { %8070 = vmatpush.bf16.msra.mxu1 %v11595_v43  ;;  %v12040_v30 = vld [vmem:[%s13776_s6 + $0x1cd8] sm:$0xf0]  ;;  %v13400_v49 = vld [vmem:[%s13776_s6 + $0x1dcc] sm:$0xf]  ;;  %v12443_v20 = vor.u32 %v13468_v27, %v12440_v15 }
 0x405   : > { %8083 = vmatpush.bf16.msra.mxu2 %v11723_v44  ;;  %v12168_v59 = vld [vmem:[%s13776_s6 + $0x1dd8] sm:$0xf0]  ;;  %v13432_v33 = vld [vmem:[%s13776_s6 + $0x1ecc] sm:$0xf]  ;;  %v12043_v37 = vor.u32 %v13368_v62, %v12040_v30  ;;  %v13552_v44 = vld [vmem:[#allocation1 + $0x9] sm:$0xff] }
 0x406   : > { %8096 = vmatpush.bf16.msra.mxu3 %v11851_v36  ;;  %v12296_v34 = vld [vmem:[%s13776_s6 + $0x1ed8] sm:$0xf0]  ;;  %v13464_v7 = vld [vmem:[%s13776_s6 + $0x1fcc] sm:$0xf]  ;;  %v12171_v21 = vor.u32 %v13400_v49, %v12168_v59 }
 0x407   : > { %8058 = vmatpush.bf16.msra.mxu0 %v11451_v60  ;;  %v12424_v35 = vld [vmem:[%s13776_s6 + $0x1fd8] sm:$0xf0]  ;;  %v12299_v22 = vor.u32 %v13432_v33, %v12296_v34  ;;  %v13364_v1 = vld [vmem:[%s13776_s6 + $0x1cac] sm:$0xf] }
 0x408   : > { %8071 = vmatpush.bf16.msra.mxu1 %v11579_v55  ;;  %v12024_v14 = vld [vmem:[%s13776_s6 + $0x1cb8] sm:$0xf0]  ;;  %v13396_v28 = vld [vmem:[%s13776_s6 + $0x1dac] sm:$0xf]  ;;  %v12427_v40 = vor.u32 %v13464_v7, %v12424_v35 }
 0x409   : > { %8084 = vmatpush.bf16.msra.mxu2 %v11707_v63  ;;  %v13550_v54 = vld [vmem:[#allocation1] sm:$0xff]  ;;  %v13428_v61 = vld [vmem:[%s13776_s6 + $0x1eac] sm:$0xf]  ;;  %v12027_v39 = vor.u32 %v13364_v1, %v12024_v14 }
 0x40a   : > { %8097 = vmatpush.bf16.msra.mxu3 %v11835_v0  ;;  %v12152_v26 = vld [vmem:[%s13776_s6 + $0x1db8] sm:$0xf0]  ;;  %v13551_v43 = vld [vmem:[#allocation1 + $0x12] sm:$0xff] }
 0x40b   : > { %8059 = vmatpush.bf16.msra.mxu0 %v11435_v12  ;;  %v12280_v23 = vld [vmem:[%s13776_s6 + $0x1eb8] sm:$0xf0]  ;;  %v13460_v45 = vld [vmem:[%s13776_s6 + $0x1fac] sm:$0xf]  ;;  %v12155_v36 = vor.u32 %v13396_v28, %v12152_v26  ;;  %v7853_v55 = vpop.f32.mrf.mxu0 }
 0x40c   : > { %8072 = vmatpush.bf16.msra.mxu1 %v11563_v9  ;;  %v12408_v51 = vld [vmem:[%s13776_s6 + $0x1fb8] sm:$0xf0]  ;;  %v12283_v29 = vor.u32 %v13428_v61, %v12280_v23  ;;  %v13360_v58 = vld [vmem:[%s13776_s6 + $0x1c8c] sm:$0xf]  ;;  %v7854_v16 = vadd.f32 %v7853_v55, %v15986_v42  ;;  %v7866_v18 = vpop.f32.mrf.mxu1 }
 0x40d   : > { %8085 = vmatpush.bf16.msra.mxu2 %v11691_v10  ;;  %v12008_v2 = vld [vmem:[%s13776_s6 + $0x1c98] sm:$0xf0]  ;;  %v13392_v31 = vld [vmem:[%s13776_s6 + $0x1d8c] sm:$0xf]  ;;  %v12411_v32 = vor.u32 %v13460_v45, %v12408_v51 }
 0x40e   : > { %8098 = vmatpush.bf16.msra.mxu3 %v11819_v47  ;;  %8060 = vmatmul.bf16.vlgmr.msra.gmra.mxu0 %v13550_v54  ;;  %v12136_v60 = vld [vmem:[%s13776_s6 + $0x1d98] sm:$0xf0]  ;;  %v13424_v17 = vld [vmem:[%s13776_s6 + $0x1e8c] sm:$0xf]  ;;  %v12011_v8 = vor.u32 %v13360_v58, %v12008_v2  ;;  %v7867_v4 = vadd.f32 %v7866_v18, %v7854_v16 }
 0x40f   : > { %8104 = vmatpush.bf16.msrb.mxu0 %v12059_v13  ;;  %8073 = vmatmul.bf16.vlgmr.msra.gmra.mxu1 %v13552_v44  ;;  %v12264_v50 = vld [vmem:[%s13776_s6 + $0x1e98] sm:$0xf0]  ;;  %v13456_v63 = vld [vmem:[%s13776_s6 + $0x1f8c] sm:$0xf]  ;;  %v12139_v0 = vor.u32 %v13392_v31, %v12136_v60 }
 0x410   : > { %8117 = vmatpush.bf16.msrb.mxu1 %v12187_v48  ;;  %8086 = vmatmul.bf16.vlgmr.msra.gmra.mxu2 %v13551_v43  ;;  %v12392_v6 = vld [vmem:[%s13776_s6 + $0x1f98] sm:$0xf0]  ;;  %v12267_v3 = vor.u32 %v13424_v17, %v12264_v50  ;;  %v13356_v19 = vld [vmem:[%s13776_s6 + $0x1c6c] sm:$0xf] }
 0x411   : > { %8130 = vmatpush.bf16.msrb.mxu2 %v12315_v56  ;;  %8099 = vmatmul.bf16.vlgmr.msra.gmra.mxu3 %v13553_v41  ;;  %v11992_v57 = vld [vmem:[%s13776_s6 + $0x1c78] sm:$0xf0]  ;;  %v13388_v53 = vld [vmem:[%s13776_s6 + $0x1d6c] sm:$0xf]  ;;  %v12395_v11 = vor.u32 %v13456_v63, %v12392_v6 }
 0x412   : > { %8143 = vmatpush.bf16.msrb.mxu3 %v12443_v20  ;;  %v12120_v5 = vld [vmem:[%s13776_s6 + $0x1d78] sm:$0xf0]  ;;  %v13420_v12 = vld [vmem:[%s13776_s6 + $0x1e6c] sm:$0xf]  ;;  %v11995_v25 = vor.u32 %v13356_v19, %v11992_v57 }
 0x413   : > { %8105 = vmatpush.bf16.msrb.mxu0 %v12043_v37  ;;  %v12248_v42 = vld [vmem:[%s13776_s6 + $0x1e78] sm:$0xf0]  ;;  %v13452_v46 = vld [vmem:[%s13776_s6 + $0x1f6c] sm:$0xf]  ;;  %v12123_v9 = vor.u32 %v13388_v53, %v12120_v5  ;;  %v7879_v48 = vpop.f32.mrf.mxu2  ;;  %v7855_v34 = vpop.f32.mrf.mxu0 }
 0x414   : > { %8118 = vmatpush.bf16.msrb.mxu1 %v12171_v21  ;;  %v12376_v24 = vld [vmem:[%s13776_s6 + $0x1f78] sm:$0xf0]  ;;  %v12251_v10 = vor.u32 %v13420_v12, %v12248_v42  ;;  %v13352_v27 = vld [vmem:[%s13776_s6 + $0x1c4c] sm:$0xf]  ;;  %v7880_v49 = vadd.f32 %v7879_v48, %v7867_v4  ;;  %v7892_v20 = vpop.f32.mrf.mxu3  ;;  %v7868_v35 = vpop.f32.mrf.mxu1 }
 0x415   : > { %8131 = vmatpush.bf16.msrb.mxu2 %v12299_v22  ;;  %v11976_v15 = vld [vmem:[%s13776_s6 + $0x1c58] sm:$0xf0]  ;;  %v13384_v47 = vld [vmem:[%s13776_s6 + $0x1d4c] sm:$0xf]  ;;  %v12379_v13 = vor.u32 %v13452_v46, %v12376_v24 }
 0x416   : > { %8144 = vmatpush.bf16.msrb.mxu3 %v12427_v40  ;;  %v12104_v56 = vld [vmem:[%s13776_s6 + $0x1d58] sm:$0xf0]  ;;  %v13416_v62 = vld [vmem:[%s13776_s6 + $0x1e4c] sm:$0xf]  ;;  %v11979_v7 = vor.u32 %v13352_v27, %v11976_v15  ;;  %v7893_v37 = vadd.f32 %v7892_v20, %v7880_v49 }
 0x417   : > { %8106 = vmatpush.bf16.msrb.mxu0 %v12027_v39  ;;  %v12232_v30 = vld [vmem:[%s13776_s6 + $0x1e58] sm:$0xf0]  ;;  %v13448_v59 = vld [vmem:[%s13776_s6 + $0x1f4c] sm:$0xf]  ;;  %v12107_v21 = vor.u32 %v13384_v47, %v12104_v56 }
 0x418   : > { %8119 = vmatpush.bf16.msrb.mxu1 %v12155_v36  ;;  %v12360_v33 = vld [vmem:[%s13776_s6 + $0x1f58] sm:$0xf0]  ;;  %v12235_v22 = vor.u32 %v13416_v62, %v12232_v30  ;;  %v13348_v1 = vld [vmem:[%s13776_s6 + $0x1c2c] sm:$0xf] }
 0x419   : > { %8132 = vmatpush.bf16.msrb.mxu2 %v12283_v29  ;;  %v11960_v14 = vld [vmem:[%s13776_s6 + $0x1c38] sm:$0xf0]  ;;  %v13380_v28 = vld [vmem:[%s13776_s6 + $0x1d2c] sm:$0xf]  ;;  %v12363_v54 = vor.u32 %v13448_v59, %v12360_v33 }
 0x41a   : > { %8145 = vmatpush.bf16.msrb.mxu3 %v12411_v32  ;;  %v12088_v40 = vld [vmem:[%s13776_s6 + $0x1d38] sm:$0xf0]  ;;  %v13412_v26 = vld [vmem:[%s13776_s6 + $0x1e2c] sm:$0xf]  ;;  %v11963_v44 = vor.u32 %v13348_v1, %v11960_v14 }
 0x41b   : > { %8107 = vmatpush.bf16.msrb.mxu0 %v12011_v8  ;;  %v12216_v61 = vld [vmem:[%s13776_s6 + $0x1e38] sm:$0xf0]  ;;  %v13444_v23 = vld [vmem:[%s13776_s6 + $0x1f2c] sm:$0xf]  ;;  %v12091_v45 = vor.u32 %v13380_v28, %v12088_v40  ;;  %v7881_v32 = vpop.f32.mrf.mxu2 }
 0x41c   : > { %8120 = vmatpush.bf16.msrb.mxu1 %v12139_v0  ;;  %v12344_v43 = vld [vmem:[%s13776_s6 + $0x1f38] sm:$0xf0]  ;;  %v12219_v51 = vor.u32 %v13412_v26, %v12216_v61  ;;  %v13344_v41 = vld [vmem:[%s13776_s6 + $0x1c0c] sm:$0xf]  ;;  %v7894_v50 = vpop.f32.mrf.mxu3 }
 0x41d   : > { %8133 = vmatpush.bf16.msrb.mxu2 %v12267_v3  ;;  %v11944_v39 = vld [vmem:[%s13776_s6 + $0x1c18] sm:$0xf0]  ;;  %v13376_v36 = vld [vmem:[%s13776_s6 + $0x1d0c] sm:$0xf]  ;;  %v12347_v29 = vor.u32 %v13444_v23, %v12344_v43 }
 0x41e   : > { %8146 = vmatpush.bf16.msrb.mxu3 %v12395_v11  ;;  %v12072_v58 = vld [vmem:[%s13776_s6 + $0x1d18] sm:$0xf0]  ;;  %v13408_v2 = vld [vmem:[%s13776_s6 + $0x1e0c] sm:$0xf]  ;;  %v11947_v55 = vor.u32 %v13344_v41, %v11944_v39 }
 0x41f   : > { %8108 = vmatpush.bf16.msrb.mxu0 %v11995_v25  ;;  %v12200_v31 = vld [vmem:[%s13776_s6 + $0x1e18] sm:$0xf0]  ;;  %v13440_v60 = vld [vmem:[%s13776_s6 + $0x1f0c] sm:$0xf]  ;;  %v12075_v63 = vor.u32 %v13376_v36, %v12072_v58  ;;  %v8200_v58 = vld [vmem:[%s13782_s10] sm:$0xf] }
 0x420   : > { %8121 = vmatpush.bf16.msrb.mxu1 %v12123_v9  ;;  %v12328_v17 = vld [vmem:[%s13776_s6 + $0x1f18] sm:$0xf0]  ;;  %v12203_v6 = vor.u32 %v13408_v2, %v12200_v31  ;;  %v13555_v18 = vld [vmem:[#allocation1 + $0x2d] sm:$0xff]  ;;  %v13556_v0 = vld [vmem:[#allocation1 + $0x36] sm:$0xff]  ;;  %v8204_v50 = vperm.slane %v8200_v58, 2 }
 0x421   : > { %8134 = vmatpush.bf16.msrb.mxu2 %v12251_v10  ;;  %v12331_v16 = vor.u32 %v13440_v60, %v12328_v17  ;;  %v13554_v8 = vld [vmem:[#allocation1 + $0x24] sm:$0xff]  ;;  %v8203_v60 = vperm.slane %v8200_v58, 1 }
 0x422   : > { %8147 = vmatpush.bf16.msrb.mxu3 %v12379_v13  ;;  %v13557_v3 = vld [vmem:[#allocation1 + $0x3f] sm:$0xff] }
 0x423   : > { %8109 = vmatpush.bf16.msrb.mxu0 %v11979_v7 }
 0x424   : > { %8122 = vmatpush.bf16.msrb.mxu1 %v12107_v21 }
 0x425   : > { %8135 = vmatpush.bf16.msrb.mxu2 %v12235_v22 }
 0x426   : > { %8148 = vmatpush.bf16.msrb.mxu3 %v12363_v54 }
 0x427   : > { %8110 = vmatpush.bf16.msrb.mxu0 %v11963_v44 }
 0x428   : > { %8123 = vmatpush.bf16.msrb.mxu1 %v12091_v45 }
 0x429   : > { %8136 = vmatpush.bf16.msrb.mxu2 %v12219_v51 }
 0x42a   : > { %8149 = vmatpush.bf16.msrb.mxu3 %v12347_v29 }
 0x42b   : > { %8111 = vmatpush.bf16.msrb.mxu0 %v11947_v55  ;;  %v7905_v19 = vpop.f32.mrf.mxu0  ;;  %v8205_v55 = vperm.slane %v8200_v58, 3 }
 0x42c   : > { %8124 = vmatpush.bf16.msrb.mxu1 %v12075_v63  ;;  %v7906_v57 = vadd.f32 %v7905_v19, %v7893_v37  ;;  %v7918_v53 = vpop.f32.mrf.mxu1  ;;  %v8202_v63 = vperm.slane %v8200_v58, 0 }
 0x42d   : > { %8137 = vmatpush.bf16.msrb.mxu2 %v12203_v6  ;;  %v8206_v6 = vrot.slane %v8203_v60, 6 }
 0x42e   : > { %8150 = vmatpush.bf16.msrb.mxu3 %v12331_v16  ;;  %8112 = vmatmul.bf16.vlgmr.msrb.gmra.mxu0 %v13554_v8  ;;  %v7919_v11 = vadd.f32 %v7918_v53, %v7906_v57  ;;  %v8207_v8 = vrot.slane %v8204_v50, 4 }
 0x42f   : > { %8125 = vmatmul.bf16.vlgmr.msrb.gmra.mxu1 %v13555_v18  ;;  %v8208_v18 = vrot.slane %v8205_v55, 2 }
 0x430   : > { %8138 = vmatmul.bf16.vlgmr.msrb.gmra.mxu2 %v13556_v0 }
 0x431   : > { %8151 = vmatmul.bf16.vlgmr.msrb.gmra.mxu3 %v13557_v3 }
 0x433   : > { %v7931_v4 = vpop.f32.mrf.mxu2  ;;  %v7907_v42 = vpop.f32.mrf.mxu0 }
 0x434   : > { %v7932_v5 = vadd.f32 %v7931_v4, %v7919_v11  ;;  %v7944_v12 = vpop.f32.mrf.mxu3  ;;  %v7920_v46 = vpop.f32.mrf.mxu1  ;;  %v8210_v11 = vsel %vm8167_vm0, %v8202_v63, %v8206_v6 }
 0x436   : > { %v7945_v24 = vadd.f32 %v7944_v12, %v7932_v5  ;;  %v8212_v5 = vsel %vm8169_vm1, %v8207_v8, %v8208_v18  ;;  %v8165_v12 = vrot.slane %v15845_v38, 4 }
 0x437   : > { %v8214_v46 = vsel %vm8171_vm2, %v8210_v11, %v8212_v5 }
 0x43b   : > { %v7933_v25 = vpop.f32.mrf.mxu2 }
 0x43c   : > { %v7946_v9 = vpop.f32.mrf.mxu3 }
 0x44b   : > { %v7957_v10 = vpop.f32.mrf.mxu0 }
 0x44c   : > { %v7958_v27 = vadd.f32 %v7957_v10, %v7945_v24  ;;  %v7970_v15 = vpop.f32.mrf.mxu1 }
 0x44e   : > { %v7971_v47 = vadd.f32 %v7970_v15, %v7958_v27 }
 0x453   : > { %v7983_v13 = vpop.f32.mrf.mxu2  ;;  %v7959_v62 = vpop.f32.mrf.mxu0 }
 0x454   : > { %v7984_v48 = vadd.f32 %v7983_v13, %v7971_v47  ;;  %v7996_v56 = vpop.f32.mrf.mxu3  ;;  %v7972_v30 = vpop.f32.mrf.mxu1 }
 0x456   : > { %v7997_v49 = vadd.f32 %v7996_v56, %v7984_v48 }
 0x45b   : > { %v7985_v20 = vpop.f32.mrf.mxu2 }
 0x45c   : > { %v7998_v59 = vpop.f32.mrf.mxu3 }
 0x46b   : > { %v8009_v33 = vpop.f32.mrf.mxu0 }
 0x46c   : > { %v8022_v34 = vpop.f32.mrf.mxu1  ;;  %v8010_v54 = vadd.f32 %v8009_v33, %v7997_v49 }
 0x46e   : > { %v8023_v43 = vadd.f32 %v8022_v34, %v8010_v54 }
 0x473   : > { %v8035_v7 = vpop.f32.mrf.mxu2  ;;  %v8011_v37 = vpop.f32.mrf.mxu0 }
 0x474   : > { %v8048_v35 = vpop.f32.mrf.mxu3  ;;  %v8024_v21 = vpop.f32.mrf.mxu1  ;;  %v8036_v44 = vadd.f32 %v8035_v7, %v8023_v43 }
 0x476   : > { %v8049_v41 = vadd.f32 %v8048_v35, %v8036_v44 }
 0x47b   : > { %v8037_v22 = vpop.f32.mrf.mxu2 }
 0x47c   : > { %v8050_v1 = vpop.f32.mrf.mxu3 }
 0x48b   : > { %v8061_v14 = vpop.f32.mrf.mxu0 }
 0x48c   : > { %v8074_v28 = vpop.f32.mrf.mxu1  ;;  %v8062_v39 = vadd.f32 %v8061_v14, %v8049_v41 }
 0x48e   : > { %v8075_v36 = vadd.f32 %v8074_v28, %v8062_v39 }
 0x493   : > { %v8087_v40 = vpop.f32.mrf.mxu2  ;;  %v8063_v61 = vpop.f32.mrf.mxu0 }
 0x494   : > { %v8100_v26 = vpop.f32.mrf.mxu3  ;;  %v8076_v23 = vpop.f32.mrf.mxu1  ;;  %v8088_v29 = vadd.f32 %v8087_v40, %v8075_v36 }
 0x496   : > { %v8101_v2 = vadd.f32 %v8100_v26, %v8088_v29 }
 0x49b   : > { %v8089_v45 = vpop.f32.mrf.mxu2 }
 0x49c   : > { %v8102_v51 = vpop.f32.mrf.mxu3 }
 0x4ab   : > { %v8113_v31 = vpop.f32.mrf.mxu0 }
 0x4ac   : > { %v8126_v32 = vpop.f32.mrf.mxu1  ;;  %v8114_v17 = vadd.f32 %v8113_v31, %v8101_v2 }
 0x4ae   : > { %v8127_v16 = vadd.f32 %v8126_v32, %v8114_v17 }
 0x4b3   : > { %v8139_v0 = vpop.f32.mrf.mxu2  ;;  %v8115_v57 = vpop.f32.mrf.mxu0 }
 0x4b4   : > { %v8140_v3 = vadd.f32 %v8139_v0, %v8127_v16  ;;  %v8152_v19 = vpop.f32.mrf.mxu3  ;;  %v8128_v53 = vpop.f32.mrf.mxu1 }
 0x4b6   : > { %v8153_v4 = vadd.f32 %v8152_v19, %v8140_v3 }
 0x4b8   : > { %v8166_v42 = vrot.slane %v8153_v4, 2 }
 0x4ba   : > { %v8170_v24 = vsel %vm8169_vm1, %v8165_v12, %v8166_v42 }
 0x4bb   : > { %v8172_v25 = vsel %vm8171_vm2, %v15296_v52, %v8170_v24  ;;  %v8141_v9 = vpop.f32.mrf.mxu2 }
 0x4bc   : > { %v8216_v10 = vadd.f32 %v8214_v46, %v8172_v25  ;;  %v8154_v27 = vpop.f32.mrf.mxu3 }
 0x4be   : > { %v8217_v15 = vmax.f32 %v8216_v10, 0.0 }
 0x4c0   : > { %8218 = vst [vmem:[%s270_s28] sm:$0xff] %v8217_v15 }
 0x4c1 PF: > { %s19_s17 = sadd.s32 1, %s13672_s17   ;;  %s16102_s12 = smov %s13656_s13 }
 0x4c2   : > { %p16_p0 = scmp.ge.s32.totalorder %s19_s17, 10   ;;  %s16103_s13 = smov %s13660_s14 }
 0x4c3   : > { %s16104_s14 = smov %s13746_s24  ;;  %s16105_s15 = smov %s13668_s16 }
 0x4c4   : > { %s16106_s16 = smov %s16108_s19  ;;  %18 = sbr.rel (!%p16_p0) target bundleno = 6 (0x6), region = 100 }
 0x4c9   :  { %8241 = vsyncpa [#allocation3], 1 }
 0x4ca   :  { %8243 = vsyncpa [#allocation3 + $0x1], 1 }
 0x4cb   :  { %8244 = vsyncpa [#allocation5], 1 }
 0x4cc   :  { %8246 = vsyncpa [#allocation5 + $0x1], 1 }

</bundles_post_ra>
